<compile_context>
chip_gen: v6e
topology: v6e:2x2x1
jax: 0.10.0
libtpu: 0.0.40
codegen_flags: <defaults>
</compile_context>

<pallas_src>
import numpy as np
import jax
import jax.numpy as jnp
from jax.experimental import pallas as pl
from jax.experimental.pallas import tpu as pltpu

LANE = 128


# ----------------------------- fused Pallas kernel -------------------------- #

def _make_fused_kernel(n_conv, H, W, Cin, Cpad):
    """Kernel refs (in order):
       x_ref (1,H,W,Cin),
       [w_ref (3, 3*Cpad, Cpad) bf16, scale_ref (1,Cpad) f32, bias_ref (1,Cpad) f32]
         * n_conv,
       o_ref (1, H//2, W//2, Cpad),
       act   (H+2, W+2, Cpad) bf16 VMEM scratch (padded activation with halo)."""
    Hp, Wp = H // 2, W // 2

    def kernel(*refs):
        x_ref = refs[0]
        o_ref = refs[1 + 3 * n_conv]
        act = refs[2 + 3 * n_conv]

        zcol = jnp.zeros((H, 1, Cpad), jnp.bfloat16)

        # Layer-0 interior: one lane-dense store of x, channel+width padded in-vreg.
        xb = x_ref[0].astype(jnp.bfloat16)                         # (H, W, Cin)
        if Cpad > Cin:
            xb = jnp.concatenate(
                [xb, jnp.zeros((H, W, Cpad - Cin), jnp.bfloat16)], axis=-1)
        act[1:H + 1, :, :] = jnp.concatenate([zcol, xb, zcol], axis=1)

        # Top/bottom halo rows.  Zeroed per step (cheap: 2*(W+2)*Cpad) instead of a
        # one-time pl.when(pid==0) init, so correctness holds when the batch grid
        # axis is split across TensorCores (each core has its own scratch).
        zrow = jnp.zeros((1, W + 2, Cpad), jnp.bfloat16)
        act[0:1, :, :] = zrow
        act[H + 1:H + 2, :, :] = zrow

        y = None
        for layer in range(n_conv):
            w_ref = refs[1 + 3 * layer]      # (3, 3*Cpad, Cpad) bf16, per-dh slabs
            s_ref = refs[2 + 3 * layer]      # (1, Cpad) f32  folded BN scale
            b_ref = refs[3 + 3 * layer]      # (1, Cpad) f32  folded conv-bias + BN bias

            if layer > 0:
                # Previous layer's output becomes the new padded-activation interior
                # (all Cpad channels + side-halo columns written lane-dense; top/
                # bottom halo rows are untouched and stay zero).
                yb = y.reshape(H, W, Cpad).astype(jnp.bfloat16)
                act[1:H + 1, :, :] = jnp.concatenate([zcol, yb, zcol], axis=1)

            # 3x3 conv as 3 accumulating MXU dots (one per dh), K = 3*Cpad per dot.
            # Only one (H*W, 3*Cpad) col group is live at a time (no 9-way concat).
            acc = jnp.zeros((H * W, Cpad), jnp.float32)
            for dh in range(3):
                col = jnp.concatenate(
                    [act[dh:dh + H, dw:dw + W, :] for dw in range(3)],
                    axis=-1).reshape(H * W, 3 * Cpad)              # bf16
                acc = acc + jnp.dot(col, w_ref[dh],
                                    preferred_element_type=jnp.float32)

            # Folded BN + ReLU epilogue in f32 (exact zeros in padded channels).
            y = jnp.maximum(acc * s_ref[...] + b_ref[...], 0.0)    # (H*W, Cpad) f32

        # Fused 2x2 / stride-2 max pool on the last layer's f32 output, using only
        # 3-D reshapes + aligned slices + VPU max (no 4-D reshape / axis reduce).
        yc = y.reshape(H, Wp, 2 * Cpad)                       # col pairs -> lane groups
        yc = jnp.maximum(yc[:, :, :Cpad], yc[:, :, Cpad:])    # (H, Wp, Cpad)
        yr = yc.reshape(Hp, 2 * Wp, Cpad)                     # row pairs -> sublane halves
        yp = jnp.maximum(yr[:, :Wp, :], yr[:, Wp:, :])        # (Hp, Wp, Cpad)
        o_ref[...] = yp.reshape(1, Hp, Wp, Cpad).astype(o_ref.dtype)

    return kernel


# ------------------------- one-time parameter preparation ------------------- #

def prepare_params(params, in_channels):
    """Pad channels to a lane-dense multiple of 128, reshape each layer's weights
    into 3 per-dh (3*Cpad, Cpad) slabs, and cast to bf16 — ONCE, outside the
    per-call forward.  params: list of (w_hwio, scale, bias) with BN running
    stats / affine / conv bias already folded into (scale, bias)."""
    cout = params[0][0].shape[-1]
    cpad = ((max(in_channels, cout) + LANE - 1) // LANE) * LANE
    prepared = []
    ci = in_channels
    for (w, scale, bias) in params:
        co = w.shape[-1]
        wpad = jnp.zeros((3, 3, cpad, cpad), jnp.float32).at[:, :, :ci, :co].set(w)
        wmat = wpad.reshape(3, 3 * cpad, cpad).astype(jnp.bfloat16)   # (dh, dw*ci, co)
        spad = jnp.zeros((1, cpad), jnp.float32).at[0, :co].set(scale)
        bpad = jnp.zeros((1, cpad), jnp.float32).at[0, :co].set(bias)
        prepared.append((wmat, spad, bpad))
        ci = co
    return prepared, cpad


# --------------------------------- wrappers --------------------------------- #

def vggnet_enc_block_nhwc(x_nhwc, prepared, cpad):
    """Production path: x_nhwc (N, H, W, Cin<=cpad) -> channel-padded NHWC
    (N, H/2, W/2, cpad), so the next encoder block can consume it directly
    without any slice / transpose HBM passes."""
    N, H, W, Cin = x_nhwc.shape
    n_conv = len(prepared)
    assert H % 2 == 0 and W % 2 == 0, "MaxPool2d(2) requires even H and W"
    Hp, Wp = H // 2, W // 2

    flat_inputs = [x_nhwc]
    in_specs = [pl.BlockSpec((1, H, W, Cin), lambda n: (n, 0, 0, 0))]
    for (wmat, spad, bpad) in prepared:
        flat_inputs += [wmat, spad, bpad]
        # Grid-invariant operands (constant index_map -> not re-DMA'd per step).
        in_specs += [
            pl.BlockSpec((3, 3 * cpad, cpad), lambda n: (0, 0, 0)),
            pl.BlockSpec((1, cpad), lambda n: (0, 0)),
            pl.BlockSpec((1, cpad), lambda n: (0, 0)),
        ]

    kernel = _make_fused_kernel(n_conv, H, W, Cin, cpad)

    return pl.pallas_call(
        kernel,
        out_shape=jax.ShapeDtypeStruct((N, Hp, Wp, cpad), x_nhwc.dtype),
        grid_spec=pltpu.PrefetchScalarGridSpec(
            num_scalar_prefetch=0,
            grid=(N,),
            in_specs=in_specs,
            out_specs=pl.BlockSpec((1, Hp, Wp, cpad), lambda n: (n, 0, 0, 0)),
            scratch_shapes=[pltpu.VMEM((H + 2, W + 2, cpad), jnp.bfloat16)],
        ),
        compiler_params=pltpu.CompilerParams(
            dimension_semantics=("parallel",),        # batch elems are independent
            vmem_limit_bytes=32 * 1024 * 1024,        # explicit; safe on v5e/v6e/v7x
        ),
    )(*flat_inputs)


def vggnet_enc_block(x_nchw, prepared, cpad, out_channels):
    """PyTorch-parity interface (NCHW in / NCHW out).  NOTE: the channel slice and
    the two transposes are extra HBM passes — for a full VGG encoder prefer the
    channel-padded NHWC interface above as the inter-block format."""
    x = jnp.transpose(x_nchw, (0, 2, 3, 1))                     # NCHW -> NHWC
    out = vggnet_enc_block_nhwc(x, prepared, cpad)
    return jnp.transpose(out[..., :out_channels], (0, 3, 1, 2)) # NHWC -> NCHW


# ------------------------- pure-JAX reference (check) ----------------------- #

def _reference(x_nchw, params):
    x = jnp.transpose(x_nchw, (0, 2, 3, 1))
    for w, scale, bias in params:
        y = jax.lax.conv_general_dilated(
            x, w, window_strides=(1, 1), padding="SAME",
            dimension_numbers=("NHWC", "HWIO", "NHWC"))
        x = jnp.maximum(y * scale + bias, 0.0)
    x = jax.lax.reduce_window(x, -jnp.inf, jax.lax.max,
                              (1, 2, 2, 1), (1, 2, 2, 1), "VALID")
    return jnp.transpose(x, (0, 3, 1, 2))


# ---------------------------------- main ------------------------------------ #

if __name__ == "__main__":
    # VggnetEncBlock(in_channels=4, out_channels=8, n_conv=2) at small shapes.
    N, Cin, Cout, H, W, n_conv = 2, 4, 8, 16, 16, 2
    eps = 1e-5

    key = jax.random.PRNGKey(0)
    keys = jax.random.split(key, 1 + 6 * n_conv)
    x = jax.random.normal(keys[0], (N, Cin, H, W), dtype=jnp.float32)

    params = []
    cin = Cin
    for layer in range(n_conv):
        kw, kb, kg, kbeta, km, kv = keys[1 + 6 * layer: 1 + 6 * (layer + 1)]
        w = 0.1 * jax.random.normal(kw, (3, 3, cin, Cout), jnp.float32)  # HWIO
        conv_b = 0.1 * jax.random.normal(kb, (Cout,), jnp.float32)
        gamma = 1.0 + 0.1 * jax.random.normal(kg, (Cout,), jnp.float32)
        beta = 0.1 * jax.random.normal(kbeta, (Cout,), jnp.float32)
        run_mean = 0.1 * jax.random.normal(km, (Cout,), jnp.float32)
        run_var = 0.5 + 0.5 * jax.random.uniform(kv, (Cout,), jnp.float32)
        # Fold conv bias + BN(running stats, affine) into scale / bias.
        scale = gamma / jnp.sqrt(run_var + eps)
        bias = beta + (conv_b - run_mean) * scale
        params.append((w, scale, bias))
        cin = Cout

    prepared, cpad = prepare_params(params, Cin)   # done once, not per forward call

    out = vggnet_enc_block(x, prepared, cpad, Cout)
    out = jax.block_until_ready(out)

    ref = jax.block_until_ready(_reference(x, params))
    assert out.shape == (N, Cout, H // 2, W // 2), out.shape
    # bf16 matmul operands (f32 accumulation) vs. the all-f32 reference -> ~1e-2
    # level differences are expected; tolerance loosened accordingly.
    np.testing.assert_allclose(np.asarray(out), np.asarray(ref),
                               rtol=3e-2, atol=3e-2)
    print("KERNEL_OK")
</pallas_src>

<mosaic_0001>
module attributes {stable_mosaic.version = 11 : i64} {
  func.func @kernel(%arg0: i32, %arg1: memref<1x16x16x4xf32, #tpu.memory_space<vmem>>, %arg2: memref<3x384x128xbf16, #tpu.memory_space<vmem>>, %arg3: memref<1x128xf32, #tpu.memory_space<vmem>>, %arg4: memref<1x128xf32, #tpu.memory_space<vmem>>, %arg5: memref<3x384x128xbf16, #tpu.memory_space<vmem>>, %arg6: memref<1x128xf32, #tpu.memory_space<vmem>>, %arg7: memref<1x128xf32, #tpu.memory_space<vmem>>, %arg8: memref<1x8x8x128xf32, #tpu.memory_space<vmem>>, %arg9: memref<18x18x128xbf16, #tpu.memory_space<vmem>>) attributes {dimension_semantics = [#tpu.dimension_semantics<parallel>], iteration_bounds = array<i64: 2>, scalar_prefetch = 0 : i64, scratch_operands = 1 : i64, tpu.core_type = #tpu.core_type<tc>, window_params = [{transform_indices = @transform_0, window_bounds = array<i64: 1, 16, 16, 4>}, {pipeline_mode = #tpu.pipeline_mode<synchronous>, transform_indices = @transform_1, window_bounds = array<i64: 3, 384, 128>}, {pipeline_mode = #tpu.pipeline_mode<synchronous>, transform_indices = @transform_2, window_bounds = array<i64: 1, 128>}, {pipeline_mode = #tpu.pipeline_mode<synchronous>, transform_indices = @transform_3, window_bounds = array<i64: 1, 128>}, {pipeline_mode = #tpu.pipeline_mode<synchronous>, transform_indices = @transform_4, window_bounds = array<i64: 3, 384, 128>}, {pipeline_mode = #tpu.pipeline_mode<synchronous>, transform_indices = @transform_5, window_bounds = array<i64: 1, 128>}, {pipeline_mode = #tpu.pipeline_mode<synchronous>, transform_indices = @transform_6, window_bounds = array<i64: 1, 128>}, {transform_indices = @transform_7, window_bounds = array<i64: 1, 8, 8, 128>}]} {
    %cst = arith.constant 0.000000e+00 : bf16
    %0 = vector.broadcast %cst : bf16 to vector<16x1x128xbf16>
    %c0 = arith.constant 0 : index
    %c0_0 = arith.constant 0 : index
    %c0_1 = arith.constant 0 : index
    %c0_2 = arith.constant 0 : index
    %1 = vector.load %arg1[%c0, %c0_0, %c0_1, %c0_2] : memref<1x16x16x4xf32, #tpu.memory_space<vmem>>, vector<1x16x16x4xf32>
    %2 = vector.shape_cast %1 : vector<1x16x16x4xf32> to vector<16x16x4xf32>
    %3 = arith.truncf %2 : vector<16x16x4xf32> to vector<16x16x4xbf16>
    %cst_3 = arith.constant 0.000000e+00 : bf16
    %4 = vector.broadcast %cst_3 : bf16 to vector<16x16x124xbf16>
    %5 = tpu.concatenate %3, %4 in 2 : vector<16x16x4xbf16>, vector<16x16x124xbf16> -> vector<16x16x128xbf16>
    %6 = tpu.concatenate %0, %5, %0 in 1 : vector<16x1x128xbf16>, vector<16x16x128xbf16>, vector<16x1x128xbf16> -> vector<16x18x128xbf16>
    %c1 = arith.constant 1 : index
    %c0_4 = arith.constant 0 : index
    %c0_5 = arith.constant 0 : index
    %7 = vector.load %arg9[%c1, %c0_4, %c0_5] : memref<18x18x128xbf16, #tpu.memory_space<vmem>>, vector<16x18x128xbf16>
    tpu.vector_store %arg9[%c1, %c0_4, %c0_5], %6 {strides = array<i32>} : memref<18x18x128xbf16, #tpu.memory_space<vmem>>, vector<16x18x128xbf16>,
    %cst_6 = arith.constant 0.000000e+00 : bf16
    %8 = vector.broadcast %cst_6 : bf16 to vector<1x18x128xbf16>
    %c0_7 = arith.constant 0 : index
    %c0_8 = arith.constant 0 : index
    %c0_9 = arith.constant 0 : index
    %9 = vector.load %arg9[%c0_7, %c0_8, %c0_9] : memref<18x18x128xbf16, #tpu.memory_space<vmem>>, vector<1x18x128xbf16>
    tpu.vector_store %arg9[%c0_7, %c0_8, %c0_9], %8 {strides = array<i32>} : memref<18x18x128xbf16, #tpu.memory_space<vmem>>, vector<1x18x128xbf16>,
    %c17 = arith.constant 17 : index
    %c0_10 = arith.constant 0 : index
    %c0_11 = arith.constant 0 : index
    %10 = vector.load %arg9[%c17, %c0_10, %c0_11] : memref<18x18x128xbf16, #tpu.memory_space<vmem>>, vector<1x18x128xbf16>
    tpu.vector_store %arg9[%c17, %c0_10, %c0_11], %8 {strides = array<i32>} : memref<18x18x128xbf16, #tpu.memory_space<vmem>>, vector<1x18x128xbf16>,
    %cst_12 = arith.constant 0.000000e+00 : f32
    %11 = vector.broadcast %cst_12 : f32 to vector<256x128xf32>
    %c0_13 = arith.constant 0 : index
    %c0_14 = arith.constant 0 : index
    %c0_15 = arith.constant 0 : index
    %12 = vector.load %arg9[%c0_13, %c0_14, %c0_15] : memref<18x18x128xbf16, #tpu.memory_space<vmem>>, vector<16x16x128xbf16>
    %c0_16 = arith.constant 0 : index
    %c1_17 = arith.constant 1 : index
    %c0_18 = arith.constant 0 : index
    %13 = vector.load %arg9[%c0_16, %c1_17, %c0_18] : memref<18x18x128xbf16, #tpu.memory_space<vmem>>, vector<16x16x128xbf16>
    %c0_19 = arith.constant 0 : index
    %c2 = arith.constant 2 : index
    %c0_20 = arith.constant 0 : index
    %14 = vector.load %arg9[%c0_19, %c2, %c0_20] : memref<18x18x128xbf16, #tpu.memory_space<vmem>>, vector<16x16x128xbf16>
    %15 = tpu.concatenate %12, %13, %14 in 2 : vector<16x16x128xbf16>, vector<16x16x128xbf16>, vector<16x16x128xbf16> -> vector<16x16x384xbf16>
    %16 = vector.shape_cast %15 : vector<16x16x384xbf16> to vector<256x384xbf16>
    %c0_21 = arith.constant 0 : index
    %c0_22 = arith.constant 0 : index
    %c0_23 = arith.constant 0 : index
    %17 = vector.load %arg2[%c0_21, %c0_22, %c0_23] : memref<3x384x128xbf16, #tpu.memory_space<vmem>>, vector<1x384x128xbf16>
    %18 = vector.shape_cast %17 : vector<1x384x128xbf16> to vector<384x128xbf16>
    %cst_24 = arith.constant dense<0.000000e+00> : vector<256x128xf32>
    %19 = tpu.matmul %16, %18, %cst_24 {dimension_numbers = #tpu.dot_dimension_numbers<[1], [0], [0], [1], [0, 0, 1, 1], [], []>} : vector<256x384xbf16>, vector<384x128xbf16>, vector<256x128xf32> -> vector<256x128xf32>
    %20 = arith.addf %11, %19 : vector<256x128xf32>
    %c1_25 = arith.constant 1 : index
    %c0_26 = arith.constant 0 : index
    %c0_27 = arith.constant 0 : index
    %21 = vector.load %arg9[%c1_25, %c0_26, %c0_27] : memref<18x18x128xbf16, #tpu.memory_space<vmem>>, vector<16x16x128xbf16>
    %c1_28 = arith.constant 1 : index
    %c1_29 = arith.constant 1 : index
    %c0_30 = arith.constant 0 : index
    %22 = vector.load %arg9[%c1_28, %c1_29, %c0_30] : memref<18x18x128xbf16, #tpu.memory_space<vmem>>, vector<16x16x128xbf16>
    %c1_31 = arith.constant 1 : index
    %c2_32 = arith.constant 2 : index
    %c0_33 = arith.constant 0 : index
    %23 = vector.load %arg9[%c1_31, %c2_32, %c0_33] : memref<18x18x128xbf16, #tpu.memory_space<vmem>>, vector<16x16x128xbf16>
    %24 = tpu.concatenate %21, %22, %23 in 2 : vector<16x16x128xbf16>, vector<16x16x128xbf16>, vector<16x16x128xbf16> -> vector<16x16x384xbf16>
    %25 = vector.shape_cast %24 : vector<16x16x384xbf16> to vector<256x384xbf16>
    %c1_34 = arith.constant 1 : index
    %c0_35 = arith.constant 0 : index
    %c0_36 = arith.constant 0 : index
    %26 = vector.load %arg2[%c1_34, %c0_35, %c0_36] : memref<3x384x128xbf16, #tpu.memory_space<vmem>>, vector<1x384x128xbf16>
    %27 = vector.shape_cast %26 : vector<1x384x128xbf16> to vector<384x128xbf16>
    %cst_37 = arith.constant dense<0.000000e+00> : vector<256x128xf32>
    %28 = tpu.matmul %25, %27, %cst_37 {dimension_numbers = #tpu.dot_dimension_numbers<[1], [0], [0], [1], [0, 0, 1, 1], [], []>} : vector<256x384xbf16>, vector<384x128xbf16>, vector<256x128xf32> -> vector<256x128xf32>
    %29 = arith.addf %20, %28 : vector<256x128xf32>
    %c2_38 = arith.constant 2 : index
    %c0_39 = arith.constant 0 : index
    %c0_40 = arith.constant 0 : index
    %30 = vector.load %arg9[%c2_38, %c0_39, %c0_40] : memref<18x18x128xbf16, #tpu.memory_space<vmem>>, vector<16x16x128xbf16>
    %c2_41 = arith.constant 2 : index
    %c1_42 = arith.constant 1 : index
    %c0_43 = arith.constant 0 : index
    %31 = vector.load %arg9[%c2_41, %c1_42, %c0_43] : memref<18x18x128xbf16, #tpu.memory_space<vmem>>, vector<16x16x128xbf16>
    %c2_44 = arith.constant 2 : index
    %c2_45 = arith.constant 2 : index
    %c0_46 = arith.constant 0 : index
    %32 = vector.load %arg9[%c2_44, %c2_45, %c0_46] : memref<18x18x128xbf16, #tpu.memory_space<vmem>>, vector<16x16x128xbf16>
    %33 = tpu.concatenate %30, %31, %32 in 2 : vector<16x16x128xbf16>, vector<16x16x128xbf16>, vector<16x16x128xbf16> -> vector<16x16x384xbf16>
    %34 = vector.shape_cast %33 : vector<16x16x384xbf16> to vector<256x384xbf16>
    %c2_47 = arith.constant 2 : index
    %c0_48 = arith.constant 0 : index
    %c0_49 = arith.constant 0 : index
    %35 = vector.load %arg2[%c2_47, %c0_48, %c0_49] : memref<3x384x128xbf16, #tpu.memory_space<vmem>>, vector<1x384x128xbf16>
    %36 = vector.shape_cast %35 : vector<1x384x128xbf16> to vector<384x128xbf16>
    %cst_50 = arith.constant dense<0.000000e+00> : vector<256x128xf32>
    %37 = tpu.matmul %34, %36, %cst_50 {dimension_numbers = #tpu.dot_dimension_numbers<[1], [0], [0], [1], [0, 0, 1, 1], [], []>} : vector<256x384xbf16>, vector<384x128xbf16>, vector<256x128xf32> -> vector<256x128xf32>
    %38 = arith.addf %29, %37 : vector<256x128xf32>
    %c0_51 = arith.constant 0 : index
    %c0_52 = arith.constant 0 : index
    %39 = vector.load %arg3[%c0_51, %c0_52] : memref<1x128xf32, #tpu.memory_space<vmem>>, vector<1x128xf32>
    %40 = vector.broadcast %39 : vector<1x128xf32> to vector<256x128xf32>
    %41 = arith.mulf %38, %40 : vector<256x128xf32>
    %c0_53 = arith.constant 0 : index
    %c0_54 = arith.constant 0 : index
    %42 = vector.load %arg4[%c0_53, %c0_54] : memref<1x128xf32, #tpu.memory_space<vmem>>, vector<1x128xf32>
    %43 = vector.broadcast %42 : vector<1x128xf32> to vector<256x128xf32>
    %44 = arith.addf %41, %43 : vector<256x128xf32>
    %cst_55 = arith.constant 0.000000e+00 : f32
    %45 = vector.broadcast %cst_55 : f32 to vector<256x128xf32>
    %46 = arith.maximumf %44, %45 : vector<256x128xf32>
    %47 = vector.shape_cast %46 : vector<256x128xf32> to vector<16x16x128xf32>
    %48 = arith.truncf %47 : vector<16x16x128xf32> to vector<16x16x128xbf16>
    %49 = tpu.concatenate %0, %48, %0 in 1 : vector<16x1x128xbf16>, vector<16x16x128xbf16>, vector<16x1x128xbf16> -> vector<16x18x128xbf16>
    %c1_56 = arith.constant 1 : index
    %c0_57 = arith.constant 0 : index
    %c0_58 = arith.constant 0 : index
    %50 = vector.load %arg9[%c1_56, %c0_57, %c0_58] : memref<18x18x128xbf16, #tpu.memory_space<vmem>>, vector<16x18x128xbf16>
    tpu.vector_store %arg9[%c1_56, %c0_57, %c0_58], %49 {strides = array<i32>} : memref<18x18x128xbf16, #tpu.memory_space<vmem>>, vector<16x18x128xbf16>,
    %cst_59 = arith.constant 0.000000e+00 : f32
    %51 = vector.broadcast %cst_59 : f32 to vector<256x128xf32>
    %c0_60 = arith.constant 0 : index
    %c0_61 = arith.constant 0 : index
    %c0_62 = arith.constant 0 : index
    %52 = vector.load %arg9[%c0_60, %c0_61, %c0_62] : memref<18x18x128xbf16, #tpu.memory_space<vmem>>, vector<16x16x128xbf16>
    %c0_63 = arith.constant 0 : index
    %c1_64 = arith.constant 1 : index
    %c0_65 = arith.constant 0 : index
    %53 = vector.load %arg9[%c0_63, %c1_64, %c0_65] : memref<18x18x128xbf16, #tpu.memory_space<vmem>>, vector<16x16x128xbf16>
    %c0_66 = arith.constant 0 : index
    %c2_67 = arith.constant 2 : index
    %c0_68 = arith.constant 0 : index
    %54 = vector.load %arg9[%c0_66, %c2_67, %c0_68] : memref<18x18x128xbf16, #tpu.memory_space<vmem>>, vector<16x16x128xbf16>
    %55 = tpu.concatenate %52, %53, %54 in 2 : vector<16x16x128xbf16>, vector<16x16x128xbf16>, vector<16x16x128xbf16> -> vector<16x16x384xbf16>
    %56 = vector.shape_cast %55 : vector<16x16x384xbf16> to vector<256x384xbf16>
    %c0_69 = arith.constant 0 : index
    %c0_70 = arith.constant 0 : index
    %c0_71 = arith.constant 0 : index
    %57 = vector.load %arg5[%c0_69, %c0_70, %c0_71] : memref<3x384x128xbf16, #tpu.memory_space<vmem>>, vector<1x384x128xbf16>
    %58 = vector.shape_cast %57 : vector<1x384x128xbf16> to vector<384x128xbf16>
    %cst_72 = arith.constant dense<0.000000e+00> : vector<256x128xf32>
    %59 = tpu.matmul %56, %58, %cst_72 {dimension_numbers = #tpu.dot_dimension_numbers<[1], [0], [0], [1], [0, 0, 1, 1], [], []>} : vector<256x384xbf16>, vector<384x128xbf16>, vector<256x128xf32> -> vector<256x128xf32>
    %60 = arith.addf %51, %59 : vector<256x128xf32>
    %c1_73 = arith.constant 1 : index
    %c0_74 = arith.constant 0 : index
    %c0_75 = arith.constant 0 : index
    %61 = vector.load %arg9[%c1_73, %c0_74, %c0_75] : memref<18x18x128xbf16, #tpu.memory_space<vmem>>, vector<16x16x128xbf16>
    %c1_76 = arith.constant 1 : index
    %c1_77 = arith.constant 1 : index
    %c0_78 = arith.constant 0 : index
    %62 = vector.load %arg9[%c1_76, %c1_77, %c0_78] : memref<18x18x128xbf16, #tpu.memory_space<vmem>>, vector<16x16x128xbf16>
    %c1_79 = arith.constant 1 : index
    %c2_80 = arith.constant 2 : index
    %c0_81 = arith.constant 0 : index
    %63 = vector.load %arg9[%c1_79, %c2_80, %c0_81] : memref<18x18x128xbf16, #tpu.memory_space<vmem>>, vector<16x16x128xbf16>
    %64 = tpu.concatenate %61, %62, %63 in 2 : vector<16x16x128xbf16>, vector<16x16x128xbf16>, vector<16x16x128xbf16> -> vector<16x16x384xbf16>
    %65 = vector.shape_cast %64 : vector<16x16x384xbf16> to vector<256x384xbf16>
    %c1_82 = arith.constant 1 : index
    %c0_83 = arith.constant 0 : index
    %c0_84 = arith.constant 0 : index
    %66 = vector.load %arg5[%c1_82, %c0_83, %c0_84] : memref<3x384x128xbf16, #tpu.memory_space<vmem>>, vector<1x384x128xbf16>
    %67 = vector.shape_cast %66 : vector<1x384x128xbf16> to vector<384x128xbf16>
    %cst_85 = arith.constant dense<0.000000e+00> : vector<256x128xf32>
    %68 = tpu.matmul %65, %67, %cst_85 {dimension_numbers = #tpu.dot_dimension_numbers<[1], [0], [0], [1], [0, 0, 1, 1], [], []>} : vector<256x384xbf16>, vector<384x128xbf16>, vector<256x128xf32> -> vector<256x128xf32>
    %69 = arith.addf %60, %68 : vector<256x128xf32>
    %c2_86 = arith.constant 2 : index
    %c0_87 = arith.constant 0 : index
    %c0_88 = arith.constant 0 : index
    %70 = vector.load %arg9[%c2_86, %c0_87, %c0_88] : memref<18x18x128xbf16, #tpu.memory_space<vmem>>, vector<16x16x128xbf16>
    %c2_89 = arith.constant 2 : index
    %c1_90 = arith.constant 1 : index
    %c0_91 = arith.constant 0 : index
    %71 = vector.load %arg9[%c2_89, %c1_90, %c0_91] : memref<18x18x128xbf16, #tpu.memory_space<vmem>>, vector<16x16x128xbf16>
    %c2_92 = arith.constant 2 : index
    %c2_93 = arith.constant 2 : index
    %c0_94 = arith.constant 0 : index
    %72 = vector.load %arg9[%c2_92, %c2_93, %c0_94] : memref<18x18x128xbf16, #tpu.memory_space<vmem>>, vector<16x16x128xbf16>
    %73 = tpu.concatenate %70, %71, %72 in 2 : vector<16x16x128xbf16>, vector<16x16x128xbf16>, vector<16x16x128xbf16> -> vector<16x16x384xbf16>
    %74 = vector.shape_cast %73 : vector<16x16x384xbf16> to vector<256x384xbf16>
    %c2_95 = arith.constant 2 : index
    %c0_96 = arith.constant 0 : index
    %c0_97 = arith.constant 0 : index
    %75 = vector.load %arg5[%c2_95, %c0_96, %c0_97] : memref<3x384x128xbf16, #tpu.memory_space<vmem>>, vector<1x384x128xbf16>
    %76 = vector.shape_cast %75 : vector<1x384x128xbf16> to vector<384x128xbf16>
    %cst_98 = arith.constant dense<0.000000e+00> : vector<256x128xf32>
    %77 = tpu.matmul %74, %76, %cst_98 {dimension_numbers = #tpu.dot_dimension_numbers<[1], [0], [0], [1], [0, 0, 1, 1], [], []>} : vector<256x384xbf16>, vector<384x128xbf16>, vector<256x128xf32> -> vector<256x128xf32>
    %78 = arith.addf %69, %77 : vector<256x128xf32>
    %c0_99 = arith.constant 0 : index
    %c0_100 = arith.constant 0 : index
    %79 = vector.load %arg6[%c0_99, %c0_100] : memref<1x128xf32, #tpu.memory_space<vmem>>, vector<1x128xf32>
    %80 = vector.broadcast %79 : vector<1x128xf32> to vector<256x128xf32>
    %81 = arith.mulf %78, %80 : vector<256x128xf32>
    %c0_101 = arith.constant 0 : index
    %c0_102 = arith.constant 0 : index
    %82 = vector.load %arg7[%c0_101, %c0_102] : memref<1x128xf32, #tpu.memory_space<vmem>>, vector<1x128xf32>
    %83 = vector.broadcast %82 : vector<1x128xf32> to vector<256x128xf32>
    %84 = arith.addf %81, %83 : vector<256x128xf32>
    %cst_103 = arith.constant 0.000000e+00 : f32
    %85 = vector.broadcast %cst_103 : f32 to vector<256x128xf32>
    %86 = arith.maximumf %84, %85 : vector<256x128xf32>
    %87 = vector.shape_cast %86 : vector<256x128xf32> to vector<16x8x256xf32>
    %88 = vector.extract_strided_slice %87 {offsets = [0, 0, 0], sizes = [16, 8, 128], strides = [1, 1, 1]} : vector<16x8x256xf32> to vector<16x8x128xf32>
    %89 = vector.extract_strided_slice %87 {offsets = [0, 0, 128], sizes = [16, 8, 128], strides = [1, 1, 1]} : vector<16x8x256xf32> to vector<16x8x128xf32>
    %90 = arith.maximumf %88, %89 : vector<16x8x128xf32>
    %91 = vector.shape_cast %90 : vector<16x8x128xf32> to vector<8x16x128xf32>
    %92 = vector.extract_strided_slice %91 {offsets = [0, 0, 0], sizes = [8, 8, 128], strides = [1, 1, 1]} : vector<8x16x128xf32> to vector<8x8x128xf32>
    %93 = vector.extract_strided_slice %91 {offsets = [0, 8, 0], sizes = [8, 8, 128], strides = [1, 1, 1]} : vector<8x16x128xf32> to vector<8x8x128xf32>
    %94 = arith.maximumf %92, %93 : vector<8x8x128xf32>
    %95 = vector.shape_cast %94 : vector<8x8x128xf32> to vector<1x8x8x128xf32>
    %c0_104 = arith.constant 0 : index
    %c0_105 = arith.constant 0 : index
    %c0_106 = arith.constant 0 : index
    %c0_107 = arith.constant 0 : index
    %96 = vector.load %arg8[%c0_104, %c0_105, %c0_106, %c0_107] : memref<1x8x8x128xf32, #tpu.memory_space<vmem>>, vector<1x8x8x128xf32>
    tpu.vector_store %arg8[%c0_104, %c0_105, %c0_106, %c0_107], %95 {strides = array<i32>} : memref<1x8x8x128xf32, #tpu.memory_space<vmem>>, vector<1x8x8x128xf32>,
    return
  }
  func.func @transform_0(%arg0: i32) -> (i32, i32, i32, i32) {
    %c0_i32 = arith.constant 0 : i32
    %c0_i32_0 = arith.constant 0 : i32
    %c0_i32_1 = arith.constant 0 : i32
    %c0_i32_2 = arith.constant 0 : i32
    return %arg0, %c0_i32, %c0_i32_0, %c0_i32_1 : i32, i32, i32, i32
  }
  func.func @transform_1(%arg0: i32) -> (i32, i32, i32) {
    %c0_i32 = arith.constant 0 : i32
    %c0_i32_0 = arith.constant 0 : i32
    %c0_i32_1 = arith.constant 0 : i32
    %c0_i32_2 = arith.constant 0 : i32
    return %c0_i32, %c0_i32_0, %c0_i32_1 : i32, i32, i32
  }
  func.func @transform_2(%arg0: i32) -> (i32, i32) {
    %c0_i32 = arith.constant 0 : i32
    %c0_i32_0 = arith.constant 0 : i32
    %c0_i32_1 = arith.constant 0 : i32
    return %c0_i32, %c0_i32_0 : i32, i32
  }
  func.func @transform_3(%arg0: i32) -> (i32, i32) {
    %c0_i32 = arith.constant 0 : i32
    %c0_i32_0 = arith.constant 0 : i32
    %c0_i32_1 = arith.constant 0 : i32
    return %c0_i32, %c0_i32_0 : i32, i32
  }
  func.func @transform_4(%arg0: i32) -> (i32, i32, i32) {
    %c0_i32 = arith.constant 0 : i32
    %c0_i32_0 = arith.constant 0 : i32
    %c0_i32_1 = arith.constant 0 : i32
    %c0_i32_2 = arith.constant 0 : i32
    return %c0_i32, %c0_i32_0, %c0_i32_1 : i32, i32, i32
  }
  func.func @transform_5(%arg0: i32) -> (i32, i32) {
    %c0_i32 = arith.constant 0 : i32
    %c0_i32_0 = arith.constant 0 : i32
    %c0_i32_1 = arith.constant 0 : i32
    return %c0_i32, %c0_i32_0 : i32, i32
  }
  func.func @transform_6(%arg0: i32) -> (i32, i32) {
    %c0_i32 = arith.constant 0 : i32
    %c0_i32_0 = arith.constant 0 : i32
    %c0_i32_1 = arith.constant 0 : i32
    return %c0_i32, %c0_i32_0 : i32, i32
  }
  func.func @transform_7(%arg0: i32) -> (i32, i32, i32, i32) {
    %c0_i32 = arith.constant 0 : i32
    %c0_i32_0 = arith.constant 0 : i32
    %c0_i32_1 = arith.constant 0 : i32
    %c0_i32_2 = arith.constant 0 : i32
    return %arg0, %c0_i32, %c0_i32_0, %c0_i32_1 : i32, i32, i32, i32
  }
}

</mosaic_0001>

<bundles_post_ra>
// kernel: tpu_custom_call.1
= control target key start
LH: loop header
LB: loop body
LE: loop exit
PB: predicated region body
PF: predicated region fallthrough
CT: control target
= control target key end

     0   :  { %12 = vsyncpa [#allocation4], 0  ;;  %s13460_s0 = inlined_call_operand.vmem [shape: f32[2,16,16,4], index: 0, kind: input, shape index: {}]   ;;  %s13461_s1 = inlined_call_operand.vmem [shape: bf16[3,384,128], index: 1, kind: input, shape index: {}]   ;;  %s13462_s2 = inlined_call_operand.vmem [shape: f32[1,128], index: 2, kind: input, shape index: {}]   ;;  %s13463_s3 = inlined_call_operand.vmem [shape: f32[1,128], index: 3, kind: input, shape index: {}]   ;;  %s13464_s4 = inlined_call_operand.hbm [shape: bf16[3,384,128], index: 4, kind: input, shape index: {}]   ;;  %s13465_s5 = inlined_call_operand.vmem [shape: f32[1,128], index: 5, kind: input, shape index: {}]   ;;  %s13466_s6 = inlined_call_operand.vmem [shape: f32[1,128], index: 6, kind: input, shape index: {}]   ;;  %s13467_s7 = inlined_call_operand.hbm [shape: f32[2,8,8,128], index: 7, kind: output, shape index: {}]  }
   0x1   :  { %13 = vsyncpa [#allocation5], 0 }
   0x2   :  { %15 = vsyncpa [#allocation5 + $0x1], 0  ;;  %s10603_s24 = smov 0   ;;  %s10605_s25 = smov 0  }
   0x3   :  { %s10607_s26 = smov 0   ;;  %s10609_s27 = smov 0  }
   0x4 LB: > { %s10624_s28 = sadd.s32 4294967295, %s10553_s27   ;;  %s8225_s29 = sadd.s32 4294967294, %s10553_s27   ;;  %s10553_s27 = sphi %s10609_s27, %s13512_s27   ;;  %s10549_s26 = sphi %s10607_s26, %s13511_s26   ;;  %s10545_s25 = sphi %s10605_s25, %s13510_s25   ;;  %s10541_s24 = sphi %s10603_s24, %s13509_s24  }
   0x5   : > { %s10628_s30 = sadd.s32 1, %s10553_s27   ;;  %s180_s8 = sadd.s32 1, %s10549_s26 }
   0x6   : > { %s177_s9 = ssub.s32 %s10553_s27, %s10628_s30  ;;  %p190_p0 = scmp.ne.s32.totalorder %s10549_s26, %s10545_s25 }
   0x7   : > { %p178_p1 = scmp.eq.s32.totalorder %s177_s9, 0  ;;  %p191_p2 = scmp.eq.s32.totalorder %s10624_s28, 1 }
   0x8   : > { %p196_p3 = scmp.ne.s32.totalorder %s10545_s25, %s10541_s24  ;;  %p197_p4 = scmp.eq.s32.totalorder %s8225_s29, 1 }
   0x9   : > { %s10639_s10 = scalar_select %p178_p1, %s10549_s26, %s180_s8  }
   0xa   : > { %p10641_p5 = por %p191_p2, %p190_p0  ;;  %p10645_p6 = por %p197_p4, %p196_p3 }
   0xb   : > { %p8226_p7 = scmp.ge.s32.totalorder %s10553_s27, 1  ;;  %p204_p8 = scmp.lt.s32.totalorder %s10553_s27, 3 }
   0xc   : > { %s13469_s12 = scalar_select %p10645_p6, 1, 0 }
   0xd   : > { %p9987_p9 = scmp.eq.s32.totalorder %s10624_s28, 0  ;;  %p10652_p10 = pnand %p8226_p7, %p204_p8 }
   0xe   : > { %s10555_s14 = smov [#allocation3]  }
   0xf   : > { %s225_s15 = sshll.u32 %s10555_s14, 4  ;;  %p9979_p11 = pneg %p10652_p10  ;;  %s226_s15 = int_to_ptr.vmem [resolvable:$true] %s225_s15 }
  0x10   : > { %s10474_s16 = scalar_lea.vmem %s226_s15, 9216  ;;  %p10482_p3 = scmp.lt.s32.totalorder %s226_s15, %s226_s15 }
  0x11   : > { %p9980_p12 = pnand %p9987_p9, %p9979_p11  ;;  %p10475_p0 = scmp.ne.s32.totalorder %s226_s15, %s10474_s16 }
  0x12   : > { %p10483_p4 = scmp.lt.s32.totalorder %s10474_s16, %s10474_s16 }
  0x13   : > { %p10465_p13 = pneg %p9980_p12 }
  0x14   : > { %p10484_p6 = por %p10483_p4, %p10482_p3 }
  0x15   : > { %p10477_p1 = pnand %p10475_p0, %p10465_p13 }
  0x17   : > { %p10478_p2 = pneg %p10477_p1 }
  0x19   : > { %p10485_p7 = pnand %p10484_p6, %p10478_p2 }
  0x1b   : > { %10488 = shalt.err (!%p10485_p7)
}
  0x1c   : > { %s10556_s17 = smov 64   ;;  %s10557_s18 = smov 4  }
  0x1d   : > { %9982 = dma.hbm_to_vmem [thread:$0]  (!%p9980_p12), %s13464_s4, 9216, %s226_s15, [#allocation4], %s10556_s17, %s10556_s17, %s10557_s18  }
  0x1e   : > { %255 = sbr.rel (%p10652_p10) target bundleno = 1073 (0x431), region = 48 }
  0x23   : > { %10532 = dma.done.wait (%p9987_p9), [#allocation4], 9216  }
  0x24   : > { %10534 = vsyncadd (%p9987_p9), [#allocation4], 4294958080  ;;  %v10558_v0 = vmov 0   ;;  %v10029_v1 = vld [vmem:[%s13461_s1 + $0x138] sm:$0xff]   ;;  %v10032_v4 = vld [vmem:[%s13461_s1 + $0x130] sm:$0xff]   ;;  %p287_p6 = scmp.lt.s32.totalorder %s10624_s28, 1 }
  0x25   : > { %763 = vst [vmem:[#allocation2] sm:$0xf] %v10558_v0  ;;  %764 = vst [vmem:[#allocation2 + $0x4] sm:$0xf] %v10558_v0  ;;  %v10030_v2 = vld [vmem:[%s13461_s1 + $0x178] sm:$0xff]   ;;  %8869 = vmatprep.subr.bf16.mxu0 %v10029_v1  ;;  %v10033_v5 = vld [vmem:[%s13461_s1 + $0x170] sm:$0xff]  }
  0x26   : > { %765 = vst [vmem:[#allocation2 + $0x8] sm:$0x1] %v10558_v0  ;;  %767 = vst [vmem:[#allocation2 + $0xcc] sm:$0xf] %v10558_v0  ;;  %v10031_v3 = vld [vmem:[%s13461_s1 + $0xf8] sm:$0xff]   ;;  %9685 = vmatprep.subr.bf16.mxu1 %v10030_v2  ;;  %v10034_v6 = vld [vmem:[%s13461_s1 + $0xf0] sm:$0xff]  }
  0x27   : > { %768 = vst [vmem:[#allocation2 + $0xd0] sm:$0xf] %v10558_v0  ;;  %769 = vst [vmem:[#allocation2 + $0xd4] sm:$0x1] %v10558_v0  ;;  %8870 = vmatpush3.bf16.msra.mxu0 %v10031_v3  ;;  %9686 = vmatpush3.bf16.msra.mxu1 %v10030_v2  ;;  %v10035_v7 = vld [vmem:[%s13461_s1 + $0x128] sm:$0xff]   ;;  %v10038_v10 = vld [vmem:[%s13461_s1 + $0x120] sm:$0xff]  }
  0x28   : > { %8871 = vmatprep.subr.bf16.mxu0 %v10032_v4  ;;  %9687 = vmatprep.subr.bf16.mxu1 %v10033_v5  ;;  %v10036_v8 = vld [vmem:[%s13461_s1 + $0x168] sm:$0xff]   ;;  %v10039_v11 = vld [vmem:[%s13461_s1 + $0x160] sm:$0xff]   ;;  %v10041_v13 = vld [vmem:[%s13461_s1 + $0x118] sm:$0xff]   ;;  %s288_s21 = scalar_select %p287_p6, %s10624_s28, 1  ;;  %vm341_vm0 = vcmask 31744   ;;  %vm503_vm2 = vcmask 1040384  }
  0x29   : > { %v10037_v9 = vld [vmem:[%s13461_s1 + $0xe8] sm:$0xff]   ;;  %v10040_v12 = vld [vmem:[%s13461_s1 + $0xe0] sm:$0xff]   ;;  %v10042_v14 = vld [vmem:[%s13461_s1 + $0x158] sm:$0xff]   ;;  %vm504_vm1 = vsmask.f32 256  ;;  %vm1235_vm4 = vcmask 1046528  }
  0x2a   : > { %v10043_v15 = vld [vmem:[%s13461_s1 + $0xd8] sm:$0xff]   ;;  %v10044_v16 = vld [vmem:[%s13461_s1 + $0x110] sm:$0xff]   ;;  %s8867_s14 = sshll.u32 %s288_s21, 8  ;;  %v10047_v19 = vld [vmem:[%s13461_s1 + $0x108] sm:$0xff]   ;;  %vm978_vm5 = vsmask.f32 7424 }
  0x2b   : > { %8872 = vmatpush3.bf16.msra.mxu0 %v10034_v6  ;;  %9688 = vmatpush3.bf16.msra.mxu1 %v10033_v5  ;;  %v10045_v17 = vld [vmem:[%s13461_s1 + $0x150] sm:$0xff]   ;;  %v10048_v20 = vld [vmem:[%s13461_s1 + $0x148] sm:$0xff]   ;;  %s10734_s21 = scalar_lea.vmem %s13460_s0, %s8867_s14  ;;  %v10050_v22 = vld [vmem:[%s13461_s1 + $0x100] sm:$0xff]   ;;  %s284_s17 = sand.u32 1, %s10545_s25  }
  0x2c   : > { %8873 = vmatprep.subr.bf16.mxu0 %v10035_v7  ;;  %9689 = vmatprep.subr.bf16.mxu1 %v10036_v8  ;;  %v10046_v18 = vld [vmem:[%s13461_s1 + $0xd0] sm:$0xff]   ;;  %v10049_v21 = vld [vmem:[%s13461_s1 + $0xc8] sm:$0xff]   ;;  %v10051_v23 = vld [vmem:[%s13461_s1 + $0x140] sm:$0xff]   ;;  %s13278_s18 = sshll.u32 %s284_s17, 6  ;;  %s8868_s20 = sshll.u32 %s10624_s28, 10 }
  0x2d   : > { %v293_v24 = vld [vmem:[%s10734_s21] sm:$0xff]  ;;  %v294_v25 = vld [vmem:[%s10734_s21 + $0x8] sm:$0xff]  ;;  %v295_v26 = vld [vmem:[%s10734_s21 + $0x10] sm:$0xff]  ;;  %s13292_s19 = scalar_lea.vmem [#allocation6], %s13278_s18  ;;  %s13413_s8 = scalar_lea.hbm %s13467_s7, %s8868_s20 }
  0x2e   : > { %v325_v27 = vpack.c.bf16 %v294_v25, %v293_v24  ;;  %v296_v28 = vld [vmem:[%s10734_s21 + $0x18] sm:$0xff]  ;;  %v10052_v29 = vld [vmem:[%s13461_s1 + $0xc0] sm:$0xff]   ;;  %v298_v38 = vld [vmem:[%s10734_s21 + $0x28] sm:$0xff]  ;;  %s8151_s22 = sshll.u32 %s13292_s19, 4  ;;  %s10560_s28 = smov [#allocation6]   ;;  %s13415_s22 = int_to_ptr.vmem [resolvable:$true] %s8151_s22 }
  0x2f   : > { %8874 = vmatpush3.bf16.msra.mxu0 %v10037_v9  ;;  %9690 = vmatpush3.bf16.msra.mxu1 %v10036_v8  ;;  %v326_v30 = vpack.c.bf16 %v296_v28, %v295_v26  ;;  %v10756_v32 = vld [vmem:[%s13461_s1 + $0xb8] sm:$0xff]   ;;  %v297_v37 = vld [vmem:[%s10734_s21 + $0x20] sm:$0xff]  ;;  %v299_v42 = vld [vmem:[%s10734_s21 + $0x30] sm:$0xff]  ;;  %s10489_s9 = scalar_lea.vmem %s13415_s22, 1024  ;;  %s10493_s13 = sshll.u32 %s10560_s28, 4  ;;  %s10494_s13 = int_to_ptr.vmem [resolvable:$false] %s10493_s13 }
  0x30   : > { %8875 = vmatprep.subr.bf16.mxu0 %v10038_v10  ;;  %9691 = vmatprep.subr.bf16.mxu1 %v10039_v11  ;;  %v344_v31 = vsel %vm341_vm0, %v325_v27, 0  ;;  %v10060_v36 = vld [vmem:[%s13461_s1 + $0x78] sm:$0xff]   ;;  %v327_v41 = vpack.c.bf16 %v298_v38, %v297_v37  ;;  %vm10768_vm3 = vmand %vm503_vm2, %vm504_vm1  ;;  %v301_v53 = vld [vmem:[%s10734_s21 + $0x40] sm:$0xff]  ;;  %p10490_p8 = scmp.ne.s32.totalorder %s13415_s22, %s10489_s9  ;;  %s10495_s15 = scalar_lea.vmem %s10494_s13, 2048 }
  0x31   : > { %v375_v33 = vshrl.u32 %v344_v31, 16  ;;  %v378_v34 = vshll.u32 %v344_v31, 16  ;;  %v346_v35 = vsel %vm341_vm0, %v326_v30, 0  ;;  %v300_v43 = vld [vmem:[%s10734_s21 + $0x38] sm:$0xff]  ;;  %v302_v54 = vld [vmem:[%s10734_s21 + $0x48] sm:$0xff]  ;;  %v303_v55 = vld [vmem:[%s10734_s21 + $0x50] sm:$0xff]  ;;  %p10496_p11 = scmp.lt.s32.totalorder %s13415_s22, %s10494_s13  ;;  %p10497_p12 = scmp.lt.s32.totalorder %s10495_s15, %s10489_s9 }
  0x32   : > { %v381_v39 = vshrl.u32 %v346_v35, 16  ;;  %v384_v40 = vshll.u32 %v346_v35, 16  ;;  %v328_v45 = vpack.c.bf16 %v300_v43, %v299_v42  ;;  %v348_v48 = vsel %vm341_vm0, %v327_v41, 0  ;;  %v304_v0 = vld [vmem:[%s10734_s21 + $0x58] sm:$0xff]  ;;  %v305_v9 = vld [vmem:[%s10734_s21 + $0x60] sm:$0xff]  ;;  %v10800_v24 = vld [vmem:[%s10734_s21 + $0x70] sm:$0xff]  ;;  %p10491_p9 = pnand %p10490_p8, %p10641_p5 }
  0x33   : > { %8876 = vmatpush3.bf16.msra.mxu0 %v10040_v12  ;;  %9692 = vmatpush3.bf16.msra.mxu1 %v10039_v11  ;;  %v377_v44 = vrot.slane %v375_v33, 7  ;;  %v387_v51 = vshrl.u32 %v348_v48, 16  ;;  %v390_v52 = vshll.u32 %v348_v48, 16  ;;  %v329_v12 = vpack.c.bf16 %v302_v54, %v301_v53  ;;  %v10803_v25 = vld [vmem:[%s10734_s21 + $0x78] sm:$0xff]  ;;  %v10811_v30 = vld [vmem:[%s10734_s21 + $0x80] sm:$0xff]  ;;  %v10814_v31 = vld [vmem:[%s10734_s21 + $0x88] sm:$0xff]  ;;  %p10498_p13 = por %p10497_p12, %p10496_p11 }
  0x34   : > { %8877 = vmatprep.subr.bf16.mxu0 %v10041_v13  ;;  %9693 = vmatprep.subr.bf16.mxu1 %v10042_v14  ;;  %v383_v47 = vrot.slane %v381_v39, 7  ;;  %v350_v59 = vsel %vm341_vm0, %v328_v45, 0  ;;  %v330_v13 = vpack.c.bf16 %v304_v0, %v303_v55  ;;  %p10492_p10 = pneg %p10491_p9 }
  0x35   : > { %v380_v49 = vor.u32 %v378_v34, %v377_v44  ;;  %v522_v50 = vsel %vm10768_vm3, %v377_v44, 0  ;;  %v389_v62 = vrot.slane %v387_v51, 7  ;;  %v393_v63 = vshrl.u32 %v350_v59, 16 }
  0x36   : > { %v8236_v56 = vcombine.low %v522_v50, %v522_v50  ;;  %v386_v57 = vor.u32 %v384_v40, %v383_v47  ;;  %v523_v58 = vsel %vm10768_vm3, %v383_v47, 0  ;;  %v396_v4 = vshll.u32 %v350_v59, 16  ;;  %v10061_v59 = vld [vmem:[%s13461_s1 + $0x38] sm:$0xff]   ;;  %p10499_p0 = pnand %p10498_p13, %p10492_p10 }
  0x37   : > { %8878 = vmatpush3.bf16.msra.mxu0 %v10043_v15  ;;  %9694 = vmatpush3.bf16.msra.mxu1 %v10042_v14  ;;  %v506_v60 = vsel %vm10768_vm3, 0, %v380_v49  ;;  %v8239_v61 = vcombine.low %v523_v58, %v523_v58  ;;  %v392_v7 = vor.u32 %v390_v52, %v389_v62  ;;  %v524_v8 = vsel %vm10768_vm3, %v389_v62, 0  ;;  %v306_v14 = vld [vmem:[%s10734_s21 + $0x68] sm:$0xff] }
  0x38   : > { %8879 = vmatprep.subr.bf16.mxu0 %v10044_v16  ;;  %9695 = vmatprep.subr.bf16.mxu1 %v10045_v17  ;;  %v8234_v1 = vcombine.low %v506_v60, %v506_v60  ;;  %v8235_v2 = vcombine.high %v506_v60, %v506_v60  ;;  %717 = vst [vmem:[#allocation2 + $0x14] sm:$0x1] %v8236_v56  ;;  %v507_v3 = vsel %vm10768_vm3, 0, %v386_v57  ;;  %v395_v11 = vrot.slane %v393_v63, 7 }
  0x39   : > { %v8237_v5 = vcombine.low %v507_v3, %v507_v3  ;;  %v8238_v6 = vcombine.high %v507_v3, %v507_v3  ;;  %720 = vst [vmem:[#allocation2 + $0x20] sm:$0x1] %v8239_v61  ;;  %v8242_v10 = vcombine.low %v524_v8, %v524_v8  ;;  %v508_v15 = vsel %vm10768_vm3, 0, %v392_v7 }
  0x3a   : > { %715 = vst [vmem:[#allocation2 + $0xc] sm:$0xf] %v8234_v1  ;;  %716 = vst [vmem:[#allocation2 + $0x10] sm:$0xf] %v8235_v2  ;;  %v331_v16 = vpack.c.bf16 %v306_v14, %v305_v9  ;;  %v332_v49 = vpack.c.bf16 %v10803_v25, %v10800_v24  ;;  %v333_v50 = vpack.c.bf16 %v10814_v31, %v10811_v30  ;;  %v10068_v2 = vld [vmem:[%s13461_s1 + $0x70] sm:$0xff]   ;;  %v10086_v24 = vld [vmem:[%s13461_s1 + $0x20] sm:$0xff]  }
  0x3b   : > { %8880 = vmatpush3.bf16.msra.mxu0 %v10046_v18  ;;  %9696 = vmatpush3.bf16.msra.mxu1 %v10045_v17  ;;  %718 = vst [vmem:[#allocation2 + $0x18] sm:$0xf] %v8237_v5  ;;  %719 = vst [vmem:[#allocation2 + $0x1c] sm:$0xf] %v8238_v6  ;;  %v8240_v17 = vcombine.low %v508_v15, %v508_v15  ;;  %v8241_v18 = vcombine.high %v508_v15, %v508_v15  ;;  %v10102_v30 = vld [vmem:[%s13461_s1 + $0x50] sm:$0xff]   ;;  %v10110_v31 = vld [vmem:[%s13461_s1 + $0xa0] sm:$0xff]  }
  0x3c   : > { %8881 = vmatprep.subr.bf16.mxu0 %v10047_v19  ;;  %9697 = vmatprep.subr.bf16.mxu1 %v10048_v20  ;;  %723 = vst [vmem:[#allocation2 + $0x2c] sm:$0x1] %v8242_v10  ;;  %v398_v19 = vor.u32 %v396_v4, %v395_v11 }
  0x3d   : > { %721 = vst [vmem:[#allocation2 + $0x24] sm:$0xf] %v8240_v17  ;;  %722 = vst [vmem:[#allocation2 + $0x28] sm:$0xf] %v8241_v18 }
  0x3e   : > { %v509_v26 = vsel %vm10768_vm3, 0, %v398_v19 }
  0x3f   : > { %8882 = vmatpush3.bf16.msra.mxu0 %v10049_v21  ;;  %9698 = vmatpush3.bf16.msra.mxu1 %v10048_v20  ;;  %v525_v20 = vsel %vm10768_vm3, %v395_v11, 0  ;;  %v10054_v33 = vld [vmem:[#allocation2 + $0x14] ss:$0 sps:$4 sm:$0x11]   ;;  %v8243_v34 = vcombine.low %v509_v26, %v509_v26  ;;  %v8244_v35 = vcombine.high %v509_v26, %v509_v26 }
  0x40   : > { %8883 = vmatprep.subr.bf16.mxu0 %v10050_v22  ;;  %9699 = vmatprep.subr.bf16.mxu1 %v10051_v23  ;;  %v8245_v21 = vcombine.low %v525_v20, %v525_v20  ;;  %v352_v22 = vsel %vm341_vm0, %v329_v12, 0  ;;  %v10057_v37 = vld [vmem:[#allocation2 + $0x20] ss:$0 sps:$4 sm:$0x11]   ;;  %v1564_v41 = vshll.u32 %v10054_v33, 16  ;;  %v1813_v52 = vrot.slane %v10054_v33, 1 }
  0x41   : > { %v399_v27 = vshrl.u32 %v352_v22, 16  ;;  %v402_v28 = vshll.u32 %v352_v22, 16  ;;  %v1348_v39 = vld [vmem:[#allocation2 + $0xc] sm:$0xf]  ;;  %v1349_v40 = vld [vmem:[#allocation2 + $0x10] sm:$0xf] }
  0x42   : > { %726 = vst [vmem:[#allocation2 + $0x38] sm:$0x1] %v8245_v21  ;;  %724 = vst [vmem:[#allocation2 + $0x30] sm:$0xf] %v8243_v34  ;;  %v8330_v43 = vcombine.low %v1348_v39, %v1349_v40  ;;  %v1396_v44 = vld [vmem:[#allocation2 + $0xc] sm:$0xe] }
  0x43   : > { %8884 = vmatpush3.bf16.msra.mxu0 %v10052_v29  ;;  %9700 = vmatpush3.bf16.msra.mxu1 %v10051_v23  ;;  %v10797_v23 = vsel %vm341_vm0, %v330_v13, 0  ;;  %v10808_v29 = vsel %vm341_vm0, %v331_v16, 0  ;;  %v10817_v38 = vrot.slane %v399_v27, 7  ;;  %725 = vst [vmem:[#allocation2 + $0x34] sm:$0xf] %v8244_v35  ;;  %v8362_v51 = vcombine.low %v1396_v44, %v1349_v40  ;;  %v10069_v20 = vld [vmem:[%s13461_s1 + $0x30] sm:$0xff]  }
  0x44   : > { %9733 = vmatprep.subr.bf16.mxu0 %v10756_v32  ;;  %9005 = vmatprep.subr.bf16.mxu1 %v10060_v36  ;;  %v405_v36 = vshrl.u32 %v10797_v23, 16  ;;  %v408_v42 = vshll.u32 %v10797_v23, 16  ;;  %v1350_v45 = vld [vmem:[#allocation2 + $0x18] sm:$0xf]  ;;  %v1351_v47 = vld [vmem:[#allocation2 + $0x1c] sm:$0xf] }
  0x45   : > { %v404_v48 = vor.u32 %v402_v28, %v10817_v38  ;;  %v1397_v53 = vld [vmem:[#allocation2 + $0x18] sm:$0xe]  ;;  %v10825_v54 = vcombine.low %v1350_v45, %v1351_v47  ;;  %v1816_v55 = vrot.slane %v10057_v37, 1  ;;  %v1557_v56 = vshrl.u32 %v8330_v43, 16  ;;  %v1352_v1 = vld [vmem:[#allocation2 + $0x24] sm:$0xf] }
  0x46   : > { %v1559_v57 = vshll.u32 %v8330_v43, 16  ;;  %v8363_v58 = vcombine.low %v1397_v53, %v1351_v47  ;;  %v1576_v60 = vshll.u32 %v10057_v37, 16  ;;  %v10063_v61 = vld [vmem:[#allocation2 + $0x2c] ss:$0 sps:$4 sm:$0x11]   ;;  %v1812_v62 = vrot.slane %v8362_v51, 1 }
  0x47   : > { %v1569_v63 = vshrl.u32 %v10825_v54, 16  ;;  %v1571_v0 = vshll.u32 %v10825_v54, 16  ;;  %v510_v3 = vsel %vm10768_vm3, 0, %v404_v48  ;;  %v1566_v5 = vrot.slane %v1564_v41, 1  ;;  %v1353_v8 = vld [vmem:[#allocation2 + $0x28] sm:$0xf] }
  0x48   : > { %v1561_v4 = vrot.slane %v1559_v57, 1  ;;  %v1815_v6 = vrot.slane %v8363_v58, 1  ;;  %v1578_v7 = vrot.slane %v1576_v60, 1  ;;  %v1814_v9 = vsel %vm1235_vm4, %v1812_v62, %v1813_v52  ;;  %v1398_v11 = vld [vmem:[#allocation2 + $0x24] sm:$0xe]  ;;  %v10076_v40 = vld [vmem:[%s13461_s1 + $0xb0] sm:$0xff]  }
  0x49   : > { %v1573_v10 = vrot.slane %v1571_v0, 1  ;;  %v10838_v12 = vcombine.low %v1352_v1, %v1353_v8  ;;  %v1819_v13 = vrot.slane %v10063_v61, 1  ;;  %9701 = vmatprep.mubr.bf16.mxu1 %v1814_v9  ;;  %v8364_v16 = vcombine.low %v1398_v11, %v1353_v8  ;;  %v1354_v17 = vld [vmem:[#allocation2 + $0x30] sm:$0xf]  ;;  %v10077_v48 = vld [vmem:[%s13461_s1 + $0x68] sm:$0xff]   ;;  %v312_v60 = vld [vmem:[%s10734_s21 + $0x98] sm:$0xff] }
  0x4a   : > { %v1562_v14 = vor.u32 %v1561_v4, %v1557_v56  ;;  %v1817_v15 = vsel %vm1235_vm4, %v1815_v6, %v1816_v55  ;;  %v1355_v18 = vld [vmem:[#allocation2 + $0x34] sm:$0xf]  ;;  %v1399_v19 = vld [vmem:[#allocation2 + $0x30] sm:$0xe]  ;;  %v8246_v21 = vcombine.low %v510_v3, %v510_v3  ;;  %v1588_v33 = vshll.u32 %v10063_v61, 16  ;;  %v10078_v61 = vld [vmem:[%s13461_s1 + $0x28] sm:$0xff]  }
  0x4b   : > { %9702 = vmatmul.mubr.bf16.vlgmr.msra.gmra.mxu1 %v1817_v15  ;;  %v1574_v22 = vor.u32 %v1573_v10, %v1569_v63  ;;  %v10844_v26 = vcombine.low %v1354_v17, %v1355_v18  ;;  %v10066_v27 = vld [vmem:[#allocation2 + $0x38] ss:$0 sps:$4 sm:$0x11]   ;;  %v8365_v28 = vcombine.low %v1399_v19, %v1355_v18  ;;  %v1818_v35 = vrot.slane %v8364_v16, 1  ;;  %v311_v56 = vld [vmem:[%s10734_s21 + $0x90] sm:$0xff] }
  0x4c   : > { %v1567_v34 = vsel %vm978_vm5, %v1562_v14, %v1566_v5  ;;  %9006 = vmatpush3.bf16.msra.mxu1 %v10061_v59  ;;  %v1581_v37 = vshrl.u32 %v10838_v12, 16  ;;  %v1583_v39 = vshll.u32 %v10838_v12, 16  ;;  %727 = vst [vmem:[#allocation2 + $0x3c] sm:$0xf] %v8246_v21  ;;  %v1822_v45 = vrot.slane %v10066_v27, 1  ;;  %v10094_v14 = vld [vmem:[%s13461_s1 + $0x58] sm:$0xff]  }
  0x4d   : > { %2101 = vmatprep.mubr.bf16.mxu0 %v1567_v34  ;;  %v1579_v41 = vsel %vm978_vm5, %v1574_v22, %v1578_v7  ;;  %v1821_v44 = vrot.slane %v8365_v28, 1  ;;  %9007 = vmatprep.subr.bf16.mxu1 %v10068_v2  ;;  %v526_v47 = vsel %vm10768_vm3, %v10817_v38, 0  ;;  %v1820_v51 = vsel %vm1235_vm4, %v1818_v35, %v1819_v13 }
  0x4e   : > { %2102 = vmatmul.mubr.bf16.vlgmr.msra.gmra.mxu0 %v8330_v43  ;;  %v1585_v52 = vrot.slane %v1583_v39, 1  ;;  %v8247_v53 = vcombine.high %v510_v3, %v510_v3  ;;  %v8248_v55 = vcombine.low %v526_v47, %v526_v47  ;;  %v1590_v58 = vrot.slane %v1588_v33, 1  ;;  %9705 = vmatprep.mubr.bf16.mxu1 %v1820_v51 }
  0x4f   : > { %9734 = vmatpush3.bf16.msra.mxu0 %v10756_v32  ;;  %2109 = vmatprep.mubr.bf16.mxu0 %v1579_v41  ;;  %v1823_v57 = vsel %vm1235_vm4, %v1821_v44, %v1822_v45  ;;  %v407_v38 = vrot.slane %v405_v36, 7  ;;  %v1595_v59 = vshll.u32 %v10844_v26, 16  ;;  %v1600_v32 = vshll.u32 %v10066_v27, 16  ;;  %v10093_v36 = vld [vmem:[%s13461_s1 + $0xa8] sm:$0xff]   ;;  %v10095_v27 = vld [vmem:[%s13461_s1 + $0x18] sm:$0xff]  }
  0x50   : > { %9008 = vmatpush3.bf16.msra.mxu1 %v10069_v20  ;;  %v1586_v43 = vor.u32 %v1585_v52, %v1581_v37  ;;  %728 = vst [vmem:[#allocation2 + $0x40] sm:$0xf] %v8247_v53  ;;  %729 = vst [vmem:[#allocation2 + $0x44] sm:$0x1] %v8248_v55  ;;  %v411_v62 = vshrl.u32 %v10808_v29, 16  ;;  %v414_v63 = vshll.u32 %v10808_v29, 16  ;;  %9735 = vmatprep.subr.bf16.mxu0 %v10076_v40 }
  0x51   : > { %v410_v0 = vor.u32 %v408_v42, %v407_v38  ;;  %v527_v1 = vsel %vm10768_vm3, %v407_v38, 0  ;;  %9009 = vmatprep.subr.bf16.mxu1 %v10077_v48  ;;  %v1593_v2 = vshrl.u32 %v10844_v26, 16  ;;  %v358_v3 = vsel %vm341_vm0, %v332_v49, 0  ;;  %v10085_v29 = vld [vmem:[%s13461_s1 + $0x60] sm:$0xff]  }
  0x52   : > { %v8251_v4 = vcombine.low %v527_v1, %v527_v1  ;;  %v1597_v5 = vrot.slane %v1595_v59, 1  ;;  %v413_v23 = vrot.slane %v411_v62, 7  ;;  %v334_v42 = vpack.c.bf16 %v312_v60, %v311_v56  ;;  %v313_v56 = vld [vmem:[%s10734_s21 + $0xa0] sm:$0xff] }
  0x53   : > { %9706 = vmatmul.mubr.bf16.gmra.mxu1 %v1823_v57  ;;  %v1591_v6 = vsel %vm978_vm5, %v1586_v43, %v1590_v58  ;;  %v511_v7 = vsel %vm10768_vm3, 0, %v410_v0  ;;  %9736 = vmatpush3.bf16.msra.mxu0 %v10076_v40  ;;  %v1602_v8 = vrot.slane %v1600_v32, 1  ;;  %v417_v9 = vshrl.u32 %v358_v3, 16  ;;  %v1356_v25 = vld [vmem:[#allocation2 + $0x3c] sm:$0xf]  ;;  %v314_v57 = vld [vmem:[%s10734_s21 + $0xa8] sm:$0xff] }
  0x54   : > { %v8249_v49 = vcombine.low %v511_v7, %v511_v7  ;;  %v8250_v10 = vcombine.high %v511_v7, %v511_v7  ;;  %732 = vst [vmem:[#allocation2 + $0x50] sm:$0x1] %v8251_v4  ;;  %9010 = vmatpush3.bf16.msra.mxu1 %v10078_v61  ;;  %v416_v11 = vor.u32 %v414_v63, %v413_v23  ;;  %v528_v13 = vsel %vm10768_vm3, %v413_v23, 0  ;;  %v1400_v15 = vld [vmem:[#allocation2 + $0x3c] sm:$0xe]  ;;  %v10103_v58 = vld [vmem:[%s13461_s1 + $0x10] sm:$0xff]  }
  0x55   : > { %9737 = vmatprep.subr.bf16.mxu0 %v10093_v36  ;;  %v8254_v16 = vcombine.low %v528_v13, %v528_v13  ;;  %v419_v17 = vrot.slane %v417_v9, 7  ;;  %v420_v18 = vshll.u32 %v358_v3, 16  ;;  %9011 = vmatprep.subr.bf16.mxu1 %v10085_v29  ;;  %v1598_v19 = vor.u32 %v1597_v5, %v1593_v2  ;;  %v10111_v63 = vld [vmem:[%s13461_s1 + $0x48] sm:$0xff]   ;;  %v315_v7 = vld [vmem:[%s10734_s21 + $0xb0] sm:$0xff] }
  0x56   : > { %2110 = vmatmul.mubr.bf16.gmra.mxu0 %v10825_v54  ;;  %730 = vst [vmem:[#allocation2 + $0x48] sm:$0xf] %v8249_v49  ;;  %731 = vst [vmem:[#allocation2 + $0x4c] sm:$0xf] %v8250_v10  ;;  %v512_v20 = vsel %vm10768_vm3, 0, %v416_v11  ;;  %v360_v21 = vsel %vm341_vm0, %v333_v50, 0 }
  0x57   : > { %v10906_v22 = vsel %vm341_vm0, %v334_v42, 0  ;;  %2117 = vmatprep.mubr.bf16.mxu0 %v1591_v6  ;;  %v1357_v54 = vld [vmem:[#allocation2 + $0x40] sm:$0xf]  ;;  %v8252_v28 = vcombine.low %v512_v20, %v512_v20  ;;  %v8253_v33 = vcombine.high %v512_v20, %v512_v20  ;;  %735 = vst [vmem:[#allocation2 + $0x5c] sm:$0x1] %v8254_v16  ;;  %v422_v34 = vor.u32 %v420_v18, %v419_v17  ;;  %v10112_v9 = vld [vmem:[%s13461_s1 + $0x8] sm:$0xff]  }
  0x58   : > { %v529_v35 = vsel %vm10768_vm3, %v419_v17, 0  ;;  %9738 = vmatpush3.bf16.msra.mxu0 %v10093_v36  ;;  %v10919_v50 = vcombine.low %v1356_v25, %v1357_v54  ;;  %v10071_v37 = vld [vmem:[#allocation2 + $0x44] ss:$0 sps:$4 sm:$0x11]   ;;  %v8366_v39 = vcombine.low %v1400_v15, %v1357_v54  ;;  %9012 = vmatpush3.bf16.msra.mxu1 %v10086_v24  ;;  %v423_v41 = vshrl.u32 %v360_v21, 16 }
  0x59   : > { %v8257_v40 = vcombine.low %v529_v35, %v529_v35  ;;  %733 = vst [vmem:[#allocation2 + $0x54] sm:$0xf] %v8252_v28  ;;  %734 = vst [vmem:[#allocation2 + $0x58] sm:$0xf] %v8253_v33  ;;  %v513_v44 = vsel %vm10768_vm3, 0, %v422_v34  ;;  %v426_v45 = vshll.u32 %v360_v21, 16  ;;  %9013 = vmatprep.subr.bf16.mxu1 %v10094_v14  ;;  %9739 = vmatprep.subr.bf16.mxu0 %v10110_v31 }
  0x5a   : > { %v429_v47 = vshrl.u32 %v10906_v22, 16  ;;  %v432_v48 = vshll.u32 %v10906_v22, 16  ;;  %v1824_v51 = vrot.slane %v8366_v39, 1  ;;  %v1825_v52 = vrot.slane %v10071_v37, 1 }
  0x5b   : > { %v8255_v53 = vcombine.low %v513_v44, %v513_v44  ;;  %v8256_v55 = vcombine.high %v513_v44, %v513_v44  ;;  %738 = vst [vmem:[#allocation2 + $0x68] sm:$0x1] %v8257_v40  ;;  %v10930_v38 = vld [vmem:[#allocation2 + $0x50] ss:$0 sps:$4 sm:$0x11]   ;;  %v1603_v59 = vsel %vm978_vm5, %v1598_v19, %v1602_v8  ;;  %v1605_v60 = vshrl.u32 %v10919_v50, 16 }
  0x5c   : > { %9740 = vmatpush3.bf16.msra.mxu0 %v10110_v31  ;;  %v1826_v43 = vsel %vm1235_vm4, %v1824_v51, %v1825_v52  ;;  %v1607_v61 = vshll.u32 %v10919_v50, 16  ;;  %v1612_v32 = vshll.u32 %v10071_v37, 16  ;;  %v425_v62 = vrot.slane %v423_v41, 7  ;;  %9014 = vmatpush3.bf16.msra.mxu1 %v10095_v27  ;;  %v316_v8 = vld [vmem:[%s10734_s21 + $0xb8] sm:$0xff]  ;;  %v10119_v27 = vld [vmem:[%s13461_s1 + $0x40] sm:$0xff]  }
  0x5d   : > { %736 = vst [vmem:[#allocation2 + $0x60] sm:$0xf] %v8255_v53  ;;  %737 = vst [vmem:[#allocation2 + $0x64] sm:$0xf] %v8256_v55  ;;  %9709 = vmatprep.mubr.bf16.mxu1 %v1826_v43  ;;  %v1358_v36 = vld [vmem:[#allocation2 + $0x48] sm:$0xf]  ;;  %9015 = vmatprep.subr.bf16.mxu1 %v10102_v30  ;;  %v335_v6 = vpack.c.bf16 %v314_v57, %v313_v56  ;;  %v336_v35 = vpack.c.bf16 %v316_v8, %v315_v7 }
  0x5e   : > { %v1359_v0 = vld [vmem:[#allocation2 + $0x4c] sm:$0xf]  ;;  %v1401_v1 = vld [vmem:[#allocation2 + $0x48] sm:$0xe]  ;;  %2118 = vmatmul.mubr.bf16.gmra.mxu0 %v10838_v12  ;;  %v1828_v3 = vrot.slane %v10930_v38, 1  ;;  %v428_v4 = vor.u32 %v426_v45, %v425_v62  ;;  %v1609_v5 = vrot.slane %v1607_v61, 1 }
  0x5f   : > { %v8367_v2 = vcombine.low %v1401_v1, %v1359_v0  ;;  %v10941_v29 = vld [vmem:[#allocation2 + $0x5c] ss:$0 sps:$4 sm:$0x11]   ;;  %2125 = vmatprep.mubr.bf16.mxu0 %v1603_v59  ;;  %v530_v23 = vsel %vm10768_vm3, %v425_v62, 0  ;;  %v431_v42 = vrot.slane %v429_v47, 7  ;;  %v10950_v12 = vcombine.low %v1358_v36, %v1359_v0  ;;  %v317_v47 = vld [vmem:[%s10734_s21 + $0xc0] sm:$0xff] }
  0x60   : > { %v1360_v25 = vld [vmem:[#allocation2 + $0x54] sm:$0xf]  ;;  %v1361_v49 = vld [vmem:[#allocation2 + $0x58] sm:$0xf]  ;;  %v1614_v10 = vrot.slane %v1612_v32, 1  ;;  %v8260_v11 = vcombine.low %v530_v23, %v530_v23  ;;  %9016 = vmatpush3.bf16.msra.mxu1 %v10103_v58  ;;  %v1831_v14 = vrot.slane %v10941_v29, 1  ;;  %v1610_v15 = vor.u32 %v1609_v5, %v1605_v60 }
  0x61   : > { %v1827_v24 = vrot.slane %v8367_v2, 1  ;;  %v1402_v13 = vld [vmem:[#allocation2 + $0x54] sm:$0xe]  ;;  %v514_v16 = vsel %vm10768_vm3, 0, %v428_v4  ;;  %v434_v17 = vor.u32 %v432_v48, %v431_v42  ;;  %9017 = vmatprep.subr.bf16.mxu1 %v10111_v63  ;;  %v10961_v54 = vcombine.low %v1360_v25, %v1361_v49  ;;  %v318_v55 = vld [vmem:[%s10734_s21 + $0xc8] sm:$0xff]  ;;  %v10120_v57 = vld [vmem:[%s13461_s1] sm:$0xff]  }
  0x62   : > { %v8368_v19 = vcombine.low %v1402_v13, %v1361_v49  ;;  %v10956_v20 = vld [vmem:[#allocation2 + $0x68] ss:$0 sps:$4 sm:$0x11]   ;;  %v8258_v21 = vcombine.low %v514_v16, %v514_v16  ;;  %v8259_v22 = vcombine.high %v514_v16, %v514_v16  ;;  %741 = vst [vmem:[#allocation2 + $0x74] sm:$0x1] %v8260_v11  ;;  %v364_v34 = vsel %vm341_vm0, %v335_v6, 0 }
  0x63   : > { %v1829_v18 = vsel %vm1235_vm4, %v1827_v24, %v1828_v3  ;;  %v1834_v37 = vrot.slane %v10956_v20, 1  ;;  %v1615_v39 = vsel %vm978_vm5, %v1610_v15, %v1614_v10  ;;  %v515_v40 = vsel %vm10768_vm3, 0, %v434_v17  ;;  %v10980_v56 = vld [vmem:[%s10734_s21 + $0xd0] sm:$0xff]  ;;  %v10123_v43 = vld [vmem:[%s13461_s1 + $0x98] sm:$0xff]   ;;  %v10995_v36 = vld [vmem:[%s10734_s21 + $0xe0] sm:$0xff] }
  0x64   : > { %9710 = vmatmul.mubr.bf16.gmra.mxu1 %v1829_v18  ;;  %v10963_v28 = vld [vmem:[#allocation2 + $0x64] sm:$0xf]  ;;  %v1403_v33 = vld [vmem:[#allocation2 + $0x60] sm:$0xe]  ;;  %v1830_v30 = vrot.slane %v8368_v19, 1  ;;  %v531_v41 = vsel %vm10768_vm3, %v431_v42, 0  ;;  %v8261_v52 = vcombine.low %v515_v40, %v515_v40  ;;  %v8262_v53 = vcombine.high %v515_v40, %v515_v40  ;;  %9741 = vmatprep.subr.bf16.mxu0 %v10123_v43 }
  0x65   : > { %v8369_v31 = vcombine.low %v1403_v33, %v10963_v28  ;;  %739 = vst [vmem:[#allocation2 + $0x6c] sm:$0xf] %v8258_v21  ;;  %740 = vst [vmem:[#allocation2 + $0x70] sm:$0xf] %v8259_v22  ;;  %9018 = vmatpush3.bf16.msra.mxu1 %v10112_v9  ;;  %v1617_v44 = vshrl.u32 %v10950_v12, 16  ;;  %v1619_v45 = vshll.u32 %v10950_v12, 16  ;;  %v8263_v58 = vcombine.low %v531_v41, %v531_v41 }
  0x66   : > { %9019 = vmatprep.subr.bf16.mxu1 %v10119_v27  ;;  %v1832_v48 = vsel %vm1235_vm4, %v1830_v30, %v1831_v14  ;;  %2126 = vmatmul.mubr.bf16.gmra.mxu0 %v10844_v26  ;;  %v1624_v60 = vshll.u32 %v10930_v38, 16  ;;  %v435_v26 = vshrl.u32 %v364_v34, 16  ;;  %742 = vst [vmem:[#allocation2 + $0x78] sm:$0xf] %v8261_v52  ;;  %743 = vst [vmem:[#allocation2 + $0x7c] sm:$0xf] %v8262_v53 }
  0x67   : > { %v1833_v51 = vrot.slane %v8369_v31, 1  ;;  %9713 = vmatprep.mubr.bf16.mxu1 %v1832_v48  ;;  %2133 = vmatprep.mubr.bf16.mxu0 %v1615_v39  ;;  %v1621_v59 = vrot.slane %v1619_v45, 1  ;;  %v438_v32 = vshll.u32 %v364_v34, 16  ;;  %v366_v62 = vsel %vm341_vm0, %v336_v35, 0  ;;  %v10992_v63 = vld [vmem:[%s10734_s21 + $0xd8] sm:$0xff]  ;;  %v10998_v0 = vld [vmem:[%s10734_s21 + $0xe8] sm:$0xff] }
  0x68   : > { %744 = vst [vmem:[#allocation2 + $0x80] sm:$0x1] %v8263_v58  ;;  %v1626_v2 = vrot.slane %v1624_v60, 1  ;;  %v1362_v3 = vld [vmem:[#allocation2 + $0x60] sm:$0xf]  ;;  %v437_v4 = vrot.slane %v435_v26, 7  ;;  %v337_v42 = vpack.c.bf16 %v318_v55, %v317_v47  ;;  %9742 = vmatpush3.bf16.msra.mxu0 %v10123_v43  ;;  %v338_v24 = vpack.c.bf16 %v10992_v63, %v10980_v56 }
  0x69   : > { %v1835_v61 = vsel %vm1235_vm4, %v1833_v51, %v1834_v37  ;;  %9020 = vmatpush3.bf16.msra.mxu1 %v10120_v57  ;;  %v11000_v38 = vld [vmem:[#allocation2 + $0x74] ss:$0 sps:$4 sm:$0x11]   ;;  %v1622_v1 = vor.u32 %v1621_v59, %v1617_v44  ;;  %v441_v5 = vshrl.u32 %v366_v62, 16  ;;  %v1631_v23 = vshll.u32 %v10961_v54, 16  ;;  %v11016_v14 = vld [vmem:[%s13461_s1 + $0x238] sm:$0xff]  }
  0x6a   : > { %v444_v8 = vshll.u32 %v366_v62, 16  ;;  %v1629_v9 = vshrl.u32 %v10961_v54, 16  ;;  %v339_v25 = vpack.c.bf16 %v10998_v0, %v10995_v36  ;;  %v1837_v10 = vrot.slane %v11000_v38, 1  ;;  %v11026_v33 = vld [vmem:[%s10734_s21 + $0xf0] sm:$0xff]  ;;  %9781 = vmatprep.subr.bf16.mxu1 %v11016_v14  ;;  %v324_v39 = vld [vmem:[%s10734_s21 + $0xf8] sm:$0xff]  ;;  %v10135_v63 = vld [vmem:[%s13461_s1 + $0x88] sm:$0xff]  }
  0x6b   : > { %v1627_v11 = vsel %vm978_vm5, %v1622_v1, %v1626_v2  ;;  %v440_v13 = vor.u32 %v438_v32, %v437_v4  ;;  %v532_v15 = vsel %vm10768_vm3, %v437_v4, 0  ;;  %v443_v16 = vrot.slane %v441_v5, 7  ;;  %v10129_v34 = vld [vmem:[%s13461_s1 + $0x90] sm:$0xff]   ;;  %s13420_s21 = scalar_lea.sflag [#allocation5], %s284_s17 }
  0x6c   : > { %9714 = vmatmul.mubr.bf16.gmra.mxu1 %v1835_v61  ;;  %v11003_v6 = vld [vmem:[#allocation2 + $0x70] sm:$0xf]  ;;  %v1404_v7 = vld [vmem:[#allocation2 + $0x6c] sm:$0xe]  ;;  %v1633_v17 = vrot.slane %v1631_v23, 1  ;;  %v1636_v18 = vshll.u32 %v10941_v29, 16  ;;  %v8266_v22 = vcombine.low %v532_v15, %v532_v15  ;;  %v11033_v29 = vcombine.low %v1362_v3, %v10963_v28  ;;  %9743 = vmatprep.subr.bf16.mxu0 %v10129_v34 }
  0x6d   : > { %v8370_v49 = vcombine.low %v1404_v7, %v11003_v6  ;;  %v516_v21 = vsel %vm10768_vm3, 0, %v440_v13  ;;  %v368_v27 = vsel %vm341_vm0, %v337_v42, 0  ;;  %v11035_v35 = vld [vmem:[#allocation2 + $0x7c] sm:$0xf]  ;;  %v446_v37 = vor.u32 %v444_v8, %v443_v16  ;;  %9744 = vmatpush3.bf16.msra.mxu0 %v10129_v34  ;;  %v1364_v8 = vld [vmem:[#allocation2 + $0x6c] sm:$0xf] }
  0x6e   : > { %2134 = vmatmul.mubr.bf16.gmra.mxu0 %v10919_v50  ;;  %v1405_v50 = vld [vmem:[#allocation2 + $0x78] sm:$0xe]  ;;  %v8264_v30 = vcombine.low %v516_v21, %v516_v21  ;;  %v8265_v31 = vcombine.high %v516_v21, %v516_v21  ;;  %747 = vst [vmem:[#allocation2 + $0x8c] sm:$0x1] %v8266_v22  ;;  %v533_v45 = vsel %vm10768_vm3, %v443_v16, 0  ;;  %v1634_v28 = vor.u32 %v1633_v17, %v1629_v9 }
  0x6f   : > { %v1836_v19 = vrot.slane %v8370_v49, 1  ;;  %2141 = vmatprep.mubr.bf16.mxu0 %v1627_v11  ;;  %v11039_v41 = vld [vmem:[#allocation2 + $0x80] ss:$0 sps:$4 sm:$0x11]   ;;  %v8371_v44 = vcombine.low %v1405_v50, %v11035_v35  ;;  %v517_v47 = vsel %vm10768_vm3, 0, %v446_v37  ;;  %v8269_v48 = vcombine.low %v533_v45, %v533_v45  ;;  %9745 = vmatprep.subr.bf16.mxu0 %v10135_v63 }
  0x70   : > { %745 = vst [vmem:[#allocation2 + $0x84] sm:$0xf] %v8264_v30  ;;  %746 = vst [vmem:[#allocation2 + $0x88] sm:$0xf] %v8265_v31  ;;  %v1638_v51 = vrot.slane %v1636_v18, 1  ;;  %v447_v52 = vshrl.u32 %v368_v27, 16  ;;  %v8267_v56 = vcombine.low %v517_v47, %v517_v47  ;;  %v8268_v57 = vcombine.high %v517_v47, %v517_v47 }
  0x71   : > { %v1838_v40 = vsel %vm1235_vm4, %v1836_v19, %v1837_v10  ;;  %v1839_v53 = vrot.slane %v8371_v44, 1  ;;  %v1840_v55 = vrot.slane %v11039_v41, 1  ;;  %750 = vst [vmem:[#allocation2 + $0x98] sm:$0x1] %v8269_v48  ;;  %v450_v59 = vshll.u32 %v368_v27, 16  ;;  %9746 = vmatpush3.bf16.msra.mxu0 %v10135_v63 }
  0x72   : > { %9717 = vmatprep.mubr.bf16.mxu1 %v1838_v40  ;;  %v449_v58 = vrot.slane %v447_v52, 7  ;;  %v370_v60 = vsel %vm341_vm0, %v338_v24, 0  ;;  %v340_v26 = vpack.c.bf16 %v324_v39, %v11026_v33  ;;  %748 = vst [vmem:[#allocation2 + $0x90] sm:$0xf] %v8267_v56  ;;  %749 = vst [vmem:[#allocation2 + $0x94] sm:$0xf] %v8268_v57  ;;  %v1639_v61 = vsel %vm978_vm5, %v1634_v28, %v1638_v51 }
  0x73   : > { %v1841_v43 = vsel %vm1235_vm4, %v1839_v53, %v1840_v55  ;;  %v453_v32 = vshrl.u32 %v370_v60, 16  ;;  %v456_v62 = vshll.u32 %v370_v60, 16  ;;  %v1641_v3 = vshrl.u32 %v11033_v29, 16  ;;  %v770_v37 = vld [vmem:[#allocation2] sm:$0xf] }
  0x74   : > { %9718 = vmatmul.mubr.bf16.gmra.mxu1 %v1841_v43  ;;  %v452_v1 = vor.u32 %v450_v59, %v449_v58  ;;  %v534_v2 = vsel %vm10768_vm3, %v449_v58, 0  ;;  %v1643_v4 = vshll.u32 %v11033_v29, 16  ;;  %v1648_v42 = vshll.u32 %v10956_v20, 16  ;;  %v10141_v39 = vld [vmem:[%s13461_s1 + $0x80] sm:$0xff]   ;;  %v1366_v60 = vld [vmem:[#allocation2 + $0x78] sm:$0xf] }
  0x75   : > { %v8272_v5 = vcombine.low %v534_v2, %v534_v2  ;;  %v455_v23 = vrot.slane %v453_v32, 7  ;;  %v372_v7 = vsel %vm341_vm0, %v339_v25, 0  ;;  %v11064_v9 = vld [vmem:[#allocation2 + $0x8c] ss:$0 sps:$4 sm:$0x11]   ;;  %v374_v36 = vsel %vm341_vm0, %v340_v26, 0  ;;  %9747 = vmatprep.subr.bf16.mxu0 %v10141_v39 }
  0x76   : > { %2142 = vmatmul.mubr.bf16.gmra.mxu0 %v10950_v12  ;;  %v518_v24 = vsel %vm10768_vm3, 0, %v452_v1  ;;  %v1843_v25 = vrot.slane %v11064_v9, 1  ;;  %v1645_v27 = vrot.slane %v1643_v4, 1  ;;  %v11082_v33 = vcombine.low %v1364_v8, %v11003_v6  ;;  %v11091_v51 = vld [vmem:[#allocation2 + $0x4] sm:$0xf] }
  0x77   : > { %2149 = vmatprep.mubr.bf16.mxu0 %v1639_v61  ;;  %v11068_v49 = vld [vmem:[#allocation2 + $0x88] sm:$0xf]  ;;  %v1406_v12 = vld [vmem:[#allocation2 + $0x84] sm:$0xe]  ;;  %v8270_v10 = vcombine.low %v518_v24, %v518_v24  ;;  %v8271_v11 = vcombine.high %v518_v24, %v518_v24  ;;  %753 = vst [vmem:[#allocation2 + $0xa4] sm:$0x1] %v8272_v5  ;;  %v458_v20 = vor.u32 %v456_v62, %v455_v23 }
  0x78   : > { %v8372_v0 = vcombine.low %v1406_v12, %v11068_v49  ;;  %v535_v13 = vsel %vm10768_vm3, %v455_v23, 0  ;;  %v11075_v15 = vld [vmem:[#allocation2 + $0x98] ss:$0 sps:$4 sm:$0x11]   ;;  %v1650_v30 = vrot.slane %v1648_v42, 1  ;;  %v459_v31 = vshrl.u32 %v372_v7, 16  ;;  %9748 = vmatpush3.bf16.msra.mxu0 %v10141_v39 }
  0x79   : > { %751 = vst [vmem:[#allocation2 + $0x9c] sm:$0xf] %v8270_v10  ;;  %752 = vst [vmem:[#allocation2 + $0xa0] sm:$0xf] %v8271_v11  ;;  %v519_v16 = vsel %vm10768_vm3, 0, %v458_v20  ;;  %v8275_v17 = vcombine.low %v535_v13, %v535_v13  ;;  %v1846_v50 = vrot.slane %v11075_v15, 1  ;;  %v1646_v45 = vor.u32 %v1645_v27, %v1641_v3 }
  0x7a   : > { %v1842_v18 = vrot.slane %v8372_v0, 1  ;;  %v11079_v19 = vld [vmem:[#allocation2 + $0x94] sm:$0xf]  ;;  %v8273_v21 = vcombine.low %v519_v16, %v519_v16  ;;  %v8274_v22 = vcombine.high %v519_v16, %v519_v16  ;;  %v1407_v34 = vld [vmem:[#allocation2 + $0x90] sm:$0xe]  ;;  %v462_v6 = vshll.u32 %v372_v7, 16 }
  0x7b   : > { %756 = vst [vmem:[#allocation2 + $0xb0] sm:$0x1] %v8275_v17  ;;  %v8373_v44 = vcombine.low %v1407_v34, %v11079_v19  ;;  %v461_v28 = vrot.slane %v459_v31, 7  ;;  %v465_v47 = vshrl.u32 %v374_v36, 16  ;;  %v468_v48 = vshll.u32 %v374_v36, 16 }
  0x7c   : > { %v1844_v40 = vsel %vm1235_vm4, %v1842_v18, %v1843_v25  ;;  %754 = vst [vmem:[#allocation2 + $0xa8] sm:$0xf] %v8273_v21  ;;  %755 = vst [vmem:[#allocation2 + $0xac] sm:$0xf] %v8274_v22  ;;  %v1651_v55 = vsel %vm978_vm5, %v1646_v45, %v1650_v30  ;;  %v1655_v59 = vshll.u32 %v11082_v33, 16  ;;  %v11106_v62 = vcombine.low %v770_v37, %v11091_v51 }
  0x7d   : > { %9721 = vmatprep.mubr.bf16.mxu1 %v1844_v40  ;;  %v1845_v52 = vrot.slane %v8373_v44, 1  ;;  %v464_v56 = vor.u32 %v462_v6, %v461_v28  ;;  %v536_v57 = vsel %vm10768_vm3, %v461_v28, 0  ;;  %v467_v58 = vrot.slane %v465_v47, 7  ;;  %v11129_v18 = vld [vmem:[#allocation2 + $0x8] ss:$0 sps:$4 sm:$0x11]  }
  0x7e   : > { %2150 = vmatmul.mubr.bf16.gmra.mxu0 %v10961_v54  ;;  %v11093_v53 = vld [vmem:[#allocation2 + $0xa4] ss:$0 sps:$4 sm:$0x11]   ;;  %v10149_v54 = vld [vmem:[%s13461_s1 + $0x1f8] sm:$0xff]   ;;  %v8278_v32 = vcombine.low %v536_v57, %v536_v57  ;;  %v1653_v3 = vshrl.u32 %v11082_v33, 16  ;;  %v11118_v8 = vcombine.low %v1366_v60, %v11035_v35  ;;  %v1657_v11 = vrot.slane %v1655_v59, 1 }
  0x7f   : > { %2157 = vmatprep.mubr.bf16.mxu0 %v1651_v55  ;;  %v1847_v26 = vsel %vm1235_vm4, %v1845_v52, %v1846_v50  ;;  %v1849_v1 = vrot.slane %v11093_v53, 1  ;;  %v520_v2 = vsel %vm10768_vm3, 0, %v464_v56  ;;  %9141 = vmatprep.subr.bf16.mxu0 %v10149_v54  ;;  %v470_v42 = vor.u32 %v468_v48, %v467_v58  ;;  %v772_v21 = vld [vmem:[#allocation2 + $0xc] sm:$0xf]  ;;  %v11131_v34 = vld [vmem:[#allocation2 + $0x10] sm:$0xf] }
  0x80   : > { %v11103_v43 = vld [vmem:[#allocation2 + $0xa0] sm:$0xf]  ;;  %v1408_v61 = vld [vmem:[#allocation2 + $0x9c] sm:$0xe]  ;;  %9722 = vmatmul.mubr.bf16.gmra.mxu1 %v1847_v26  ;;  %v8276_v5 = vcombine.low %v520_v2, %v520_v2  ;;  %v8277_v23 = vcombine.high %v520_v2, %v520_v2  ;;  %759 = vst [vmem:[#allocation2 + $0xbc] sm:$0x1] %v8278_v32  ;;  %v1658_v22 = vor.u32 %v1657_v11, %v1653_v3 }
  0x81   : > { %v8374_v63 = vcombine.low %v1408_v61, %v11103_v43  ;;  %v537_v7 = vsel %vm10768_vm3, %v467_v58, 0  ;;  %v521_v0 = vsel %vm10768_vm3, 0, %v470_v42  ;;  %v1660_v25 = vshll.u32 %v11000_v38, 16  ;;  %v1368_v31 = vld [vmem:[#allocation2 + $0x84] sm:$0xf] }
  0x82   : > { %v11113_v4 = vld [vmem:[#allocation2 + $0xb0] ss:$0 sps:$4 sm:$0x11]   ;;  %v8281_v10 = vcombine.low %v537_v7, %v537_v7  ;;  %757 = vst [vmem:[#allocation2 + $0xb4] sm:$0xf] %v8276_v5  ;;  %v8279_v16 = vcombine.low %v521_v0, %v521_v0  ;;  %v8280_v17 = vcombine.high %v521_v0, %v521_v0  ;;  %v982_v38 = vshll.u32 %v11106_v62, 16 }
  0x83   : > { %v1848_v24 = vrot.slane %v8374_v63, 1  ;;  %v11120_v12 = vld [vmem:[#allocation2 + $0xac] sm:$0xf]  ;;  %v1409_v20 = vld [vmem:[#allocation2 + $0xa8] sm:$0xe]  ;;  %v1852_v36 = vrot.slane %v11113_v4, 1  ;;  %v11142_v6 = vcombine.low %v772_v21, %v11131_v34  ;;  %v11149_v57 = vcombine.low %v1368_v31, %v11068_v49 }
  0x84   : > { %758 = vst [vmem:[#allocation2 + $0xb8] sm:$0xf] %v8277_v23  ;;  %v8375_v35 = vcombine.low %v1409_v20, %v11120_v12  ;;  %762 = vst [vmem:[#allocation2 + $0xc8] sm:$0x1] %v8281_v10  ;;  %v1662_v27 = vrot.slane %v1660_v25, 1  ;;  %v1667_v30 = vshll.u32 %v11118_v8, 16 }
  0x85   : > { %v1850_v13 = vsel %vm1235_vm4, %v1848_v24, %v1849_v1  ;;  %760 = vst [vmem:[#allocation2 + $0xc0] sm:$0xf] %v8279_v16  ;;  %761 = vst [vmem:[#allocation2 + $0xc4] sm:$0xf] %v8280_v17  ;;  %v1672_v37 = vshll.u32 %v11039_v41, 16  ;;  %v1665_v45 = vshrl.u32 %v11118_v8, 16 }
  0x86   : > { %2158 = vmatmul.mubr.bf16.gmra.mxu0 %v11033_v29  ;;  %9725 = vmatprep.mubr.bf16.mxu1 %v1850_v13  ;;  %v1851_v50 = vrot.slane %v8375_v35, 1  ;;  %v1663_v29 = vsel %vm978_vm5, %v1658_v22, %v1662_v27  ;;  %v1370_v39 = vld [vmem:[#allocation2 + $0x90] sm:$0xf]  ;;  %v980_v28 = vshrl.u32 %v11106_v62, 16  ;;  %v987_v47 = vshll.u32 %v11129_v18, 16 }
  0x87   : > { %v11138_v44 = vld [vmem:[#allocation2 + $0xbc] ss:$0 sps:$4 sm:$0x11]   ;;  %2165 = vmatprep.mubr.bf16.mxu0 %v1663_v29  ;;  %v1669_v48 = vrot.slane %v1667_v30, 1  ;;  %v984_v55 = vrot.slane %v982_v38, 1  ;;  %v1674_v56 = vrot.slane %v1672_v37, 1  ;;  %v11160_v32 = vcombine.low %v1370_v39, %v11079_v19 }
  0x88   : > { %v1853_v40 = vsel %vm1235_vm4, %v1851_v50, %v1852_v36  ;;  %v1855_v59 = vrot.slane %v11138_v44, 1  ;;  %v11156_v26 = vld [vmem:[#allocation2 + $0x14] ss:$0 sps:$4 sm:$0x11]   ;;  %v994_v61 = vshll.u32 %v11142_v6, 16  ;;  %v989_v49 = vrot.slane %v987_v47, 1 }
  0x89   : > { %9726 = vmatmul.mubr.bf16.gmra.mxu1 %v1853_v40  ;;  %v1410_v41 = vld [vmem:[#allocation2 + $0xb4] sm:$0xe]  ;;  %v1670_v60 = vor.u32 %v1669_v48, %v1665_v45  ;;  %v774_v2 = vld [vmem:[#allocation2 + $0x18] sm:$0xf]  ;;  %v985_v23 = vor.u32 %v984_v55, %v980_v28  ;;  %v1372_v7 = vld [vmem:[#allocation2 + $0x9c] sm:$0xf] }
  0x8a   : > { %v1679_v19 = vshll.u32 %v11149_v57, 16  ;;  %v1684_v11 = vshll.u32 %v11064_v9, 16  ;;  %v11171_v20 = vld [vmem:[#allocation2 + $0x1c] sm:$0xf]  ;;  %v992_v36 = vshrl.u32 %v11142_v6, 16  ;;  %v996_v0 = vrot.slane %v994_v61, 1 }
  0x8b   : > { %v11146_v52 = vld [vmem:[#allocation2 + $0xb8] sm:$0xf]  ;;  %v11153_v54 = vld [vmem:[#allocation2 + $0xc8] ss:$0 sps:$4 sm:$0x11]   ;;  %v1675_v42 = vsel %vm978_vm5, %v1670_v60, %v1674_v56  ;;  %v999_v13 = vshll.u32 %v11156_v26, 16  ;;  %v11176_v17 = vcombine.low %v1372_v7, %v11103_v43  ;;  %v990_v21 = vsel %vm978_vm5, %v985_v23, %v989_v49 }
  0x8c   : > { %v8376_v58 = vcombine.low %v1410_v41, %v11146_v52  ;;  %v11162_v1 = vld [vmem:[#allocation2 + $0xc4] sm:$0xf]  ;;  %v1411_v3 = vld [vmem:[#allocation2 + $0xc0] sm:$0xe]  ;;  %v1858_v5 = vrot.slane %v11153_v54, 1  ;;  %v1681_v35 = vrot.slane %v1679_v19, 1  ;;  %v11180_v22 = vcombine.low %v774_v2, %v11171_v20 }
  0x8d   : > { %v8377_v10 = vcombine.low %v1411_v3, %v11162_v1  ;;  %v1686_v16 = vrot.slane %v1684_v11, 1  ;;  %v1691_v9 = vshll.u32 %v11160_v32, 16  ;;  %v11184_v38 = vld [vmem:[#allocation2 + $0x20] ss:$0 sps:$4 sm:$0x11]   ;;  %v1689_v30 = vshrl.u32 %v11160_v32, 16 }
  0x8e   : > { %2166 = vmatmul.mubr.bf16.gmra.mxu0 %v11082_v33  ;;  %v1854_v63 = vrot.slane %v8376_v58, 1  ;;  %v1677_v33 = vshrl.u32 %v11149_v57, 16  ;;  %v1696_v31 = vshll.u32 %v11075_v15, 16  ;;  %v776_v29 = vld [vmem:[#allocation2 + $0x24] sm:$0xf]  ;;  %v997_v39 = vor.u32 %v996_v0, %v992_v36  ;;  %v10130_v60 = vld [vmem:[%s13461_s1 + $0x230] sm:$0xff]  }
  0x8f   : > { %2173 = vmatprep.mubr.bf16.mxu0 %v1675_v42  ;;  %v1857_v25 = vrot.slane %v8377_v10, 1  ;;  %v1693_v43 = vrot.slane %v1691_v9, 1  ;;  %v1374_v37 = vld [vmem:[#allocation2 + $0xa8] sm:$0xf]  ;;  %v1001_v40 = vrot.slane %v999_v13, 1  ;;  %v1006_v47 = vshll.u32 %v11180_v22, 16 }
  0x90   : > { %v1856_v24 = vsel %vm1235_vm4, %v1854_v63, %v1855_v59  ;;  %v1682_v50 = vor.u32 %v1681_v35, %v1677_v33  ;;  %v11190_v28 = vld [vmem:[#allocation2 + $0x28] sm:$0xf]  ;;  %v1703_v48 = vshll.u32 %v11176_v17, 16  ;;  %v1698_v15 = vrot.slane %v1696_v31, 1  ;;  %v778_v33 = vld [vmem:[#allocation2 + $0x30] sm:$0xf] }
  0x91   : > { %9729 = vmatprep.mubr.bf16.mxu1 %v1856_v24  ;;  %v1859_v27 = vsel %vm1235_vm4, %v1857_v25, %v1858_v5  ;;  %v1694_v41 = vor.u32 %v1693_v43, %v1689_v30  ;;  %v11195_v55 = vcombine.low %v776_v29, %v11190_v28  ;;  %v1002_v56 = vsel %vm978_vm5, %v997_v39, %v1001_v40  ;;  %v10136_v5 = vld [vmem:[%s13461_s1 + $0x228] sm:$0xff]   ;;  %v11238_v9 = vld [vmem:[#allocation2 + $0x38] ss:$0 sps:$4 sm:$0x11]   ;;  %v780_v29 = vld [vmem:[#allocation2 + $0x3c] sm:$0xf] }
  0x92   : > { %9730 = vmatmul.mubr.bf16.gmra.mxu1 %v1859_v27  ;;  %v1687_v45 = vsel %vm978_vm5, %v1682_v50, %v1686_v16  ;;  %v1004_v58 = vshrl.u32 %v11180_v22, 16  ;;  %v1011_v59 = vshll.u32 %v11184_v38, 16  ;;  %v1008_v61 = vrot.slane %v1006_v47, 1  ;;  %v1378_v27 = vld [vmem:[#allocation2 + $0xc0] sm:$0xf] }
  0x93   : > { %2567 = vmatprep.mubr.bf16.mxu1 %v990_v21  ;;  %v1701_v63 = vshrl.u32 %v11176_v17, 16  ;;  %v1705_v49 = vrot.slane %v1703_v48, 1  ;;  %v1708_v2 = vshll.u32 %v11093_v53, 16  ;;  %v1699_v3 = vsel %vm978_vm5, %v1694_v41, %v1698_v15  ;;  %v1376_v53 = vld [vmem:[#allocation2 + $0xb4] sm:$0xf] }
  0x94   : > { %v1013_v23 = vrot.slane %v1011_v59, 1  ;;  %v1018_v42 = vshll.u32 %v11195_v55, 16  ;;  %v1009_v7 = vor.u32 %v1008_v61, %v1004_v58  ;;  %v1016_v19 = vshrl.u32 %v11195_v55, 16 }
  0x95   : > { %v1710_v24 = vrot.slane %v1708_v2, 1  ;;  %v1720_v21 = vshll.u32 %v11113_v4, 16  ;;  %v1035_v48 = vshll.u32 %v11238_v9, 16  ;;  %v1732_v59 = vshll.u32 %v11138_v44, 16  ;;  %v782_v2 = vld [vmem:[#allocation2 + $0x48] sm:$0xf] }
  0x96   : > { %2174 = vmatmul.mubr.bf16.gmra.mxu0 %v11118_v8  ;;  %v11198_v8 = vcombine.low %v1374_v37, %v11120_v12  ;;  %v11211_v12 = vld [vmem:[#allocation2 + $0x2c] ss:$0 sps:$4 sm:$0x11]   ;;  %v1020_v36 = vrot.slane %v1018_v42, 1  ;;  %v1014_v13 = vsel %vm978_vm5, %v1009_v7, %v1013_v23  ;;  %v11241_v37 = vld [vmem:[#allocation2 + $0x40] sm:$0xf] }
  0x97   : > { %2181 = vmatprep.mubr.bf16.mxu0 %v1687_v45  ;;  %v1023_v11 = vshll.u32 %v11211_v12, 16  ;;  %v1722_v4 = vrot.slane %v1720_v21, 1  ;;  %v11254_v41 = vcombine.low %v780_v29, %v11241_v37  ;;  %v11267_v44 = vld [vmem:[#allocation2 + $0x4c] sm:$0xf]  ;;  %v784_v21 = vld [vmem:[#allocation2 + $0x54] sm:$0xf] }
  0x98   : > { %v1715_v10 = vshll.u32 %v11198_v8, 16  ;;  %v1713_v25 = vshrl.u32 %v11198_v8, 16  ;;  %v1021_v50 = vor.u32 %v1020_v36, %v1016_v19  ;;  %v11277_v7 = vcombine.low %v782_v2, %v11267_v44  ;;  %v11316_v2 = vld [vmem:[#allocation2 + $0x68] ss:$0 sps:$4 sm:$0x11]  }
  0x99   : > { %v1025_v30 = vrot.slane %v1023_v11, 1  ;;  %v1744_v19 = vshll.u32 %v11153_v54, 16  ;;  %v10190_v11 = vld [vmem:[%s13461_s1 + $0x200] sm:$0xff]  }
  0x9a   : > { %2568 = vmatmul.mubr.bf16.vlgmr.msra.gmra.mxu1 %v11106_v62  ;;  %v1706_v62 = vor.u32 %v1705_v49, %v1701_v63  ;;  %v1717_v16 = vrot.slane %v1715_v10, 1  ;;  %v1037_v63 = vrot.slane %v1035_v48, 1  ;;  %v1042_v49 = vshll.u32 %v11254_v41, 16 }
  0x9b   : > { %9782 = vmatpush3.bf16.msra.mxu1 %v11016_v14  ;;  %2575 = vmatprep.mubr.bf16.mxu1 %v1002_v56  ;;  %v11224_v14 = vcombine.low %v1376_v53, %v11146_v52  ;;  %v10142_v52 = vld [vmem:[%s13461_s1 + $0x220] sm:$0xff]   ;;  %v1026_v45 = vsel %vm978_vm5, %v1021_v50, %v1025_v30  ;;  %v1746_v54 = vrot.slane %v1744_v19, 1  ;;  %v11297_v30 = vld [vmem:[#allocation2 + $0x5c] ss:$0 sps:$4 sm:$0x11]  }
  0x9c   : > { %9783 = vmatprep.subr.bf16.mxu1 %v10130_v60  ;;  %v1711_v35 = vsel %vm978_vm5, %v1706_v62, %v1710_v24  ;;  %v1718_v43 = vor.u32 %v1717_v16, %v1713_v25  ;;  %v1044_v53 = vrot.slane %v1042_v49, 1  ;;  %v11287_v25 = vld [vmem:[#allocation2 + $0x50] ss:$0 sps:$4 sm:$0x11]  }
  0x9d   : > { %v1727_v39 = vshll.u32 %v11224_v14, 16  ;;  %v1725_v56 = vshrl.u32 %v11224_v14, 16  ;;  %v1059_v50 = vshll.u32 %v11287_v25, 16 }
  0x9e   : > { %2182 = vmatmul.mubr.bf16.gmra.mxu0 %v11149_v57  ;;  %v11218_v57 = vld [vmem:[#allocation2 + $0x34] sm:$0xf]  ;;  %v1723_v15 = vsel %vm978_vm5, %v1718_v43, %v1722_v4 }
  0x9f   : > { %2189 = vmatprep.mubr.bf16.mxu0 %v1699_v3  ;;  %9784 = vmatpush3.bf16.msra.mxu1 %v10130_v60  ;;  %v11227_v0 = vcombine.low %v778_v33, %v11218_v57  ;;  %v1729_v58 = vrot.slane %v1727_v39, 1  ;;  %v11264_v60 = vld [vmem:[#allocation2 + $0x44] ss:$0 sps:$4 sm:$0x11]   ;;  %v1040_v33 = vshrl.u32 %v11254_v41, 16 }
  0xa0   : > { %9785 = vmatprep.subr.bf16.mxu1 %v10136_v5  ;;  %v786_v39 = vld [vmem:[#allocation2 + $0x60] sm:$0xf] }
  0xa1   : > { %v1030_v31 = vshll.u32 %v11227_v0, 16  ;;  %v1028_v40 = vshrl.u32 %v11227_v0, 16  ;;  %v1730_v3 = vor.u32 %v1729_v58, %v1725_v56  ;;  %v1237_v56 = vrot.slane %v11129_v18, 1 }
  0xa2   : > { %2576 = vmatmul.mubr.bf16.gmra.mxu1 %v11142_v6  ;;  %v10151_v6 = vld [vmem:[%s13461_s1 + $0x218] sm:$0xff]  }
  0xa3   : > { %2583 = vmatprep.mubr.bf16.mxu1 %v1014_v13  ;;  %9786 = vmatpush3.bf16.msra.mxu1 %v10136_v5  ;;  %v1032_v47 = vrot.slane %v1030_v31, 1  ;;  %v1734_v5 = vrot.slane %v1732_v59, 1  ;;  %v1045_v13 = vor.u32 %v1044_v53, %v1040_v33  ;;  %v1243_v53 = vrot.slane %v11184_v38, 1  ;;  %v10156_v38 = vld [vmem:[%s13461_s1 + $0x1f0] sm:$0xff]  }
  0xa4   : > { %9787 = vmatprep.subr.bf16.mxu1 %v10142_v52 }
  0xa5   : > { %v1033_v61 = vor.u32 %v1032_v47, %v1028_v40  ;;  %v1735_v62 = vsel %vm978_vm5, %v1730_v3, %v1734_v5  ;;  %v1061_v40 = vrot.slane %v1059_v50, 1  ;;  %v788_v5 = vld [vmem:[#allocation2 + $0x6c] sm:$0xf]  ;;  %v1246_v50 = vrot.slane %v11211_v12, 1  ;;  %v824_v12 = vld [vmem:[#allocation2 + $0x48] sm:$0xe] }
  0xa6   : > { %2190 = vmatmul.mubr.bf16.gmra.mxu0 %v11160_v32  ;;  %v11248_v32 = vcombine.low %v1378_v27, %v11162_v1  ;;  %v10164_v1 = vld [vmem:[%s13461_s1 + $0x210] sm:$0xff]   ;;  %v818_v27 = vld [vmem:[#allocation2] sm:$0xe] }
  0xa7   : > { %2197 = vmatprep.mubr.bf16.mxu0 %v1711_v35  ;;  %9788 = vmatpush3.bf16.msra.mxu1 %v10142_v52  ;;  %v1038_v42 = vsel %vm978_vm5, %v1033_v61, %v1037_v63  ;;  %v1054_v35 = vshll.u32 %v11277_v7, 16  ;;  %v11290_v52 = vld [vmem:[#allocation2 + $0x58] sm:$0xf]  ;;  %v8314_v29 = vcombine.low %v818_v27, %v11091_v51  ;;  %v1071_v51 = vshll.u32 %v11297_v30, 16 }
  0xa8   : > { %9789 = vmatprep.subr.bf16.mxu1 %v10151_v6  ;;  %v1739_v23 = vshll.u32 %v11248_v32, 16  ;;  %v1737_v24 = vshrl.u32 %v11248_v32, 16 }
  0xa9   : > { %v1056_v43 = vrot.slane %v1054_v35, 1  ;;  %v1073_v49 = vrot.slane %v1071_v51, 1 }
  0xaa   : > { %2584 = vmatmul.mubr.bf16.gmra.mxu1 %v11180_v22  ;;  %v1047_v22 = vshll.u32 %v11264_v60, 16  ;;  %v1741_v10 = vrot.slane %v1739_v23, 1 }
  0xab   : > { %2591 = vmatprep.mubr.bf16.mxu1 %v1026_v45  ;;  %9790 = vmatpush3.bf16.msra.mxu1 %v10151_v6  ;;  %v11304_v6 = vld [vmem:[#allocation2 + $0x64] sm:$0xf]  ;;  %v819_v45 = vld [vmem:[#allocation2 + $0xc] sm:$0xe] }
  0xac   : > { %9791 = vmatprep.subr.bf16.mxu1 %v10164_v1  ;;  %v1049_v36 = vrot.slane %v1047_v22, 1  ;;  %v1742_v16 = vor.u32 %v1741_v10, %v1737_v24  ;;  %v11310_v58 = vcombine.low %v786_v39, %v11304_v6  ;;  %v10150_v10 = vld [vmem:[%s13461_s1 + $0x1b8] sm:$0xff]   ;;  %v10162_v39 = vld [vmem:[%s13461_s1 + $0x1e8] sm:$0xff]  }
  0xae   : > { %2198 = vmatmul.mubr.bf16.gmra.mxu0 %v11176_v17  ;;  %v10177_v17 = vld [vmem:[%s13461_s1 + $0x208] sm:$0xff]   ;;  %v1050_v31 = vsel %vm978_vm5, %v1045_v13, %v1049_v36  ;;  %v1747_v4 = vsel %vm978_vm5, %v1742_v16, %v1746_v54  ;;  %v1078_v18 = vshll.u32 %v11310_v58, 16  ;;  %v790_v16 = vld [vmem:[#allocation2 + $0x78] sm:$0xf]  ;;  %v11344_v54 = vld [vmem:[#allocation2 + $0x7c] sm:$0xf] }
  0xaf   : > { %2205 = vmatprep.mubr.bf16.mxu0 %v1723_v15  ;;  %9792 = vmatpush3.bf16.msra.mxu1 %v10164_v1  ;;  %v1236_v15 = vrot.slane %v8314_v29, 1  ;;  %v823_v29 = vld [vmem:[#allocation2 + $0x3c] sm:$0xe] }
  0xb0   : > { %9793 = vmatprep.subr.bf16.mxu1 %v10177_v17  ;;  %v1080_v24 = vrot.slane %v1078_v18, 1  ;;  %v794_v18 = vld [vmem:[#allocation2 + $0x90] sm:$0xf] }
  0xb1   : > { %v1238_v63 = vsel %vm1235_vm4, %v1236_v15, %v1237_v56  ;;  %v11363_v15 = vld [vmem:[#allocation2 + $0x80] ss:$0 sps:$4 sm:$0x11]   ;;  %v8319_v56 = vcombine.low %v823_v29, %v11241_v37 }
  0xb2   : > { %2592 = vmatmul.mubr.bf16.gmra.mxu1 %v11195_v55  ;;  %v1052_v55 = vshrl.u32 %v11277_v7, 16 }
  0xb3   : > { %2599 = vmatprep.mubr.bf16.mxu1 %v1038_v42  ;;  %9794 = vmatpush3.bf16.msra.mxu1 %v10177_v17  ;;  %v1240_v17 = vrot.slane %v11156_v26, 1  ;;  %v821_v42 = vld [vmem:[#allocation2 + $0x24] sm:$0xe]  ;;  %v11335_v26 = vld [vmem:[#allocation2 + $0x74] ss:$0 sps:$4 sm:$0x11]  }
  0xb4   : > { %9795 = vmatprep.subr.bf16.mxu1 %v10190_v11  ;;  %v1057_v47 = vor.u32 %v1056_v43, %v1052_v55 }
  0xb6   : > { %2206 = vmatmul.mubr.bf16.gmra.mxu0 %v11198_v8  ;;  %v11295_v8 = vcombine.low %v784_v21, %v11290_v52  ;;  %v1062_v59 = vsel %vm978_vm5, %v1057_v47, %v1061_v40 }
  0xb7   : > { %2213 = vmatprep.mubr.bf16.mxu0 %v1735_v62  ;;  %9796 = vmatpush3.bf16.msra.mxu1 %v10190_v11  ;;  %v822_v62 = vld [vmem:[#allocation2 + $0x30] sm:$0xe]  ;;  %v8317_v11 = vcombine.low %v821_v42, %v11190_v28  ;;  %v826_v42 = vld [vmem:[#allocation2 + $0x60] sm:$0xe] }
  0xb8   : > { %v1066_v48 = vshll.u32 %v11295_v8, 16  ;;  %v1064_v1 = vshrl.u32 %v11295_v8, 16  ;;  %v8318_v13 = vcombine.low %v822_v62, %v11218_v57  ;;  %v10157_v57 = vld [vmem:[%s13461_s1 + $0x1b0] sm:$0xff]   ;;  %v10170_v62 = vld [vmem:[%s13461_s1 + $0x1a0] sm:$0xff]  }
  0xb9   : > { %v1245_v55 = vrot.slane %v8317_v11, 1  ;;  %v11401_v11 = vld [vmem:[#allocation2 + $0x98] ss:$0 sps:$4 sm:$0x11]  }
  0xba   : > { %2600 = vmatmul.mubr.bf16.gmra.mxu1 %v11227_v0  ;;  %v820_v0 = vld [vmem:[#allocation2 + $0x18] sm:$0xe]  ;;  %v1068_v61 = vrot.slane %v1066_v48, 1  ;;  %v1248_v43 = vrot.slane %v8318_v13, 1 }
  0xbb   : > { %2607 = vmatprep.mubr.bf16.mxu1 %v1050_v31  ;;  %v8316_v3 = vcombine.low %v820_v0, %v11171_v20  ;;  %v1076_v20 = vshrl.u32 %v11310_v58, 16  ;;  %v1095_v31 = vshll.u32 %v11335_v26, 16  ;;  %v1247_v48 = vsel %vm1235_vm4, %v1245_v55, %v1246_v50 }
  0xbc   : > { %v1069_v22 = vor.u32 %v1068_v61, %v1064_v1  ;;  %v10169_v1 = vld [vmem:[%s13461_s1 + $0x1e0] sm:$0xff]   ;;  %v1258_v55 = vrot.slane %v11297_v30, 1  ;;  %v10183_v30 = vld [vmem:[%s13461_s1 + $0x190] sm:$0xff]  }
  0xbd   : > { %v1242_v33 = vrot.slane %v8316_v3, 1  ;;  %v1081_v27 = vor.u32 %v1080_v24, %v1076_v20  ;;  %v1097_v51 = vrot.slane %v1095_v31, 1  ;;  %v792_v61 = vld [vmem:[#allocation2 + $0x84] sm:$0xf]  ;;  %v11380_v3 = vld [vmem:[#allocation2 + $0x94] sm:$0xf] }
  0xbe   : > { %2214 = vmatmul.mubr.bf16.gmra.mxu0 %v11224_v14  ;;  %v8315_v14 = vcombine.low %v819_v45, %v11131_v34  ;;  %v11322_v34 = vld [vmem:[#allocation2 + $0x70] sm:$0xf]  ;;  %v1074_v36 = vsel %vm978_vm5, %v1069_v22, %v1073_v49  ;;  %v1252_v49 = vrot.slane %v11264_v60, 1  ;;  %v825_v22 = vld [vmem:[#allocation2 + $0x54] sm:$0xe]  ;;  %v1255_v60 = vrot.slane %v11287_v25, 1 }
  0xbf   : > { %2221 = vmatprep.mubr.bf16.mxu0 %v1747_v4  ;;  %v11333_v19 = vcombine.low %v788_v5, %v11322_v34  ;;  %v1244_v35 = vsel %vm1235_vm4, %v1242_v33, %v1243_v53  ;;  %v1249_v4 = vrot.slane %v11238_v9, 1  ;;  %v11393_v20 = vcombine.low %v794_v18, %v11380_v3  ;;  %v796_v24 = vld [vmem:[#allocation2 + $0x9c] sm:$0xf]  ;;  %v10182_v31 = vld [vmem:[%s13461_s1 + $0x1d0] sm:$0xff]  }
  0xc0   : > { %v1239_v23 = vrot.slane %v8315_v14, 1  ;;  %v10163_v14 = vld [vmem:[%s13461_s1 + $0x1a8] sm:$0xff]   ;;  %v8322_v25 = vcombine.low %v826_v42, %v11304_v6 }
  0xc1   : > { %v1090_v28 = vshll.u32 %v11333_v19, 16  ;;  %v1088_v40 = vshrl.u32 %v11333_v19, 16  ;;  %v1250_v0 = vsel %vm1235_vm4, %v1248_v43, %v1249_v4  ;;  %v1126_v50 = vshll.u32 %v11393_v20, 16 }
  0xc2   : > { %2608 = vmatmul.mubr.bf16.gmra.mxu1 %v11254_v41  ;;  %v1083_v41 = vshll.u32 %v11316_v2, 16  ;;  %v1131_v4 = vshll.u32 %v11401_v11, 16  ;;  %v1260_v29 = vrot.slane %v8322_v25, 1 }
  0xc3   : > { %2615 = vmatprep.mubr.bf16.mxu1 %v1062_v59  ;;  %v1092_v47 = vrot.slane %v1090_v28, 1  ;;  %v8320_v59 = vcombine.low %v824_v12, %v11267_v44  ;;  %v1107_v44 = vshll.u32 %v11363_v15, 16  ;;  %v798_v12 = vld [vmem:[#allocation2 + $0xa8] sm:$0xf] }
  0xc4   : > { %v1085_v21 = vrot.slane %v1083_v41, 1  ;;  %v10175_v41 = vld [vmem:[%s13461_s1 + $0x1d8] sm:$0xff]  }
  0xc5   : > { %v1093_v5 = vor.u32 %v1092_v47, %v1088_v40  ;;  %v1254_v53 = vrot.slane %v8320_v59, 1  ;;  %v11429_v40 = vld [vmem:[#allocation2 + $0xac] sm:$0xf]  ;;  %v829_v59 = vld [vmem:[#allocation2 + $0x84] sm:$0xe] }
  0xc6   : > { %2222 = vmatmul.mubr.bf16.gmra.mxu0 %v11248_v32  ;;  %v1241_v32 = vsel %vm1235_vm4, %v1239_v23, %v1240_v17  ;;  %v1086_v45 = vsel %vm978_vm5, %v1081_v27, %v1085_v21  ;;  %v1251_v23 = vrot.slane %v8319_v56, 1  ;;  %v11383_v17 = vld [vmem:[#allocation2 + $0x8c] ss:$0 sps:$4 sm:$0x11]   ;;  %v827_v27 = vld [vmem:[#allocation2 + $0x6c] sm:$0xe] }
  0xc7   : > { %9749 = vmatprep.mubr.bf16.mxu0 %v1238_v63  ;;  %v11375_v63 = vld [vmem:[#allocation2 + $0x88] sm:$0xf]  ;;  %v1256_v21 = vsel %vm1235_vm4, %v1254_v53, %v1255_v60  ;;  %v1119_v6 = vshll.u32 %v11383_v17, 16  ;;  %v828_v56 = vld [vmem:[#allocation2 + $0x78] sm:$0xe]  ;;  %v10195_v60 = vld [vmem:[%s13461_s1 + $0x1c0] sm:$0xff]  }
  0xc8   : > { %v1253_v13 = vsel %vm1235_vm4, %v1251_v23, %v1252_v49  ;;  %v11446_v49 = vcombine.low %v798_v12, %v11429_v40  ;;  %v8324_v23 = vcombine.low %v828_v56, %v11344_v54  ;;  %v10189_v53 = vld [vmem:[%s13461_s1 + $0x188] sm:$0xff]   ;;  %v2860_v56 = vld [vmem:[#allocation2 + $0x24] sm:$0xf] }
  0xca   : > { %2616 = vmatmul.mubr.bf16.gmra.mxu1 %v11277_v7  ;;  %v11354_v7 = vcombine.low %v790_v16, %v11344_v54  ;;  %v830_v54 = vld [vmem:[#allocation2 + $0x90] sm:$0xe] }
  0xcb   : > { %2623 = vmatprep.mubr.bf16.mxu1 %v1074_v36  ;;  %v1109_v36 = vrot.slane %v1107_v44, 1 }
  0xcc   : > { %v1102_v9 = vshll.u32 %v11354_v7, 16  ;;  %v1100_v37 = vshrl.u32 %v11354_v7, 16 }
  0xce   : > { %9750 = vmatmul.mubr.bf16.vlgmr.msra.gmra.mxu0 %v1241_v32  ;;  %v1104_v33 = vrot.slane %v1102_v9, 1  ;;  %v11398_v32 = vld [vmem:[#allocation2 + $0xa0] sm:$0xf]  ;;  %v1121_v9 = vrot.slane %v1119_v6, 1 }
  0xcf   : > { %9142 = vmatpush3.bf16.msra.mxu0 %v10150_v10  ;;  %9753 = vmatprep.mubr.bf16.mxu0 %v1244_v35  ;;  %v8321_v10 = vcombine.low %v825_v22, %v11290_v52  ;;  %v10176_v52 = vld [vmem:[%s13461_s1 + $0x198] sm:$0xff]   ;;  %v11412_v28 = vcombine.low %v796_v24, %v11398_v32  ;;  %v11451_v22 = vld [vmem:[#allocation2 + $0xb0] ss:$0 sps:$4 sm:$0x11]   ;;  %v800_v24 = vld [vmem:[#allocation2 + $0xb4] sm:$0xf] }
  0xd0   : > { %9143 = vmatprep.subr.bf16.mxu0 %v10156_v38  ;;  %v1098_v38 = vsel %vm978_vm5, %v1093_v5, %v1097_v51  ;;  %v1105_v35 = vor.u32 %v1104_v33, %v1100_v37  ;;  %v10188_v51 = vld [vmem:[%s13461_s1 + $0x1c8] sm:$0xff]   ;;  %v1267_v37 = vrot.slane %v11363_v15, 1  ;;  %v8325_v33 = vcombine.low %v829_v59, %v11375_v63 }
  0xd1   : > { %v1257_v43 = vrot.slane %v8321_v10, 1  ;;  %v1270_v15 = vrot.slane %v11383_v17, 1  ;;  %v801_v10 = vld [vmem:[#allocation2 + $0xb8] sm:$0xf]  ;;  %v2861_v59 = vld [vmem:[#allocation2 + $0x28] sm:$0xf] }
  0xd2   : > { %2624 = vmatmul.mubr.bf16.gmra.mxu1 %v11295_v8  ;;  %v11386_v8 = vcombine.low %v792_v61, %v11375_v63  ;;  %v1150_v63 = vshll.u32 %v11446_v49, 16 }
  0xd3   : > { %9144 = vmatpush3.bf16.msra.mxu0 %v10157_v57  ;;  %2631 = vmatprep.mubr.bf16.mxu1 %v1086_v45  ;;  %v1261_v57 = vrot.slane %v11316_v2, 1  ;;  %v8323_v2 = vcombine.low %v827_v27, %v11322_v34  ;;  %v11438_v34 = vrot.slane %v1126_v50, 1  ;;  %v1259_v18 = vsel %vm1235_vm4, %v1257_v43, %v1258_v55  ;;  %v2858_v50 = vld [vmem:[#allocation2 + $0x18] sm:$0xf] }
  0xd4   : > { %9145 = vmatprep.subr.bf16.mxu0 %v10162_v39  ;;  %v1114_v16 = vshll.u32 %v11386_v8, 16  ;;  %v11423_v39 = vld [vmem:[#allocation2 + $0xa4] ss:$0 sps:$4 sm:$0x11]   ;;  %v1112_v45 = vshrl.u32 %v11386_v8, 16  ;;  %v11476_v55 = vcombine.low %v800_v24, %v801_v10  ;;  %v11479_v43 = vrot.slane %v1150_v63, 1 }
  0xd5   : > { %v1143_v61 = vshll.u32 %v11423_v39, 16  ;;  %v1262_v5 = vsel %vm1235_vm4, %v1260_v29, %v1261_v57  ;;  %v1263_v44 = vrot.slane %v8323_v2, 1  ;;  %v1276_v27 = vrot.slane %v11423_v39, 1  ;;  %v2859_v57 = vld [vmem:[#allocation2 + $0x1c] sm:$0xf] }
  0xd6   : > { %9754 = vmatmul.mubr.bf16.gmra.mxu0 %v1247_v48  ;;  %v1116_v47 = vrot.slane %v1114_v16, 1  ;;  %v1138_v48 = vshll.u32 %v11412_v28, 16  ;;  %v1269_v16 = vrot.slane %v8325_v33, 1  ;;  %v2906_v2 = vld [vmem:[#allocation2 + $0x18] sm:$0xe] }
  0xd7   : > { %9757 = vmatprep.mubr.bf16.mxu0 %v1250_v0  ;;  %9146 = vmatpush3.bf16.msra.mxu0 %v10163_v14  ;;  %v1124_v0 = vshrl.u32 %v11393_v20, 16  ;;  %v1264_v14 = vrot.slane %v11335_v26, 1  ;;  %v1136_v26 = vshrl.u32 %v11412_v28, 16  ;;  %v2864_v33 = vld [vmem:[#allocation2 + $0x3c] sm:$0xf] }
  0xd8   : > { %9147 = vmatprep.subr.bf16.mxu0 %v10169_v1  ;;  %v11441_v1 = vrot.slane %v1131_v4, 1  ;;  %v11454_v42 = vrot.slane %v1138_v48, 1  ;;  %v1117_v25 = vor.u32 %v1116_v47, %v1112_v45  ;;  %v11490_v47 = vcombine.low %v2858_v50, %v2859_v57  ;;  %v11492_v48 = vld [vmem:[#allocation2 + $0x20] ss:$0 sps:$4 sm:$0x11]  }
  0xd9   : > { %v1265_v29 = vsel %vm1235_vm4, %v1263_v44, %v1264_v14  ;;  %v1162_v14 = vshll.u32 %v11476_v55, 16  ;;  %v2862_v44 = vld [vmem:[#allocation2 + $0x30] sm:$0xf]  ;;  %v1271_v24 = vsel %vm1235_vm4, %v1269_v16, %v1270_v15  ;;  %v11533_v16 = vld [vmem:[#allocation2 + $0x38] ss:$0 sps:$4 sm:$0x11]  }
  0xda   : > { %2632 = vmatmul.mubr.bf16.gmra.mxu1 %v11310_v58  ;;  %v1110_v58 = vsel %vm978_vm5, %v1105_v35, %v1109_v36  ;;  %v1155_v36 = vshll.u32 %v11451_v22, 16  ;;  %v833_v35 = vld [vmem:[#allocation2 + $0xb4] sm:$0xe]  ;;  %v1122_v12 = vsel %vm978_vm5, %v1117_v25, %v1121_v9  ;;  %v1160_v9 = vshrl.u32 %v11476_v55, 16 }
  0xdb   : > { %9148 = vmatpush3.bf16.msra.mxu0 %v10170_v62  ;;  %2639 = vmatprep.mubr.bf16.mxu1 %v1098_v38  ;;  %v831_v62 = vld [vmem:[#allocation2 + $0x9c] sm:$0xe]  ;;  %v1266_v38 = vrot.slane %v8324_v23, 1  ;;  %v8329_v4 = vcombine.low %v833_v35, %v801_v10  ;;  %v2863_v23 = vld [vmem:[#allocation2 + $0x34] sm:$0xf]  ;;  %v11518_v25 = vrot.slane %v1162_v14, 1 }
  0xdc   : > { %9149 = vmatprep.subr.bf16.mxu0 %v10175_v41  ;;  %v11465_v41 = vrot.slane %v1143_v61, 1  ;;  %v8327_v6 = vcombine.low %v831_v62, %v11398_v32  ;;  %v1279_v32 = vrot.slane %v11451_v22, 1  ;;  %v2907_v61 = vld [vmem:[#allocation2 + $0x24] sm:$0xe]  ;;  %v2908_v62 = vld [vmem:[#allocation2 + $0x30] sm:$0xe] }
  0xdd   : > { %v3067_v35 = vshrl.u32 %v11490_v47, 16  ;;  %v11586_v39 = vld [vmem:[#allocation2 + $0x5c] ss:$0 sps:$4 sm:$0x11]  }
  0xde   : > { %9758 = vmatmul.mubr.bf16.gmra.mxu0 %v1253_v13  ;;  %v832_v13 = vld [vmem:[#allocation2 + $0xa8] sm:$0xe] }
  0xdf   : > { %9761 = vmatprep.mubr.bf16.mxu0 %v1256_v21  ;;  %9150 = vmatpush3.bf16.msra.mxu0 %v10176_v52  ;;  %v8326_v21 = vcombine.low %v830_v54, %v11380_v3  ;;  %v10196_v52 = vld [vmem:[%s13461_s1 + $0x180] sm:$0xff]   ;;  %v11481_v3 = vld [vmem:[#allocation2 + $0xbc] ss:$0 sps:$4 sm:$0x11]   ;;  %v8507_v54 = vcombine.low %v2907_v61, %v2861_v59 }
  0xe0   : > { %9151 = vmatprep.subr.bf16.mxu0 %v10182_v31  ;;  %v1148_v31 = vshrl.u32 %v11446_v49, 16 }
  0xe1   : > { %v1272_v45 = vrot.slane %v8326_v21, 1  ;;  %v11525_v21 = vcombine.low %v2862_v44, %v2863_v23  ;;  %v2866_v44 = vld [vmem:[#allocation2 + $0x48] sm:$0xf] }
  0xe2   : > { %2640 = vmatmul.mubr.bf16.gmra.mxu1 %v11333_v19  ;;  %v1273_v19 = vrot.slane %v11401_v11, 1  ;;  %v8328_v11 = vcombine.low %v832_v13, %v11429_v40  ;;  %v1129_v40 = vor.u32 %v11438_v34, %v1124_v0  ;;  %v8506_v0 = vcombine.low %v2906_v2, %v2859_v57  ;;  %v11541_v2 = vld [vmem:[#allocation2 + $0x44] ss:$0 sps:$4 sm:$0x11]  }
  0xe3   : > { %9152 = vmatpush3.bf16.msra.mxu0 %v10183_v30  ;;  %2647 = vmatprep.mubr.bf16.mxu1 %v1110_v58  ;;  %v11485_v30 = vrot.slane %v1155_v36, 1  ;;  %v1268_v58 = vsel %vm1235_vm4, %v1266_v38, %v1267_v37  ;;  %v1167_v37 = vshll.u32 %v11481_v3, 16  ;;  %v11507_v34 = vcombine.low %v2860_v56, %v2861_v59  ;;  %v11520_v38 = vld [vmem:[#allocation2 + $0x2c] ss:$0 sps:$4 sm:$0x11]  }
  0xe4   : > { %9153 = vmatprep.subr.bf16.mxu0 %v10188_v51  ;;  %v11497_v51 = vrot.slane %v8327_v6, 1  ;;  %v1134_v63 = vsel %vm978_vm5, %v1129_v40, %v11441_v1  ;;  %v1274_v10 = vsel %vm1235_vm4, %v1272_v45, %v1273_v19  ;;  %v2865_v36 = vld [vmem:[#allocation2 + $0x40] sm:$0xf]  ;;  %v11529_v1 = vrot.slane %v8506_v0, 1  ;;  %v2867_v0 = vld [vmem:[#allocation2 + $0x4c] sm:$0xf] }
  0xe5   : > { %v11522_v13 = vrot.slane %v1167_v37, 1  ;;  %v11527_v6 = vcombine.low %v2864_v33, %v2865_v36  ;;  %v3081_v17 = vshll.u32 %v11507_v34, 16  ;;  %v3086_v15 = vshll.u32 %v11520_v38, 16 }
  0xe6   : > { %9762 = vmatmul.mubr.bf16.gmra.mxu0 %v1259_v18  ;;  %v11503_v18 = vrot.slane %v8328_v11, 1  ;;  %v8508_v19 = vcombine.low %v2908_v62, %v2863_v23  ;;  %v3323_v11 = vrot.slane %v11492_v48, 1  ;;  %v3093_v45 = vshll.u32 %v11525_v21, 16 }
  0xe7   : > { %9765 = vmatprep.mubr.bf16.mxu0 %v1262_v5  ;;  %9154 = vmatpush3.bf16.msra.mxu0 %v10189_v53  ;;  %v11505_v5 = vrot.slane %v8329_v4, 1  ;;  %v1282_v53 = vrot.slane %v11481_v3, 1  ;;  %v11538_v4 = vrot.slane %v8507_v54, 1  ;;  %v3098_v56 = vshll.u32 %v11533_v16, 16  ;;  %v2868_v54 = vld [vmem:[#allocation2 + $0x54] sm:$0xf] }
  0xe8   : > { %9155 = vmatprep.subr.bf16.mxu0 %v10195_v60  ;;  %v3074_v60 = vshll.u32 %v11492_v48, 16  ;;  %v3105_v40 = vshll.u32 %v11527_v6, 16  ;;  %v11548_v14 = vrot.slane %v3081_v17, 1  ;;  %v11550_v59 = vrot.slane %v3086_v15, 1  ;;  %v2869_v17 = vld [vmem:[#allocation2 + $0x58] sm:$0xf] }
  0xe9   : > { %v11552_v61 = vrot.slane %v8508_v19, 1  ;;  %v3329_v37 = vrot.slane %v11533_v16, 1  ;;  %v3332_v33 = vrot.slane %v11541_v2, 1  ;;  %v11563_v62 = vrot.slane %v3093_v45, 1 }
  0xea   : > { %2648 = vmatmul.mubr.bf16.gmra.mxu1 %v11354_v7  ;;  %v3069_v7 = vshll.u32 %v11490_v47, 16  ;;  %v11535_v57 = vrot.slane %v3074_v60, 1  ;;  %v3103_v60 = vshrl.u32 %v11527_v6, 16  ;;  %v1280_v19 = vsel %vm1235_vm4, %v11503_v18, %v1279_v32  ;;  %v11614_v3 = vld [vmem:[#allocation2 + $0x68] ss:$0 sps:$4 sm:$0x11]  }
  0xeb   : > { %9156 = vmatpush3.bf16.msra.mxu0 %v10196_v52  ;;  %2655 = vmatprep.mubr.bf16.mxu1 %v1122_v12  ;;  %v2909_v52 = vld [vmem:[#allocation2 + $0x3c] sm:$0xe]  ;;  %v11584_v45 = vcombine.low %v2868_v54, %v2869_v17  ;;  %v1153_v32 = vor.u32 %v11479_v43, %v1148_v31  ;;  %v2912_v54 = vld [vmem:[#allocation2 + $0x60] sm:$0xe] }
  0xec   : > { %v3071_v50 = vrot.slane %v3069_v7, 1  ;;  %v8509_v12 = vcombine.low %v2909_v52, %v2865_v36  ;;  %v3091_v7 = vshrl.u32 %v11525_v21, 16  ;;  %v11574_v36 = vcombine.low %v2866_v44, %v2867_v0  ;;  %v11576_v52 = vld [vmem:[#allocation2 + $0x50] ss:$0 sps:$4 sm:$0x11]  }
  0xed   : > { %v3122_v22 = vshll.u32 %v11576_v52, 16  ;;  %v3335_v31 = vrot.slane %v11576_v52, 1  ;;  %v13473_v52 = vshrl.u32 %v11584_v45, 16 }
  0xee   : > { %9766 = vmatmul.mubr.bf16.gmra.mxu0 %v1265_v29  ;;  %v3326_v29 = vrot.slane %v11520_v38, 1  ;;  %v11558_v23 = vrot.slane %v8509_v12, 1  ;;  %v2911_v12 = vld [vmem:[#allocation2 + $0x54] sm:$0xe]  ;;  %v3072_v18 = vor.u32 %v3071_v50, %v3067_v35  ;;  %v3115_v43 = vshrl.u32 %v11574_v36, 16 }
  0xef   : > { %9769 = vmatprep.mubr.bf16.mxu0 %v1268_v58  ;;  %v3079_v58 = vshrl.u32 %v11507_v34, 16  ;;  %v8511_v44 = vcombine.low %v2911_v12, %v2869_v17  ;;  %v1158_v35 = vsel %vm978_vm5, %v1153_v32, %v11485_v30 }
  0xf0   : > { %v3077_v50 = vsel %vm978_vm5, %v3072_v18, %v11535_v57  ;;  %v11624_v57 = vrot.slane %v3122_v22, 1 }
  0xf1   : > { %v3084_v32 = vor.u32 %v11548_v14, %v3079_v58  ;;  %v2914_v58 = vld [vmem:[#allocation2 + $0x78] sm:$0xe] }
  0xf2   : > { %2656 = vmatmul.mubr.bf16.gmra.mxu1 %v11386_v8  ;;  %v1141_v8 = vor.u32 %v11454_v42, %v1136_v26  ;;  %v1277_v26 = vsel %vm1235_vm4, %v11497_v51, %v1276_v27  ;;  %v2910_v42 = vld [vmem:[#allocation2 + $0x48] sm:$0xe]  ;;  %v2870_v27 = vld [vmem:[#allocation2 + $0x60] sm:$0xf]  ;;  %v2871_v51 = vld [vmem:[#allocation2 + $0x64] sm:$0xf] }
  0xf3   : > { %2663 = vmatprep.mubr.bf16.mxu1 %v1134_v63  ;;  %v11565_v63 = vrot.slane %v3098_v56, 1  ;;  %v8510_v56 = vcombine.low %v2910_v42, %v2867_v0  ;;  %v1283_v0 = vsel %vm1235_vm4, %v11505_v5, %v1282_v53  ;;  %v8512_v5 = vcombine.low %v2912_v54, %v2871_v51  ;;  %v2873_v53 = vld [vmem:[#allocation2 + $0x70] sm:$0xf] }
  0xf4   : > { %v1146_v15 = vsel %vm978_vm5, %v1141_v8, %v11465_v41  ;;  %v3117_v41 = vshll.u32 %v11574_v36, 16  ;;  %v3134_v8 = vshll.u32 %v11586_v39, 16 }
  0xf5   : > { %v11636_v18 = vrot.slane %v8512_v5, 1 }
  0xf6   : > { %9770 = vmatmul.mubr.bf16.gmra.mxu0 %v1271_v24  ;;  %v11567_v24 = vrot.slane %v3105_v40, 1  ;;  %v3129_v40 = vshll.u32 %v11584_v45, 16  ;;  %v11612_v17 = vrot.slane %v3117_v41, 1  ;;  %v11628_v41 = vrot.slane %v3134_v8, 1 }
  0xf7   : > { %9773 = vmatprep.mubr.bf16.mxu0 %v1274_v10  ;;  %v3110_v10 = vshll.u32 %v11541_v2, 16  ;;  %v3146_v8 = vshll.u32 %v11614_v3, 16 }
  0xf8   : > { %v3108_v48 = vor.u32 %v11567_v24, %v3103_v60  ;;  %v3120_v16 = vor.u32 %v11612_v17, %v3115_v43 }
  0xf9   : > { %v11602_v42 = vrot.slane %v3110_v10, 1  ;;  %v11616_v10 = vrot.slane %v8511_v44, 1 }
  0xfa   : > { %2664 = vmatmul.mubr.bf16.gmra.mxu1 %v11393_v20  ;;  %v11596_v20 = vcombine.low %v2870_v27, %v2871_v51  ;;  %v1165_v51 = vor.u32 %v11518_v25, %v1160_v9  ;;  %v11646_v25 = vld [vmem:[#allocation2 + $0x7c] sm:$0xf]  ;;  %v3125_v43 = vsel %vm978_vm5, %v3120_v16, %v11624_v57 }
  0xfb   : > { %2671 = vmatprep.mubr.bf16.mxu1 %v1146_v15  ;;  %v11604_v15 = vrot.slane %v8510_v56, 1  ;;  %v11626_v56 = vrot.slane %v3129_v40, 1 }
  0xfc   : > { %v3141_v27 = vshll.u32 %v11596_v20, 16  ;;  %v1170_v14 = vsel %vm978_vm5, %v1165_v51, %v11522_v13  ;;  %v3096_v13 = vor.u32 %v11563_v62, %v3091_v7  ;;  %v3324_v7 = vsel %vm1235_vm4, %v11529_v1, %v3323_v11 }
  0xfe   : > { %9774 = vmatmul.mubr.bf16.gmra.mxu0 %v1277_v26  ;;  %v2872_v26 = vld [vmem:[#allocation2 + $0x6c] sm:$0xf]  ;;  %v11641_v44 = vrot.slane %v3141_v27, 1 }
  0xff   : > { %9777 = vmatprep.mubr.bf16.mxu0 %v1280_v19  ;;  %v11619_v12 = vcombine.low %v2872_v26, %v2873_v53 }
 0x101   : > { %v3153_v54 = vshll.u32 %v11619_v12, 16 }
 0x102   : > { %2672 = vmatmul.mubr.bf16.gmra.mxu1 %v11412_v28  ;;  %v2913_v28 = vld [vmem:[#allocation2 + $0x6c] sm:$0xe] }
 0x103   : > { %2679 = vmatprep.mubr.bf16.mxu1 %v1158_v35  ;;  %v8513_v9 = vcombine.low %v2913_v28, %v2873_v53  ;;  %v3089_v35 = vsel %vm978_vm5, %v3084_v32, %v11550_v59  ;;  %v8514_v28 = vcombine.low %v2914_v58, %v11646_v25  ;;  %v11666_v32 = vrot.slane %v3153_v54, 1 }
 0x105   : > { %v11656_v40 = vrot.slane %v8513_v9, 1  ;;  %v11669_v58 = vrot.slane %v8514_v28, 1 }
 0x106   : > { %9778 = vmatmul.mubr.bf16.gmra.mxu0 %v1283_v0  ;;  %v11644_v0 = vld [vmem:[#allocation2 + $0x74] ss:$0 sps:$4 sm:$0x11]  }
 0x107   : > { %3611 = vmatprep.mubr.bf16.mxu0 %v3077_v50  ;;  %v11652_v50 = vld [vmem:[#allocation2 + $0x80] ss:$0 sps:$4 sm:$0x11]   ;;  %v3344_v51 = vrot.slane %v11644_v0, 1 }
 0x10a   : > { %2680 = vmatmul.mubr.bf16.gmra.mxu1 %v11446_v49  ;;  %v11664_v49 = vrot.slane %v3146_v8, 1  ;;  %v3101_v8 = vsel %vm978_vm5, %v3096_v13, %v11565_v63  ;;  %v3113_v13 = vsel %vm978_vm5, %v3108_v48, %v11602_v42  ;;  %v3333_v42 = vsel %vm1235_vm4, %v11558_v23, %v3332_v33 }
 0x10b   : > { %v9703_v26 = vpop.f32.mrf.mxu1  ;;  %2687 = vmatprep.mubr.bf16.mxu1 %v1170_v14  ;;  %v3347_v14 = vrot.slane %v11652_v50, 1 }
 0x10d   : > { %v2264_v5 = vpop.f32.mrf.mxu1 }
 0x10e   : > { %v8885_v27 = vpop.f32.mrf.mxu0  ;;  %3612 = vmatmul.mubr.bf16.vlgmr.msra.gmra.mxu0 %v11490_v47  ;;  %v3158_v47 = vshll.u32 %v11644_v0, 16 }
 0x10f   : > { %v9704_v22 = vpop.f32.mrf.mxu1  ;;  %3619 = vmatprep.mubr.bf16.mxu0 %v3089_v35 }
 0x110   : > { %v8886_v59 = vpop.f32.mrf.mxu0 }
 0x111   : > { %v8887_v9 = vadd.f32 %v8886_v59, %v8885_v27  ;;  %v2267_v53 = vpop.f32.mrf.mxu1 }
 0x112   : > { %v8888_v30 = vpop.f32.mrf.mxu0  ;;  %2688 = vmatmul.mubr.bf16.gmra.mxu1 %v11476_v55  ;;  %v3327_v55 = vsel %vm1235_vm4, %v11538_v4, %v3326_v29 }
 0x113   : > { %v11672_v35 = vadd.f32 %v8887_v9, %v2264_v5  ;;  %v9707_v19 = vpop.f32.mrf.mxu1  ;;  %9797 = vmatprep.mubr.bf16.mxu1 %v3324_v7  ;;  %v3336_v9 = vsel %vm1235_vm4, %v11604_v15, %v3335_v31  ;;  %v3132_v15 = vor.u32 %v11626_v56, %v13473_v52  ;;  %v2876_v52 = vld [vmem:[#allocation2 + $0x84] sm:$0xf] }
 0x114   : > { %v8889_v62 = vpop.f32.mrf.mxu0 }
 0x115   : > { %v8890_v54 = vadd.f32 %v8889_v62, %v8888_v30  ;;  %v2280_v5 = vpop.f32.mrf.mxu1  ;;  %v3330_v30 = vsel %vm1235_vm4, %v11552_v61, %v3329_v37  ;;  %v3137_v48 = vsel %vm978_vm5, %v3132_v15, %v11628_v41  ;;  %v2916_v41 = vld [vmem:[#allocation2 + $0x90] sm:$0xe] }
 0x116   : > { %v8891_v27 = vpop.f32.mrf.mxu0  ;;  %3620 = vmatmul.mubr.bf16.gmra.mxu0 %v11507_v34 }
 0x117   : > { %v11682_v28 = vadd.f32 %v8890_v54, %v2267_v53  ;;  %3627 = vmatprep.mubr.bf16.mxu0 %v3101_v8  ;;  %v9708_v34 = vpop.f32.mrf.mxu1 }
 0x118   : > { %v8892_v59 = vpop.f32.mrf.mxu0 }
 0x119   : > { %v8893_v1 = vadd.f32 %v8892_v59, %v8891_v27  ;;  %v2283_v4 = vpop.f32.mrf.mxu1 }
 0x11a   : > { %v8894_v11 = vpop.f32.mrf.mxu0  ;;  %9798 = vmatmul.mubr.bf16.vlgmr.msra.gmra.mxu1 %v3327_v55 }
 0x11b   : > { %v11691_v63 = vadd.f32 %v9703_v26, %v8893_v1  ;;  %9801 = vmatprep.mubr.bf16.mxu1 %v3330_v30  ;;  %v13475_v1 = vrot.slane %v11614_v3, 1  ;;  %v2877_v30 = vld [vmem:[#allocation2 + $0x88] sm:$0xf]  ;;  %v11748_v3 = vld [vmem:[#allocation2 + $0x94] sm:$0xf] }
 0x11c   : > { %v8895_v53 = vpop.f32.mrf.mxu0 }
 0x11d   : > { %v8896_v60 = vadd.f32 %v8895_v53, %v8894_v11  ;;  %v3342_v56 = vsel %vm1235_vm4, %v11636_v18, %v13475_v1  ;;  %v2915_v53 = vld [vmem:[#allocation2 + $0x84] sm:$0xe] }
 0x11e   : > { %v8897_v24 = vpop.f32.mrf.mxu0  ;;  %3628 = vmatmul.mubr.bf16.gmra.mxu0 %v11525_v21 }
 0x11f   : > { %v11700_v38 = vadd.f32 %v9704_v22, %v8896_v60  ;;  %3635 = vmatprep.mubr.bf16.mxu0 %v3113_v13  ;;  %v13476_v60 = vshrl.u32 %v11596_v20, 16 }
 0x120   : > { %v8898_v29 = vpop.f32.mrf.mxu0 }
 0x121   : > { %v8899_v61 = vadd.f32 %v8898_v29, %v8897_v24  ;;  %v3144_v24 = vor.u32 %v11641_v44, %v13476_v60  ;;  %v11755_v29 = vld [vmem:[#allocation2 + $0x8c] ss:$0 sps:$4 sm:$0x11]  }
 0x122   : > { %v8900_v37 = vpop.f32.mrf.mxu0  ;;  %9802 = vmatmul.mubr.bf16.gmra.mxu1 %v3333_v42 }
 0x123   : > { %v11711_v21 = vadd.f32 %v8899_v61, %v2280_v5  ;;  %9805 = vmatprep.mubr.bf16.mxu1 %v3336_v9  ;;  %v11757_v61 = vld [vmem:[#allocation2 + $0x98] ss:$0 sps:$4 sm:$0x11]   ;;  %v3149_v9 = vsel %vm978_vm5, %v3144_v24, %v11664_v49 }
 0x124   : > { %v11709_v26 = vpop.f32.mrf.mxu1  ;;  %v8901_v22 = vpop.f32.mrf.mxu0  ;;  %v3353_v0 = vrot.slane %v11757_v61, 1 }
 0x125   : > { %v8902_v7 = vadd.f32 %v8901_v22, %v8900_v37  ;;  %v3345_v37 = vsel %vm1235_vm4, %v11656_v40, %v3344_v51  ;;  %v8515_v22 = vcombine.low %v2915_v53, %v2877_v30  ;;  %v3160_v40 = vrot.slane %v3158_v47, 1  ;;  %v11790_v47 = vld [vmem:[#allocation2 + $0xa0] sm:$0xf]  ;;  %v11804_v53 = vld [vmem:[#allocation2 + $0xa4] ss:$0 sps:$4 sm:$0x11]  }
 0x126   : > { %v2296_v17 = vpop.f32.mrf.mxu1  ;;  %v8903_v2 = vpop.f32.mrf.mxu0  ;;  %3636 = vmatmul.mubr.bf16.gmra.mxu0 %v11527_v6  ;;  %v13474_v6 = vrot.slane %v11586_v39, 1  ;;  %v2874_v39 = vld [vmem:[#allocation2 + $0x78] sm:$0xf] }
 0x127   : > { %v11722_v33 = vadd.f32 %v8902_v7, %v2283_v4  ;;  %3643 = vmatprep.mubr.bf16.mxu0 %v3125_v43  ;;  %v11766_v42 = vcombine.low %v2874_v39, %v11646_v25  ;;  %v3348_v43 = vsel %vm1235_vm4, %v11669_v58, %v3347_v14  ;;  %v3349_v49 = vrot.slane %v8515_v22, 1 }
 0x128   : > { %v11720_v23 = vpop.f32.mrf.mxu1  ;;  %v8904_v62 = vpop.f32.mrf.mxu0  ;;  %v3339_v5 = vsel %vm1235_vm4, %v11616_v10, %v13474_v6  ;;  %v3350_v58 = vrot.slane %v11755_v29, 1  ;;  %v11802_v39 = vcombine.low %v2876_v52, %v2877_v30 }
 0x129   : > { %v8905_v8 = vadd.f32 %v8904_v62, %v8903_v2  ;;  %v3165_v14 = vshll.u32 %v11766_v42, 16 }
 0x12a   : > { %v2299_v31 = vpop.f32.mrf.mxu1  ;;  %v8906_v57 = vpop.f32.mrf.mxu0  ;;  %9806 = vmatmul.mubr.bf16.gmra.mxu1 %v3339_v5  ;;  %v11792_v5 = vld [vmem:[#allocation2 + $0xac] sm:$0xf] }
 0x12b   : > { %v11729_v27 = vadd.f32 %v9707_v19, %v8905_v8  ;;  %9809 = vmatprep.mubr.bf16.mxu1 %v3342_v56  ;;  %v13477_v8 = vshrl.u32 %v11619_v12, 16  ;;  %v3163_v56 = vshrl.u32 %v11766_v42, 16  ;;  %v3167_v24 = vrot.slane %v3165_v14, 1  ;;  %v11821_v14 = vld [vmem:[#allocation2 + $0xb8] sm:$0xf] }
 0x12c   : > { %v11727_v54 = vpop.f32.mrf.mxu1  ;;  %v8907_v59 = vpop.f32.mrf.mxu0 }
 0x12d   : > { %v8908_v55 = vadd.f32 %v8907_v59, %v8906_v57  ;;  %v2918_v59 = vld [vmem:[#allocation2 + $0xa8] sm:$0xe] }
 0x12e   : > { %v11741_v11 = vpop.f32.mrf.mxu1  ;;  %v8909_v19 = vpop.f32.mrf.mxu0  ;;  %3644 = vmatmul.mubr.bf16.gmra.mxu0 %v11574_v36 }
 0x12f   : > { %v11746_v13 = vadd.f32 %v9708_v34, %v8908_v55  ;;  %3651 = vmatprep.mubr.bf16.mxu0 %v3137_v48  ;;  %v3170_v55 = vshll.u32 %v11652_v50, 16  ;;  %v8518_v50 = vcombine.low %v2918_v59, %v11792_v5 }
 0x130   : > { %v11744_v10 = vpop.f32.mrf.mxu1  ;;  %v8910_v18 = vpop.f32.mrf.mxu0 }
 0x131   : > { %v8911_v36 = vadd.f32 %v8910_v18, %v8909_v19  ;;  %v3172_v30 = vrot.slane %v3170_v55, 1 }
 0x132   : > { %v11753_v4 = vpop.f32.mrf.mxu1  ;;  %v8912_v16 = vpop.f32.mrf.mxu0  ;;  %9810 = vmatmul.mubr.bf16.gmra.mxu1 %v3345_v37 }
 0x133   : > { %v11759_v34 = vadd.f32 %v8911_v36, %v2296_v17  ;;  %v8516_v17 = vcombine.low %v2916_v41, %v11748_v3  ;;  %9813 = vmatprep.mubr.bf16.mxu1 %v3348_v43  ;;  %v2878_v43 = vld [vmem:[#allocation2 + $0x90] sm:$0xf] }
 0x134   : > { %v8913_v44 = vpop.f32.mrf.mxu0  ;;  %v11775_v7 = vpop.f32.mrf.mxu1 }
 0x135   : > { %v8914_v2 = vadd.f32 %v8913_v44, %v8912_v16  ;;  %v3352_v57 = vrot.slane %v8516_v17, 1  ;;  %v11809_v16 = vld [vmem:[#allocation2 + $0xb0] ss:$0 sps:$4 sm:$0x11]  }
 0x136   : > { %v8915_v62 = vpop.f32.mrf.mxu0  ;;  %3652 = vmatmul.mubr.bf16.gmra.mxu0 %v11584_v45  ;;  %v11780_v25 = vpop.f32.mrf.mxu1  ;;  %v3156_v45 = vor.u32 %v11666_v32, %v13477_v8  ;;  %v3351_v32 = vsel %vm1235_vm4, %v3349_v49, %v3350_v58  ;;  %v3358_v49 = vrot.slane %v8518_v50, 1  ;;  %v3359_v58 = vrot.slane %v11809_v16, 1 }
 0x137   : > { %v11782_v51 = vadd.f32 %v8914_v2, %v2299_v31  ;;  %3659 = vmatprep.mubr.bf16.mxu0 %v3149_v9  ;;  %v2917_v31 = vld [vmem:[#allocation2 + $0x9c] sm:$0xe]  ;;  %v3354_v36 = vsel %vm1235_vm4, %v3352_v57, %v3353_v0  ;;  %v3177_v9 = vshll.u32 %v11802_v39, 16  ;;  %v3356_v2 = vrot.slane %v11804_v53, 1 }
 0x138   : > { %v8916_v15 = vpop.f32.mrf.mxu0  ;;  %v11794_v48 = vpop.f32.mrf.mxu1  ;;  %v8517_v41 = vcombine.low %v2917_v31, %v11790_v47  ;;  %v3161_v60 = vsel %vm978_vm5, %v3156_v45, %v3160_v40  ;;  %v3168_v40 = vor.u32 %v3167_v24, %v3163_v56  ;;  %v3175_v57 = vshrl.u32 %v11802_v39, 16 }
 0x139   : > { %v8917_v6 = vadd.f32 %v8916_v15, %v8915_v62  ;;  %v11823_v15 = vld [vmem:[#allocation2 + $0xc4] sm:$0xf]  ;;  %v3182_v0 = vshll.u32 %v11755_v29, 16  ;;  %v3360_v29 = vsel %vm1235_vm4, %v3358_v49, %v3359_v58  ;;  %v2921_v49 = vld [vmem:[#allocation2 + $0xcc] sm:$0xe] }
 0x13a   : > { %v8918_v1 = vpop.f32.mrf.mxu0  ;;  %v11812_v37 = vpop.f32.mrf.mxu1  ;;  %9814 = vmatmul.mubr.bf16.gmra.mxu1 %v3351_v32  ;;  %v3355_v17 = vrot.slane %v8517_v41, 1  ;;  %v3173_v41 = vsel %vm978_vm5, %v3168_v40, %v3172_v30 }
 0x13b   : > { %v11799_v19 = vadd.f32 %v11709_v26, %v8917_v6  ;;  %9817 = vmatprep.mubr.bf16.mxu1 %v3354_v36  ;;  %v11833_v6 = vcombine.low %v2878_v43, %v11748_v3  ;;  %v3184_v50 = vrot.slane %v3182_v0, 1  ;;  %v3194_v0 = vshll.u32 %v11757_v61, 16  ;;  %v10245_v61 = vld [vmem:[#allocation3 + $0x138] sm:$0xff]  }
 0x13c   : > { %v8919_v18 = vpop.f32.mrf.mxu0  ;;  %v3357_v59 = vsel %vm1235_vm4, %v3355_v17, %v3356_v2  ;;  %9277 = vmatprep.subr.bf16.mxu1 %v10245_v61 }
 0x13d   : > { %v8920_v26 = vadd.f32 %v8919_v18, %v8918_v1  ;;  %v11836_v1 = vld [vmem:[#allocation2 + $0xbc] ss:$0 sps:$4 sm:$0x11]   ;;  %v3179_v18 = vrot.slane %v3177_v9, 1 }
 0x13e   : > { %v8921_v22 = vpop.f32.mrf.mxu0  ;;  %3660 = vmatmul.mubr.bf16.gmra.mxu0 %v11596_v20  ;;  %v2919_v20 = vld [vmem:[#allocation2 + $0xb4] sm:$0xe]  ;;  %v3362_v9 = vrot.slane %v11836_v1, 1 }
 0x13f   : > { %v11816_v44 = vadd.f32 %v11720_v23, %v8920_v26  ;;  %3667 = vmatprep.mubr.bf16.mxu0 %v3161_v60  ;;  %v2920_v23 = vld [vmem:[#allocation2 + $0xc0] sm:$0xe]  ;;  %v8519_v56 = vcombine.low %v2919_v20, %v11821_v14  ;;  %v11843_v60 = vld [vmem:[#allocation2 + $0xc8] ss:$0 sps:$4 sm:$0x11]   ;;  %v3180_v2 = vor.u32 %v3179_v18, %v3175_v57 }
 0x140   : > { %v8922_v62 = vpop.f32.mrf.mxu0  ;;  %v11825_v8 = vpop.f32.mrf.mxu1  ;;  %v3365_v40 = vrot.slane %v11843_v60, 1 }
 0x141   : > { %v8923_v52 = vadd.f32 %v8922_v62, %v8921_v22  ;;  %v3189_v22 = vshll.u32 %v11833_v6, 16  ;;  %v3361_v30 = vrot.slane %v8519_v56, 1 }
 0x142   : > { %v8924_v45 = vpop.f32.mrf.mxu0  ;;  %v11839_v55 = vpop.f32.mrf.mxu1  ;;  %9818 = vmatmul.mubr.bf16.gmra.mxu1 %v3357_v59  ;;  %v11867_v59 = vld [vmem:[#allocation2 + $0xd4] ss:$0 sps:$4 sm:$0x11]  }
 0x143   : > { %v11830_v31 = vadd.f32 %v8923_v52, %v11741_v11  ;;  %v8520_v11 = vcombine.low %v2920_v23, %v11823_v15  ;;  %9821 = vmatprep.mubr.bf16.mxu1 %v3360_v29  ;;  %v3187_v52 = vshrl.u32 %v11833_v6, 16  ;;  %v3363_v57 = vsel %vm1235_vm4, %v3361_v30, %v3362_v9  ;;  %v10246_v30 = vld [vmem:[#allocation3 + $0xf8] sm:$0xff]  }
 0x144   : > { %v8925_v32 = vpop.f32.mrf.mxu0  ;;  %v11846_v24 = vpop.f32.mrf.mxu1  ;;  %v3191_v18 = vrot.slane %v3189_v22, 1  ;;  %9278 = vmatpush3.bf16.msra.mxu1 %v10246_v30 }
 0x145   : > { %v8926_v3 = vadd.f32 %v8925_v32, %v8924_v45  ;;  %v3364_v62 = vrot.slane %v8520_v11, 1 }
 0x146   : > { %v8927_v36 = vpop.f32.mrf.mxu0  ;;  %3668 = vmatmul.mubr.bf16.gmra.mxu0 %v11619_v12  ;;  %v11854_v43 = vpop.f32.mrf.mxu1  ;;  %v11857_v12 = vld [vmem:[#allocation2 + $0xd0] sm:$0xf] }
 0x147   : > { %v11850_v26 = vadd.f32 %v8926_v3, %v11753_v4  ;;  %3675 = vmatprep.mubr.bf16.mxu0 %v3173_v41  ;;  %v2880_v4 = vld [vmem:[#allocation2 + $0x9c] sm:$0xf]  ;;  %v8521_v56 = vcombine.low %v2921_v49, %v11857_v12  ;;  %v3185_v41 = vsel %vm978_vm5, %v3180_v2, %v3184_v50  ;;  %v3366_v11 = vsel %vm1235_vm4, %v3364_v62, %v3365_v40  ;;  %v2882_v49 = vld [vmem:[#allocation2 + $0xa8] sm:$0xf] }
 0x148   : > { %v8928_v17 = vpop.f32.mrf.mxu0  ;;  %v11872_v29 = vcombine.low %v2880_v4, %v11790_v47  ;;  %v3368_v50 = vrot.slane %v11867_v59, 1  ;;  %v3192_v2 = vor.u32 %v3191_v18, %v3187_v52  ;;  %v3196_v62 = vrot.slane %v3194_v0, 1 }
 0x149   : > { %v8929_v58 = vadd.f32 %v8928_v17, %v8927_v36  ;;  %v11860_v23 = vpop.f32.mrf.mxu1  ;;  %v3367_v47 = vrot.slane %v8521_v56, 1  ;;  %v11895_v18 = vcombine.low %v2882_v49, %v11792_v5 }
 0x14a   : > { %v8930_v20 = vpop.f32.mrf.mxu0  ;;  %9822 = vmatmul.mubr.bf16.gmra.mxu1 %v3363_v57  ;;  %v3201_v40 = vshll.u32 %v11872_v29, 16  ;;  %v3206_v57 = vshll.u32 %v11804_v53, 16  ;;  %v3197_v0 = vsel %vm978_vm5, %v3192_v2, %v3196_v62  ;;  %v10248_v53 = vld [vmem:[#allocation3 + $0x130] sm:$0xff]  }
 0x14b   : > { %v11863_v45 = vadd.f32 %v11727_v54, %v8929_v58  ;;  %v11875_v3 = vpop.f32.mrf.mxu1  ;;  %9825 = vmatprep.mubr.bf16.mxu1 %v3366_v11  ;;  %v10247_v58 = vld [vmem:[#allocation3 + $0x178] sm:$0xff]   ;;  %v3369_v56 = vsel %vm1235_vm4, %v3367_v47, %v3368_v50  ;;  %v3213_v5 = vshll.u32 %v11895_v18, 16  ;;  %9279 = vmatprep.subr.bf16.mxu1 %v10248_v53 }
 0x14c   : > { %v8931_v32 = vpop.f32.mrf.mxu0  ;;  %9829 = vmatprep.subr.bf16.mxu0 %v10247_v58  ;;  %v3208_v50 = vrot.slane %v3206_v57, 1  ;;  %v3211_v57 = vshrl.u32 %v11895_v18, 16 }
 0x14d   : > { %v8932_v54 = vadd.f32 %v8931_v32, %v8930_v20  ;;  %v11878_v9 = vpop.f32.mrf.mxu1  ;;  %v3199_v32 = vshrl.u32 %v11872_v29, 16  ;;  %9830 = vmatpush3.bf16.msra.mxu0 %v10247_v58 }
 0x14e   : > { %v8933_v36 = vpop.f32.mrf.mxu0  ;;  %3676 = vmatmul.mubr.bf16.gmra.mxu0 %v11766_v42 }
 0x14f   : > { %v11881_v17 = vadd.f32 %v11744_v10, %v8932_v54  ;;  %3683 = vmatprep.mubr.bf16.mxu0 %v3185_v41  ;;  %v11885_v4 = vpop.f32.mrf.mxu1  ;;  %v3203_v41 = vrot.slane %v3201_v40, 1 }
 0x150   : > { %v8934_v22 = vpop.f32.mrf.mxu0 }
 0x151   : > { %v8935_v42 = vadd.f32 %v8934_v22, %v8933_v36  ;;  %v10249_v36 = vld [vmem:[#allocation3 + $0xf0] sm:$0xff]   ;;  %v3204_v47 = vor.u32 %v3203_v41, %v3199_v32  ;;  %v2884_v22 = vld [vmem:[#allocation2 + $0xb4] sm:$0xf] }
 0x152   : > { %v8936_v20 = vpop.f32.mrf.mxu0  ;;  %v11899_v54 = vpop.f32.mrf.mxu1  ;;  %9826 = vmatmul.mubr.bf16.gmra.mxu1 %v3369_v56  ;;  %v3215_v56 = vrot.slane %v3213_v5, 1  ;;  %v2886_v5 = vld [vmem:[#allocation2 + $0xc0] sm:$0xf] }
 0x153   : > { %v11888_v10 = vadd.f32 %v8935_v42, %v11780_v25  ;;  %9280 = vmatpush3.bf16.msra.mxu1 %v10249_v36  ;;  %v11911_v42 = vcombine.low %v2884_v22, %v11821_v14  ;;  %v10250_v22 = vld [vmem:[#allocation3 + $0x128] sm:$0xff]  }
 0x154   : > { %v8937_v52 = vpop.f32.mrf.mxu0  ;;  %v11902_v61 = vpop.f32.mrf.mxu1  ;;  %v3216_v36 = vor.u32 %v3215_v56, %v3211_v57  ;;  %9281 = vmatprep.subr.bf16.mxu1 %v10250_v22  ;;  %v10252_v22 = vld [vmem:[#allocation3 + $0x170] sm:$0xff]  }
 0x155   : > { %v11897_v11 = vadd.f32 %v8937_v52, %v8936_v20  ;;  %v3209_v20 = vsel %vm978_vm5, %v3204_v47, %v3208_v50  ;;  %v3218_v52 = vshll.u32 %v11809_v16, 16  ;;  %v3225_v14 = vshll.u32 %v11911_v42, 16  ;;  %v10251_v16 = vld [vmem:[#allocation3 + $0xe8] sm:$0xff]   ;;  %9831 = vmatprep.subr.bf16.mxu0 %v10252_v22 }
 0x156   : > { %v8939_v25 = vpop.f32.mrf.mxu0  ;;  %3684 = vmatmul.mubr.bf16.gmra.mxu0 %v11802_v39  ;;  %v11905_v62 = vpop.f32.mrf.mxu1 }
 0x157   : > { %3691 = vmatprep.mubr.bf16.mxu0 %v3197_v0  ;;  %9282 = vmatpush3.bf16.msra.mxu1 %v10251_v16 }
 0x158   : > { %v8940_v30 = vpop.f32.mrf.mxu0  ;;  %v11913_v49 = vpop.f32.mrf.mxu1  ;;  %9832 = vmatpush3.bf16.msra.mxu0 %v10252_v22 }
 0x159   : > { %v8941_v2 = vadd.f32 %v8940_v30, %v8939_v25  ;;  %v3220_v30 = vrot.slane %v3218_v52, 1 }
 0x15a   : > { %v8942_v40 = vpop.f32.mrf.mxu0  ;;  %v9021_v32 = vpop.f32.mrf.mxu1 }
 0x15b   : > { %v11908_v39 = vadd.f32 %v11775_v7, %v8941_v2  ;;  %v3221_v52 = vsel %vm978_vm5, %v3216_v36, %v3220_v30 }
 0x15c   : > { %v8943_v58 = vpop.f32.mrf.mxu0  ;;  %v9022_v25 = vpop.f32.mrf.mxu1 }
 0x15d   : > { %v8944_v0 = vadd.f32 %v8943_v58, %v8942_v40  ;;  %v9023_v47 = vadd.f32 %v9022_v25, %v9021_v32  ;;  %v3223_v58 = vshrl.u32 %v11911_v42, 16  ;;  %v11933_v32 = vcombine.low %v2886_v5, %v11823_v15  ;;  %v2888_v5 = vld [vmem:[#allocation2 + $0xcc] sm:$0xf] }
 0x15e   : > { %v8945_v41 = vpop.f32.mrf.mxu0  ;;  %3692 = vmatmul.mubr.bf16.gmra.mxu0 %v11833_v6  ;;  %v9024_v2 = vpop.f32.mrf.mxu1 }
 0x15f   : > { %v11920_v7 = vadd.f32 %v11794_v48, %v8944_v0  ;;  %3699 = vmatprep.mubr.bf16.mxu0 %v3209_v20  ;;  %v3227_v48 = vrot.slane %v3225_v14, 1  ;;  %v3230_v20 = vshll.u32 %v11836_v1, 16  ;;  %v11929_v0 = vadd.f32 %v9023_v47, %v11672_v35 }
 0x160   : > { %v8946_v53 = vpop.f32.mrf.mxu0  ;;  %v9025_v57 = vpop.f32.mrf.mxu1  ;;  %v3237_v36 = vshll.u32 %v11933_v32, 16 }
 0x161   : > { %v8947_v50 = vadd.f32 %v8946_v53, %v8945_v41  ;;  %v9026_v41 = vadd.f32 %v9025_v57, %v9024_v2  ;;  %v3228_v1 = vor.u32 %v3227_v48, %v3223_v58  ;;  %v3232_v35 = vrot.slane %v3230_v20, 1 }
 0x162   : > { %v8948_v40 = vpop.f32.mrf.mxu0  ;;  %v11950_v20 = vcombine.low %v2888_v5, %v11857_v12  ;;  %v3235_v57 = vshrl.u32 %v11933_v32, 16 }
 0x163   : > { %v11925_v6 = vadd.f32 %v8947_v50, %v11839_v55  ;;  %v9027_v55 = vpop.f32.mrf.mxu1  ;;  %v11939_v14 = vadd.f32 %v9026_v41, %v11682_v28 }
 0x164   : > { %v8949_v56 = vpop.f32.mrf.mxu0 }
 0x165   : > { %v11935_v25 = vadd.f32 %v8949_v56, %v8948_v40  ;;  %v9028_v47 = vpop.f32.mrf.mxu1  ;;  %v3239_v56 = vrot.slane %v3237_v36, 1 }
 0x166   : > { %v8951_v53 = vpop.f32.mrf.mxu0  ;;  %3700 = vmatmul.mubr.bf16.gmra.mxu0 %v11872_v29  ;;  %v9029_v15 = vadd.f32 %v9028_v47, %v9027_v55  ;;  %v3233_v29 = vsel %vm978_vm5, %v3228_v1, %v3232_v35 }
 0x167   : > { %3707 = vmatprep.mubr.bf16.mxu0 %v3221_v52  ;;  %v9030_v16 = vpop.f32.mrf.mxu1  ;;  %v3242_v52 = vshll.u32 %v11843_v60, 16  ;;  %v3240_v47 = vor.u32 %v3239_v56, %v3235_v57  ;;  %v3249_v60 = vshll.u32 %v11950_v20, 16 }
 0x168   : > { %v8952_v50 = vpop.f32.mrf.mxu0  ;;  %v11947_v58 = vadd.f32 %v9029_v15, %v11691_v63 }
 0x169   : > { %v8953_v30 = vadd.f32 %v8952_v50, %v8951_v53  ;;  %v9031_v28 = vpop.f32.mrf.mxu1  ;;  %v3244_v50 = vrot.slane %v3242_v52, 1 }
 0x16a   : > { %v8954_v2 = vpop.f32.mrf.mxu0  ;;  %v9032_v41 = vadd.f32 %v9031_v28, %v9030_v16  ;;  %v3254_v28 = vshll.u32 %v11867_v59, 16 }
 0x16b   : > { %v11943_v40 = vadd.f32 %v11825_v8, %v8953_v30  ;;  %v9033_v55 = vpop.f32.mrf.mxu1  ;;  %v3245_v16 = vsel %vm978_vm5, %v3240_v47, %v3244_v50  ;;  %v10254_v47 = vld [vmem:[#allocation3 + $0xe0] sm:$0xff]  }
 0x16c   : > { %v8955_v48 = vpop.f32.mrf.mxu0  ;;  %v11959_v1 = vadd.f32 %v9032_v41, %v11700_v38 }
 0x16d   : > { %v8956_v8 = vadd.f32 %v8955_v48, %v8954_v2  ;;  %v9034_v12 = vpop.f32.mrf.mxu1  ;;  %v3247_v2 = vshrl.u32 %v11950_v20, 16 }
 0x16e   : > { %v8957_v53 = vpop.f32.mrf.mxu0  ;;  %3708 = vmatmul.mubr.bf16.gmra.mxu0 %v11895_v18  ;;  %v9035_v36 = vadd.f32 %v9034_v12, %v9033_v55  ;;  %v3256_v55 = vrot.slane %v3254_v28, 1 }
 0x16f   : > { %v11956_v63 = vadd.f32 %v11846_v24, %v8956_v8  ;;  %3715 = vmatprep.mubr.bf16.mxu0 %v3233_v29  ;;  %v9036_v30 = vpop.f32.mrf.mxu1  ;;  %v3251_v29 = vrot.slane %v3249_v60, 1  ;;  %v10255_v60 = vld [vmem:[#allocation3 + $0x118] sm:$0xff]  }
 0x170   : > { %v8958_v35 = vpop.f32.mrf.mxu0  ;;  %v11968_v24 = vadd.f32 %v9035_v36, %v11711_v21  ;;  %v10257_v21 = vld [vmem:[#allocation3 + $0x168] sm:$0xff]   ;;  %v10256_v36 = vld [vmem:[#allocation3 + $0xd8] sm:$0xff]  }
 0x171   : > { %v8959_v15 = vadd.f32 %v8958_v35, %v8957_v53  ;;  %v9037_v22 = vpop.f32.mrf.mxu1  ;;  %v3252_v8 = vor.u32 %v3251_v29, %v3247_v2  ;;  %v10253_v53 = vld [vmem:[#allocation3 + $0x120] sm:$0xff]   ;;  %9833 = vmatprep.subr.bf16.mxu0 %v10257_v21 }
 0x172   : > { %v11962_v5 = vpop.f32.mrf.mxu0  ;;  %v9038_v48 = vadd.f32 %v9037_v22, %v9036_v30  ;;  %9283 = vmatprep.subr.bf16.mxu1 %v10253_v53  ;;  %9834 = vmatpush3.bf16.msra.mxu0 %v10257_v21 }
 0x173   : > { %v11965_v18 = vadd.f32 %v8959_v15, %v11875_v3  ;;  %v9039_v57 = vpop.f32.mrf.mxu1  ;;  %9284 = vmatpush3.bf16.msra.mxu1 %v10254_v47  ;;  %v10260_v15 = vld [vmem:[#allocation3 + $0x160] sm:$0xff]  }
 0x174   : > { %v11970_v38 = vpop.f32.mrf.mxu0  ;;  %v11977_v3 = vadd.f32 %v9038_v48, %v11722_v33  ;;  %9285 = vmatprep.subr.bf16.mxu1 %v10255_v60  ;;  %9835 = vmatprep.subr.bf16.mxu0 %v10260_v15  ;;  %v10262_v60 = vld [vmem:[#allocation3 + $0xc8] sm:$0xff]  }
 0x175   : > { %v9040_v52 = vpop.f32.mrf.mxu1 }
 0x176   : > { %v8963_v56 = vpop.f32.mrf.mxu0  ;;  %3716 = vmatmul.mubr.bf16.gmra.mxu0 %v11911_v42  ;;  %v9041_v12 = vadd.f32 %v9040_v52, %v9039_v57  ;;  %v10263_v57 = vld [vmem:[#allocation3 + $0x158] sm:$0xff]   ;;  %v10258_v52 = vld [vmem:[#allocation3 + $0x110] sm:$0xff]  }
 0x177   : > { %3723 = vmatprep.mubr.bf16.mxu0 %v3245_v16  ;;  %v9042_v59 = vpop.f32.mrf.mxu1  ;;  %v3257_v16 = vsel %vm978_vm5, %v3252_v8, %v3256_v55  ;;  %9286 = vmatpush3.bf16.msra.mxu1 %v10256_v36  ;;  %v10259_v55 = vld [vmem:[#allocation3 + $0xd0] sm:$0xff]  }
 0x178   : > { %v8964_v41 = vpop.f32.mrf.mxu0  ;;  %v11983_v33 = vadd.f32 %v9041_v12, %v11729_v27  ;;  %9836 = vmatpush3.bf16.msra.mxu0 %v10260_v15  ;;  %9287 = vmatprep.subr.bf16.mxu1 %v10258_v52 }
 0x179   : > { %v8965_v35 = vadd.f32 %v8964_v41, %v8963_v56  ;;  %v9043_v30 = vpop.f32.mrf.mxu1  ;;  %9837 = vmatprep.subr.bf16.mxu0 %v10263_v57 }
 0x17a   : > { %v8966_v50 = vpop.f32.mrf.mxu0  ;;  %v9044_v2 = vadd.f32 %v9043_v30, %v9042_v59  ;;  %v10261_v59 = vld [vmem:[#allocation3 + $0x108] sm:$0xff]  }
 0x17b   : > { %v11980_v42 = vadd.f32 %v11860_v23, %v8965_v35  ;;  %v9045_v28 = vpop.f32.mrf.mxu1  ;;  %9288 = vmatpush3.bf16.msra.mxu1 %v10259_v55 }
 0x17c   : > { %v8967_v22 = vpop.f32.mrf.mxu0  ;;  %v11991_v27 = vadd.f32 %v9044_v2, %v11746_v13  ;;  %9838 = vmatpush3.bf16.msra.mxu0 %v10263_v57  ;;  %9289 = vmatprep.subr.bf16.mxu1 %v10261_v59 }
 0x17d   : > { %v8968_v29 = vadd.f32 %v8967_v22, %v8966_v50  ;;  %v9046_v56 = vpop.f32.mrf.mxu1 }
 0x17e   : > { %v8969_v48 = vpop.f32.mrf.mxu0  ;;  %3724 = vmatmul.mubr.bf16.gmra.mxu0 %v11933_v32  ;;  %v9047_v41 = vadd.f32 %v9046_v56, %v9045_v28  ;;  %v10264_v32 = vld [vmem:[#allocation3 + $0x150] sm:$0xff]   ;;  %v10266_v28 = vld [vmem:[#allocation3 + $0xc0] sm:$0xff]  }
 0x17f   : > { %v11988_v23 = vadd.f32 %v11878_v9, %v8968_v29  ;;  %3731 = vmatprep.mubr.bf16.mxu0 %v3257_v16  ;;  %v9048_v53 = vpop.f32.mrf.mxu1  ;;  %9839 = vmatprep.subr.bf16.mxu0 %v10264_v32  ;;  %v10265_v16 = vld [vmem:[#allocation3 + $0x100] sm:$0xff]  }
 0x180   : > { %v8970_v21 = vpop.f32.mrf.mxu0  ;;  %v11999_v13 = vadd.f32 %v9047_v41, %v11759_v34  ;;  %9290 = vmatpush3.bf16.msra.mxu1 %v10262_v60  ;;  %v10267_v34 = vld [vmem:[#allocation3 + $0x148] sm:$0xff]   ;;  %9840 = vmatpush3.bf16.msra.mxu0 %v10264_v32 }
 0x181   : > { %v8971_v8 = vadd.f32 %v8970_v21, %v8969_v48  ;;  %v9049_v35 = vpop.f32.mrf.mxu1  ;;  %9841 = vmatprep.subr.bf16.mxu0 %v10267_v34  ;;  %9291 = vmatprep.subr.bf16.mxu1 %v10265_v16 }
 0x182   : > { %v11993_v12 = vpop.f32.mrf.mxu0  ;;  %v9050_v50 = vadd.f32 %v9049_v35, %v9048_v53  ;;  %v10271_v53 = vld [vmem:[#allocation3 + $0x140] sm:$0xff]  }
 0x183   : > { %v11996_v9 = vadd.f32 %v8971_v8, %v11902_v61  ;;  %v9051_v36 = vpop.f32.mrf.mxu1 }
 0x184   : > { %v12001_v47 = vpop.f32.mrf.mxu0  ;;  %v12005_v61 = vadd.f32 %v9050_v50, %v11782_v51  ;;  %9292 = vmatpush3.bf16.msra.mxu1 %v10266_v28  ;;  %9842 = vmatpush3.bf16.msra.mxu0 %v10267_v34 }
 0x185   : > { %v9052_v30 = vpop.f32.mrf.mxu1  ;;  %9843 = vmatprep.subr.bf16.mxu0 %v10271_v53 }
 0x186   : > { %v8975_v15 = vpop.f32.mrf.mxu0  ;;  %3732 = vmatmul.mubr.bf16.gmra.mxu0 %v11950_v20  ;;  %v9053_v2 = vadd.f32 %v9052_v30, %v9051_v36 }
 0x187   : > { %v9054_v48 = vpop.f32.mrf.mxu1 }
 0x188   : > { %v8976_v22 = vpop.f32.mrf.mxu0  ;;  %v2610_v20 = vadd.f32 %v9053_v2, %v11799_v19  ;;  %9844 = vmatpush3.bf16.msra.mxu0 %v10271_v53  ;;  %v12027_v2 = vld [vmem:[#allocation3 + $0xb8] sm:$0xff]  }
 0x189   : > { %v8977_v29 = vadd.f32 %v8976_v22, %v8975_v15  ;;  %v9055_v51 = vpop.f32.mrf.mxu1  ;;  %9877 = vmatprep.subr.bf16.mxu1 %v12027_v2 }
 0x18a   : > { %v8978_v57 = vpop.f32.mrf.mxu0  ;;  %v9056_v52 = vadd.f32 %v9055_v51, %v9054_v48 }
 0x18b   : > { %v12008_v56 = vadd.f32 %v11899_v54, %v8977_v29  ;;  %v9057_v8 = vpop.f32.mrf.mxu1 }
 0x18c   : > { %v8979_v21 = vpop.f32.mrf.mxu0  ;;  %v2613_v54 = vadd.f32 %v9056_v52, %v11816_v44 }
 0x18d   : > { %v8980_v41 = vadd.f32 %v8979_v21, %v8978_v57  ;;  %v9058_v59 = vpop.f32.mrf.mxu1 }
 0x18e   : > { %v9751_v55 = vpop.f32.mrf.mxu0  ;;  %v9059_v19 = vadd.f32 %v9058_v59, %v9057_v8 }
 0x18f   : > { %v12012_v32 = vadd.f32 %v11905_v62, %v8980_v41  ;;  %v12015_v35 = vadd.f32 %v9751_v55, %v11947_v58  ;;  %v9060_v36 = vpop.f32.mrf.mxu1 }
 0x190   : > { %v2730_v50 = vpop.f32.mrf.mxu0  ;;  %v2618_v62 = vadd.f32 %v9059_v19, %v11830_v31 }
 0x191   : > { %v12019_v60 = vadd.f32 %v2730_v50, %v11929_v0  ;;  %v9061_v30 = vpop.f32.mrf.mxu1 }
 0x192   : > { %v9752_v15 = vpop.f32.mrf.mxu0  ;;  %v9062_v22 = vadd.f32 %v9061_v30, %v9060_v36 }
 0x193   : > { %v12022_v34 = vadd.f32 %v9752_v15, %v11959_v1  ;;  %v9063_v44 = vpop.f32.mrf.mxu1 }
 0x194   : > { %v12025_v58 = vpop.f32.mrf.mxu0  ;;  %v12033_v0 = vadd.f32 %v9062_v22, %v11850_v26 }
 0x195   : > { %v9064_v28 = vpop.f32.mrf.mxu1 }
 0x196   : > { %v9755_v16 = vpop.f32.mrf.mxu0  ;;  %v9065_v1 = vadd.f32 %v9064_v28, %v9063_v44 }
 0x197   : > { %v12030_v29 = vadd.f32 %v9755_v16, %v11983_v33  ;;  %v9066_v57 = vpop.f32.mrf.mxu1 }
 0x198   : > { %v2746_v48 = vpop.f32.mrf.mxu0  ;;  %v2626_v52 = vadd.f32 %v9065_v1, %v11863_v45 }
 0x199   : > { %v12037_v31 = vadd.f32 %v2746_v48, %v11968_v24  ;;  %v9067_v33 = vpop.f32.mrf.mxu1 }
 0x19a   : > { %v9756_v51 = vpop.f32.mrf.mxu0  ;;  %v9068_v26 = vadd.f32 %v9067_v33, %v9066_v57 }
 0x19b   : > { %v12040_v21 = vadd.f32 %v9756_v51, %v11991_v27  ;;  %v9069_v8 = vpop.f32.mrf.mxu1 }
 0x19c   : > { %v12043_v41 = vpop.f32.mrf.mxu0  ;;  %v2629_v59 = vadd.f32 %v9068_v26, %v11881_v17 }
 0x19d   : > { %v9070_v50 = vpop.f32.mrf.mxu1 }
 0x19e   : > { %v9759_v55 = vpop.f32.mrf.mxu0  ;;  %v9071_v19 = vadd.f32 %v9070_v50, %v9069_v8 }
 0x19f   : > { %v12045_v53 = vadd.f32 %v9759_v55, %v2610_v20  ;;  %v9072_v27 = vpop.f32.mrf.mxu1  ;;  %v2332_v20 = vadd.f32 %v11897_v11, %v11812_v37 }
 0x1a0   : > { %v2762_v24 = vpop.f32.mrf.mxu0  ;;  %v2634_v45 = vadd.f32 %v9071_v19, %v11888_v10 }
 0x1a1   : > { %v12049_v36 = vadd.f32 %v2762_v24, %v11999_v13  ;;  %v9073_v22 = vpop.f32.mrf.mxu1 }
 0x1a2   : > { %v9760_v15 = vpop.f32.mrf.mxu0  ;;  %v9074_v16 = vadd.f32 %v9073_v22, %v9072_v27 }
 0x1a3   : > { %v12051_v30 = vadd.f32 %v9760_v15, %v2613_v54  ;;  %v9075_v17 = vpop.f32.mrf.mxu1 }
 0x1a4   : > { %v12054_v44 = vpop.f32.mrf.mxu0  ;;  %v12060_v1 = vadd.f32 %v9074_v16, %v2332_v20 }
 0x1a5   : > { %v9076_v13 = vpop.f32.mrf.mxu1 }
 0x1a6   : > { %v9763_v28 = vpop.f32.mrf.mxu0  ;;  %v9077_v51 = vadd.f32 %v9076_v13, %v9075_v17  ;;  %v2348_v13 = vadd.f32 %v11935_v25, %v11854_v43 }
 0x1a7   : > { %v12058_v48 = vadd.f32 %v9763_v28, %v2626_v52  ;;  %v9078_v33 = vpop.f32.mrf.mxu1 }
 0x1a8   : > { %v2778_v57 = vpop.f32.mrf.mxu0  ;;  %v2642_v8 = vadd.f32 %v9077_v51, %v11908_v39 }
 0x1a9   : > { %v12062_v54 = vadd.f32 %v2778_v57, %v2618_v62  ;;  %v9079_v55 = vpop.f32.mrf.mxu1 }
 0x1aa   : > { %v9764_v10 = vpop.f32.mrf.mxu0  ;;  %v9080_v11 = vadd.f32 %v9079_v55, %v9078_v33 }
 0x1ab   : > { %v12064_v26 = vadd.f32 %v9764_v10, %v2629_v59  ;;  %v9081_v50 = vpop.f32.mrf.mxu1 }
 0x1ac   : > { %v12067_v37 = vpop.f32.mrf.mxu0  ;;  %v2645_v19 = vadd.f32 %v9080_v11, %v11920_v7 }
 0x1ad   : > { %v9082_v27 = vpop.f32.mrf.mxu1 }
 0x1ae   : > { %v9767_v52 = vpop.f32.mrf.mxu0  ;;  %v9083_v62 = vadd.f32 %v9082_v27, %v9081_v50 }
 0x1af   : > { %v12069_v24 = vadd.f32 %v9767_v52, %v2642_v8  ;;  %v9084_v20 = vpop.f32.mrf.mxu1 }
 0x1b0   : > { %v2794_v15 = vpop.f32.mrf.mxu0  ;;  %v2650_v39 = vadd.f32 %v9083_v62, %v11925_v6 }
 0x1b1   : > { %v12072_v22 = vadd.f32 %v2794_v15, %v2634_v45  ;;  %v9085_v17 = vpop.f32.mrf.mxu1 }
 0x1b2   : > { %v9768_v59 = vpop.f32.mrf.mxu0  ;;  %v9086_v57 = vadd.f32 %v9085_v17, %v9084_v20 }
 0x1b3   : > { %v12074_v16 = vadd.f32 %v9768_v59, %v2645_v19  ;;  %v9087_v51 = vpop.f32.mrf.mxu1 }
 0x1b4   : > { %v12077_v28 = vpop.f32.mrf.mxu0  ;;  %v12081_v33 = vadd.f32 %v9086_v57, %v2348_v13 }
 0x1b5   : > { %v9088_v10 = vpop.f32.mrf.mxu1 }
 0x1b6   : > { %v9771_v7 = vpop.f32.mrf.mxu0  ;;  %v9089_v8 = vadd.f32 %v9088_v10, %v9087_v51 }
 0x1b7   : > { %v9090_v11 = vpop.f32.mrf.mxu1 }
 0x1b8   : > { %v2810_v45 = vpop.f32.mrf.mxu0  ;;  %v2658_v6 = vadd.f32 %v9089_v8, %v11943_v40 }
 0x1b9   : > { %v12083_v55 = vadd.f32 %v2810_v45, %v2650_v39  ;;  %v9091_v52 = vpop.f32.mrf.mxu1  ;;  %v8962_v39 = vadd.f32 %v11970_v38, %v11962_v5 }
 0x1ba   : > { %v9772_v50 = vpop.f32.mrf.mxu0  ;;  %v9092_v27 = vadd.f32 %v9091_v52, %v9090_v11  ;;  %v12088_v15 = vadd.f32 %v9771_v7, %v2658_v6 }
 0x1bb   : > { %v9093_v43 = vpop.f32.mrf.mxu1  ;;  %v2364_v7 = vadd.f32 %v8962_v39, %v11885_v4 }
 0x1bc   : > { %v12086_v19 = vpop.f32.mrf.mxu0  ;;  %13478 = vst [vmem:[#allocation9_spill] sm:$0xff] %v12088_v15  ;;  %v2661_v62 = vadd.f32 %v9092_v27, %v11956_v63 }
 0x1bd   : > { %v9094_v20 = vpop.f32.mrf.mxu1 }
 0x1be   : > { %v9775_v25 = vpop.f32.mrf.mxu0  ;;  %v9095_v17 = vadd.f32 %v9094_v20, %v9093_v43  ;;  %v12093_v13 = vadd.f32 %v9772_v50, %v2661_v62 }
 0x1bf   : > { %v9096_v57 = vpop.f32.mrf.mxu1 }
 0x1c0   : > { %v2826_v59 = vpop.f32.mrf.mxu0  ;;  %13479 = vst [vmem:[#allocation10_spill] sm:$0xff] %v12093_v13  ;;  %v2666_v51 = vadd.f32 %v9095_v17, %v11965_v18 }
 0x1c1   : > { %v9097_v10 = vpop.f32.mrf.mxu1 }
 0x1c2   : > { %v9776_v40 = vpop.f32.mrf.mxu0  ;;  %v9098_v8 = vadd.f32 %v9097_v10, %v9096_v57  ;;  %v12099_v11 = vadd.f32 %v2826_v59, %v2666_v51  ;;  %v8974_v10 = vadd.f32 %v12001_v47, %v11993_v12 }
 0x1c3   : > { %v9099_v63 = vpop.f32.mrf.mxu1 }
 0x1c4   : > { %v12096_v45 = vpop.f32.mrf.mxu0  ;;  %13480 = vst [vmem:[#allocation11_spill] sm:$0xff] %v12099_v11  ;;  %v12101_v52 = vadd.f32 %v9098_v8, %v2364_v7 }
 0x1c5   : > { %v9100_v5 = vpop.f32.mrf.mxu1 }
 0x1c6   : > { %v9779_v6 = vpop.f32.mrf.mxu0  ;;  %v9101_v50 = vadd.f32 %v9100_v5, %v9099_v63 }
 0x1c7   : > { %v9102_v27 = vpop.f32.mrf.mxu1 }
 0x1c8   : > { %v2842_v38 = vpop.f32.mrf.mxu0  ;;  %v2674_v62 = vadd.f32 %v9101_v50, %v11980_v42 }
 0x1c9   : > { %v9103_v18 = vpop.f32.mrf.mxu1 }
 0x1ca   : > { %v9780_v43 = vpop.f32.mrf.mxu0  ;;  %v9104_v17 = vadd.f32 %v9103_v18, %v9102_v27  ;;  %v12106_v13 = vadd.f32 %v9775_v25, %v2674_v62  ;;  %v2380_v25 = vadd.f32 %v8974_v10, %v11913_v49 }
 0x1cb   : > { %v9105_v4 = vpop.f32.mrf.mxu1 }
 0x1cc   : > { %v12104_v20 = vpop.f32.mrf.mxu0  ;;  %13481 = vst [vmem:[#allocation12_spill] sm:$0xff] %v12106_v13  ;;  %v2677_v39 = vadd.f32 %v9104_v17, %v11988_v23 }
 0x1cd   : > { %v9106_v57 = vpop.f32.mrf.mxu1 }
 0x1ce   : > { %v9157_v59 = vpop.f32.mrf.mxu0  ;;  %v9107_v7 = vadd.f32 %v9106_v57, %v9105_v4  ;;  %v12111_v8 = vadd.f32 %v9776_v40, %v2677_v39 }
 0x1cf   : > { %v9108_v63 = vpop.f32.mrf.mxu1 }
 0x1d0   : > { %v9158_v51 = vpop.f32.mrf.mxu0  ;;  %13482 = vst [vmem:[#allocation13_spill] sm:$0xff] %v12111_v8  ;;  %v2682_v5 = vadd.f32 %v9107_v7, %v11996_v9  ;;  %v10301_v8 = vld [vmem:[#allocation3 + $0x78] sm:$0xff]  }
 0x1d1   : > { %v9109_v50 = vpop.f32.mrf.mxu1  ;;  %9413 = vmatprep.subr.bf16.mxu0 %v10301_v8 }
 0x1d2   : > { %v9160_v42 = vpop.f32.mrf.mxu0  ;;  %v9110_v62 = vadd.f32 %v9109_v50, %v9108_v63  ;;  %v12115_v18 = vadd.f32 %v2842_v38, %v2682_v5  ;;  %v9159_v38 = vadd.f32 %v9158_v51, %v9157_v59 }
 0x1d3   : > { %v9111_v23 = vpop.f32.mrf.mxu1 }
 0x1d4   : > { %v9161_v27 = vpop.f32.mrf.mxu0  ;;  %v12117_v13 = vadd.f32 %v9110_v62, %v2380_v25 }
 0x1d5   : > { %v9112_v11 = vpop.f32.mrf.mxu1 }
 0x1d6   : > { %v9163_v17 = vpop.f32.mrf.mxu0  ;;  %v9113_v47 = vadd.f32 %v9112_v11, %v9111_v23 }
 0x1d7   : > { %v9114_v40 = vpop.f32.mrf.mxu1 }
 0x1d8   : > { %v9164_v12 = vpop.f32.mrf.mxu0  ;;  %v2690_v39 = vadd.f32 %v9113_v47, %v12008_v56 }
 0x1d9   : > { %v9165_v57 = vadd.f32 %v9164_v12, %v9163_v17  ;;  %v9115_v9 = vpop.f32.mrf.mxu1  ;;  %v9162_v17 = vadd.f32 %v9161_v27, %v9160_v42 }
 0x1da   : > { %v9166_v4 = vpop.f32.mrf.mxu0  ;;  %v12120_v15 = vadd.f32 %v9779_v6, %v2690_v39  ;;  %v9116_v49 = vadd.f32 %v9115_v9, %v9114_v40  ;;  %v12129_v6 = vld [vmem:[%s13462_s2] ss:$0 sm:$0xff] }
 0x1db   : > { %v9799_v10 = vpop.f32.mrf.mxu1 }
 0x1dc   : > { %v9167_v7 = vpop.f32.mrf.mxu0  ;;  %v2693_v5 = vadd.f32 %v9116_v49, %v12012_v32  ;;  %v3783_v50 = vadd.f32 %v9799_v10, %v9165_v57 }
 0x1dd   : > { %v9168_v25 = vadd.f32 %v9167_v7, %v9166_v4  ;;  %v3774_v11 = vpop.f32.mrf.mxu1 }
 0x1de   : > { %v9169_v63 = vpop.f32.mrf.mxu0  ;;  %v12123_v23 = vadd.f32 %v9780_v43, %v2693_v5  ;;  %v3775_v56 = vadd.f32 %v9159_v38, %v3774_v11  ;;  %v3903_v12 = vadd.f32 %v3783_v50, %v12015_v35  ;;  %v2734_v43 = vadd.f32 %v12025_v58, %v11939_v14  ;;  %v12139_v35 = vld [vmem:[%s13463_s3] ss:$0 sm:$0xff] }
 0x1df   : > { %v9800_v59 = vpop.f32.mrf.mxu1 }
 0x1e0   : > { %v9170_v62 = vpop.f32.mrf.mxu0  ;;  %v3901_v8 = vadd.f32 %v3775_v56, %v12019_v60  ;;  %v3942_v32 = vmul.f32 %v12129_v6, %v3903_v12  ;;  %v3786_v47 = vadd.f32 %v9800_v59, %v9168_v25 }
 0x1e1   : > { %v3777_v40 = vpop.f32.mrf.mxu1  ;;  %v9171_v57 = vadd.f32 %v9170_v62, %v9169_v63 }
 0x1e2   : > { %v9172_v51 = vpop.f32.mrf.mxu0  ;;  %v3940_v42 = vmul.f32 %v12129_v6, %v3901_v8  ;;  %v3778_v27 = vadd.f32 %v9162_v17, %v3777_v40  ;;  %v3904_v39 = vadd.f32 %v3786_v47, %v12022_v34  ;;  %v3981_v49 = vadd.f32 %v12139_v35, %v3942_v32 }
 0x1e3   : > { %v9803_v60 = vpop.f32.mrf.mxu1 }
 0x1e4   : > { %v9173_v4 = vpop.f32.mrf.mxu0  ;;  %v3902_v7 = vadd.f32 %v3778_v27, %v2734_v43  ;;  %v3943_v14 = vmul.f32 %v12129_v6, %v3904_v39  ;;  %v3979_v58 = vadd.f32 %v12139_v35, %v3940_v42  ;;  %v4013_v17 = vmax.f32 %v3981_v49, 0.0 }
 0x1e5   : > { %v3790_v38 = vpop.f32.mrf.mxu1  ;;  %v9174_v11 = vadd.f32 %v9173_v4, %v9172_v51  ;;  %v2750_v51 = vadd.f32 %v12043_v41, %v11977_v3 }
 0x1e6   : > { %v9175_v9 = vpop.f32.mrf.mxu0  ;;  %v3941_v5 = vmul.f32 %v12129_v6, %v3902_v7  ;;  %v3982_v50 = vadd.f32 %v12139_v35, %v3943_v14  ;;  %v3791_v25 = vadd.f32 %v9171_v57, %v3790_v38  ;;  %v4011_v8 = vmax.f32 %v3979_v58, 0.0 }
 0x1e7   : > { %v9804_v56 = vpop.f32.mrf.mxu1 }
 0x1e8   : > { %v9176_v10 = vpop.f32.mrf.mxu0  ;;  %v3980_v62 = vadd.f32 %v12139_v35, %v3941_v5  ;;  %v4014_v12 = vmax.f32 %v3982_v50, 0.0  ;;  %v3905_v59 = vadd.f32 %v3791_v25, %v12037_v31  ;;  %v2766_v50 = vadd.f32 %v12054_v44, %v12005_v61 }
 0x1e9   : > { %v9177_v34 = vadd.f32 %v9176_v10, %v9175_v9  ;;  %v3793_v32 = vpop.f32.mrf.mxu1 }
 0x1ea   : > { %v9178_v63 = vpop.f32.mrf.mxu0  ;;  %v4012_v40 = vmax.f32 %v3980_v62, 0.0  ;;  %v4044_v42 = vpack.c.bf16 %v4014_v12, %v4013_v17  ;;  %v3944_v27 = vmul.f32 %v12129_v6, %v3905_v59  ;;  %v3794_v39 = vadd.f32 %v9174_v11, %v3793_v32 }
 0x1eb   : > { %v3799_v47 = vadd.f32 %v9803_v60, %v9177_v34  ;;  %v12153_v57 = vpop.f32.mrf.mxu1 }
 0x1ec   : > { %v9179_v43 = vpop.f32.mrf.mxu0  ;;  %v4043_v49 = vpack.c.bf16 %v4012_v40, %v4011_v8  ;;  %v4067_v31 = vshrl.u32 %v4044_v42, 16  ;;  %v3983_v14 = vadd.f32 %v12139_v35, %v3944_v27  ;;  %v3906_v60 = vadd.f32 %v3794_v39, %v2750_v51 }
 0x1ed   : > { %v3907_v4 = vadd.f32 %v3799_v47, %v12030_v29  ;;  %v9180_v9 = vadd.f32 %v9179_v43, %v9178_v63  ;;  %v3806_v10 = vpop.f32.mrf.mxu1  ;;  %v4070_v29 = vshll.u32 %v4044_v42, 16 }
 0x1ee   : > { %v9181_v7 = vpop.f32.mrf.mxu0  ;;  %v4060_v3 = vshrl.u32 %v4043_v49, 16  ;;  %v4069_v41 = vrot.slane %v4067_v31, 7  ;;  %v4063_v25 = vshll.u32 %v4043_v49, 16  ;;  %v3945_v11 = vmul.f32 %v12129_v6, %v3906_v60 }
 0x1ef   : > { %v3946_v58 = vmul.f32 %v12129_v6, %v3907_v4  ;;  %v3802_v38 = vadd.f32 %v9804_v56, %v9180_v9  ;;  %v4015_v59 = vmax.f32 %v3983_v14, 0.0  ;;  %v9808_v47 = vpop.f32.mrf.mxu1 }
 0x1f0   : > { %v9182_v5 = vpop.f32.mrf.mxu0  ;;  %v4062_v17 = vrot.slane %v4060_v3, 7  ;;  %v4072_v12 = vor.u32 %v4070_v29, %v4069_v41  ;;  %v4220_v56 = vsel %vm10768_vm3, %v4069_v41, 0  ;;  %v3984_v32 = vadd.f32 %v12139_v35, %v3945_v11 }
 0x1f1   : > { %v3908_v34 = vadd.f32 %v3802_v38, %v12040_v21  ;;  %v9183_v63 = vadd.f32 %v9182_v5, %v9181_v7  ;;  %v8601_v8 = vcombine.low %v4220_v56, %v4220_v56  ;;  %v3985_v61 = vadd.f32 %v12139_v35, %v3946_v58  ;;  %v3809_v3 = vpop.f32.mrf.mxu1 }
 0x1f2   : > { %v9184_v62 = vpop.f32.mrf.mxu0  ;;  %v4065_v40 = vor.u32 %v4063_v25, %v4062_v17  ;;  %v4219_v21 = vsel %vm10768_vm3, %v4062_v17, 0  ;;  %v4204_v42 = vsel %vm10768_vm3, 0, %v4072_v12  ;;  %v4016_v9 = vmax.f32 %v3984_v32, 0.0 }
 0x1f3   : > { %v3947_v44 = vmul.f32 %v12129_v6, %v3908_v34  ;;  %v3807_v27 = vadd.f32 %v9183_v63, %v3806_v10  ;;  %v8598_v39 = vcombine.low %v4219_v21, %v4219_v21  ;;  %v8599_v51 = vcombine.low %v4204_v42, %v4204_v42  ;;  %4416 = vst [vmem:[#allocation2 + $0x20] sm:$0x1] %v8601_v8  ;;  %v12194_v21 = vpop.f32.mrf.mxu1 }
 0x1f4   : > { %v9185_v43 = vpop.f32.mrf.mxu0  ;;  %v8600_v4 = vcombine.high %v4204_v42, %v4204_v42  ;;  %v4203_v49 = vsel %vm10768_vm3, 0, %v4065_v40  ;;  %v4045_v10 = vpack.c.bf16 %v4016_v9, %v4015_v59  ;;  %v4017_v5 = vmax.f32 %v3985_v61, 0.0 }
 0x1f5   : > { %v3986_v31 = vadd.f32 %v12139_v35, %v3947_v44  ;;  %v3909_v14 = vadd.f32 %v3807_v27, %v12049_v36  ;;  %v9186_v60 = vadd.f32 %v9185_v43, %v9184_v62  ;;  %v8596_v58 = vcombine.low %v4203_v49, %v4203_v49  ;;  %4413 = vst [vmem:[#allocation2 + $0x14] sm:$0x1] %v8598_v39 }
 0x1f6   : > { %v9187_v7 = vpop.f32.mrf.mxu0  ;;  %v8597_v38 = vcombine.high %v4203_v49, %v4203_v49  ;;  %4415 = vst [vmem:[#allocation2 + $0x1c] sm:$0xf] %v8600_v4  ;;  %4414 = vst [vmem:[#allocation2 + $0x18] sm:$0xf] %v8599_v51  ;;  %v12177_v63 = vadd.f32 %v12067_v37, %v12033_v0  ;;  %v12181_v36 = vadd.f32 %v12077_v28, %v12060_v1  ;;  %v4074_v62 = vshrl.u32 %v4045_v10, 16 }
 0x1f7   : > { %v4018_v29 = vmax.f32 %v3986_v31, 0.0  ;;  %v3948_v25 = vmul.f32 %v12129_v6, %v3909_v14  ;;  %v3810_v11 = vadd.f32 %v9186_v60, %v3809_v3  ;;  %4411 = vst [vmem:[#allocation2 + $0xc] sm:$0xf] %v8596_v58  ;;  %v12187_v32 = vadd.f32 %v12086_v19, %v12081_v33 }
 0x1f8   : > { %v9188_v41 = vpop.f32.mrf.mxu0  ;;  %4412 = vst [vmem:[#allocation2 + $0x10] sm:$0xf] %v8597_v38  ;;  %v12191_v0 = vadd.f32 %v12096_v45, %v12101_v52  ;;  %v4076_v1 = vrot.slane %v4074_v62, 7  ;;  %v4077_v37 = vshll.u32 %v4045_v10, 16  ;;  %v12203_v52 = vadd.f32 %v12104_v20, %v12117_v13  ;;  %v3822_v10 = vpop.f32.mrf.mxu1 }
 0x1f9   : > { %v9189_v34 = vadd.f32 %v9188_v41, %v9187_v7  ;;  %v4046_v12 = vpack.c.bf16 %v4018_v29, %v4017_v5  ;;  %v3987_v56 = vadd.f32 %v12139_v35, %v3948_v25  ;;  %v3910_v59 = vadd.f32 %v3810_v11, %v2766_v50 }
 0x1fa   : > { %v9190_v17 = vpop.f32.mrf.mxu0  ;;  %v4079_v50 = vor.u32 %v4077_v37, %v4076_v1  ;;  %v12199_v45 = vld [vmem:[#allocation2 + $0x20] ss:$0 sps:$4 sm:$0x11]  }
 0x1fb   : > { %v3815_v8 = vadd.f32 %v12153_v57, %v9189_v34  ;;  %v4081_v61 = vshrl.u32 %v4046_v12, 16  ;;  %v4084_v44 = vshll.u32 %v4046_v12, 16  ;;  %v4019_v43 = vmax.f32 %v3987_v56, 0.0 }
 0x1fc   : > { %v9191_v28 = vpop.f32.mrf.mxu0  ;;  %v3949_v40 = vmul.f32 %v12129_v6, %v3910_v59  ;;  %v4221_v57 = vsel %vm10768_vm3, %v4076_v1, 0  ;;  %v10269_v4 = vld [vmem:[#allocation2 + $0x14] ss:$0 sps:$4 sm:$0x11]   ;;  %v4205_v9 = vsel %vm10768_vm3, 0, %v4079_v50  ;;  %v5503_v31 = vrot.slane %v12199_v45, 1 }
 0x1fd   : > { %v3911_v33 = vadd.f32 %v3815_v8, %v12045_v53  ;;  %v9192_v19 = vadd.f32 %v9191_v28, %v9190_v17  ;;  %v8604_v27 = vcombine.low %v4221_v57, %v4221_v57  ;;  %v4083_v39 = vrot.slane %v4081_v61, 7  ;;  %v5038_v1 = vld [vmem:[#allocation2 + $0x1c] sm:$0xf]  ;;  %v5084_v37 = vld [vmem:[#allocation2 + $0x18] sm:$0xe]  ;;  %v12221_v57 = vpop.f32.mrf.mxu1 }
 0x1fe   : > { %v9193_v42 = vpop.f32.mrf.mxu0  ;;  %v3988_v51 = vadd.f32 %v12139_v35, %v3949_v40  ;;  %v8602_v14 = vcombine.low %v4205_v9, %v4205_v9  ;;  %v8603_v60 = vcombine.high %v4205_v9, %v4205_v9  ;;  %v5035_v20 = vld [vmem:[#allocation2 + $0xc] sm:$0xf]  ;;  %v5500_v62 = vrot.slane %v10269_v4, 1 }
 0x1ff   : > { %v3950_v7 = vmul.f32 %v12129_v6, %v3911_v33  ;;  %v3818_v49 = vadd.f32 %v9808_v47, %v9192_v19  ;;  %4419 = vst [vmem:[#allocation2 + $0x2c] sm:$0x1] %v8604_v27  ;;  %v4086_v58 = vor.u32 %v4084_v44, %v4083_v39  ;;  %v4222_v13 = vsel %vm10768_vm3, %v4083_v39, 0  ;;  %v5036_v38 = vld [vmem:[#allocation2 + $0x10] sm:$0xf] }
 0x200   : > { %v9194_v53 = vpop.f32.mrf.mxu0  ;;  %v8607_v5 = vcombine.low %v4222_v13, %v4222_v13  ;;  %v4020_v3 = vmax.f32 %v3988_v51, 0.0  ;;  %v5083_v29 = vld [vmem:[#allocation2 + $0xc] sm:$0xe]  ;;  %v12213_v25 = vcombine.low %v5035_v20, %v5036_v38  ;;  %4418 = vst [vmem:[#allocation2 + $0x28] sm:$0xf] %v8603_v60  ;;  %v5251_v27 = vshll.u32 %v10269_v4, 16 }
 0x201   : > { %v3989_v41 = vadd.f32 %v12139_v35, %v3950_v7  ;;  %4417 = vst [vmem:[#allocation2 + $0x24] sm:$0xf] %v8602_v14  ;;  %v4206_v11 = vsel %vm10768_vm3, 0, %v4086_v58  ;;  %v8724_v34 = vcombine.low %v5083_v29, %v5036_v38  ;;  %v3912_v17 = vadd.f32 %v3818_v49, %v12051_v30  ;;  %v5037_v33 = vld [vmem:[#allocation2 + $0x18] sm:$0xf] }
 0x202   : > { %v9196_v47 = vpop.f32.mrf.mxu0  ;;  %v8605_v12 = vcombine.low %v4206_v11, %v4206_v11  ;;  %v8606_v56 = vcombine.high %v4206_v11, %v4206_v11  ;;  %4422 = vst [vmem:[#allocation2 + $0x38] sm:$0x1] %v8607_v5  ;;  %v4047_v59 = vpack.c.bf16 %v4020_v3, %v4019_v43  ;;  %v5244_v40 = vshrl.u32 %v12213_v25, 16  ;;  %v3825_v3 = vpop.f32.mrf.mxu1 }
 0x203   : > { %v4021_v8 = vmax.f32 %v3989_v41, 0.0  ;;  %v5499_v61 = vrot.slane %v8724_v34, 1  ;;  %v3951_v44 = vmul.f32 %v12129_v6, %v3912_v17  ;;  %v5246_v50 = vshll.u32 %v12213_v25, 16  ;;  %v10306_v17 = vld [vmem:[#allocation3 + $0x70] sm:$0xff]  }
 0x204   : > { %v9197_v28 = vpop.f32.mrf.mxu0  ;;  %4421 = vst [vmem:[#allocation2 + $0x34] sm:$0xf] %v8606_v56  ;;  %4420 = vst [vmem:[#allocation2 + $0x30] sm:$0xf] %v8605_v12  ;;  %v4088_v30 = vshrl.u32 %v4047_v59, 16  ;;  %v4091_v19 = vshll.u32 %v4047_v59, 16  ;;  %v9195_v43 = vadd.f32 %v9194_v53, %v9193_v42  ;;  %v8725_v49 = vcombine.low %v5084_v37, %v5038_v1 }
 0x205   : > { %v5501_v51 = vsel %vm1235_vm4, %v5499_v61, %v5500_v62  ;;  %v3990_v9 = vadd.f32 %v12139_v35, %v3951_v44  ;;  %v5248_v7 = vrot.slane %v5246_v50, 1  ;;  %v5253_v60 = vrot.slane %v5251_v27, 1  ;;  %v10305_v42 = vld [vmem:[#allocation3 + $0x38] sm:$0xff]  }
 0x206   : > { %v9199_v39 = vpop.f32.mrf.mxu0  ;;  %v4090_v14 = vrot.slane %v4088_v30, 7  ;;  %9845 = vmatprep.mubr.bf16.mxu0 %v5501_v51  ;;  %v3823_v58 = vadd.f32 %v9195_v43, %v3822_v10  ;;  %v9198_v13 = vadd.f32 %v9197_v28, %v9196_v47  ;;  %v5502_v41 = vrot.slane %v8725_v49, 1  ;;  %v10312_v49 = vld [vmem:[#allocation3 + $0x68] sm:$0xff]  }
 0x207   : > { %v4022_v38 = vmax.f32 %v3990_v9, 0.0  ;;  %v5249_v5 = vor.u32 %v5248_v7, %v5244_v40  ;;  %v12225_v29 = vcombine.low %v5037_v33, %v5038_v1  ;;  %v10279_v1 = vld [vmem:[#allocation3 + $0xb0] sm:$0xff]   ;;  %v5263_v51 = vshll.u32 %v12199_v45, 16  ;;  %v12252_v45 = vpop.f32.mrf.mxu1 }
 0x208   : > { %v9200_v20 = vpop.f32.mrf.mxu0  ;;  %v4093_v4 = vor.u32 %v4091_v19, %v4090_v14  ;;  %v4223_v53 = vsel %vm10768_vm3, %v4090_v14, 0  ;;  %v3913_v11 = vadd.f32 %v3823_v58, %v12062_v54  ;;  %v3826_v34 = vadd.f32 %v9198_v13, %v3825_v3  ;;  %v5039_v59 = vld [vmem:[#allocation2 + $0x24] sm:$0xf]  ;;  %v10310_v19 = vld [vmem:[#allocation3 + $0x30] sm:$0xff]  }
 0x209   : > { %v8610_v10 = vcombine.low %v4223_v53, %v4223_v53  ;;  %v4048_v47 = vpack.c.bf16 %v4022_v38, %v4021_v8  ;;  %v5254_v12 = vsel %vm978_vm5, %v5249_v5, %v5253_v60  ;;  %v5504_v56 = vsel %vm1235_vm4, %v5502_v41, %v5503_v31  ;;  %v5040_v8 = vld [vmem:[#allocation2 + $0x28] sm:$0xf]  ;;  %v5085_v44 = vld [vmem:[#allocation2 + $0x24] sm:$0xe] }
 0x20a   : > { %v12230_v62 = vpop.f32.mrf.mxu0  ;;  %v4207_v37 = vsel %vm10768_vm3, 0, %v4093_v4  ;;  %5788 = vmatprep.mubr.bf16.mxu1 %v5254_v12  ;;  %v3952_v54 = vmul.f32 %v12129_v6, %v3913_v11  ;;  %9846 = vmatmul.mubr.bf16.vlgmr.msra.gmra.mxu0 %v5504_v56  ;;  %v3914_v28 = vadd.f32 %v3826_v34, %v12177_v63  ;;  %v5256_v61 = vshrl.u32 %v12225_v29, 16  ;;  %v12247_v9 = vld [vmem:[#allocation2 + $0x2c] ss:$0 sps:$4 sm:$0x11]   ;;  %v10286_v58 = vld [vmem:[#allocation3 + $0xa8] sm:$0xff]  }
 0x20b   : > { %v8608_v50 = vcombine.low %v4207_v37, %v4207_v37  ;;  %v8609_v33 = vcombine.high %v4207_v37, %v4207_v37  ;;  %4425 = vst [vmem:[#allocation2 + $0x44] sm:$0x1] %v8610_v10  ;;  %v4095_v31 = vshrl.u32 %v4048_v47, 16  ;;  %v4098_v30 = vshll.u32 %v4048_v47, 16  ;;  %5789 = vmatmul.mubr.bf16.vlgmr.msra.gmra.mxu1 %v12213_v25  ;;  %9414 = vmatpush3.bf16.msra.mxu0 %v10305_v42  ;;  %v12260_v12 = vld [vmem:[#allocation3 + $0xa0] sm:$0xff]  }
 0x20c   : > { %v9203_v40 = vpop.f32.mrf.mxu0  ;;  %9878 = vmatpush3.bf16.msra.mxu1 %v12027_v2  ;;  %v3991_v27 = vadd.f32 %v12139_v35, %v3952_v54  ;;  %v3953_v63 = vmul.f32 %v12129_v6, %v3914_v28  ;;  %v5258_v43 = vshll.u32 %v12225_v29, 16  ;;  %9415 = vmatprep.subr.bf16.mxu0 %v10306_v17  ;;  %v9201_v14 = vadd.f32 %v9200_v20, %v9199_v39  ;;  %v10316_v20 = vld [vmem:[#allocation3 + $0x28] sm:$0xff]   ;;  %v10317_v54 = vld [vmem:[#allocation3 + $0x60] sm:$0xff]  }
 0x20d   : > { %4424 = vst [vmem:[#allocation2 + $0x40] sm:$0xf] %v8609_v33  ;;  %4423 = vst [vmem:[#allocation2 + $0x3c] sm:$0xf] %v8608_v50  ;;  %v4097_v25 = vrot.slane %v4095_v31, 7  ;;  %v12249_v60 = vcombine.low %v5039_v59, %v5040_v8  ;;  %v8726_v2 = vcombine.low %v5085_v44, %v5040_v8  ;;  %9879 = vmatprep.subr.bf16.mxu1 %v10279_v1  ;;  %v5265_v3 = vrot.slane %v5263_v51, 1  ;;  %v3838_v50 = vpop.f32.mrf.mxu1 }
 0x20e   : > { %v9205_v7 = vpop.f32.mrf.mxu0  ;;  %v4023_v13 = vmax.f32 %v3991_v27, 0.0  ;;  %v3992_v38 = vadd.f32 %v12139_v35, %v3953_v63  ;;  %v5260_v5 = vrot.slane %v5258_v43, 1  ;;  %v3831_v53 = vadd.f32 %v12194_v21, %v9201_v14  ;;  %v10321_v28 = vld [vmem:[#allocation3 + $0x20] sm:$0xff]   ;;  %v5041_v33 = vld [vmem:[#allocation2 + $0x30] sm:$0xf] }
 0x20f   : > { %v4100_v42 = vor.u32 %v4098_v30, %v4097_v25  ;;  %v4224_v4 = vsel %vm10768_vm3, %v4097_v25, 0  ;;  %v5505_v39 = vrot.slane %v8726_v2, 1  ;;  %9416 = vmatpush3.bf16.msra.mxu0 %v10310_v19  ;;  %v5506_v10 = vrot.slane %v12247_v9, 1  ;;  %v5042_v31 = vld [vmem:[#allocation2 + $0x34] sm:$0xf] }
 0x210   : > { %v9206_v41 = vpop.f32.mrf.mxu0  ;;  %v8613_v11 = vcombine.low %v4224_v4, %v4224_v4  ;;  %v4024_v34 = vmax.f32 %v3992_v38, 0.0  ;;  %v5261_v17 = vor.u32 %v5260_v5, %v5256_v61  ;;  %9880 = vmatpush3.bf16.msra.mxu1 %v10279_v1  ;;  %9417 = vmatprep.subr.bf16.mxu0 %v10312_v49  ;;  %v3915_v59 = vadd.f32 %v3831_v53, %v12058_v48  ;;  %v5086_v27 = vld [vmem:[#allocation2 + $0x30] sm:$0xe]  ;;  %v12272_v63 = vld [vmem:[#allocation2 + $0x38] ss:$0 sps:$4 sm:$0x11]   ;;  %v12280_v4 = vpop.f32.mrf.mxu1 }
 0x211   : > { %v4208_v56 = vsel %vm10768_vm3, 0, %v4100_v42  ;;  %v9204_v21 = vadd.f32 %v9203_v40, %v12230_v62  ;;  %v5268_v37 = vshrl.u32 %v12249_v60, 16  ;;  %9881 = vmatprep.subr.bf16.mxu1 %v10286_v58  ;;  %v5507_v62 = vsel %vm1235_vm4, %v5505_v39, %v5506_v10  ;;  %v10323_v2 = vld [vmem:[#allocation3 + $0x58] sm:$0xff]  }
 0x212   : > { %v12258_v47 = vpop.f32.mrf.mxu0  ;;  %v8611_v61 = vcombine.low %v4208_v56, %v4208_v56  ;;  %v8612_v8 = vcombine.high %v4208_v56, %v4208_v56  ;;  %4428 = vst [vmem:[#allocation2 + $0x50] sm:$0x1] %v8613_v11  ;;  %v4049_v1 = vpack.c.bf16 %v4024_v34, %v4023_v13  ;;  %v5266_v44 = vsel %vm978_vm5, %v5261_v17, %v5265_v3  ;;  %v12288_v56 = vld [vmem:[#allocation3 + $0x90] sm:$0xff]  }
 0x213   : > { %5796 = vmatprep.mubr.bf16.mxu1 %v5266_v44  ;;  %v3954_v48 = vmul.f32 %v12129_v6, %v3915_v59  ;;  %v3834_v40 = vadd.f32 %v12221_v57, %v9204_v21  ;;  %v5270_v19 = vshll.u32 %v12249_v60, 16  ;;  %9418 = vmatpush3.bf16.msra.mxu0 %v10316_v20  ;;  %v5275_v49 = vshll.u32 %v12247_v9, 16  ;;  %v10300_v9 = vld [vmem:[#allocation3 + $0x98] sm:$0xff]   ;;  %v3841_v44 = vpop.f32.mrf.mxu1 }
 0x214   : > { %v9209_v30 = vpop.f32.mrf.mxu0  ;;  %4427 = vst [vmem:[#allocation2 + $0x4c] sm:$0xf] %v8612_v8  ;;  %4426 = vst [vmem:[#allocation2 + $0x48] sm:$0xf] %v8611_v61  ;;  %v4102_v43 = vshrl.u32 %v4049_v1, 16  ;;  %v4105_v51 = vshll.u32 %v4049_v1, 16  ;;  %5797 = vmatmul.mubr.bf16.gmra.mxu1 %v12225_v29  ;;  %9849 = vmatprep.mubr.bf16.mxu0 %v5507_v62  ;;  %v9207_v25 = vadd.f32 %v9206_v41, %v9205_v7 }
 0x215   : > { %v3993_v57 = vadd.f32 %v12139_v35, %v3954_v48  ;;  %v3916_v13 = vadd.f32 %v3834_v40, %v12064_v26  ;;  %v5272_v38 = vrot.slane %v5270_v19, 1  ;;  %v12278_v5 = vcombine.low %v5041_v33, %v5042_v31  ;;  %9882 = vmatpush3.bf16.msra.mxu1 %v10286_v58  ;;  %9419 = vmatprep.subr.bf16.mxu0 %v10317_v54  ;;  %v10327_v59 = vld [vmem:[#allocation3 + $0x18] sm:$0xff]   ;;  %v10328_v8 = vld [vmem:[#allocation3 + $0x50] sm:$0xff]   ;;  %v5087_v48 = vld [vmem:[#allocation2 + $0x3c] sm:$0xe] }
 0x216   : > { %v9211_v14 = vpop.f32.mrf.mxu0  ;;  %v4104_v3 = vrot.slane %v4102_v43, 7  ;;  %v5277_v42 = vrot.slane %v5275_v49, 1  ;;  %v3839_v29 = vadd.f32 %v9207_v25, %v3838_v50  ;;  %v8727_v53 = vcombine.low %v5086_v27, %v5042_v31  ;;  %9883 = vmatprep.subr.bf16.mxu1 %v12260_v12  ;;  %v5044_v31 = vld [vmem:[#allocation2 + $0x40] sm:$0xf] }
 0x217   : > { %v4025_v7 = vmax.f32 %v3993_v57, 0.0  ;;  %v3955_v41 = vmul.f32 %v12129_v6, %v3916_v13  ;;  %v5273_v20 = vor.u32 %v5272_v38, %v5268_v37  ;;  %v5509_v26 = vrot.slane %v12272_v63, 1  ;;  %9420 = vmatpush3.bf16.msra.mxu0 %v10321_v28  ;;  %v5043_v28 = vld [vmem:[#allocation2 + $0x3c] sm:$0xf] }
 0x218   : > { %v9212_v39 = vpop.f32.mrf.mxu0  ;;  %v4107_v11 = vor.u32 %v4105_v51, %v4104_v3  ;;  %v4225_v58 = vsel %vm10768_vm3, %v4104_v3, 0  ;;  %v3917_v34 = vadd.f32 %v3839_v29, %v12072_v22  ;;  %v5508_v17 = vrot.slane %v8727_v53, 1  ;;  %9421 = vmatprep.subr.bf16.mxu0 %v10323_v2  ;;  %v12305_v49 = vld [vmem:[#allocation2 + $0x44] ss:$0 sps:$4 sm:$0x11]   ;;  %v10332_v2 = vld [vmem:[#allocation3 + $0x10] sm:$0xff]   ;;  %v12314_v53 = vpop.f32.mrf.mxu1 }
 0x219   : > { %v8616_v21 = vcombine.low %v4225_v58, %v4225_v58  ;;  %v3994_v54 = vadd.f32 %v12139_v35, %v3955_v41  ;;  %v5278_v37 = vsel %vm978_vm5, %v5273_v20, %v5277_v42  ;;  %v9210_v61 = vadd.f32 %v9209_v30, %v12258_v47  ;;  %9884 = vmatpush3.bf16.msra.mxu1 %v12260_v12  ;;  %v10334_v3 = vld [vmem:[#allocation3 + $0x48] sm:$0xff]  }
 0x21a   : > { %v9214_v10 = vpop.f32.mrf.mxu0  ;;  %v4209_v22 = vsel %vm10768_vm3, 0, %v4107_v11  ;;  %5804 = vmatprep.mubr.bf16.mxu1 %v5278_v37  ;;  %v3956_v1 = vmul.f32 %v12129_v6, %v3917_v34  ;;  %v5510_v50 = vsel %vm1235_vm4, %v5508_v17, %v5509_v26  ;;  %v5280_v33 = vshrl.u32 %v12278_v5, 16  ;;  %9885 = vmatprep.subr.bf16.mxu1 %v10300_v9  ;;  %v10322_v41 = vld [vmem:[#allocation3 + $0x88] sm:$0xff]  }
 0x21b   : > { %v8614_v47 = vcombine.low %v4209_v22, %v4209_v22  ;;  %v8615_v30 = vcombine.high %v4209_v22, %v4209_v22  ;;  %4431 = vst [vmem:[#allocation2 + $0x5c] sm:$0x1] %v8616_v21  ;;  %v4026_v12 = vmax.f32 %v3994_v54, 0.0  ;;  %9850 = vmatmul.mubr.bf16.gmra.mxu0 %v5510_v50  ;;  %v3842_v40 = vadd.f32 %v9210_v61, %v3841_v44  ;;  %v10339_v61 = vld [vmem:[#allocation3 + $0x40] sm:$0xff]   ;;  %v3854_v22 = vpop.f32.mrf.mxu1 }
 0x21c   : > { %v9215_v62 = vpop.f32.mrf.mxu0  ;;  %5805 = vmatmul.mubr.bf16.gmra.mxu1 %v12249_v60  ;;  %v12301_v19 = vadd.f32 %v12139_v35, %v3956_v1  ;;  %v5282_v27 = vshll.u32 %v12278_v5, 16  ;;  %v5287_v43 = vshll.u32 %v12272_v63, 16  ;;  %v9213_v51 = vadd.f32 %v9212_v39, %v9211_v14  ;;  %9422 = vmatpush3.bf16.msra.mxu0 %v10327_v59  ;;  %v10333_v44 = vld [vmem:[#allocation3 + $0x80] sm:$0xff]  }
 0x21d   : > { %4430 = vst [vmem:[#allocation2 + $0x58] sm:$0xf] %v8615_v30  ;;  %4429 = vst [vmem:[#allocation2 + $0x54] sm:$0xf] %v8614_v47  ;;  %v4050_v57 = vpack.c.bf16 %v4026_v12, %v4025_v7  ;;  %v3918_v13 = vadd.f32 %v3842_v40, %v12181_v36  ;;  %v12310_v60 = vcombine.low %v5043_v28, %v5044_v31  ;;  %9886 = vmatpush3.bf16.msra.mxu1 %v10300_v9  ;;  %v5045_v12 = vld [vmem:[#allocation2 + $0x48] sm:$0xf] }
 0x21e   : > { %v12307_v25 = vpop.f32.mrf.mxu0  ;;  %v8728_v38 = vcombine.low %v5087_v48, %v5044_v31  ;;  %v4027_v42 = vmax.f32 %v12301_v19, 0.0  ;;  %v5284_v63 = vrot.slane %v5282_v27, 1  ;;  %v5289_v14 = vrot.slane %v5287_v43, 1  ;;  %9887 = vmatprep.subr.bf16.mxu1 %v12288_v56  ;;  %9423 = vmatprep.subr.bf16.mxu0 %v10328_v8  ;;  %v10340_v48 = vld [vmem:[#allocation3] sm:$0xff]  }
 0x21f   : > { %v3847_v29 = vadd.f32 %v12252_v45, %v9213_v51  ;;  %v4109_v7 = vshrl.u32 %v4050_v57, 16  ;;  %v4112_v36 = vshll.u32 %v4050_v57, 16  ;;  %v3957_v20 = vmul.f32 %v12129_v6, %v3918_v13  ;;  %v10338_v45 = vld [vmem:[#allocation3 + $0x8] sm:$0xff]   ;;  %v12336_v40 = vld [vmem:[#allocation2 + $0x50] ss:$0 sps:$4 sm:$0x11]  }
 0x220   : > { %v9218_v39 = vpop.f32.mrf.mxu0  ;;  %v5511_v26 = vrot.slane %v8728_v38, 1  ;;  %v5285_v9 = vor.u32 %v5284_v63, %v5280_v33  ;;  %v5512_v58 = vrot.slane %v12305_v49, 1  ;;  %v9216_v34 = vadd.f32 %v9215_v62, %v9214_v10  ;;  %9424 = vmatpush3.bf16.msra.mxu0 %v10332_v2  ;;  %v5088_v57 = vld [vmem:[#allocation2 + $0x48] sm:$0xe]  ;;  %v12346_v63 = vpop.f32.mrf.mxu1 }
 0x221   : > { %v3919_v11 = vadd.f32 %v3847_v29, %v12069_v24  ;;  %v4111_v59 = vrot.slane %v4109_v7, 7  ;;  %v3996_v21 = vadd.f32 %v12139_v35, %v3957_v20  ;;  %v5292_v54 = vshrl.u32 %v12310_v60, 16  ;;  %9888 = vmatpush3.bf16.msra.mxu1 %v12288_v56  ;;  %9425 = vmatprep.subr.bf16.mxu0 %v10334_v3 }
 0x222   : > { %v12320_v17 = vpop.f32.mrf.mxu0  ;;  %v5294_v37 = vshll.u32 %v12310_v60, 16  ;;  %v5290_v24 = vsel %vm978_vm5, %v5285_v9, %v5289_v14  ;;  %v5513_v10 = vsel %vm1235_vm4, %v5511_v26, %v5512_v58  ;;  %v3850_v8 = vadd.f32 %v12280_v4, %v9216_v34  ;;  %9889 = vmatprep.subr.bf16.mxu1 %v10322_v41 }
 0x223   : > { %v3958_v28 = vmul.f32 %v12129_v6, %v3919_v11  ;;  %v4114_v50 = vor.u32 %v4112_v36, %v4111_v59  ;;  %v4226_v33 = vsel %vm10768_vm3, %v4111_v59, 0  ;;  %v4028_v31 = vmax.f32 %v3996_v21, 0.0  ;;  %5812 = vmatprep.mubr.bf16.mxu1 %v5290_v24  ;;  %9853 = vmatprep.mubr.bf16.mxu0 %v5513_v10  ;;  %v3857_v21 = vpop.f32.mrf.mxu1 }
 0x224   : > { %v9221_v1 = vpop.f32.mrf.mxu0  ;;  %v5296_v56 = vrot.slane %v5294_v37, 1  ;;  %v8619_v62 = vcombine.low %v4226_v33, %v4226_v33  ;;  %5813 = vmatmul.mubr.bf16.gmra.mxu1 %v12278_v5  ;;  %v3920_v4 = vadd.f32 %v3850_v8, %v12074_v16  ;;  %v5299_v30 = vshll.u32 %v12305_v49, 16  ;;  %9426 = vmatpush3.bf16.msra.mxu0 %v10338_v45  ;;  %v5046_v5 = vld [vmem:[#allocation2 + $0x4c] sm:$0xf]  ;;  %v12343_v16 = vld [vmem:[#allocation3 + $0x238] sm:$0xff]  }
 0x225   : > { %v3997_v47 = vadd.f32 %v12139_v35, %v3958_v28  ;;  %v4210_v27 = vsel %vm10768_vm3, 0, %v4114_v50  ;;  %v4051_v43 = vpack.c.bf16 %v4028_v31, %v4027_v42  ;;  %v9219_v2 = vadd.f32 %v9218_v39, %v12307_v25  ;;  %9890 = vmatpush3.bf16.msra.mxu1 %v10322_v41  ;;  %9427 = vmatprep.subr.bf16.mxu0 %v10339_v61  ;;  %v10347_v42 = vld [vmem:[#allocation3 + $0x1f8] sm:$0xff]  }
 0x226   : > { %v12338_v19 = vpop.f32.mrf.mxu0  ;;  %v5297_v51 = vor.u32 %v5296_v56, %v5292_v54  ;;  %v8617_v49 = vcombine.low %v4210_v27, %v4210_v27  ;;  %v8618_v13 = vcombine.high %v4210_v27, %v4210_v27  ;;  %4434 = vst [vmem:[#allocation2 + $0x68] sm:$0x1] %v8619_v62  ;;  %v3959_v3 = vmul.f32 %v12129_v6, %v3920_v4  ;;  %v5047_v8 = vld [vmem:[#allocation2 + $0x54] sm:$0xf] }
 0x227   : > { %v4029_v38 = vmax.f32 %v3997_v47, 0.0  ;;  %9891 = vmatprep.subr.bf16.mxu1 %v10333_v44  ;;  %v4116_v29 = vshrl.u32 %v4051_v43, 16  ;;  %v4119_v7 = vshll.u32 %v4051_v43, 16  ;;  %v5301_v25 = vrot.slane %v5299_v30, 1  ;;  %v5089_v56 = vld [vmem:[#allocation2 + $0x54] sm:$0xe] }
 0x228   : > { %v9224_v14 = vpop.f32.mrf.mxu0  ;;  %v3855_v39 = vadd.f32 %v9219_v2, %v3854_v22  ;;  %4433 = vst [vmem:[#allocation2 + $0x64] sm:$0xf] %v8618_v13  ;;  %4432 = vst [vmem:[#allocation2 + $0x60] sm:$0xf] %v8617_v49  ;;  %v3998_v41 = vadd.f32 %v12139_v35, %v3959_v3  ;;  %v12349_v36 = vcombine.low %v5045_v12, %v5046_v5  ;;  %v5515_v26 = vrot.slane %v12336_v40, 1  ;;  %v12371_v13 = vpop.f32.mrf.mxu1 }
 0x229   : > { %v8729_v20 = vcombine.low %v5088_v57, %v5046_v5  ;;  %9428 = vmatpush3.bf16.msra.mxu0 %v10340_v48  ;;  %v4118_v11 = vrot.slane %v4116_v29, 7  ;;  %v5302_v58 = vsel %vm978_vm5, %v5297_v51, %v5301_v25  ;;  %v9222_v45 = vadd.f32 %v9221_v1, %v12320_v17  ;;  %9892 = vmatpush3.bf16.msra.mxu1 %v10333_v44  ;;  %v5048_v22 = vld [vmem:[#allocation2 + $0x58] sm:$0xf]  ;;  %v12361_v1 = vld [vmem:[#allocation2 + $0x5c] ss:$0 sps:$4 sm:$0x11]  }
 0x22a   : > { %v9226_v9 = vpop.f32.mrf.mxu0  ;;  %v3921_v34 = vadd.f32 %v3855_v39, %v12083_v55  ;;  %9925 = vmatprep.subr.bf16.mxu0 %v12343_v16  ;;  %v4030_v59 = vmax.f32 %v3998_v41, 0.0  ;;  %5820 = vmatprep.mubr.bf16.mxu1 %v5302_v58  ;;  %v5304_v37 = vshrl.u32 %v12349_v36, 16  ;;  %v5306_v61 = vshll.u32 %v12349_v36, 16 }
 0x22b   : > { %v5514_v54 = vrot.slane %v8729_v20, 1  ;;  %9549 = vmatprep.subr.bf16.mxu1 %v10347_v42  ;;  %v4121_v28 = vor.u32 %v4119_v7, %v4118_v11  ;;  %v4227_v10 = vsel %vm10768_vm3, %v4118_v11, 0  ;;  %v3858_v17 = vadd.f32 %v9222_v45, %v3857_v21 }
 0x22c   : > { %v9227_v24 = vpop.f32.mrf.mxu0  ;;  %v3960_v55 = vmul.f32 %v12129_v6, %v3921_v34  ;;  %v8622_v44 = vcombine.low %v4227_v10, %v4227_v10  ;;  %v4052_v50 = vpack.c.bf16 %v4030_v59, %v4029_v38  ;;  %5821 = vmatmul.mubr.bf16.gmra.mxu1 %v12310_v60  ;;  %v5308_v31 = vrot.slane %v5306_v61, 1  ;;  %v3870_v34 = vpop.f32.mrf.mxu1  ;;  %v13483_v59 = vld [vmem:[#allocation9_spill] sm:$0xff]  ;;  %v13484_v10 = vld [vmem:[#allocation10_spill] sm:$0xff] }
 0x22d   : > { %v5516_v33 = vsel %vm1235_vm4, %v5514_v54, %v5515_v26  ;;  %v4211_v62 = vsel %vm10768_vm3, 0, %v4121_v28  ;;  %v3922_v4 = vadd.f32 %v3858_v17, %v12187_v32  ;;  %v5311_v30 = vshll.u32 %v12336_v40, 16  ;;  %v12393_v17 = vld [vmem:[#allocation2 + $0x68] ss:$0 sps:$4 sm:$0x11]  }
 0x22e   : > { %v9229_v48 = vpop.f32.mrf.mxu0  ;;  %v3999_v47 = vadd.f32 %v12139_v35, %v3960_v55  ;;  %9854 = vmatmul.mubr.bf16.gmra.mxu0 %v5516_v33  ;;  %v8620_v12 = vcombine.low %v4211_v62, %v4211_v62  ;;  %v8621_v27 = vcombine.high %v4211_v62, %v4211_v62  ;;  %4437 = vst [vmem:[#allocation2 + $0x74] sm:$0x1] %v8622_v44  ;;  %v4123_v43 = vshrl.u32 %v4052_v50, 16 }
 0x22f   : > { %v4126_v60 = vshll.u32 %v4052_v50, 16  ;;  %v3961_v5 = vmul.f32 %v12129_v6, %v3922_v4  ;;  %v5309_v57 = vor.u32 %v5308_v31, %v5304_v37  ;;  %v5313_v49 = vrot.slane %v5311_v30, 1  ;;  %v5049_v45 = vld [vmem:[#allocation2 + $0x60] sm:$0xf]  ;;  %v5050_v37 = vld [vmem:[#allocation2 + $0x64] sm:$0xf]  ;;  %v12403_v4 = vpop.f32.mrf.mxu1 }
 0x230   : > { %v9230_v51 = vpop.f32.mrf.mxu0  ;;  %v4031_v2 = vmax.f32 %v3999_v47, 0.0  ;;  %4436 = vst [vmem:[#allocation2 + $0x70] sm:$0xf] %v8621_v27  ;;  %4435 = vst [vmem:[#allocation2 + $0x6c] sm:$0xf] %v8620_v12  ;;  %v4125_v38 = vrot.slane %v4123_v43, 7  ;;  %v9225_v32 = vadd.f32 %v9224_v14, %v12338_v19  ;;  %v12374_v3 = vcombine.low %v5047_v8, %v5048_v22 }
 0x231   : > { %v8730_v40 = vcombine.low %v5089_v56, %v5048_v22  ;;  %v4000_v29 = vadd.f32 %v12139_v35, %v3961_v5  ;;  %v5314_v7 = vsel %vm978_vm5, %v5309_v57, %v5313_v49  ;;  %v5518_v25 = vrot.slane %v12361_v1, 1  ;;  %v5090_v33 = vld [vmem:[#allocation2 + $0x60] sm:$0xe]  ;;  %v12410_v12 = vld [vmem:[%s13463_s3] ss:$0 sm:$0xff] }
 0x232   : > { %v9232_v42 = vpop.f32.mrf.mxu0  ;;  %v9228_v6 = vadd.f32 %v9227_v24, %v9226_v9  ;;  %v4128_v39 = vor.u32 %v4126_v60, %v4125_v38  ;;  %v4228_v41 = vsel %vm10768_vm3, %v4125_v38, 0  ;;  %5828 = vmatprep.mubr.bf16.mxu1 %v5314_v7  ;;  %v3863_v20 = vadd.f32 %v12314_v53, %v9225_v32  ;;  %v13485_v32 = vld [vmem:[#allocation11_spill] sm:$0xff] }
 0x233   : > { %v5517_v26 = vrot.slane %v8730_v40, 1  ;;  %v8625_v14 = vcombine.low %v4228_v41, %v4228_v41  ;;  %v4032_v11 = vmax.f32 %v4000_v29, 0.0  ;;  %v5316_v35 = vshrl.u32 %v12374_v3, 16  ;;  %v3873_v41 = vpop.f32.mrf.mxu1 }
 0x234   : > { %v9233_v19 = vpop.f32.mrf.mxu0  ;;  %v3866_v58 = vadd.f32 %v12346_v63, %v9228_v6  ;;  %v4212_v9 = vsel %vm10768_vm3, 0, %v4128_v39  ;;  %5829 = vmatmul.mubr.bf16.gmra.mxu1 %v12349_v36  ;;  %v3923_v21 = vadd.f32 %v3863_v20, %v13483_v59  ;;  %v5318_v53 = vshll.u32 %v12374_v3, 16  ;;  %v12398_v36 = vld [vmem:[%s13462_s2] ss:$0 sm:$0xff] }
 0x235   : > { %v5519_v54 = vsel %vm1235_vm4, %v5517_v26, %v5518_v25  ;;  %v8623_v24 = vcombine.low %v4212_v9, %v4212_v9  ;;  %v8624_v63 = vcombine.high %v4212_v9, %v4212_v9  ;;  %4440 = vst [vmem:[#allocation2 + $0x80] sm:$0x1] %v8625_v14  ;;  %v4053_v28 = vpack.c.bf16 %v4032_v11, %v4031_v2 }
 0x236   : > { %v12390_v61 = vpop.f32.mrf.mxu0  ;;  %9857 = vmatprep.mubr.bf16.mxu0 %v5519_v54  ;;  %v3924_v55 = vadd.f32 %v3866_v58, %v13484_v10  ;;  %v3962_v8 = vmul.f32 %v12398_v36, %v3923_v21  ;;  %v5320_v22 = vrot.slane %v5318_v53, 1  ;;  %v5323_v44 = vshll.u32 %v12361_v1, 16 }
 0x237   : > { %v9231_v50 = vadd.f32 %v9230_v51, %v9229_v48  ;;  %4439 = vst [vmem:[#allocation2 + $0x7c] sm:$0xf] %v8624_v63  ;;  %4438 = vst [vmem:[#allocation2 + $0x78] sm:$0xf] %v8623_v24  ;;  %v4130_v56 = vshrl.u32 %v4053_v28, 16  ;;  %v4133_v62 = vshll.u32 %v4053_v28, 16  ;;  %v12405_v30 = vcombine.low %v5049_v45, %v5050_v37 }
 0x238   : > { %v9236_v31 = vpop.f32.mrf.mxu0  ;;  %v3963_v47 = vmul.f32 %v12398_v36, %v3924_v55  ;;  %v4001_v1 = vadd.f32 %v12410_v12, %v3962_v8  ;;  %v5321_v48 = vor.u32 %v5320_v22, %v5316_v35  ;;  %v5325_v27 = vrot.slane %v5323_v44, 1  ;;  %v5051_v26 = vld [vmem:[#allocation2 + $0x6c] sm:$0xf]  ;;  %v5052_v35 = vld [vmem:[#allocation2 + $0x70] sm:$0xf] }
 0x239   : > { %v3871_v43 = vadd.f32 %v9231_v50, %v3870_v34  ;;  %v4132_v51 = vrot.slane %v4130_v56, 7  ;;  %v8731_v5 = vcombine.low %v5090_v33, %v5050_v37  ;;  %v5521_v57 = vrot.slane %v12393_v17, 1  ;;  %v5091_v37 = vld [vmem:[#allocation2 + $0x6c] sm:$0xe]  ;;  %v12437_v56 = vpop.f32.mrf.mxu1 }
 0x23a   : > { %v9238_v60 = vpop.f32.mrf.mxu0  ;;  %v4002_v2 = vadd.f32 %v12410_v12, %v3963_v47  ;;  %v4033_v49 = vmax.f32 %v4001_v1, 0.0  ;;  %v5326_v38 = vsel %vm978_vm5, %v5321_v48, %v5325_v27  ;;  %v9234_v29 = vadd.f32 %v9233_v19, %v9232_v42  ;;  %v12430_v24 = vld [vmem:[#allocation2 + $0x74] ss:$0 sps:$4 sm:$0x11]  }
 0x23b   : > { %v3925_v40 = vadd.f32 %v3871_v43, %v13485_v32  ;;  %v4135_v25 = vor.u32 %v4133_v62, %v4132_v51  ;;  %v4229_v6 = vsel %vm10768_vm3, %v4132_v51, 0  ;;  %5836 = vmatprep.mubr.bf16.mxu1 %v5326_v38  ;;  %v5520_v20 = vrot.slane %v8731_v5, 1 }
 0x23c   : > { %v9239_v7 = vpop.f32.mrf.mxu0  ;;  %v4034_v39 = vmax.f32 %v4002_v2, 0.0  ;;  %v8628_v14 = vcombine.low %v4229_v6, %v4229_v6  ;;  %5837 = vmatmul.mubr.bf16.gmra.mxu1 %v12374_v3  ;;  %v3874_v58 = vadd.f32 %v9234_v29, %v3873_v41  ;;  %v5328_v34 = vshrl.u32 %v12405_v30, 16 }
 0x23d   : > { %v3964_v11 = vmul.f32 %v12398_v36, %v3925_v40  ;;  %v4213_v19 = vsel %vm10768_vm3, 0, %v4135_v25  ;;  %v5522_v9 = vsel %vm1235_vm4, %v5520_v20, %v5521_v57  ;;  %v5330_v59 = vshll.u32 %v12405_v30, 16  ;;  %v13486_v40 = vld [vmem:[#allocation12_spill] sm:$0xff] }
 0x23e   : > { %v12422_v42 = vpop.f32.mrf.mxu0  ;;  %v4054_v45 = vpack.c.bf16 %v4034_v39, %v4033_v49  ;;  %v8626_v21 = vcombine.low %v4213_v19, %v4213_v19  ;;  %v8627_v54 = vcombine.high %v4213_v19, %v4213_v19  ;;  %4443 = vst [vmem:[#allocation2 + $0x8c] sm:$0x1] %v8628_v14  ;;  %9858 = vmatmul.mubr.bf16.gmra.mxu0 %v5522_v9  ;;  %v5335_v8 = vshll.u32 %v12393_v17, 16  ;;  %v5053_v49 = vld [vmem:[#allocation2 + $0x78] sm:$0xf] }
 0x23f   : > { %v4003_v3 = vadd.f32 %v12410_v12, %v3964_v11  ;;  %v3926_v53 = vadd.f32 %v3874_v58, %v12191_v0  ;;  %v5332_v55 = vrot.slane %v5330_v59, 1  ;;  %v9237_v50 = vadd.f32 %v9236_v31, %v12390_v61  ;;  %v5054_v6 = vld [vmem:[#allocation2 + $0x7c] sm:$0xf]  ;;  %v10303_v58 = vld [vmem:[#allocation2 + $0x80] ss:$0 sps:$4 sm:$0x11]  }
 0x240   : > { %v9242_v63 = vpop.f32.mrf.mxu0  ;;  %v4137_v28 = vshrl.u32 %v4054_v45, 16  ;;  %v4140_v10 = vshll.u32 %v4054_v45, 16  ;;  %4442 = vst [vmem:[#allocation2 + $0x88] sm:$0xf] %v8627_v54  ;;  %4441 = vst [vmem:[#allocation2 + $0x84] sm:$0xf] %v8626_v21  ;;  %v12435_v33 = vcombine.low %v5051_v26, %v5052_v35  ;;  %v8732_v48 = vcombine.low %v5091_v37, %v5052_v35 }
 0x241   : > { %v4035_v22 = vmax.f32 %v4003_v3, 0.0  ;;  %v3965_v44 = vmul.f32 %v12398_v36, %v3926_v53  ;;  %v5333_v47 = vor.u32 %v5332_v55, %v5328_v34  ;;  %v5337_v1 = vrot.slane %v5335_v8, 1  ;;  %v13487_v34 = vld [vmem:[#allocation13_spill] sm:$0xff] }
 0x242   : > { %v9244_v0 = vpop.f32.mrf.mxu0  ;;  %v4139_v62 = vrot.slane %v4137_v28, 7  ;;  %v3879_v17 = vadd.f32 %v12371_v13, %v9237_v50  ;;  %v5524_v43 = vrot.slane %v12430_v24, 1  ;;  %v9240_v51 = vadd.f32 %v9239_v7, %v9238_v60  ;;  %v3886_v13 = vpop.f32.mrf.mxu1  ;;  %v5092_v9 = vld [vmem:[#allocation2 + $0x78] sm:$0xe] }
 0x243   : > { %v4004_v27 = vadd.f32 %v12410_v12, %v3965_v44  ;;  %v5338_v31 = vsel %vm978_vm5, %v5333_v47, %v5337_v1  ;;  %v5523_v57 = vrot.slane %v8732_v48, 1  ;;  %v5340_v41 = vshrl.u32 %v12435_v33, 16 }
 0x244   : > { %v9245_v2 = vpop.f32.mrf.mxu0  ;;  %v4142_v5 = vor.u32 %v4140_v10, %v4139_v62  ;;  %v4230_v61 = vsel %vm10768_vm3, %v4139_v62, 0  ;;  %5844 = vmatprep.mubr.bf16.mxu1 %v5338_v31  ;;  %v3927_v29 = vadd.f32 %v3879_v17, %v13486_v40  ;;  %v3882_v25 = vadd.f32 %v12403_v4, %v9240_v51  ;;  %v12460_v3 = vpop.f32.mrf.mxu1 }
 0x245   : > { %v8631_v38 = vcombine.low %v4230_v61, %v4230_v61  ;;  %v4036_v32 = vmax.f32 %v4004_v27, 0.0  ;;  %5845 = vmatmul.mubr.bf16.gmra.mxu1 %v12405_v30  ;;  %v5525_v7 = vsel %vm1235_vm4, %v5523_v57, %v5524_v43  ;;  %v5342_v20 = vshll.u32 %v12435_v33, 16 }
 0x246   : > { %v12447_v39 = vpop.f32.mrf.mxu0  ;;  %v4214_v60 = vsel %vm10768_vm3, 0, %v4142_v5  ;;  %v3966_v4 = vmul.f32 %v12398_v36, %v3927_v29  ;;  %9861 = vmatprep.mubr.bf16.mxu0 %v5525_v7  ;;  %v3928_v35 = vadd.f32 %v3882_v25, %v13487_v34  ;;  %v5347_v45 = vshll.u32 %v12430_v24, 16  ;;  %v3889_v27 = vpop.f32.mrf.mxu1 }
 0x247   : > { %v8629_v26 = vcombine.low %v4214_v60, %v4214_v60  ;;  %v8630_v14 = vcombine.high %v4214_v60, %v4214_v60  ;;  %4446 = vst [vmem:[#allocation2 + $0x98] sm:$0x1] %v8631_v38  ;;  %v4055_v11 = vpack.c.bf16 %v4036_v32, %v4035_v22  ;;  %v5344_v19 = vrot.slane %v5342_v20, 1  ;;  %v5055_v51 = vld [vmem:[#allocation2 + $0x84] sm:$0xf] }
 0x248   : > { %v9243_v30 = vadd.f32 %v9242_v63, %v12422_v42  ;;  %v4005_v54 = vadd.f32 %v12410_v12, %v3966_v4  ;;  %v12462_v53 = vcombine.low %v5053_v49, %v5054_v6  ;;  %v9248_v37 = vpop.f32.mrf.mxu0  ;;  %v3967_v28 = vmul.f32 %v12398_v36, %v3928_v35 }
 0x249   : > { %4445 = vst [vmem:[#allocation2 + $0x94] sm:$0xf] %v8630_v14  ;;  %4444 = vst [vmem:[#allocation2 + $0x90] sm:$0xf] %v8629_v26  ;;  %v4144_v59 = vshrl.u32 %v4055_v11, 16  ;;  %v4147_v21 = vshll.u32 %v4055_v11, 16  ;;  %v5345_v10 = vor.u32 %v5344_v19, %v5340_v41  ;;  %v8733_v42 = vcombine.low %v5092_v9, %v5054_v6 }
 0x24a   : > { %v5349_v55 = vrot.slane %v5347_v45, 1  ;;  %v3887_v8 = vadd.f32 %v9243_v30, %v3886_v13  ;;  %v4037_v22 = vmax.f32 %v4005_v54, 0.0  ;;  %v5527_v63 = vrot.slane %v10303_v58, 1  ;;  %v9250_v5 = vpop.f32.mrf.mxu0  ;;  %v10308_v6 = vld [vmem:[#allocation2 + $0x8c] ss:$0 sps:$4 sm:$0x11]  }
 0x24b   : > { %v4146_v24 = vrot.slane %v4144_v59, 7  ;;  %v4006_v44 = vadd.f32 %v12410_v12, %v3967_v28  ;;  %v9246_v47 = vadd.f32 %v9245_v2, %v9244_v0  ;;  %v5526_v17 = vrot.slane %v8733_v42, 1 }
 0x24c   : > { %v5350_v50 = vsel %vm978_vm5, %v5345_v10, %v5349_v55  ;;  %v3929_v62 = vadd.f32 %v3887_v8, %v12115_v18  ;;  %v5352_v43 = vshrl.u32 %v12462_v53, 16  ;;  %v5056_v18 = vld [vmem:[#allocation2 + $0x88] sm:$0xf]  ;;  %v5354_v38 = vshll.u32 %v12462_v53, 16  ;;  %v9251_v26 = vpop.f32.mrf.mxu0 }
 0x24d   : > { %v4149_v1 = vor.u32 %v4147_v21, %v4146_v24  ;;  %v4231_v48 = vsel %vm10768_vm3, %v4146_v24, 0  ;;  %5852 = vmatprep.mubr.bf16.mxu1 %v5350_v50  ;;  %v4038_v31 = vmax.f32 %v4006_v44, 0.0  ;;  %v3890_v49 = vadd.f32 %v9246_v47, %v3889_v27 }
 0x24e   : > { %v8634_v61 = vcombine.low %v4231_v48, %v4231_v48  ;;  %5853 = vmatmul.mubr.bf16.gmra.mxu1 %v12435_v33  ;;  %v3968_v57 = vmul.f32 %v12398_v36, %v3929_v62  ;;  %v5528_v2 = vsel %vm1235_vm4, %v5526_v17, %v5527_v63  ;;  %v5359_v32 = vshll.u32 %v10303_v58, 16  ;;  %v5093_v33 = vld [vmem:[#allocation2 + $0x84] sm:$0xe] }
 0x24f   : > { %v4215_v0 = vsel %vm10768_vm3, 0, %v4149_v1  ;;  %v4056_v25 = vpack.c.bf16 %v4038_v31, %v4037_v22  ;;  %9862 = vmatmul.mubr.bf16.gmra.mxu0 %v5528_v2  ;;  %v3930_v60 = vadd.f32 %v3890_v49, %v12203_v52  ;;  %v5356_v7 = vrot.slane %v5354_v38, 1  ;;  %v10314_v22 = vld [vmem:[#allocation2 + $0x98] ss:$0 sps:$4 sm:$0x11]  }
 0x250   : > { %v8632_v40 = vcombine.low %v4215_v0, %v4215_v0  ;;  %v8633_v29 = vcombine.high %v4215_v0, %v4215_v0  ;;  %4449 = vst [vmem:[#allocation2 + $0xa4] sm:$0x1] %v8634_v61  ;;  %v4007_v13 = vadd.f32 %v12410_v12, %v3968_v57  ;;  %v5361_v41 = vrot.slane %v5359_v32, 1  ;;  %v5057_v8 = vld [vmem:[#allocation2 + $0x90] sm:$0xf] }
 0x251   : > { %v9249_v20 = vadd.f32 %v9248_v37, %v12447_v39  ;;  %v4151_v14 = vshrl.u32 %v4056_v25, 16  ;;  %v4154_v11 = vshll.u32 %v4056_v25, 16  ;;  %v12480_v58 = vcombine.low %v5055_v51, %v5056_v18  ;;  %v5058_v24 = vld [vmem:[#allocation2 + $0x94] sm:$0xf]  ;;  %v5094_v50 = vld [vmem:[#allocation2 + $0x90] sm:$0xe] }
 0x252   : > { %4448 = vst [vmem:[#allocation2 + $0xa0] sm:$0xf] %v8633_v29  ;;  %4447 = vst [vmem:[#allocation2 + $0x9c] sm:$0xf] %v8632_v40  ;;  %v4039_v4 = vmax.f32 %v4007_v13, 0.0  ;;  %v3969_v34 = vmul.f32 %v12398_v36, %v3930_v60  ;;  %v5357_v35 = vor.u32 %v5356_v7, %v5352_v43  ;;  %v8734_v45 = vcombine.low %v5093_v33, %v5056_v18 }
 0x253   : > { %v3895_v19 = vadd.f32 %v12437_v56, %v9249_v20  ;;  %v4153_v30 = vrot.slane %v4151_v14, 7  ;;  %v5530_v52 = vrot.slane %v10308_v6, 1  ;;  %v9252_v9 = vadd.f32 %v9251_v26, %v9250_v5 }
 0x254   : > { %v5364_v59 = vshrl.u32 %v12480_v58, 16  ;;  %v4008_v39 = vadd.f32 %v12410_v12, %v3969_v34  ;;  %v5362_v21 = vsel %vm978_vm5, %v5357_v35, %v5361_v41  ;;  %v5529_v37 = vrot.slane %v8734_v45, 1 }
 0x255   : > { %v3931_v54 = vadd.f32 %v3895_v19, %v12120_v15  ;;  %v4156_v28 = vor.u32 %v4154_v11, %v4153_v30  ;;  %v4232_v10 = vsel %vm10768_vm3, %v4153_v30, 0  ;;  %5860 = vmatprep.mubr.bf16.mxu1 %v5362_v21  ;;  %v3898_v56 = vadd.f32 %v12460_v3, %v9252_v9 }
 0x256   : > { %v5366_v55 = vshll.u32 %v12480_v58, 16  ;;  %v8637_v42 = vcombine.low %v4232_v10, %v4232_v10  ;;  %v4040_v63 = vmax.f32 %v4008_v39, 0.0  ;;  %5861 = vmatmul.mubr.bf16.gmra.mxu1 %v12462_v53  ;;  %v5531_v15 = vsel %vm1235_vm4, %v5529_v37, %v5530_v52 }
 0x257   : > { %v3970_v44 = vmul.f32 %v12398_v36, %v3931_v54  ;;  %v4216_v62 = vsel %vm10768_vm3, 0, %v4156_v28  ;;  %9865 = vmatprep.mubr.bf16.mxu0 %v5531_v15  ;;  %v3932_v3 = vadd.f32 %v3898_v56, %v12123_v23  ;;  %v5371_v1 = vshll.u32 %v10308_v6, 16  ;;  %v10319_v29 = vld [vmem:[#allocation2 + $0xa4] ss:$0 sps:$4 sm:$0x11]  }
 0x258   : > { %v5368_v47 = vrot.slane %v5366_v55, 1  ;;  %v8635_v48 = vcombine.low %v4216_v62, %v4216_v62  ;;  %v8636_v27 = vcombine.high %v4216_v62, %v4216_v62  ;;  %4452 = vst [vmem:[#allocation2 + $0xb0] sm:$0x1] %v8637_v42  ;;  %v4057_v17 = vpack.c.bf16 %v4040_v63, %v4039_v4 }
 0x259   : > { %v4009_v43 = vadd.f32 %v12410_v12, %v3970_v44  ;;  %v3971_v53 = vmul.f32 %v12398_v36, %v3932_v3  ;;  %v5373_v5 = vrot.slane %v5371_v1, 1  ;;  %v12500_v61 = vcombine.low %v5057_v8, %v5058_v24  ;;  %v5059_v31 = vld [vmem:[#allocation2 + $0x9c] sm:$0xf]  ;;  %v5060_v18 = vld [vmem:[#allocation2 + $0xa0] sm:$0xf] }
 0x25a   : > { %v5369_v51 = vor.u32 %v5368_v47, %v5364_v59  ;;  %4451 = vst [vmem:[#allocation2 + $0xac] sm:$0xf] %v8636_v27  ;;  %4450 = vst [vmem:[#allocation2 + $0xa8] sm:$0xf] %v8635_v48  ;;  %v4158_v57 = vshrl.u32 %v4057_v17, 16  ;;  %v4161_v49 = vshll.u32 %v4057_v17, 16  ;;  %v8735_v23 = vcombine.low %v5094_v50, %v5058_v24 }
 0x25b   : > { %v5095_v0 = vld [vmem:[#allocation2 + $0x9c] sm:$0xe]  ;;  %v4041_v2 = vmax.f32 %v4009_v43, 0.0  ;;  %v4010_v38 = vadd.f32 %v12410_v12, %v3971_v53  ;;  %v5533_v40 = vrot.slane %v10314_v22, 1  ;;  %v5378_v13 = vshll.u32 %v12500_v61, 16 }
 0x25c   : > { %v5374_v32 = vsel %vm978_vm5, %v5369_v51, %v5373_v5  ;;  %v4160_v36 = vrot.slane %v4158_v57, 7  ;;  %v5532_v25 = vrot.slane %v8735_v23, 1  ;;  %v5383_v33 = vshll.u32 %v10314_v22, 16  ;;  %v4459_v59 = vld [vmem:[#allocation2] sm:$0xf] }
 0x25d   : > { %5868 = vmatprep.mubr.bf16.mxu1 %v5374_v32  ;;  %v4042_v6 = vmax.f32 %v4010_v38, 0.0  ;;  %v5376_v60 = vshrl.u32 %v12500_v61, 16  ;;  %v12506_v7 = vcombine.low %v5059_v31, %v5060_v18  ;;  %v8736_v41 = vcombine.low %v5095_v0, %v5060_v18  ;;  %v12518_v22 = vld [vmem:[#allocation2 + $0x4] sm:$0xf] }
 0x25e   : > { %v4163_v20 = vor.u32 %v4161_v49, %v4160_v36  ;;  %v4233_v12 = vsel %vm10768_vm3, %v4160_v36, 0  ;;  %5869 = vmatmul.mubr.bf16.gmra.mxu1 %v12480_v58  ;;  %v5534_v26 = vsel %vm1235_vm4, %v5532_v25, %v5533_v40  ;;  %v5380_v14 = vrot.slane %v5378_v13, 1  ;;  %v12534_v49 = vld [vmem:[#allocation2 + $0x8] ss:$0 sps:$4 sm:$0x11]  }
 0x25f   : > { %v8640_v11 = vcombine.low %v4233_v12, %v4233_v12  ;;  %v4058_v4 = vpack.c.bf16 %v4042_v6, %v4041_v2  ;;  %9866 = vmatmul.mubr.bf16.gmra.mxu0 %v5534_v26  ;;  %v5535_v34 = vrot.slane %v8736_v41, 1  ;;  %v5536_v35 = vrot.slane %v10319_v29, 1  ;;  %v10325_v9 = vld [vmem:[#allocation2 + $0xb0] ss:$0 sps:$4 sm:$0x11]  }
 0x260   : > { %v4217_v19 = vsel %vm10768_vm3, 0, %v4163_v20  ;;  %v5381_v45 = vor.u32 %v5380_v14, %v5376_v60  ;;  %v5385_v30 = vrot.slane %v5383_v33, 1  ;;  %v5390_v52 = vshll.u32 %v12506_v7, 16  ;;  %v4461_v60 = vld [vmem:[#allocation2 + $0xc] sm:$0xf] }
 0x261   : > { %v8638_v39 = vcombine.low %v4217_v19, %v4217_v19  ;;  %v8639_v21 = vcombine.high %v4217_v19, %v4217_v19  ;;  %4455 = vst [vmem:[#allocation2 + $0xbc] sm:$0x1] %v8640_v11  ;;  %v4165_v58 = vshrl.u32 %v4058_v4, 16  ;;  %v5388_v54 = vshrl.u32 %v12506_v7, 16  ;;  %v5061_v37 = vld [vmem:[#allocation2 + $0xa8] sm:$0xf] }
 0x262   : > { %v5062_v28 = vld [vmem:[#allocation2 + $0xac] sm:$0xf]  ;;  %v5386_v10 = vsel %vm978_vm5, %v5381_v45, %v5385_v30  ;;  %v5537_v56 = vsel %vm1235_vm4, %v5535_v34, %v5536_v35  ;;  %v5392_v55 = vrot.slane %v5390_v52, 1  ;;  %v5395_v8 = vshll.u32 %v10319_v29, 16  ;;  %v5096_v24 = vld [vmem:[#allocation2 + $0xa8] sm:$0xe] }
 0x263   : > { %4454 = vst [vmem:[#allocation2 + $0xb8] sm:$0xf] %v8639_v21  ;;  %4453 = vst [vmem:[#allocation2 + $0xb4] sm:$0xf] %v8638_v39  ;;  %v4167_v42 = vrot.slane %v4165_v58, 7  ;;  %v4168_v63 = vshll.u32 %v4058_v4, 16  ;;  %5876 = vmatprep.mubr.bf16.mxu1 %v5386_v10  ;;  %9869 = vmatprep.mubr.bf16.mxu0 %v5537_v56  ;;  %v12520_v44 = vcombine.low %v5061_v37, %v5062_v28 }
 0x264   : > { %v8737_v15 = vcombine.low %v5096_v24, %v5062_v28  ;;  %v5393_v50 = vor.u32 %v5392_v55, %v5388_v54  ;;  %v5397_v62 = vrot.slane %v5395_v8, 1  ;;  %v5539_v3 = vrot.slane %v10325_v9, 1  ;;  %v12540_v41 = vld [vmem:[#allocation2 + $0x10] sm:$0xf]  ;;  %v4463_v28 = vld [vmem:[#allocation2 + $0x18] sm:$0xf] }
 0x265   : > { %v5407_v47 = vshll.u32 %v10325_v9, 16  ;;  %v4170_v1 = vor.u32 %v4168_v63, %v4167_v42  ;;  %v4234_v48 = vsel %vm10768_vm3, %v4167_v42, 0  ;;  %v12525_v17 = vcombine.low %v4459_v59, %v12518_v22  ;;  %v12549_v24 = vld [vmem:[#allocation2 + $0x1c] sm:$0xf] }
 0x266   : > { %v5538_v27 = vrot.slane %v8737_v15, 1  ;;  %v8643_v43 = vcombine.low %v4234_v48, %v4234_v48  ;;  %5877 = vmatmul.mubr.bf16.gmra.mxu1 %v12500_v61  ;;  %v5398_v53 = vsel %vm978_vm5, %v5393_v50, %v5397_v62  ;;  %v5402_v51 = vshll.u32 %v12520_v44, 16  ;;  %v12552_v63 = vld [vmem:[#allocation2 + $0x14] ss:$0 sps:$4 sm:$0x11]  }
 0x267   : > { %v4218_v5 = vsel %vm10768_vm3, 0, %v4170_v1  ;;  %5884 = vmatprep.mubr.bf16.mxu1 %v5398_v53  ;;  %v5400_v57 = vshrl.u32 %v12520_v44, 16  ;;  %v5409_v61 = vrot.slane %v5407_v47, 1  ;;  %v4670_v38 = vshll.u32 %v12525_v17, 16  ;;  %v4507_v53 = vld [vmem:[#allocation2] sm:$0xe] }
 0x268   : > { %v5540_v31 = vsel %vm1235_vm4, %v5538_v27, %v5539_v3  ;;  %v8641_v23 = vcombine.low %v4218_v5, %v4218_v5  ;;  %v8642_v18 = vcombine.high %v4218_v5, %v4218_v5  ;;  %4458 = vst [vmem:[#allocation2 + $0xc8] sm:$0x1] %v8643_v43  ;;  %v5404_v0 = vrot.slane %v5402_v51, 1  ;;  %v10330_v2 = vld [vmem:[#allocation2 + $0xbc] ss:$0 sps:$4 sm:$0x11]  }
 0x269   : > { %9870 = vmatmul.mubr.bf16.gmra.mxu0 %v5540_v31  ;;  %v4668_v33 = vshrl.u32 %v12525_v17, 16  ;;  %v4675_v6 = vshll.u32 %v12534_v49, 16  ;;  %v5542_v12 = vrot.slane %v10330_v2, 1  ;;  %v4672_v14 = vrot.slane %v4670_v38, 1 }
 0x26a   : > { %4457 = vst [vmem:[#allocation2 + $0xc4] sm:$0xf] %v8642_v18  ;;  %4456 = vst [vmem:[#allocation2 + $0xc0] sm:$0xf] %v8641_v23  ;;  %v5405_v46 = vor.u32 %v5404_v0, %v5400_v57  ;;  %v5063_v32 = vld [vmem:[#allocation2 + $0xb4] sm:$0xf]  ;;  %v12545_v19 = vcombine.low %v4461_v60, %v12540_v41  ;;  %v12557_v1 = vcombine.low %v4463_v28, %v12549_v24 }
 0x26b   : > { %v5064_v40 = vld [vmem:[#allocation2 + $0xb8] sm:$0xf]  ;;  %v5097_v29 = vld [vmem:[#allocation2 + $0xb4] sm:$0xe]  ;;  %v5419_v11 = vshll.u32 %v10330_v2, 16  ;;  %v4677_v30 = vrot.slane %v4675_v6, 1  ;;  %v4673_v21 = vor.u32 %v4672_v14, %v4668_v33  ;;  %v8676_v57 = vcombine.low %v4507_v53, %v12518_v22 }
 0x26c   : > { %v8706_v36 = vcombine.low %v5063_v32, %v5064_v40  ;;  %v8738_v25 = vcombine.low %v5097_v29, %v5064_v40  ;;  %v5410_v13 = vsel %vm978_vm5, %v5405_v46, %v5409_v61  ;;  %v4682_v37 = vshll.u32 %v12545_v19, 16  ;;  %v12564_v23 = vld [vmem:[#allocation2 + $0x20] ss:$0 sps:$4 sm:$0x11]   ;;  %v4465_v0 = vld [vmem:[#allocation2 + $0x24] sm:$0xf] }
 0x26d   : > { %v5421_v58 = vrot.slane %v5419_v11, 1  ;;  %v4678_v42 = vsel %vm978_vm5, %v4673_v21, %v4677_v30  ;;  %v4680_v27 = vshrl.u32 %v12545_v19, 16  ;;  %v4687_v43 = vshll.u32 %v12552_v63, 16  ;;  %v12566_v61 = vld [vmem:[#allocation2 + $0x28] sm:$0xf]  ;;  %v10351_v21 = vld [vmem:[#allocation3 + $0x1b8] sm:$0xff]  }
 0x26e   : > { %v5541_v20 = vrot.slane %v8738_v25, 1  ;;  %v5414_v26 = vshll.u32 %v8706_v36, 16  ;;  %5885 = vmatmul.mubr.bf16.gmra.mxu1 %v12506_v7  ;;  %v5412_v34 = vshrl.u32 %v8706_v36, 16  ;;  %v4684_v47 = vrot.slane %v4682_v37, 1  ;;  %v10369_v2 = vld [vmem:[#allocation3 + $0x230] sm:$0xff]  }
 0x26f   : > { %5892 = vmatprep.mubr.bf16.mxu1 %v5410_v13  ;;  %v10336_v45 = vld [vmem:[#allocation2 + $0xc8] ss:$0 sps:$4 sm:$0x11]   ;;  %v4694_v5 = vshll.u32 %v12557_v1, 16  ;;  %v4689_v18 = vrot.slane %v4687_v43, 1  ;;  %v4923_v32 = vrot.slane %v8676_v57, 1  ;;  %v12573_v22 = vcombine.low %v4465_v0, %v12566_v61 }
 0x270   : > { %v5543_v4 = vsel %vm1235_vm4, %v5541_v20, %v5542_v12  ;;  %v5416_v35 = vrot.slane %v5414_v26, 1  ;;  %v5545_v55 = vrot.slane %v10336_v45, 1  ;;  %v5431_v3 = vshll.u32 %v10336_v45, 16  ;;  %v4508_v13 = vld [vmem:[#allocation2 + $0xc] sm:$0xe]  ;;  %v10403_v26 = vld [vmem:[#allocation3 + $0x220] sm:$0xff]  }
 0x271   : > { %9873 = vmatprep.mubr.bf16.mxu0 %v5543_v4  ;;  %v5065_v9 = vld [vmem:[#allocation2 + $0xc0] sm:$0xf]  ;;  %v5066_v59 = vld [vmem:[#allocation2 + $0xc4] sm:$0xf]  ;;  %v4696_v46 = vrot.slane %v4694_v5, 1  ;;  %v4924_v40 = vrot.slane %v12534_v49, 1  ;;  %v8677_v49 = vcombine.low %v4508_v13, %v12540_v41 }
 0x272   : > { %v5417_v52 = vor.u32 %v5416_v35, %v5412_v34  ;;  %v5098_v39 = vld [vmem:[#allocation2 + $0xc0] sm:$0xe]  ;;  %v8707_v54 = vcombine.low %v5065_v9, %v5066_v59  ;;  %v5433_v51 = vrot.slane %v5431_v3, 1  ;;  %v4692_v29 = vshrl.u32 %v12557_v1, 16  ;;  %v4467_v20 = vld [vmem:[#allocation2 + $0x30] sm:$0xf] }
 0x273   : > { %v8739_v7 = vcombine.low %v5098_v39, %v5066_v59  ;;  %v4699_v25 = vshll.u32 %v12564_v23, 16  ;;  %v4925_v6 = vsel %vm1235_vm4, %v4923_v32, %v4924_v40  ;;  %v4706_v60 = vshll.u32 %v12573_v22, 16  ;;  %v4468_v12 = vld [vmem:[#allocation2 + $0x34] sm:$0xf]  ;;  %v4512_v53 = vld [vmem:[#allocation2 + $0x3c] sm:$0xe] }
 0x274   : > { %v5422_v10 = vsel %vm978_vm5, %v5417_v52, %v5421_v58  ;;  %v5426_v8 = vshll.u32 %v8707_v54, 16  ;;  %v5424_v50 = vshrl.u32 %v8707_v54, 16  ;;  %v4697_v33 = vor.u32 %v4696_v46, %v4692_v29  ;;  %v12581_v11 = vld [vmem:[#allocation2 + $0x2c] ss:$0 sps:$4 sm:$0x11]   ;;  %v10413_v45 = vld [vmem:[#allocation3 + $0x218] sm:$0xff]  }
 0x275   : > { %v5544_v56 = vrot.slane %v8739_v7, 1  ;;  %v12585_v34 = vcombine.low %v4467_v20, %v4468_v12  ;;  %v4708_v35 = vrot.slane %v4706_v60, 1  ;;  %v4926_v41 = vrot.slane %v8677_v49, 1  ;;  %v4510_v52 = vld [vmem:[#allocation2 + $0x24] sm:$0xe]  ;;  %v10428_v13 = vld [vmem:[#allocation3 + $0x200] sm:$0xff]  }
 0x276   : > { %5893 = vmatmul.mubr.bf16.gmra.mxu1 %v12520_v44  ;;  %v5428_v62 = vrot.slane %v5426_v8, 1  ;;  %v4685_v44 = vor.u32 %v4684_v47, %v4680_v27  ;;  %v4704_v9 = vshrl.u32 %v12573_v22, 16  ;;  %v4711_v59 = vshll.u32 %v12581_v11, 16  ;;  %v10364_v47 = vld [vmem:[#allocation3 + $0x1e8] sm:$0xff]   ;;  %v4513_v57 = vld [vmem:[#allocation2 + $0x48] sm:$0xe] }
 0x277   : > { %v5546_v15 = vsel %vm1235_vm4, %v5544_v56, %v5545_v55  ;;  %5900 = vmatprep.mubr.bf16.mxu1 %v5422_v10  ;;  %v4927_v39 = vrot.slane %v12552_v63, 1  ;;  %v4930_v58 = vrot.slane %v12564_v23, 1  ;;  %v4718_v37 = vshll.u32 %v12585_v34, 16  ;;  %v4469_v56 = vld [vmem:[#allocation2 + $0x3c] sm:$0xf]  ;;  %v10423_v5 = vld [vmem:[#allocation3 + $0x208] sm:$0xff]  }
 0x278   : > { %9874 = vmatmul.mubr.bf16.gmra.mxu0 %v5546_v15  ;;  %v5429_v48 = vor.u32 %v5428_v62, %v5424_v50  ;;  %v4690_v38 = vsel %vm978_vm5, %v4685_v44, %v4689_v18  ;;  %v4709_v7 = vor.u32 %v4708_v35, %v4704_v9  ;;  %v8679_v10 = vcombine.low %v4510_v52, %v12566_v61  ;;  %v4470_v55 = vld [vmem:[#allocation2 + $0x40] sm:$0xf]  ;;  %v10418_v15 = vld [vmem:[#allocation3 + $0x210] sm:$0xff]   ;;  %v10373_v61 = vld [vmem:[#allocation3 + $0x1e0] sm:$0xff]  }
 0x279   : > { %6254 = vmatprep.mubr.bf16.mxu0 %v4678_v42  ;;  %v4928_v28 = vsel %vm1235_vm4, %v4926_v41, %v4927_v39  ;;  %v4713_v63 = vrot.slane %v4711_v59, 1  ;;  %v10360_v50 = vld [vmem:[#allocation3 + $0x1b0] sm:$0xff]   ;;  %v12597_v3 = vcombine.low %v4469_v56, %v4470_v55  ;;  %v10368_v23 = vld [vmem:[#allocation3 + $0x1a8] sm:$0xff]   ;;  %v8681_v46 = vcombine.low %v4512_v53, %v4470_v55 }
 0x27a   : > { %v5434_v31 = vsel %vm978_vm5, %v5429_v48, %v5433_v51  ;;  %v4720_v48 = vrot.slane %v4718_v37, 1  ;;  %v4932_v27 = vrot.slane %v8679_v10, 1  ;;  %v4716_v51 = vshrl.u32 %v12585_v34, 16  ;;  %v4471_v32 = vld [vmem:[#allocation2 + $0x48] sm:$0xf] }
 0x27b   : > { %v4714_v62 = vsel %vm978_vm5, %v4709_v7, %v4713_v63  ;;  %v10362_v29 = vld [vmem:[#allocation2 + $0x44] ss:$0 sps:$4 sm:$0x11]   ;;  %v4938_v20 = vrot.slane %v8681_v46, 1  ;;  %v10390_v59 = vld [vmem:[#allocation3 + $0x1d0] sm:$0xff]  }
 0x27c   : > { %v4721_v0 = vor.u32 %v4720_v48, %v4716_v51  ;;  %v4939_v35 = vrot.slane %v10362_v29, 1  ;;  %v4476_v41 = vld [vmem:[#allocation2 + $0x64] sm:$0xf]  ;;  %v12615_v37 = vld [vmem:[#allocation2 + $0x5c] ss:$0 sps:$4 sm:$0x11]  }
 0x27d   : > { %v12619_v56 = vld [vmem:[#allocation2 + $0x68] ss:$0 sps:$4 sm:$0x11]   ;;  %v4478_v63 = vld [vmem:[#allocation2 + $0x70] sm:$0xf]  ;;  %v4945_v48 = vrot.slane %v12615_v37, 1 }
 0x27e   : > { %5901 = vmatmul.mubr.bf16.gmra.mxu1 %v8706_v36  ;;  %v10386_v36 = vld [vmem:[#allocation3 + $0x228] sm:$0xff]   ;;  %v4940_v39 = vsel %vm1235_vm4, %v4938_v20, %v4939_v35  ;;  %v4948_v53 = vrot.slane %v12619_v56, 1 }
 0x27f   : > { %5908 = vmatprep.mubr.bf16.mxu1 %v5434_v31  ;;  %v4933_v31 = vrot.slane %v12581_v11, 1  ;;  %v4728_v11 = vshrl.u32 %v12597_v3, 16  ;;  %v12637_v46 = vld [vmem:[#allocation2 + $0x80] ss:$0 sps:$4 sm:$0x11]  }
 0x280   : > { %6255 = vmatmul.mubr.bf16.vlgmr.msra.gmra.mxu0 %v12525_v17  ;;  %v4509_v17 = vld [vmem:[#allocation2 + $0x18] sm:$0xe] }
 0x281   : > { %6262 = vmatprep.mubr.bf16.mxu0 %v4690_v38  ;;  %9926 = vmatpush3.bf16.msra.mxu0 %v12343_v16  ;;  %v4701_v16 = vrot.slane %v4699_v25, 1  ;;  %v8678_v14 = vcombine.low %v4509_v17, %v12549_v24  ;;  %v10358_v24 = vld [vmem:[#allocation2 + $0x38] ss:$0 sps:$4 sm:$0x11]   ;;  %v4934_v38 = vsel %vm1235_vm4, %v4932_v27, %v4933_v31  ;;  %v12626_v27 = vld [vmem:[#allocation2 + $0x7c] sm:$0xf] }
 0x282   : > { %9927 = vmatprep.subr.bf16.mxu0 %v10369_v2  ;;  %v4723_v44 = vshll.u32 %v10358_v24, 16  ;;  %v4936_v18 = vrot.slane %v10358_v24, 1  ;;  %v10377_v17 = vld [vmem:[#allocation3 + $0x1a0] sm:$0xff]   ;;  %v10398_v24 = vld [vmem:[#allocation3 + $0x1c8] sm:$0xff]  }
 0x283   : > { %v4702_v4 = vsel %vm978_vm5, %v4697_v33, %v4701_v16  ;;  %v4929_v30 = vrot.slane %v8678_v14, 1  ;;  %v10381_v16 = vld [vmem:[#allocation3 + $0x1d8] sm:$0xff]  }
 0x284   : > { %v4514_v14 = vld [vmem:[#allocation2 + $0x54] sm:$0xe] }
 0x285   : > { %9928 = vmatpush3.bf16.msra.mxu0 %v10369_v2  ;;  %v4931_v8 = vsel %vm1235_vm4, %v4929_v30, %v4930_v58  ;;  %v4730_v2 = vshll.u32 %v12597_v3, 16 }
 0x286   : > { %9929 = vmatprep.subr.bf16.mxu0 %v10386_v36  ;;  %5909 = vmatmul.mubr.bf16.gmra.mxu1 %v8707_v54  ;;  %v10356_v54 = vld [vmem:[#allocation3 + $0x1f0] sm:$0xff]  }
 0x287   : > { %9893 = vmatprep.mubr.bf16.mxu1 %v4925_v6  ;;  %v12606_v6 = vld [vmem:[#allocation2 + $0x50] ss:$0 sps:$4 sm:$0x11]   ;;  %v4732_v49 = vrot.slane %v4730_v2, 1  ;;  %v10408_v2 = vld [vmem:[#allocation3 + $0x180] sm:$0xff]  }
 0x288   : > { %6263 = vmatmul.mubr.bf16.gmra.mxu0 %v12545_v19  ;;  %v4511_v19 = vld [vmem:[#allocation2 + $0x30] sm:$0xe]  ;;  %v4942_v30 = vrot.slane %v12606_v6, 1 }
 0x289   : > { %6270 = vmatprep.mubr.bf16.mxu0 %v4702_v4  ;;  %9930 = vmatpush3.bf16.msra.mxu0 %v10386_v36  ;;  %v8680_v42 = vcombine.low %v4511_v19, %v4468_v12  ;;  %v4725_v36 = vrot.slane %v4723_v44, 1  ;;  %v4474_v12 = vld [vmem:[#allocation2 + $0x58] sm:$0xf]  ;;  %v4735_v4 = vshll.u32 %v10362_v29, 16  ;;  %v4733_v52 = vor.u32 %v4732_v49, %v4728_v11  ;;  %v12646_v49 = vld [vmem:[#allocation2 + $0x94] sm:$0xf] }
 0x28a   : > { %9931 = vmatprep.subr.bf16.mxu0 %v10403_v26  ;;  %v8683_v19 = vcombine.low %v4514_v14, %v4474_v12 }
 0x28b   : > { %v4935_v43 = vrot.slane %v8680_v42, 1  ;;  %v4726_v60 = vsel %vm978_vm5, %v4721_v0, %v4725_v36  ;;  %v4737_v7 = vrot.slane %v4735_v4, 1 }
 0x28c   : > { %v4944_v42 = vrot.slane %v8683_v19, 1  ;;  %v12664_v19 = vld [vmem:[#allocation2 + $0x1c] sm:$0xf] }
 0x28d   : > { %9932 = vmatpush3.bf16.msra.mxu0 %v10403_v26  ;;  %v4937_v40 = vsel %vm1235_vm4, %v4935_v43, %v4936_v18  ;;  %v4738_v55 = vsel %vm978_vm5, %v4733_v52, %v4737_v7  ;;  %v4517_v43 = vld [vmem:[#allocation2 + $0x78] sm:$0xe] }
 0x28e   : > { %9933 = vmatprep.subr.bf16.mxu0 %v10413_v45  ;;  %9894 = vmatmul.mubr.bf16.vlgmr.msra.gmra.mxu1 %v4928_v28  ;;  %v10394_v28 = vld [vmem:[#allocation3 + $0x190] sm:$0xff]   ;;  %v4946_v31 = vsel %vm1235_vm4, %v4944_v42, %v4945_v48  ;;  %v8686_v18 = vcombine.low %v4517_v43, %v12626_v27  ;;  %v12680_v43 = vld [vmem:[#allocation2 + $0xa4] ss:$0 sps:$4 sm:$0x11]  }
 0x28f   : > { %9897 = vmatprep.mubr.bf16.mxu1 %v4931_v8  ;;  %9550 = vmatpush3.bf16.msra.mxu1 %v10351_v21  ;;  %v4473_v21 = vld [vmem:[#allocation2 + $0x54] sm:$0xf] }
 0x290   : > { %9551 = vmatprep.subr.bf16.mxu1 %v10356_v54  ;;  %6271 = vmatmul.mubr.bf16.gmra.mxu0 %v12557_v1  ;;  %v4472_v1 = vld [vmem:[#allocation2 + $0x4c] sm:$0xf]  ;;  %v12617_v10 = vcombine.low %v4473_v21, %v4474_v12  ;;  %v4953_v36 = vrot.slane %v8686_v18, 1  ;;  %v6544_v21 = vld [vmem:[#allocation2 + $0x18] sm:$0xf] }
 0x291   : > { %6278 = vmatprep.mubr.bf16.mxu0 %v4714_v62  ;;  %9934 = vmatpush3.bf16.msra.mxu0 %v10413_v45  ;;  %v8682_v25 = vcombine.low %v4513_v57, %v4472_v1  ;;  %v12604_v33 = vcombine.low %v4471_v32, %v4472_v1  ;;  %v4515_v45 = vld [vmem:[#allocation2 + $0x60] sm:$0xe]  ;;  %v12678_v48 = vcombine.low %v6544_v21, %v12664_v19  ;;  %v12719_v21 = vld [vmem:[#allocation2 + $0x34] sm:$0xf] }
 0x292   : > { %9935 = vmatprep.subr.bf16.mxu0 %v10418_v15  ;;  %v8684_v54 = vcombine.low %v4515_v45, %v4476_v41  ;;  %v4754_v44 = vshll.u32 %v12617_v10, 16  ;;  %v4475_v1 = vld [vmem:[#allocation2 + $0x60] sm:$0xf]  ;;  %v12654_v45 = vld [vmem:[#allocation2 + $0x8c] ss:$0 sps:$4 sm:$0x11]  }
 0x293   : > { %9552 = vmatpush3.bf16.msra.mxu1 %v10360_v50  ;;  %v4941_v26 = vrot.slane %v8682_v25, 1  ;;  %v4742_v9 = vshll.u32 %v12604_v33, 16  ;;  %v4516_v50 = vld [vmem:[#allocation2 + $0x6c] sm:$0xe]  ;;  %v4740_v62 = vshrl.u32 %v12604_v33, 16  ;;  %v6755_v18 = vshll.u32 %v12678_v48, 16 }
 0x294   : > { %9553 = vmatprep.subr.bf16.mxu1 %v10364_v47  ;;  %v4747_v47 = vshll.u32 %v12606_v6, 16  ;;  %v8685_v57 = vcombine.low %v4516_v50, %v4478_v63  ;;  %v12641_v25 = vld [vmem:[#allocation2 + $0x88] sm:$0xf]  ;;  %v4759_v6 = vshll.u32 %v12615_v37, 16  ;;  %v4771_v37 = vshll.u32 %v12619_v56, 16 }
 0x295   : > { %9936 = vmatpush3.bf16.msra.mxu0 %v10418_v15  ;;  %v4943_v58 = vsel %vm1235_vm4, %v4941_v26, %v4942_v30  ;;  %v4744_v8 = vrot.slane %v4742_v9, 1  ;;  %v4947_v15 = vrot.slane %v8684_v54, 1  ;;  %v4477_v26 = vld [vmem:[#allocation2 + $0x6c] sm:$0xf]  ;;  %v4520_v54 = vld [vmem:[#allocation2 + $0x9c] sm:$0xe] }
 0x296   : > { %9898 = vmatmul.mubr.bf16.gmra.mxu1 %v4934_v38  ;;  %9937 = vmatprep.subr.bf16.mxu0 %v10423_v5  ;;  %v4749_v0 = vrot.slane %v4747_v47, 1  ;;  %v12635_v38 = vcombine.low %v4475_v1, %v4476_v41  ;;  %v4950_v29 = vrot.slane %v8685_v57, 1  ;;  %v4761_v41 = vrot.slane %v4759_v6, 1  ;;  %v12658_v30 = vld [vmem:[#allocation2 + $0x98] ss:$0 sps:$4 sm:$0x11]  }
 0x297   : > { %9901 = vmatprep.mubr.bf16.mxu1 %v4937_v40  ;;  %9554 = vmatpush3.bf16.msra.mxu1 %v10368_v23  ;;  %v4745_v51 = vor.u32 %v4744_v8, %v4740_v62  ;;  %v4949_v23 = vsel %vm1235_vm4, %v4947_v15, %v4948_v53  ;;  %v4756_v40 = vrot.slane %v4754_v44, 1  ;;  %v4960_v8 = vrot.slane %v12658_v30, 1  ;;  %v12685_v53 = vld [vmem:[#allocation2 + $0xb0] ss:$0 sps:$4 sm:$0x11]  }
 0x298   : > { %6279 = vmatmul.mubr.bf16.gmra.mxu0 %v12573_v22  ;;  %9555 = vmatprep.subr.bf16.mxu1 %v10373_v61  ;;  %v10385_v22 = vld [vmem:[#allocation3 + $0x198] sm:$0xff]   ;;  %v4766_v12 = vshll.u32 %v12635_v38, 16  ;;  %v4764_v7 = vshrl.u32 %v12635_v38, 16  ;;  %v4773_v47 = vrot.slane %v4771_v37, 1  ;;  %v6546_v1 = vld [vmem:[#allocation2 + $0x24] sm:$0xf] }
 0x299   : > { %6286 = vmatprep.mubr.bf16.mxu0 %v4726_v60  ;;  %9938 = vmatpush3.bf16.msra.mxu0 %v10423_v5  ;;  %v10407_v5 = vld [vmem:[#allocation3 + $0x1c0] sm:$0xff]   ;;  %v12633_v61 = vld [vmem:[#allocation2 + $0x74] ss:$0 sps:$4 sm:$0x11]   ;;  %v4750_v32 = vsel %vm978_vm5, %v4745_v51, %v4749_v0 }
 0x29a   : > { %9939 = vmatprep.subr.bf16.mxu0 %v10428_v13  ;;  %v4951_v60 = vrot.slane %v12633_v61, 1  ;;  %v4768_v9 = vrot.slane %v4766_v12, 1  ;;  %v12710_v12 = vld [vmem:[#allocation2 + $0xbc] ss:$0 sps:$4 sm:$0x11]  }
 0x29b   : > { %9556 = vmatpush3.bf16.msra.mxu1 %v10377_v17  ;;  %v4752_v17 = vshrl.u32 %v12617_v10, 16 }
 0x29c   : > { %9557 = vmatprep.subr.bf16.mxu1 %v10381_v16  ;;  %v4519_v16 = vld [vmem:[#allocation2 + $0x90] sm:$0xe]  ;;  %v4952_v14 = vsel %vm1235_vm4, %v4950_v29, %v4951_v60  ;;  %v4966_v29 = vrot.slane %v12685_v53, 1 }
 0x29d   : > { %9940 = vmatpush3.bf16.msra.mxu0 %v10428_v13  ;;  %v4518_v13 = vld [vmem:[#allocation2 + $0x84] sm:$0xe]  ;;  %v4757_v20 = vor.u32 %v4756_v40, %v4752_v17  ;;  %v8688_v35 = vcombine.low %v4519_v16, %v12646_v49 }
 0x29e   : > { %9902 = vmatmul.mubr.bf16.gmra.mxu1 %v4940_v39  ;;  %v8687_v11 = vcombine.low %v4518_v13, %v12641_v25  ;;  %v12662_v39 = vld [vmem:[#allocation2 + $0xa0] sm:$0xf]  ;;  %v4481_v40 = vld [vmem:[#allocation2 + $0x84] sm:$0xf] }
 0x29f   : > { %9905 = vmatprep.mubr.bf16.mxu1 %v4943_v58  ;;  %9558 = vmatpush3.bf16.msra.mxu1 %v10385_v22  ;;  %v12656_v22 = vcombine.low %v4477_v26, %v4478_v63  ;;  %v4762_v52 = vsel %vm978_vm5, %v4757_v20, %v4761_v41  ;;  %v4959_v58 = vrot.slane %v8688_v35, 1  ;;  %v4479_v63 = vld [vmem:[#allocation2 + $0x78] sm:$0xf]  ;;  %v8689_v50 = vcombine.low %v4520_v54, %v12662_v39  ;;  %v6548_v41 = vld [vmem:[#allocation2 + $0x30] sm:$0xf] }
 0x2a0   : > { %6287 = vmatmul.mubr.bf16.gmra.mxu0 %v12585_v34  ;;  %9559 = vmatprep.subr.bf16.mxu1 %v10390_v59  ;;  %v10402_v34 = vld [vmem:[#allocation3 + $0x188] sm:$0xff]   ;;  %v4956_v59 = vrot.slane %v8687_v11, 1  ;;  %v12708_v20 = vcombine.low %v4481_v40, %v12641_v25  ;;  %v6753_v26 = vshrl.u32 %v12678_v48, 16  ;;  %v12722_v54 = vld [vmem:[#allocation2 + $0x2c] ss:$0 sps:$4 sm:$0x11]  }
 0x2a1   : > { %6294 = vmatprep.mubr.bf16.mxu0 %v4738_v55  ;;  %v12669_v55 = vld [vmem:[#allocation2 + $0xac] sm:$0xf]  ;;  %v4778_v42 = vshll.u32 %v12656_v22, 16  ;;  %v4961_v62 = vsel %vm1235_vm4, %v4959_v58, %v4960_v8  ;;  %v4776_v0 = vshrl.u32 %v12656_v22, 16  ;;  %v4969_v58 = vrot.slane %v12710_v12, 1 }
 0x2a2   : > { %v12727_v8 = vcombine.low %v6548_v41, %v12719_v21 }
 0x2a3   : > { %9560 = vmatpush3.bf16.msra.mxu1 %v10394_v28  ;;  %v4957_v28 = vrot.slane %v12654_v45, 1  ;;  %v4780_v44 = vrot.slane %v4778_v42, 1 }
 0x2a4   : > { %9561 = vmatprep.subr.bf16.mxu1 %v10398_v24  ;;  %v4769_v24 = vor.u32 %v4768_v9, %v4764_v7 }
 0x2a5   : > { %v4958_v15 = vsel %vm1235_vm4, %v4956_v59, %v4957_v28  ;;  %v4795_v59 = vshll.u32 %v12637_v46, 16  ;;  %v4802_v28 = vshll.u32 %v12708_v20, 16 }
 0x2a6   : > { %9906 = vmatmul.mubr.bf16.gmra.mxu1 %v4946_v31  ;;  %v4774_v51 = vsel %vm978_vm5, %v4769_v24, %v4773_v47  ;;  %v12689_v31 = vld [vmem:[#allocation2 + $0xb8] sm:$0xf]  ;;  %v6779_v47 = vshll.u32 %v12727_v8, 16 }
 0x2a7   : > { %9909 = vmatprep.mubr.bf16.mxu1 %v4949_v23  ;;  %9562 = vmatpush3.bf16.msra.mxu1 %v10402_v34  ;;  %v12683_v34 = vcombine.low %v4479_v63, %v12626_v27  ;;  %v4522_v23 = vld [vmem:[#allocation2 + $0xb4] sm:$0xe]  ;;  %v4783_v27 = vshll.u32 %v12633_v61, 16  ;;  %v6757_v61 = vrot.slane %v6755_v18, 1  ;;  %v4797_v42 = vrot.slane %v4795_v59, 1 }
 0x2a8   : > { %6295 = vmatmul.mubr.bf16.gmra.mxu0 %v12597_v3  ;;  %9563 = vmatprep.subr.bf16.mxu1 %v10407_v5  ;;  %v4954_v3 = vrot.slane %v12637_v46, 1  ;;  %v4962_v5 = vrot.slane %v8689_v50, 1  ;;  %v8691_v6 = vcombine.low %v4522_v23, %v12689_v31  ;;  %v6772_v50 = vshll.u32 %v12722_v54, 16  ;;  %v12740_v23 = vld [vmem:[#allocation2 + $0x38] ss:$0 sps:$4 sm:$0x11]  }
 0x2a9   : > { %6302 = vmatprep.mubr.bf16.mxu0 %v4750_v32  ;;  %v12695_v32 = vld [vmem:[#allocation2 + $0x20] ss:$0 sps:$4 sm:$0x11]   ;;  %v4790_v13 = vshll.u32 %v12683_v34, 16  ;;  %v4785_v16 = vrot.slane %v4783_v27, 1  ;;  %v4788_v25 = vshrl.u32 %v12683_v34, 16 }
 0x2aa   : > { %v4955_v4 = vsel %vm1235_vm4, %v4953_v36, %v4954_v3  ;;  %v4781_v36 = vor.u32 %v4780_v44, %v4776_v0  ;;  %v4968_v35 = vrot.slane %v8691_v6, 1  ;;  %v12742_v18 = vld [vmem:[#allocation2 + $0x40] sm:$0xf]  ;;  %v4485_v0 = vld [vmem:[#allocation2 + $0x9c] sm:$0xf] }
 0x2ab   : > { %9564 = vmatpush3.bf16.msra.mxu1 %v10408_v2  ;;  %v4963_v2 = vrot.slane %v12680_v43, 1  ;;  %v6552_v59 = vld [vmem:[#allocation2 + $0x48] sm:$0xf] }
 0x2ac   : > { %v4786_v11 = vsel %vm978_vm5, %v4781_v36, %v4785_v16  ;;  %v6781_v36 = vrot.slane %v6779_v47, 1  ;;  %v6784_v16 = vshll.u32 %v12740_v23, 16 }
 0x2ad   : > { %v4964_v17 = vsel %vm1235_vm4, %v4962_v5, %v4963_v2  ;;  %v4800_v5 = vshrl.u32 %v12708_v20, 16 }
 0x2ae   : > { %9910 = vmatmul.mubr.bf16.gmra.mxu1 %v4952_v14  ;;  %v6760_v14 = vshll.u32 %v12695_v32, 16 }
 0x2af   : > { %9913 = vmatprep.mubr.bf16.mxu1 %v4955_v4  ;;  %v4792_v4 = vrot.slane %v4790_v13, 1 }
 0x2b0   : > { %6303 = vmatmul.mubr.bf16.gmra.mxu0 %v12604_v33  ;;  %v4521_v33 = vld [vmem:[#allocation2 + $0xa8] sm:$0xe]  ;;  %v6762_v7 = vrot.slane %v6760_v14, 1  ;;  %v6777_v14 = vshrl.u32 %v12727_v8, 16 }
 0x2b1   : > { %6310 = vmatprep.mubr.bf16.mxu0 %v4762_v52  ;;  %v8690_v56 = vcombine.low %v4521_v33, %v12669_v55  ;;  %v6758_v52 = vor.u32 %v6757_v61, %v6753_v26  ;;  %v4793_v37 = vor.u32 %v4792_v4, %v4788_v25  ;;  %v4970_v33 = vsel %vm1235_vm4, %v4968_v35, %v4969_v58  ;;  %v12766_v58 = vld [vmem:[#allocation2 + $0x4c] sm:$0xf] }
 0x2b2   : > { %v4819_v25 = vshll.u32 %v12658_v30, 16 }
 0x2b3   : > { %v4965_v57 = vrot.slane %v8690_v56, 1  ;;  %v6763_v24 = vsel %vm978_vm5, %v6758_v52, %v6762_v7  ;;  %v4804_v56 = vrot.slane %v4802_v28, 1  ;;  %v12762_v52 = vld [vmem:[#allocation2 + $0x44] ss:$0 sps:$4 sm:$0x11]   ;;  %v6786_v7 = vrot.slane %v6784_v16, 1 }
 0x2b5   : > { %v4967_v60 = vsel %vm1235_vm4, %v4965_v57, %v4966_v29  ;;  %v4805_v27 = vor.u32 %v4804_v56, %v4800_v5 }
 0x2b6   : > { %9914 = vmatmul.mubr.bf16.gmra.mxu1 %v4958_v15 }
 0x2b7   : > { %9917 = vmatprep.mubr.bf16.mxu1 %v4961_v62  ;;  %v4798_v62 = vsel %vm978_vm5, %v4793_v37, %v4797_v42 }
 0x2b8   : > { %6311 = vmatmul.mubr.bf16.gmra.mxu0 %v12617_v10  ;;  %v12697_v10 = vld [vmem:[#allocation2 + $0x28] sm:$0xf] }
 0x2b9   : > { %6318 = vmatprep.mubr.bf16.mxu0 %v4774_v51  ;;  %v12705_v3 = vcombine.low %v6546_v1, %v12697_v10  ;;  %v6550_v1 = vld [vmem:[#allocation2 + $0x3c] sm:$0xf] }
 0x2ba   : > { %v12748_v6 = vcombine.low %v6550_v1, %v12742_v18 }
 0x2bb   : > { %v6767_v9 = vshll.u32 %v12705_v3, 16  ;;  %v6765_v15 = vshrl.u32 %v12705_v3, 16 }
 0x2bc   : > { %v6789_v47 = vshrl.u32 %v12748_v6, 16 }
 0x2bd   : > { %v6769_v46 = vrot.slane %v6767_v9, 1  ;;  %v6791_v9 = vshll.u32 %v12748_v6, 16 }
 0x2be   : > { %9918 = vmatmul.mubr.bf16.gmra.mxu1 %v4964_v17 }
 0x2bf   : > { %9921 = vmatprep.mubr.bf16.mxu1 %v4967_v60  ;;  %v6770_v51 = vor.u32 %v6769_v46, %v6765_v15  ;;  %v12751_v60 = vcombine.low %v4485_v0, %v12662_v39  ;;  %v6782_v39 = vor.u32 %v6781_v36, %v6777_v14  ;;  %v6793_v42 = vrot.slane %v6791_v9, 1  ;;  %v12785_v0 = vld [vmem:[#allocation2 + $0x50] ss:$0 sps:$4 sm:$0x11]   ;;  %v12790_v36 = vld [vmem:[#allocation2 + $0x58] sm:$0xf] }
 0x2c0   : > { %6319 = vmatmul.mubr.bf16.gmra.mxu0 %v12635_v38  ;;  %v4483_v38 = vld [vmem:[#allocation2 + $0x90] sm:$0xf]  ;;  %v4821_v15 = vrot.slane %v4819_v25, 1 }
 0x2c1   : > { %6326 = vmatprep.mubr.bf16.mxu0 %v4786_v11  ;;  %v12731_v63 = vcombine.low %v4483_v38, %v12646_v49  ;;  %v4807_v49 = vshll.u32 %v12654_v45, 16  ;;  %v4826_v28 = vshll.u32 %v12751_v60, 16 }
 0x2c3   : > { %v4814_v2 = vshll.u32 %v12731_v63, 16  ;;  %v4809_v45 = vrot.slane %v4807_v49, 1  ;;  %v4812_v35 = vshrl.u32 %v12731_v63, 16  ;;  %v4828_v5 = vrot.slane %v4826_v28, 1 }
 0x2c5   : > { %v4816_v11 = vrot.slane %v4814_v2, 1  ;;  %v4831_v2 = vshll.u32 %v12680_v43, 16 }
 0x2c6   : > { %9922 = vmatmul.mubr.bf16.gmra.mxu1 %v4970_v33 }
 0x2c7   : > { %7297 = vmatprep.mubr.bf16.mxu1 %v6763_v24  ;;  %v4817_v37 = vor.u32 %v4816_v11, %v4812_v35  ;;  %v6787_v24 = vsel %vm978_vm5, %v6782_v39, %v6786_v7 }
 0x2c8   : > { %6327 = vmatmul.mubr.bf16.gmra.mxu0 %v12656_v22  ;;  %v6774_v22 = vrot.slane %v6772_v50, 1  ;;  %v12772_v50 = vcombine.low %v6552_v59, %v12766_v58 }
 0x2c9   : > { %6334 = vmatprep.mubr.bf16.mxu0 %v4798_v62 }
 0x2ca   : > { %v9847_v44 = vpop.f32.mrf.mxu0  ;;  %v6775_v13 = vsel %vm978_vm5, %v6770_v51, %v6774_v22  ;;  %v6796_v51 = vshll.u32 %v12762_v52, 16  ;;  %v6803_v22 = vshll.u32 %v12772_v50, 16  ;;  %v6801_v59 = vshrl.u32 %v12772_v50, 16 }
 0x2cb   : > { %v9293_v57 = vpop.f32.mrf.mxu1 }
 0x2cc   : > { %v5951_v29 = vpop.f32.mrf.mxu0  ;;  %v6805_v43 = vrot.slane %v6803_v22, 1 }
 0x2cd   : > { %v9294_v40 = vpop.f32.mrf.mxu1 }
 0x2ce   : > { %7298 = vmatmul.mubr.bf16.vlgmr.msra.gmra.mxu1 %v12678_v48  ;;  %v9295_v17 = vadd.f32 %v9294_v40, %v9293_v57  ;;  %v4810_v48 = vsel %vm978_vm5, %v4805_v27, %v4809_v45  ;;  %v9848_v33 = vpop.f32.mrf.mxu0  ;;  %v4824_v27 = vshrl.u32 %v12751_v60, 16  ;;  %v6806_v28 = vor.u32 %v6805_v43, %v6801_v59  ;;  %v12837_v59 = vld [vmem:[#allocation2 + $0x68] ss:$0 sps:$4 sm:$0x11]  }
 0x2cf   : > { %7305 = vmatprep.mubr.bf16.mxu1 %v6775_v13  ;;  %v9296_v61 = vpop.f32.mrf.mxu1  ;;  %v4489_v13 = vld [vmem:[#allocation2 + $0xb4] sm:$0xf] }
 0x2d0   : > { %v12754_v26 = vadd.f32 %v9295_v17, %v5951_v29  ;;  %6335 = vmatmul.mubr.bf16.gmra.mxu0 %v12683_v34  ;;  %v4487_v34 = vld [vmem:[#allocation2 + $0xa8] sm:$0xf]  ;;  %v12781_v49 = vpop.f32.mrf.mxu0  ;;  %v6554_v29 = vld [vmem:[#allocation2 + $0x54] sm:$0xf]  ;;  %v4829_v45 = vor.u32 %v4828_v5, %v4824_v27  ;;  %v12801_v39 = vcombine.low %v4489_v13, %v12689_v31 }
 0x2d1   : > { %v9297_v4 = vpop.f32.mrf.mxu1  ;;  %6342 = vmatprep.mubr.bf16.mxu0 %v4810_v48  ;;  %v12775_v30 = vcombine.low %v4487_v34, %v12669_v55  ;;  %v6794_v55 = vor.u32 %v6793_v42, %v6789_v47  ;;  %v12798_v35 = vcombine.low %v6554_v29, %v12790_v36  ;;  %v6808_v34 = vshll.u32 %v12785_v0, 16  ;;  %v6556_v42 = vld [vmem:[#allocation2 + $0x60] sm:$0xf] }
 0x2d2   : > { %v12760_v41 = vadd.f32 %v9297_v4, %v9296_v61  ;;  %v4833_v4 = vrot.slane %v4831_v2, 1 }
 0x2d3   : > { %v4838_v61 = vshll.u32 %v12775_v30, 16  ;;  %v6815_v31 = vshll.u32 %v12798_v35, 16 }
 0x2d4   : > { %v9299_v38 = vpop.f32.mrf.mxu1 }
 0x2d6   : > { %7306 = vmatmul.mubr.bf16.gmra.mxu1 %v12705_v3  ;;  %v9300_v46 = vpop.f32.mrf.mxu1  ;;  %v4822_v3 = vsel %vm978_vm5, %v4817_v37, %v4821_v15  ;;  %v12814_v15 = vld [vmem:[#allocation2 + $0x64] sm:$0xf] }
 0x2d7   : > { %7313 = vmatprep.mubr.bf16.mxu1 %v6787_v24  ;;  %v9301_v62 = vadd.f32 %v9300_v46, %v9299_v38  ;;  %v4840_v38 = vrot.slane %v4838_v61, 1  ;;  %v4843_v24 = vshll.u32 %v12685_v53, 16  ;;  %v12822_v53 = vcombine.low %v6556_v42, %v12814_v15 }
 0x2d8   : > { %v9302_v56 = vpop.f32.mrf.mxu1  ;;  %6343 = vmatmul.mubr.bf16.gmra.mxu0 %v12708_v20 }
 0x2d9   : > { %v12783_v1 = vadd.f32 %v9847_v44, %v9301_v62  ;;  %6350 = vmatprep.mubr.bf16.mxu0 %v4822_v3  ;;  %v6798_v44 = vrot.slane %v6796_v51, 1  ;;  %v6810_v62 = vrot.slane %v6808_v34, 1  ;;  %v4850_v51 = vshll.u32 %v12801_v39, 16 }
 0x2da   : > { %v9303_v57 = vpop.f32.mrf.mxu1  ;;  %v6827_v61 = vshll.u32 %v12822_v53, 16 }
 0x2db   : > { %v9304_v40 = vadd.f32 %v9303_v57, %v9302_v56  ;;  %v9851_v20 = vpop.f32.mrf.mxu0  ;;  %v6799_v14 = vsel %vm978_vm5, %v6794_v55, %v6798_v44  ;;  %v12816_v56 = vld [vmem:[#allocation2 + $0x5c] ss:$0 sps:$4 sm:$0x11]   ;;  %v6811_v3 = vsel %vm978_vm5, %v6806_v28, %v6810_v62  ;;  %v6817_v57 = vrot.slane %v6815_v31, 1 }
 0x2dc   : > { %v9305_v17 = vpop.f32.mrf.mxu1  ;;  %v4845_v55 = vrot.slane %v4843_v24, 1  ;;  %v6820_v29 = vshll.u32 %v12816_v56, 16  ;;  %v4852_v13 = vrot.slane %v4850_v51, 1  ;;  %v6829_v28 = vrot.slane %v6827_v61, 1  ;;  %v6594_v61 = vld [vmem:[#allocation2 + $0x30] sm:$0xe] }
 0x2dd   : > { %v12793_v16 = vadd.f32 %v9848_v33, %v9304_v40  ;;  %v5967_v11 = vpop.f32.mrf.mxu0  ;;  %v4836_v33 = vshrl.u32 %v12775_v30, 16  ;;  %v6813_v40 = vshrl.u32 %v12798_v35, 16  ;;  %v6825_v62 = vshrl.u32 %v12822_v53, 16 }
 0x2de   : > { %7314 = vmatmul.mubr.bf16.gmra.mxu1 %v12727_v8  ;;  %v9306_v48 = vpop.f32.mrf.mxu1  ;;  %v4834_v8 = vsel %vm978_vm5, %v4829_v45, %v4833_v4  ;;  %v6558_v4 = vld [vmem:[#allocation2 + $0x6c] sm:$0xf] }
 0x2df   : > { %7321 = vmatprep.mubr.bf16.mxu1 %v6799_v14  ;;  %v9307_v9 = vadd.f32 %v9306_v48, %v9305_v17  ;;  %v4841_v47 = vor.u32 %v4840_v38, %v4836_v33  ;;  %v9852_v22 = vpop.f32.mrf.mxu0  ;;  %v6818_v45 = vor.u32 %v6817_v57, %v6813_v40  ;;  %v4848_v14 = vshrl.u32 %v12801_v39, 16  ;;  %v6592_v38 = vld [vmem:[#allocation2 + $0x18] sm:$0xe] }
 0x2e0   : > { %v9308_v25 = vpop.f32.mrf.mxu1  ;;  %6351 = vmatmul.mubr.bf16.gmra.mxu0 %v12731_v63  ;;  %v4855_v48 = vshll.u32 %v12710_v12, 16  ;;  %v8820_v51 = vcombine.low %v6592_v38, %v12664_v19 }
 0x2e1   : > { %v12807_v7 = vadd.f32 %v9307_v9, %v5967_v11  ;;  %6358 = vmatprep.mubr.bf16.mxu0 %v4834_v8  ;;  %v12833_v11 = vpop.f32.mrf.mxu0  ;;  %v12835_v9 = vld [vmem:[#allocation2 + $0x70] sm:$0xf] }
 0x2e2   : > { %v9309_v37 = vpop.f32.mrf.mxu1  ;;  %v4857_v31 = vrot.slane %v4855_v48, 1  ;;  %v12844_v33 = vcombine.low %v6558_v4, %v12835_v9  ;;  %v7009_v4 = vrot.slane %v12695_v32, 1 }
 0x2e3   : > { %v12812_v46 = vadd.f32 %v9309_v37, %v9308_v25  ;;  %v6822_v25 = vrot.slane %v6820_v29, 1  ;;  %v6560_v29 = vld [vmem:[#allocation2 + $0x78] sm:$0xf] }
 0x2e4   : > { %v9311_v63 = vpop.f32.mrf.mxu1 }
 0x2e5   : > { %v6823_v37 = vsel %vm978_vm5, %v6818_v45, %v6822_v25  ;;  %v6593_v45 = vld [vmem:[#allocation2 + $0x24] sm:$0xe] }
 0x2e6   : > { %7322 = vmatmul.mubr.bf16.gmra.mxu1 %v12748_v6  ;;  %v9312_v5 = vpop.f32.mrf.mxu1  ;;  %v4846_v6 = vsel %vm978_vm5, %v4841_v47, %v4845_v55  ;;  %v6832_v47 = vshll.u32 %v12837_v59, 16  ;;  %v6830_v55 = vor.u32 %v6829_v28, %v6825_v62  ;;  %v8822_v28 = vcombine.low %v6594_v61, %v12719_v21 }
 0x2e7   : > { %7329 = vmatprep.mubr.bf16.mxu1 %v6811_v3  ;;  %v9313_v27 = vadd.f32 %v9312_v5, %v9311_v63  ;;  %v7012_v21 = vrot.slane %v12722_v54, 1 }
 0x2e8   : > { %v9314_v2 = vpop.f32.mrf.mxu1  ;;  %6359 = vmatmul.mubr.bf16.gmra.mxu0 %v12751_v60 }
 0x2e9   : > { %v12828_v17 = vadd.f32 %v9851_v20, %v9313_v27  ;;  %6366 = vmatprep.mubr.bf16.mxu0 %v4846_v6  ;;  %v4853_v20 = vor.u32 %v4852_v13, %v4848_v14  ;;  %v6839_v27 = vshll.u32 %v12844_v33, 16  ;;  %v12856_v6 = vld [vmem:[#allocation2 + $0x7c] sm:$0xf]  ;;  %v6834_v13 = vrot.slane %v6832_v47, 1  ;;  %v6562_v47 = vld [vmem:[#allocation2 + $0x84] sm:$0xf] }
 0x2ea   : > { %v9315_v44 = vpop.f32.mrf.mxu1 }
 0x2eb   : > { %v9316_v43 = vadd.f32 %v9315_v44, %v9314_v2  ;;  %v7008_v44 = vrot.slane %v8820_v51, 1  ;;  %v6835_v14 = vsel %vm978_vm5, %v6830_v55, %v6834_v13  ;;  %v7014_v55 = vrot.slane %v8822_v28, 1  ;;  %v12899_v28 = vld [vmem:[#allocation2 + $0x8c] ss:$0 sps:$4 sm:$0x11]  }
 0x2ec   : > { %v9317_v60 = vpop.f32.mrf.mxu1  ;;  %v7015_v13 = vrot.slane %v12740_v23, 1 }
 0x2ed   : > { %v12839_v34 = vadd.f32 %v9852_v22, %v9316_v43  ;;  %v12853_v22 = vld [vmem:[#allocation2 + $0x74] ss:$0 sps:$4 sm:$0x11]   ;;  %v6841_v43 = vrot.slane %v6839_v27, 1  ;;  %v6596_v27 = vld [vmem:[#allocation2 + $0x48] sm:$0xe] }
 0x2ee   : > { %v9855_v8 = vpop.f32.mrf.mxu0  ;;  %7330 = vmatmul.mubr.bf16.gmra.mxu1 %v12772_v50  ;;  %v9318_v12 = vpop.f32.mrf.mxu1  ;;  %v4858_v50 = vsel %vm978_vm5, %v4853_v20, %v4857_v31  ;;  %v8821_v20 = vcombine.low %v6593_v45, %v12697_v10  ;;  %v8824_v23 = vcombine.low %v6596_v27, %v12766_v58  ;;  %v7021_v27 = vrot.slane %v12785_v0, 1 }
 0x2ef   : > { %7337 = vmatprep.mubr.bf16.mxu1 %v6823_v37  ;;  %v9319_v24 = vadd.f32 %v9318_v12, %v9317_v60  ;;  %v12864_v60 = vcombine.low %v6560_v29, %v12856_v6  ;;  %v6837_v37 = vshrl.u32 %v12844_v33, 16  ;;  %v6844_v12 = vshll.u32 %v12853_v22, 16 }
 0x2f0   : > { %v5983_v42 = vpop.f32.mrf.mxu0  ;;  %v9320_v63 = vpop.f32.mrf.mxu1  ;;  %6367 = vmatmul.mubr.bf16.gmra.mxu0 %v12775_v30  ;;  %v7011_v62 = vrot.slane %v8821_v20, 1 }
 0x2f1   : > { %v12851_v3 = vadd.f32 %v9319_v24, %v5983_v42  ;;  %6374 = vmatprep.mubr.bf16.mxu0 %v4858_v50  ;;  %v6842_v24 = vor.u32 %v6841_v43, %v6837_v37  ;;  %v6851_v42 = vshll.u32 %v12864_v60, 16  ;;  %v12875_v50 = vld [vmem:[#allocation2 + $0x88] sm:$0xf]  ;;  %v7016_v43 = vsel %vm1235_vm4, %v7014_v55, %v7015_v13 }
 0x2f2   : > { %v9856_v5 = vpop.f32.mrf.mxu0  ;;  %v9321_v57 = vpop.f32.mrf.mxu1  ;;  %v7013_v61 = vsel %vm1235_vm4, %v7011_v62, %v7012_v21 }
 0x2f3   : > { %v9322_v2 = vadd.f32 %v9321_v57, %v9320_v63  ;;  %v6595_v63 = vld [vmem:[#allocation2 + $0x3c] sm:$0xe]  ;;  %v6846_v57 = vrot.slane %v6844_v12, 1  ;;  %v12897_v12 = vld [vmem:[#allocation2 + $0x94] sm:$0xf] }
 0x2f4   : > { %v5986_v40 = vpop.f32.mrf.mxu0  ;;  %v9323_v30 = vpop.f32.mrf.mxu1  ;;  %v8823_v54 = vcombine.low %v6595_v63, %v12742_v18  ;;  %v6564_v18 = vld [vmem:[#allocation2 + $0x90] sm:$0xf]  ;;  %v7020_v63 = vrot.slane %v8824_v23, 1  ;;  %v12921_v23 = vld [vmem:[#allocation2 + $0xa0] sm:$0xf] }
 0x2f5   : > { %v12858_v19 = vadd.f32 %v9322_v2, %v5986_v40  ;;  %v6847_v2 = vsel %vm978_vm5, %v6842_v24, %v6846_v57  ;;  %v6598_v57 = vld [vmem:[#allocation2 + $0x60] sm:$0xe] }
 0x2f6   : > { %7338 = vmatmul.mubr.bf16.gmra.mxu1 %v12798_v35  ;;  %v9324_v48 = vpop.f32.mrf.mxu1  ;;  %v7010_v35 = vsel %vm1235_vm4, %v7008_v44, %v7009_v4  ;;  %v12886_v44 = vcombine.low %v6562_v47, %v12875_v50  ;;  %v7018_v47 = vrot.slane %v12762_v52, 1 }
 0x2f7   : > { %7345 = vmatprep.mubr.bf16.mxu1 %v6835_v14  ;;  %v9325_v25 = vadd.f32 %v9324_v48, %v9323_v30  ;;  %v6853_v30 = vrot.slane %v6851_v42, 1 }
 0x2f8   : > { %v9326_v38 = vpop.f32.mrf.mxu1  ;;  %6375 = vmatmul.mubr.bf16.gmra.mxu0 %v12801_v39  ;;  %v12877_v39 = vld [vmem:[#allocation2 + $0x80] ss:$0 sps:$4 sm:$0x11]   ;;  %v6863_v37 = vshll.u32 %v12886_v44, 16 }
 0x2f9   : > { %v12872_v31 = vadd.f32 %v9855_v8, %v9325_v25  ;;  %9941 = vmatprep.mubr.bf16.mxu0 %v7010_v35  ;;  %v6856_v48 = vshll.u32 %v12877_v39, 16 }
 0x2fa   : > { %v9327_v32 = vpop.f32.mrf.mxu1  ;;  %v6865_v21 = vrot.slane %v6863_v37, 1 }
 0x2fb   : > { %v9328_v10 = vadd.f32 %v9327_v32, %v9326_v38  ;;  %v7017_v32 = vrot.slane %v8823_v54, 1  ;;  %v6858_v42 = vrot.slane %v6856_v48, 1 }
 0x2fc   : > { %v9329_v51 = vpop.f32.mrf.mxu1 }
 0x2fd   : > { %v12880_v8 = vadd.f32 %v9856_v5, %v9328_v10  ;;  %v6597_v10 = vld [vmem:[#allocation2 + $0x54] sm:$0xe] }
 0x2fe   : > { %7346 = vmatmul.mubr.bf16.gmra.mxu1 %v12822_v53  ;;  %v9330_v40 = vpop.f32.mrf.mxu1  ;;  %v9859_v29 = vpop.f32.mrf.mxu0  ;;  %v6849_v53 = vshrl.u32 %v12864_v60, 16  ;;  %v8825_v13 = vcombine.low %v6597_v10, %v12790_v36  ;;  %v6566_v36 = vld [vmem:[#allocation2 + $0x9c] sm:$0xf] }
 0x2ff   : > { %7353 = vmatprep.mubr.bf16.mxu1 %v6847_v2  ;;  %v9331_v45 = vadd.f32 %v9330_v40, %v9329_v51  ;;  %v12905_v51 = vcombine.low %v6564_v18, %v12897_v12  ;;  %v6868_v40 = vshll.u32 %v12899_v28, 16  ;;  %v6599_v18 = vld [vmem:[#allocation2 + $0x6c] sm:$0xe]  ;;  %v12930_v10 = vcombine.low %v6566_v36, %v12921_v23 }
 0x300   : > { %v9332_v5 = vpop.f32.mrf.mxu1  ;;  %v5999_v14 = vpop.f32.mrf.mxu0  ;;  %9942 = vmatmul.mubr.bf16.vlgmr.msra.gmra.mxu0 %v7013_v61  ;;  %v6854_v38 = vor.u32 %v6853_v30, %v6849_v53  ;;  %v7019_v30 = vsel %vm1235_vm4, %v7017_v32, %v7018_v47  ;;  %v7022_v61 = vsel %vm1235_vm4, %v7020_v63, %v7021_v27  ;;  %v12919_v53 = vld [vmem:[#allocation2 + $0x98] ss:$0 sps:$4 sm:$0x11]   ;;  %v7024_v32 = vrot.slane %v12816_v56, 1 }
 0x301   : > { %v12894_v4 = vadd.f32 %v9331_v45, %v5999_v14  ;;  %9945 = vmatprep.mubr.bf16.mxu0 %v7016_v43  ;;  %v6861_v45 = vshrl.u32 %v12886_v44, 16  ;;  %v6875_v0 = vshll.u32 %v12905_v51, 16  ;;  %v7023_v43 = vrot.slane %v8825_v13, 1 }
 0x302   : > { %v9333_v25 = vpop.f32.mrf.mxu1  ;;  %v9860_v20 = vpop.f32.mrf.mxu0  ;;  %v6859_v55 = vsel %vm978_vm5, %v6854_v38, %v6858_v42  ;;  %v6870_v38 = vrot.slane %v6868_v40, 1  ;;  %v7027_v63 = vrot.slane %v12837_v59, 1  ;;  %v6887_v13 = vshll.u32 %v12930_v10, 16 }
 0x303   : > { %v9334_v35 = vadd.f32 %v9333_v25, %v9332_v5  ;;  %v6866_v14 = vor.u32 %v6865_v21, %v6861_v45  ;;  %v7025_v56 = vsel %vm1235_vm4, %v7023_v43, %v7024_v32 }
 0x304   : > { %v6002_v24 = vpop.f32.mrf.mxu0 }
 0x305   : > { %v9335_v58 = vpop.f32.mrf.mxu1  ;;  %v12901_v62 = vadd.f32 %v9334_v35, %v6002_v24  ;;  %v6600_v24 = vld [vmem:[#allocation2 + $0x78] sm:$0xe] }
 0x306   : > { %7354 = vmatmul.mubr.bf16.gmra.mxu1 %v12844_v33  ;;  %v8826_v33 = vcombine.low %v6598_v57, %v12814_v15  ;;  %v6877_v15 = vrot.slane %v6875_v0, 1  ;;  %v6873_v57 = vshrl.u32 %v12905_v51, 16  ;;  %v8828_v59 = vcombine.low %v6600_v24, %v12856_v6  ;;  %v6601_v6 = vld [vmem:[#allocation2 + $0x84] sm:$0xe] }
 0x307   : > { %7361 = vmatprep.mubr.bf16.mxu1 %v6859_v55  ;;  %v9336_v2 = vpop.f32.mrf.mxu1  ;;  %v6880_v55 = vshll.u32 %v12919_v53, 16 }
 0x308   : > { %v9337_v52 = vadd.f32 %v9336_v2, %v9335_v58  ;;  %9946 = vmatmul.mubr.bf16.gmra.mxu0 %v7019_v30  ;;  %v7026_v37 = vrot.slane %v8826_v33, 1  ;;  %v6878_v40 = vor.u32 %v6877_v15, %v6873_v57  ;;  %v7033_v15 = vrot.slane %v12877_v39, 1 }
 0x309   : > { %v9338_v54 = vpop.f32.mrf.mxu1  ;;  %9949 = vmatprep.mubr.bf16.mxu0 %v7022_v61  ;;  %v6882_v61 = vrot.slane %v6880_v55, 1 }
 0x30a   : > { %v12917_v5 = vadd.f32 %v9859_v29, %v9337_v52  ;;  %v6871_v29 = vsel %vm978_vm5, %v6866_v14, %v6870_v38  ;;  %v12943_v14 = vld [vmem:[#allocation2 + $0xa4] ss:$0 sps:$4 sm:$0x11]   ;;  %v6602_v38 = vld [vmem:[#allocation2 + $0x90] sm:$0xe] }
 0x30b   : > { %v9339_v48 = vpop.f32.mrf.mxu1  ;;  %v6883_v36 = vsel %vm978_vm5, %v6878_v40, %v6882_v61  ;;  %v8830_v57 = vcombine.low %v6602_v38, %v12897_v12  ;;  %v7036_v12 = vrot.slane %v12899_v28, 1 }
 0x30c   : > { %v9340_v25 = vadd.f32 %v9339_v48, %v9338_v54  ;;  %v6568_v54 = vld [vmem:[#allocation2 + $0xa8] sm:$0xf]  ;;  %v7032_v48 = vrot.slane %v8828_v59, 1  ;;  %v6570_v59 = vld [vmem:[#allocation2 + $0xb4] sm:$0xf] }
 0x30e   : > { %v9341_v35 = vpop.f32.mrf.mxu1  ;;  %v12924_v42 = vadd.f32 %v9860_v20, %v9340_v25  ;;  %7362 = vmatmul.mubr.bf16.gmra.mxu1 %v12864_v60  ;;  %v8827_v20 = vcombine.low %v6599_v18, %v12835_v9  ;;  %v7028_v60 = vsel %vm1235_vm4, %v7026_v37, %v7027_v63  ;;  %v12941_v9 = vld [vmem:[#allocation2 + $0xac] sm:$0xf]  ;;  %v7030_v25 = vrot.slane %v12853_v22, 1 }
 0x30f   : > { %7369 = vmatprep.mubr.bf16.mxu1 %v6871_v29  ;;  %v9863_v47 = vpop.f32.mrf.mxu0  ;;  %v12952_v32 = vcombine.low %v6568_v54, %v12941_v9  ;;  %v8829_v29 = vcombine.low %v6601_v6, %v12875_v50  ;;  %v6885_v22 = vshrl.u32 %v12930_v10, 16 }
 0x310   : > { %v9342_v58 = vpop.f32.mrf.mxu1  ;;  %9950 = vmatmul.mubr.bf16.gmra.mxu0 %v7025_v56  ;;  %v7029_v33 = vrot.slane %v8827_v20, 1 }
 0x311   : > { %v9343_v21 = vadd.f32 %v9342_v58, %v9341_v35  ;;  %v6015_v2 = vpop.f32.mrf.mxu0  ;;  %9953 = vmatprep.mubr.bf16.mxu0 %v7028_v60  ;;  %v6889_v35 = vrot.slane %v6887_v13, 1  ;;  %v6892_v58 = vshll.u32 %v12943_v14, 16  ;;  %v6899_v20 = vshll.u32 %v12952_v32, 16  ;;  %v10447_v13 = vld [vmem:[#allocation2 + $0xb0] ss:$0 sps:$4 sm:$0x11]  }
 0x312   : > { %v9344_v27 = vpop.f32.mrf.mxu1  ;;  %v7031_v24 = vsel %vm1235_vm4, %v7029_v33, %v7030_v25  ;;  %v7035_v50 = vrot.slane %v8829_v29, 1  ;;  %v6604_v33 = vld [vmem:[#allocation2 + $0xa8] sm:$0xe] }
 0x313   : > { %v12938_v30 = vadd.f32 %v9343_v21, %v6015_v2  ;;  %v9864_v45 = vpop.f32.mrf.mxu0  ;;  %v6890_v56 = vor.u32 %v6889_v35, %v6885_v22  ;;  %v6603_v21 = vld [vmem:[#allocation2 + $0x9c] sm:$0xe]  ;;  %v6894_v40 = vrot.slane %v6892_v58, 1 }
 0x314   : > { %v9345_v52 = vpop.f32.mrf.mxu1  ;;  %v7037_v25 = vsel %vm1235_vm4, %v7035_v50, %v7036_v12  ;;  %v8831_v28 = vcombine.low %v6603_v21, %v12921_v23  ;;  %v6605_v21 = vld [vmem:[#allocation2 + $0xb4] sm:$0xe]  ;;  %v7045_v12 = vrot.slane %v10447_v13, 1 }
 0x315   : > { %v9346_v0 = vadd.f32 %v9345_v52, %v9344_v27  ;;  %v6018_v43 = vpop.f32.mrf.mxu0  ;;  %v12963_v27 = vld [vmem:[#allocation2 + $0xb8] sm:$0xf]  ;;  %v7038_v52 = vrot.slane %v8830_v57, 1  ;;  %v6572_v57 = vld [vmem:[#allocation2 + $0xc0] sm:$0xf] }
 0x316   : > { %v9347_v37 = vpop.f32.mrf.mxu1  ;;  %7370 = vmatmul.mubr.bf16.gmra.mxu1 %v12886_v44  ;;  %v7034_v44 = vsel %vm1235_vm4, %v7032_v48, %v7033_v15  ;;  %v6901_v48 = vrot.slane %v6899_v20, 1  ;;  %v12970_v6 = vcombine.low %v6570_v59, %v12963_v27  ;;  %v7042_v59 = vrot.slane %v12943_v14, 1 }
 0x317   : > { %v12948_v18 = vadd.f32 %v9346_v0, %v6018_v43  ;;  %7377 = vmatprep.mubr.bf16.mxu1 %v6883_v36  ;;  %v6895_v0 = vsel %vm978_vm5, %v6890_v56, %v6894_v40 }
 0x318   : > { %v9348_v63 = vpop.f32.mrf.mxu1  ;;  %9954 = vmatmul.mubr.bf16.gmra.mxu0 %v7031_v24  ;;  %v6911_v22 = vshll.u32 %v12970_v6, 16  ;;  %v6909_v14 = vshrl.u32 %v12970_v6, 16 }
 0x319   : > { %v9349_v55 = vadd.f32 %v9348_v63, %v9347_v37  ;;  %9957 = vmatprep.mubr.bf16.mxu0 %v7034_v44  ;;  %v6897_v37 = vshrl.u32 %v12952_v32, 16  ;;  %v10451_v63 = vld [vmem:[#allocation2 + $0xbc] ss:$0 sps:$4 sm:$0x11]   ;;  %v7041_v44 = vrot.slane %v8831_v28, 1 }
 0x31a   : > { %v9350_v39 = vpop.f32.mrf.mxu1 }
 0x31b   : > { %v12961_v60 = vadd.f32 %v9863_v47, %v9349_v55  ;;  %v7039_v47 = vrot.slane %v12919_v53, 1  ;;  %v8832_v53 = vcombine.low %v6604_v33, %v12941_v9  ;;  %v6902_v29 = vor.u32 %v6901_v48, %v6897_v37  ;;  %v6573_v55 = vld [vmem:[#allocation2 + $0xc4] sm:$0xf]  ;;  %v6574_v37 = vld [vmem:[#allocation2 + $0xcc] sm:$0xf] }
 0x31c   : > { %v9351_v2 = vpop.f32.mrf.mxu1  ;;  %v12985_v33 = vcombine.low %v6572_v57, %v6573_v55  ;;  %v8833_v48 = vcombine.low %v6605_v21, %v12963_v27  ;;  %v6607_v27 = vld [vmem:[#allocation2 + $0xcc] sm:$0xe]  ;;  %v10459_v21 = vld [vmem:[#allocation2 + $0xd4] ss:$0 sps:$4 sm:$0x11]  }
 0x31d   : > { %v9352_v61 = vadd.f32 %v9351_v2, %v9350_v39  ;;  %v7040_v35 = vsel %vm1235_vm4, %v7038_v52, %v7039_v47  ;;  %v7044_v20 = vrot.slane %v8832_v53, 1  ;;  %v6606_v2 = vld [vmem:[#allocation2 + $0xc0] sm:$0xe] }
 0x31e   : > { %v9353_v54 = vpop.f32.mrf.mxu1  ;;  %7378 = vmatmul.mubr.bf16.gmra.mxu1 %v12905_v51  ;;  %v6904_v51 = vshll.u32 %v10447_v13, 16 }
 0x31f   : > { %v12972_v43 = vadd.f32 %v9864_v45, %v9352_v61  ;;  %7385 = vmatprep.mubr.bf16.mxu1 %v6895_v0  ;;  %v9867_v36 = vpop.f32.mrf.mxu0  ;;  %v6913_v61 = vrot.slane %v6911_v22, 1  ;;  %v7043_v0 = vsel %vm1235_vm4, %v7041_v44, %v7042_v59 }
 0x320   : > { %v9354_v38 = vpop.f32.mrf.mxu1  ;;  %9958 = vmatmul.mubr.bf16.gmra.mxu0 %v7037_v25  ;;  %v6906_v56 = vrot.slane %v6904_v51, 1  ;;  %v6916_v25 = vshll.u32 %v10451_v63, 16  ;;  %v6575_v51 = vld [vmem:[#allocation2 + $0xd0] sm:$0xf] }
 0x321   : > { %v9355_v15 = vadd.f32 %v9354_v38, %v9353_v54  ;;  %v6031_v24 = vpop.f32.mrf.mxu0  ;;  %9961 = vmatprep.mubr.bf16.mxu0 %v7040_v35  ;;  %v8834_v38 = vcombine.low %v6606_v2, %v6573_v55  ;;  %v6914_v53 = vor.u32 %v6913_v61, %v6909_v14 }
 0x322   : > { %v9356_v45 = vpop.f32.mrf.mxu1  ;;  %v6907_v52 = vsel %vm978_vm5, %v6902_v29, %v6906_v56  ;;  %v7047_v29 = vrot.slane %v8833_v48, 1  ;;  %v6918_v44 = vrot.slane %v6916_v25, 1  ;;  %v12998_v56 = vcombine.low %v6574_v37, %v6575_v51 }
 0x323   : > { %v12980_v58 = vadd.f32 %v9355_v15, %v6031_v24  ;;  %v9868_v23 = vpop.f32.mrf.mxu0  ;;  %v10455_v15 = vld [vmem:[#allocation2 + $0xc8] ss:$0 sps:$4 sm:$0x11]   ;;  %v6923_v24 = vshll.u32 %v12985_v33, 16  ;;  %v7054_v25 = vrot.slane %v10459_v21, 1 }
 0x324   : > { %v9357_v39 = vpop.f32.mrf.mxu1  ;;  %v6919_v59 = vsel %vm978_vm5, %v6914_v53, %v6918_v44  ;;  %v6928_v48 = vshll.u32 %v10455_v15, 16 }
 0x325   : > { %v9358_v50 = vadd.f32 %v9357_v39, %v9356_v45  ;;  %v6034_v9 = vpop.f32.mrf.mxu0  ;;  %v7050_v39 = vrot.slane %v8834_v38, 1  ;;  %v6925_v2 = vrot.slane %v6923_v24, 1 }
 0x326   : > { %v9359_v40 = vpop.f32.mrf.mxu1  ;;  %7386 = vmatmul.mubr.bf16.gmra.mxu1 %v12930_v10  ;;  %v7046_v10 = vsel %vm1235_vm4, %v7044_v20, %v7045_v12  ;;  %v7048_v20 = vrot.slane %v10451_v63, 1 }
 0x327   : > { %v12987_v54 = vadd.f32 %v9358_v50, %v6034_v9  ;;  %7393 = vmatprep.mubr.bf16.mxu1 %v6907_v52  ;;  %v8835_v50 = vcombine.low %v6607_v27, %v6575_v51  ;;  %v6930_v51 = vrot.slane %v6928_v48, 1 }
 0x328   : > { %v9360_v47 = vpop.f32.mrf.mxu1  ;;  %9962 = vmatmul.mubr.bf16.gmra.mxu0 %v7043_v0  ;;  %v7049_v52 = vsel %vm1235_vm4, %v7047_v29, %v7048_v20  ;;  %v6921_v0 = vshrl.u32 %v12985_v33, 16 }
 0x329   : > { %v12992_v28 = vpop.f32.mrf.mxu0  ;;  %v9361_v13 = vadd.f32 %v9360_v47, %v9359_v40  ;;  %9965 = vmatprep.mubr.bf16.mxu0 %v7046_v10  ;;  %v7051_v40 = vrot.slane %v10455_v15, 1  ;;  %v6935_v47 = vshll.u32 %v12998_v56, 16  ;;  %v7053_v14 = vrot.slane %v8835_v50, 1 }
 0x32a   : > { %v9362_v35 = vpop.f32.mrf.mxu1  ;;  %v6940_v15 = vshll.u32 %v10459_v21, 16 }
 0x32b   : > { %v12996_v45 = vadd.f32 %v9867_v36, %v9361_v13  ;;  %v6047_v57 = vpop.f32.mrf.mxu0  ;;  %v7052_v63 = vsel %vm1235_vm4, %v7050_v39, %v7051_v40  ;;  %v6937_v53 = vrot.slane %v6935_v47, 1  ;;  %v7055_v27 = vsel %vm1235_vm4, %v7053_v14, %v7054_v25 }
 0x32c   : > { %v9363_v22 = vpop.f32.mrf.mxu1  ;;  %v6942_v20 = vrot.slane %v6940_v15, 1 }
 0x32d   : > { %v9364_v55 = vadd.f32 %v9363_v22, %v9362_v35  ;;  %v9872_v12 = vpop.f32.mrf.mxu0  ;;  %v6933_v35 = vshrl.u32 %v12998_v56, 16 }
 0x32e   : > { %v9365_v9 = vpop.f32.mrf.mxu1  ;;  %7394 = vmatmul.mubr.bf16.gmra.mxu1 %v12952_v32 }
 0x32f   : > { %v13002_v36 = vadd.f32 %v9868_v23, %v9364_v55  ;;  %7401 = vmatprep.mubr.bf16.mxu1 %v6919_v59  ;;  %v6926_v23 = vor.u32 %v6925_v2, %v6921_v0  ;;  %v6050_v37 = vpop.f32.mrf.mxu0  ;;  %v6938_v55 = vor.u32 %v6937_v53, %v6933_v35 }
 0x330   : > { %v9366_v61 = vpop.f32.mrf.mxu1  ;;  %9966 = vmatmul.mubr.bf16.gmra.mxu0 %v7049_v52 }
 0x331   : > { %v9367_v32 = vadd.f32 %v9366_v61, %v9365_v9  ;;  %9969 = vmatprep.mubr.bf16.mxu0 %v7052_v63  ;;  %v6931_v22 = vsel %vm978_vm5, %v6926_v23, %v6930_v51 }
 0x332   : > { %v9368_v10 = vpop.f32.mrf.mxu1 }
 0x333   : > { %v13008_v38 = vadd.f32 %v9367_v32, %v6047_v57 }
 0x334   : > { %v9369_v13 = vpop.f32.mrf.mxu1 }
 0x335   : > { %v9370_v24 = vadd.f32 %v9369_v13, %v9368_v10 }
 0x336   : > { %v9371_v29 = vpop.f32.mrf.mxu1  ;;  %7402 = vmatmul.mubr.bf16.gmra.mxu1 %v12970_v6  ;;  %v6943_v6 = vsel %vm978_vm5, %v6938_v55, %v6942_v20 }
 0x337   : > { %v13014_v44 = vadd.f32 %v9370_v24, %v6050_v37  ;;  %7409 = vmatprep.mubr.bf16.mxu1 %v6931_v22 }
 0x338   : > { %v9875_v57 = vpop.f32.mrf.mxu0  ;;  %v9372_v39 = vpop.f32.mrf.mxu1  ;;  %9970 = vmatmul.mubr.bf16.gmra.mxu0 %v7055_v27 }
 0x339   : > { %v9373_v50 = vadd.f32 %v9372_v39, %v9371_v29 }
 0x33a   : > { %v6063_v9 = vpop.f32.mrf.mxu0  ;;  %v9374_v59 = vpop.f32.mrf.mxu1 }
 0x33b   : > { %v13017_v21 = vadd.f32 %v12992_v28, %v9373_v50 }
 0x33c   : > { %v9876_v2 = vpop.f32.mrf.mxu0  ;;  %v9375_v40 = vpop.f32.mrf.mxu1 }
 0x33d   : > { %v9376_v52 = vadd.f32 %v9375_v40, %v9374_v59 }
 0x33e   : > { %v6066_v61 = vpop.f32.mrf.mxu0  ;;  %v9377_v0 = vpop.f32.mrf.mxu1  ;;  %7410 = vmatmul.mubr.bf16.gmra.mxu1 %v12985_v33  ;;  %v5955_v33 = vadd.f32 %v12760_v41, %v12781_v49 }
 0x33f   : > { %v13021_v48 = vadd.f32 %v9872_v12, %v9376_v52  ;;  %7417 = vmatprep.mubr.bf16.mxu1 %v6943_v6 }
 0x340   : > { %v9429_v63 = vpop.f32.mrf.mxu0  ;;  %v9378_v47 = vpop.f32.mrf.mxu1 }
 0x341   : > { %v9379_v32 = vadd.f32 %v9378_v47, %v9377_v0 }
 0x342   : > { %v9430_v14 = vpop.f32.mrf.mxu0  ;;  %v9380_v25 = vpop.f32.mrf.mxu1 }
 0x343   : > { %v9431_v10 = vadd.f32 %v9430_v14, %v9429_v63  ;;  %v13023_v28 = vadd.f32 %v9379_v32, %v6063_v9 }
 0x344   : > { %v9432_v23 = vpop.f32.mrf.mxu0  ;;  %v9381_v13 = vpop.f32.mrf.mxu1 }
 0x345   : > { %v6257_v37 = vadd.f32 %v9431_v10, %v12754_v26  ;;  %v9382_v51 = vadd.f32 %v9381_v13, %v9380_v25 }
 0x346   : > { %v9433_v35 = vpop.f32.mrf.mxu0  ;;  %v9383_v12 = vpop.f32.mrf.mxu1  ;;  %7418 = vmatmul.mubr.bf16.gmra.mxu1 %v12998_v56 }
 0x347   : > { %v9434_v53 = vadd.f32 %v9433_v35, %v9432_v23  ;;  %v13029_v15 = vadd.f32 %v9382_v51, %v6066_v61  ;;  %v5971_v35 = vadd.f32 %v12812_v46, %v12833_v11 }
 0x348   : > { %v9435_v24 = vpop.f32.mrf.mxu0  ;;  %v9384_v27 = vpop.f32.mrf.mxu1 }
 0x349   : > { %v6260_v29 = vadd.f32 %v9434_v53, %v5955_v33  ;;  %v9385_v22 = vadd.f32 %v9384_v27, %v9383_v12 }
 0x34a   : > { %v9436_v39 = vpop.f32.mrf.mxu0  ;;  %v9386_v55 = vpop.f32.mrf.mxu1 }
 0x34b   : > { %v9437_v20 = vadd.f32 %v9436_v39, %v9435_v24  ;;  %v13031_v50 = vadd.f32 %v9875_v57, %v9385_v22 }
 0x34c   : > { %v9438_v26 = vpop.f32.mrf.mxu0  ;;  %v9387_v9 = vpop.f32.mrf.mxu1 }
 0x34d   : > { %v6265_v59 = vadd.f32 %v9437_v20, %v12783_v1  ;;  %v9388_v41 = vadd.f32 %v9387_v9, %v9386_v55 }
 0x34e   : > { %v9439_v49 = vpop.f32.mrf.mxu0  ;;  %v9895_v40 = vpop.f32.mrf.mxu1 }
 0x34f   : > { %v9440_v56 = vadd.f32 %v9439_v49, %v9438_v26  ;;  %v13034_v6 = vadd.f32 %v9876_v2, %v9388_v41  ;;  %v13036_v52 = vadd.f32 %v9895_v40, %v6265_v59 }
 0x350   : > { %v6417_v61 = vpop.f32.mrf.mxu1  ;;  %v9441_v63 = vpop.f32.mrf.mxu0 }
 0x351   : > { %v6268_v0 = vadd.f32 %v9440_v56, %v12793_v16  ;;  %v13039_v47 = vadd.f32 %v6417_v61, %v6257_v37 }
 0x352   : > { %v9896_v57 = vpop.f32.mrf.mxu1  ;;  %v9442_v32 = vpop.f32.mrf.mxu0 }
 0x353   : > { %v9443_v14 = vadd.f32 %v9442_v32, %v9441_v63  ;;  %v13041_v25 = vadd.f32 %v9896_v57, %v6268_v0 }
 0x354   : > { %v6420_v1 = vpop.f32.mrf.mxu1  ;;  %v9444_v10 = vpop.f32.mrf.mxu0 }
 0x355   : > { %v13043_v23 = vadd.f32 %v6420_v1, %v6260_v29  ;;  %v6273_v2 = vadd.f32 %v9443_v14, %v12807_v7 }
 0x356   : > { %v9899_v13 = vpop.f32.mrf.mxu1  ;;  %v9445_v51 = vpop.f32.mrf.mxu0 }
 0x357   : > { %v9446_v16 = vadd.f32 %v9445_v51, %v9444_v10 }
 0x358   : > { %v6433_v33 = vpop.f32.mrf.mxu1  ;;  %v9447_v37 = vpop.f32.mrf.mxu0 }
 0x359   : > { %v6276_v12 = vadd.f32 %v9446_v16, %v5971_v35  ;;  %v13048_v55 = vadd.f32 %v6433_v33, %v6273_v2 }
 0x35a   : > { %v9900_v53 = vpop.f32.mrf.mxu1  ;;  %v9448_v24 = vpop.f32.mrf.mxu0 }
 0x35b   : > { %v9449_v27 = vadd.f32 %v9448_v24, %v9447_v37 }
 0x35c   : > { %v6436_v22 = vpop.f32.mrf.mxu1  ;;  %v9450_v39 = vpop.f32.mrf.mxu0 }
 0x35d   : > { %v6281_v29 = vadd.f32 %v9449_v27, %v12828_v17  ;;  %v13051_v20 = vadd.f32 %v6436_v22, %v6276_v12 }
 0x35e   : > { %v9903_v7 = vpop.f32.mrf.mxu1  ;;  %v9451_v26 = vpop.f32.mrf.mxu0 }
 0x35f   : > { %v9452_v9 = vadd.f32 %v9451_v26, %v9450_v39  ;;  %v13053_v59 = vadd.f32 %v9899_v13, %v6281_v29 }
 0x360   : > { %v6449_v46 = vpop.f32.mrf.mxu1  ;;  %v9453_v11 = vpop.f32.mrf.mxu0 }
 0x361   : > { %v6284_v41 = vadd.f32 %v9452_v9, %v12839_v34 }
 0x362   : > { %v9904_v49 = vpop.f32.mrf.mxu1  ;;  %v9454_v40 = vpop.f32.mrf.mxu0 }
 0x363   : > { %v9455_v56 = vadd.f32 %v9454_v40, %v9453_v11  ;;  %v13056_v61 = vadd.f32 %v9900_v53, %v6284_v41 }
 0x364   : > { %v6452_v0 = vpop.f32.mrf.mxu1  ;;  %v9456_v63 = vpop.f32.mrf.mxu0 }
 0x365   : > { %v6289_v17 = vadd.f32 %v9455_v56, %v12851_v3 }
 0x366   : > { %v9907_v57 = vpop.f32.mrf.mxu1  ;;  %v9457_v32 = vpop.f32.mrf.mxu0 }
 0x367   : > { %v9458_v14 = vadd.f32 %v9457_v32, %v9456_v63  ;;  %v13059_v1 = vadd.f32 %v6449_v46, %v6289_v17 }
 0x368   : > { %v6465_v10 = vpop.f32.mrf.mxu1  ;;  %v9459_v2 = vpop.f32.mrf.mxu0 }
 0x369   : > { %v6292_v13 = vadd.f32 %v9458_v14, %v12858_v19 }
 0x36a   : > { %v9908_v51 = vpop.f32.mrf.mxu1  ;;  %v9460_v34 = vpop.f32.mrf.mxu0 }
 0x36b   : > { %v9461_v35 = vadd.f32 %v9460_v34, %v9459_v2  ;;  %v13062_v16 = vadd.f32 %v6452_v0, %v6292_v13 }
 0x36c   : > { %v6468_v33 = vpop.f32.mrf.mxu1  ;;  %v9462_v37 = vpop.f32.mrf.mxu0 }
 0x36d   : > { %v6297_v12 = vadd.f32 %v9461_v35, %v12872_v31 }
 0x36e   : > { %v9911_v53 = vpop.f32.mrf.mxu1  ;;  %v9463_v3 = vpop.f32.mrf.mxu0 }
 0x36f   : > { %v9464_v24 = vadd.f32 %v9463_v3, %v9462_v37  ;;  %v13065_v27 = vadd.f32 %v9903_v7, %v6297_v12 }
 0x370   : > { %v6481_v22 = vpop.f32.mrf.mxu1  ;;  %v9465_v39 = vpop.f32.mrf.mxu0 }
 0x371   : > { %v6300_v29 = vadd.f32 %v9464_v24, %v12880_v8 }
 0x372   : > { %v9912_v26 = vpop.f32.mrf.mxu1  ;;  %v9466_v19 = vpop.f32.mrf.mxu0 }
 0x373   : > { %v9467_v9 = vadd.f32 %v9466_v19, %v9465_v39  ;;  %v13068_v46 = vadd.f32 %v9904_v49, %v6300_v29 }
 0x374   : > { %v6484_v11 = vpop.f32.mrf.mxu1  ;;  %v9468_v41 = vpop.f32.mrf.mxu0 }
 0x375   : > { %v6305_v40 = vadd.f32 %v9467_v9, %v12894_v4 }
 0x376   : > { %v13071_v56 = vpop.f32.mrf.mxu1  ;;  %v9469_v31 = vpop.f32.mrf.mxu0 }
 0x377   : > { %v9470_v0 = vadd.f32 %v9469_v31, %v9468_v41  ;;  %v13073_v63 = vadd.f32 %v6465_v10, %v6305_v40 }
 0x378   : > { %v6497_v7 = vpop.f32.mrf.mxu1  ;;  %v9471_v17 = vpop.f32.mrf.mxu0 }
 0x379   : > { %v6308_v32 = vadd.f32 %v9470_v0, %v12901_v62 }
 0x37a   : > { %v13076_v8 = vpop.f32.mrf.mxu1  ;;  %v9472_v14 = vpop.f32.mrf.mxu0 }
 0x37b   : > { %v9473_v2 = vadd.f32 %v9472_v14, %v9471_v17  ;;  %v13078_v49 = vadd.f32 %v6468_v33, %v6308_v32 }
 0x37c   : > { %v6500_v13 = vpop.f32.mrf.mxu1  ;;  %v9474_v34 = vpop.f32.mrf.mxu0 }
 0x37d   : > { %v6313_v4 = vadd.f32 %v9473_v2, %v12917_v5 }
 0x37e   : > { %v13081_v35 = vpop.f32.mrf.mxu1  ;;  %v9475_v37 = vpop.f32.mrf.mxu0 }
 0x37f   : > { %v9476_v12 = vadd.f32 %v9475_v37, %v9474_v34  ;;  %v13083_v10 = vadd.f32 %v9907_v57, %v6313_v4 }
 0x380   : > { %v13085_v3 = vpop.f32.mrf.mxu1  ;;  %v9477_v24 = vpop.f32.mrf.mxu0 }
 0x381   : > { %v6316_v62 = vadd.f32 %v9476_v12, %v12924_v42 }
 0x382   : > { %v13088_v39 = vpop.f32.mrf.mxu1  ;;  %v9478_v29 = vpop.f32.mrf.mxu0 }
 0x383   : > { %v9479_v33 = vadd.f32 %v9478_v29, %v9477_v24  ;;  %v13090_v19 = vadd.f32 %v9908_v51, %v6316_v62 }
 0x384   : > { %v13092_v9 = vpop.f32.mrf.mxu1  ;;  %v9480_v5 = vpop.f32.mrf.mxu0 }
 0x385   : > { %v6321_v41 = vadd.f32 %v9479_v33, %v12938_v30 }
 0x386   : > { %v13095_v40 = vpop.f32.mrf.mxu1  ;;  %v9481_v57 = vpop.f32.mrf.mxu0 }
 0x387   : > { %v9482_v31 = vadd.f32 %v9481_v57, %v9480_v5  ;;  %v13097_v0 = vadd.f32 %v6481_v22, %v6321_v41 }
 0x388   : > { %v13099_v17 = vpop.f32.mrf.mxu1  ;;  %v9483_v42 = vpop.f32.mrf.mxu0 }
 0x389   : > { %v6324_v32 = vadd.f32 %v9482_v31, %v12948_v18 }
 0x38a   : > { %v13102_v14 = vpop.f32.mrf.mxu1  ;;  %v9484_v51 = vpop.f32.mrf.mxu0 }
 0x38b   : > { %v9485_v2 = vadd.f32 %v9484_v51, %v9483_v42  ;;  %v13104_v34 = vadd.f32 %v6484_v11, %v6324_v32 }
 0x38c   : > { %v13106_v4 = vpop.f32.mrf.mxu1  ;;  %v9486_v30 = vpop.f32.mrf.mxu0 }
 0x38d   : > { %13488 = vst [vmem:[#allocation9_spill] sm:$0xff] %v13104_v34  ;;  %v6329_v37 = vadd.f32 %v9485_v2, %v12961_v60 }
 0x38e   : > { %v13109_v12 = vpop.f32.mrf.mxu1  ;;  %v9487_v22 = vpop.f32.mrf.mxu0 }
 0x38f   : > { %v9488_v24 = vadd.f32 %v9487_v22, %v9486_v30  ;;  %v13111_v62 = vadd.f32 %v9911_v53, %v6329_v37 }
 0x390   : > { %v13113_v29 = vpop.f32.mrf.mxu1  ;;  %v9489_v18 = vpop.f32.mrf.mxu0 }
 0x391   : > { %v6332_v33 = vadd.f32 %v9488_v24, %v12972_v43 }
 0x392   : > { %v13116_v5 = vpop.f32.mrf.mxu1  ;;  %v9490_v11 = vpop.f32.mrf.mxu0 }
 0x393   : > { %v9491_v41 = vadd.f32 %v9490_v11, %v9489_v18  ;;  %v13118_v57 = vadd.f32 %v9912_v26, %v6332_v33 }
 0x394   : > { %v13120_v31 = vpop.f32.mrf.mxu1  ;;  %v9492_v60 = vpop.f32.mrf.mxu0 }
 0x395   : > { %v6337_v42 = vadd.f32 %v9491_v41, %v12980_v58 }
 0x396   : > { %v13123_v32 = vpop.f32.mrf.mxu1  ;;  %v9493_v53 = vpop.f32.mrf.mxu0 }
 0x397   : > { %v9494_v51 = vadd.f32 %v9493_v53, %v9492_v60  ;;  %v13125_v2 = vadd.f32 %v6497_v7, %v6337_v42 }
 0x398   : > { %v13127_v30 = vpop.f32.mrf.mxu1  ;;  %v9495_v43 = vpop.f32.mrf.mxu0 }
 0x399   : > { %13489 = vst [vmem:[#allocation10_spill] sm:$0xff] %v13125_v2  ;;  %v6340_v37 = vadd.f32 %v9494_v51, %v12987_v54 }
 0x39a   : > { %v13130_v22 = vpop.f32.mrf.mxu1  ;;  %v9496_v26 = vpop.f32.mrf.mxu0 }
 0x39b   : > { %v9497_v24 = vadd.f32 %v9496_v26, %v9495_v43  ;;  %v13132_v18 = vadd.f32 %v6500_v13, %v6340_v37 }
 0x39c   : > { %v13134_v33 = vpop.f32.mrf.mxu1  ;;  %v9498_v58 = vpop.f32.mrf.mxu0 }
 0x39d   : > { %13490 = vst [vmem:[#allocation11_spill] sm:$0xff] %v13132_v18  ;;  %v6345_v11 = vadd.f32 %v9497_v24, %v12996_v45 }
 0x39e   : > { %v13137_v41 = vpop.f32.mrf.mxu1  ;;  %v9499_v7 = vpop.f32.mrf.mxu0 }
 0x39f   : > { %v9500_v60 = vadd.f32 %v9499_v7, %v9498_v58  ;;  %v13140_v42 = vadd.f32 %v13071_v56, %v6345_v11 }
 0x3a0   : > { %v13142_v53 = vpop.f32.mrf.mxu1  ;;  %v9501_v54 = vpop.f32.mrf.mxu0 }
 0x3a1   : > { %13491 = vst [vmem:[#allocation12_spill] sm:$0xff] %v13140_v42  ;;  %v6348_v51 = vadd.f32 %v9500_v60, %v13002_v36 }
 0x3a2   : > { %v13145_v43 = vpop.f32.mrf.mxu1  ;;  %v9502_v13 = vpop.f32.mrf.mxu0 }
 0x3a3   : > { %v9503_v37 = vadd.f32 %v9502_v13, %v9501_v54  ;;  %v13148_v26 = vadd.f32 %v13076_v8, %v6348_v51 }
 0x3a4   : > { %v13150_v45 = vpop.f32.mrf.mxu1  ;;  %v9504_v24 = vpop.f32.mrf.mxu0 }
 0x3a5   : > { %13492 = vst [vmem:[#allocation13_spill] sm:$0xff] %v13148_v26  ;;  %v6353_v58 = vadd.f32 %v9503_v37, %v13008_v38 }
 0x3a6   : > { %v13153_v7 = vpop.f32.mrf.mxu1  ;;  %v9505_v56 = vpop.f32.mrf.mxu0 }
 0x3a7   : > { %v9506_v11 = vadd.f32 %v9505_v56, %v9504_v24  ;;  %v13156_v18 = vadd.f32 %v13085_v3, %v6353_v58 }
 0x3a8   : > { %v13158_v36 = vpop.f32.mrf.mxu1  ;;  %v9507_v60 = vpop.f32.mrf.mxu0 }
 0x3a9   : > { %13493 = vst [vmem:[#allocation14_spill] sm:$0xff] %v13156_v18  ;;  %v6356_v54 = vadd.f32 %v9506_v11, %v13014_v44 }
 0x3aa   : > { %v13161_v13 = vpop.f32.mrf.mxu1  ;;  %v9508_v8 = vpop.f32.mrf.mxu0 }
 0x3ab   : > { %v9509_v51 = vadd.f32 %v9508_v8, %v9507_v60  ;;  %v13164_v26 = vadd.f32 %v13092_v9, %v6356_v54 }
 0x3ac   : > { %v13166_v38 = vpop.f32.mrf.mxu1  ;;  %v9510_v37 = vpop.f32.mrf.mxu0 }
 0x3ad   : > { %13494 = vst [vmem:[#allocation15_spill] sm:$0xff] %v13164_v26  ;;  %v6361_v24 = vadd.f32 %v9509_v51, %v13017_v21 }
 0x3ae   : > { %v13169_v56 = vpop.f32.mrf.mxu1  ;;  %v9511_v3 = vpop.f32.mrf.mxu0 }
 0x3af   : > { %v9512_v58 = vadd.f32 %v9511_v3, %v9510_v37  ;;  %v13172_v18 = vadd.f32 %v13081_v35, %v6361_v24 }
 0x3b0   : > { %v13174_v44 = vpop.f32.mrf.mxu1  ;;  %v9513_v11 = vpop.f32.mrf.mxu0 }
 0x3b1   : > { %13495 = vst [vmem:[#allocation16_spill] sm:$0xff] %v13172_v18  ;;  %v6364_v60 = vadd.f32 %v9512_v58, %v13021_v48 }
 0x3b2   : > { %v9592_v8 = vpop.f32.mrf.mxu1  ;;  %v9514_v9 = vpop.f32.mrf.mxu0 }
 0x3b3   : > { %v9515_v54 = vadd.f32 %v9514_v9, %v9513_v11  ;;  %v13178_v26 = vadd.f32 %v13088_v39, %v6364_v60 }
 0x3b4   : > { %v9593_v2 = vpop.f32.mrf.mxu1  ;;  %v9516_v21 = vpop.f32.mrf.mxu0 }
 0x3b5   : > { %13496 = vst [vmem:[#allocation17_spill] sm:$0xff] %v13178_v26  ;;  %v6369_v51 = vadd.f32 %v9515_v54, %v13023_v28 }
 0x3b6   : > { %v9595_v42 = vpop.f32.mrf.mxu1  ;;  %v9517_v37 = vpop.f32.mrf.mxu0 }
 0x3b7   : > { %v9518_v3 = vadd.f32 %v9517_v37, %v9516_v21  ;;  %v13182_v35 = vadd.f32 %v13099_v17, %v6369_v51  ;;  %v10559_v21 = vmov 1966171168   ;;  %v7732_v17 = vlaneseq }
 0x3b8   : > { %v9596_v24 = vpop.f32.mrf.mxu1  ;;  %v9519_v18 = vpop.f32.mrf.mxu0  ;;  %v7730_v37 = vunpack.c.l.s4 %v10559_v21  ;;  %v9573_v51 = vadd.f32 %v13127_v30, %v13123_v32  ;;  %v13200_v21 = vld [vmem:[%s13465_s5] ss:$0 sm:$0xff] }
 0x3b9   : > { %v6372_v48 = vadd.f32 %v9518_v3, %v13029_v15  ;;  %v7733_v32 = vshrl.u32 %v7732_v17, 7 }
 0x3ba   : > { %v9598_v58 = vpop.f32.mrf.mxu1  ;;  %v9520_v34 = vpop.f32.mrf.mxu0 }
 0x3bb   : > { %v9521_v11 = vadd.f32 %v9520_v34, %v9519_v18  ;;  %v13186_v39 = vadd.f32 %v13106_v4, %v6372_v48  ;;  %v9567_v4 = vadd.f32 %v13113_v29, %v13109_v12 }
 0x3bc   : > { %v9599_v60 = vpop.f32.mrf.mxu1  ;;  %v9522_v9 = vpop.f32.mrf.mxu0 }
 0x3bd   : > { %13497 = vst [vmem:[#allocation18_spill] sm:$0xff] %v13186_v39  ;;  %v6377_v28 = vadd.f32 %v9521_v11, %v13031_v50  ;;  %v7731_v39 = vunpack.c.0.s8 %v7730_v37  ;;  %v9570_v37 = vadd.f32 %v13120_v31, %v13116_v5 }
 0x3be   : > { %v9601_v54 = vpop.f32.mrf.mxu1  ;;  %v9523_v26 = vpop.f32.mrf.mxu0 }
 0x3bf   : > { %v13192_v15 = vadd.f32 %v13095_v40, %v6377_v28  ;;  %v9524_v3 = vadd.f32 %v9523_v26, %v9522_v9  ;;  %v9576_v40 = vadd.f32 %v13134_v33, %v13130_v22  ;;  %v13211_v9 = vld [vmem:[%s13466_s6] ss:$0 sm:$0xff] }
 0x3c0   : > { %v9602_v34 = vpop.f32.mrf.mxu1  ;;  %v9943_v18 = vpop.f32.mrf.mxu0 }
 0x3c1   : > { %v6380_v48 = vadd.f32 %v9524_v3, %v13034_v6  ;;  %v7469_v50 = vadd.f32 %v9943_v18, %v9573_v51  ;;  %v13221_v3 = vsub.s32 %v7731_v39, %v7733_v32 }
 0x3c2   : > { %v9604_v11 = vpop.f32.mrf.mxu1  ;;  %v7460_v30 = vpop.f32.mrf.mxu0 }
 0x3c3   : > { %v13205_v26 = vadd.f32 %v13102_v14, %v6380_v48  ;;  %v7589_v12 = vadd.f32 %v7469_v50, %v13036_v52  ;;  %v7461_v29 = vadd.f32 %v9567_v4, %v7460_v30  ;;  %v9579_v14 = vadd.f32 %v13142_v53, %v13137_v41 }
 0x3c4   : > { %v9605_v6 = vpop.f32.mrf.mxu1  ;;  %v9944_v28 = vpop.f32.mrf.mxu0  ;;  %v9582_v52 = vadd.f32 %v13150_v45, %v13145_v43  ;;  %v9588_v41 = vadd.f32 %v13166_v38, %v13161_v13  ;;  %v13232_v53 = vadd.f32 %v13174_v44, %v13169_v56  ;;  %v13234_v43 = vadd.f32 %v9593_v2, %v9592_v8 }
 0x3c5   : > { %v7628_v17 = vmul.f32 %v13200_v21, %v7589_v12  ;;  %v7587_v22 = vadd.f32 %v7461_v29, %v13039_v47  ;;  %v7472_v33 = vadd.f32 %v9944_v28, %v9576_v40  ;;  %v9585_v47 = vadd.f32 %v13158_v36, %v13153_v7 }
 0x3c6   : > { %v9607_v51 = vpop.f32.mrf.mxu1  ;;  %v7463_v18 = vpop.f32.mrf.mxu0  ;;  %v9597_v50 = vadd.f32 %v9596_v24, %v9595_v42  ;;  %v13238_v40 = vadd.f32 %v9599_v60, %v9598_v58  ;;  %v13240_v7 = vadd.f32 %v9602_v34, %v9601_v54  ;;  %v13245_v24 = vadd.f32 %v9605_v6, %v9604_v11 }
 0x3c7   : > { %v7667_v4 = vadd.f32 %v13211_v9, %v7628_v17  ;;  %v7626_v48 = vmul.f32 %v13200_v21, %v7587_v22  ;;  %v7590_v5 = vadd.f32 %v7472_v33, %v13041_v25  ;;  %v7464_v31 = vadd.f32 %v9570_v37, %v7463_v18 }
 0x3c8   : > { %v9608_v45 = vpop.f32.mrf.mxu1  ;;  %v9947_v39 = vpop.f32.mrf.mxu0 }
 0x3c9   : > { %v7699_v32 = vmax.f32 %v7667_v4, 0.0  ;;  %v7665_v30 = vadd.f32 %v13211_v9, %v7626_v48  ;;  %v7629_v25 = vmul.f32 %v13200_v21, %v7590_v5  ;;  %v7588_v13 = vadd.f32 %v7464_v31, %v13043_v23 }
 0x3ca   : > { %v9610_v36 = vpop.f32.mrf.mxu1  ;;  %v7485_v38 = vadd.f32 %v9947_v39, %v9585_v47  ;;  %v7476_v56 = vpop.f32.mrf.mxu0  ;;  %v13247_v12 = vadd.f32 %v9608_v45, %v9607_v51 }
 0x3cb   : > { %v7749_v2 = vrot.slane %v7699_v32, %v13221_v3  ;;  %v7697_v44 = vmax.f32 %v7665_v30, 0.0  ;;  %v7668_v8 = vadd.f32 %v13211_v9, %v7629_v25  ;;  %v7477_v42 = vadd.f32 %v9579_v14, %v7476_v56 }
 0x3cc   : > { %v9611_v29 = vpop.f32.mrf.mxu1  ;;  %v7627_v58 = vmul.f32 %v13200_v21, %v7588_v13  ;;  %v7593_v60 = vadd.f32 %v7485_v38, %v13053_v59  ;;  %v9948_v54 = vpop.f32.mrf.mxu0 }
 0x3cd   : > { %v7987_v34 = vrot.slane %v7749_v2, 4  ;;  %v7735_v23 = vrot.slane %v7697_v44, %v13221_v3  ;;  %v13252_v28 = vadd.f32 %v9611_v29, %v9610_v36  ;;  %v7700_v37 = vmax.f32 %v7668_v8, 0.0 }
 0x3ce   : > { %v9613_v17 = vpop.f32.mrf.mxu1  ;;  %v7666_v22 = vadd.f32 %v13211_v9, %v7627_v58  ;;  %v7632_v11 = vmul.f32 %v13200_v21, %v7593_v60  ;;  %v7591_v6 = vadd.f32 %v7477_v42, %v13048_v55  ;;  %v7488_v33 = vadd.f32 %v9948_v54, %v9588_v41  ;;  %v7479_v14 = vpop.f32.mrf.mxu0 }
 0x3cf   : > { %v8051_v51 = vmax.f32 %v7749_v2, %v7987_v34  ;;  %v7985_v18 = vrot.slane %v7735_v23, 4  ;;  %v7756_v59 = vrot.slane %v7700_v37, %v13221_v3  ;;  %v7480_v4 = vadd.f32 %v9582_v52, %v7479_v14 }
 0x3d0   : > { %v7698_v48 = vmax.f32 %v7666_v22, 0.0  ;;  %v9614_v5 = vpop.f32.mrf.mxu1  ;;  %v7671_v31 = vadd.f32 %v13211_v9, %v7632_v11  ;;  %v7630_v47 = vmul.f32 %v13200_v21, %v7591_v6  ;;  %v7594_v45 = vadd.f32 %v7488_v33, %v13056_v61  ;;  %v9951_v39 = vpop.f32.mrf.mxu0 }
 0x3d1   : > { %v8049_v32 = vmax.f32 %v7735_v23, %v7985_v18  ;;  %v7988_v30 = vrot.slane %v7756_v59, 4  ;;  %v13261_v55 = vadd.f32 %v9614_v5, %v9613_v17  ;;  %v7592_v41 = vadd.f32 %v7480_v4, %v13051_v20 }
 0x3d2   : > { %v7742_v25 = vrot.slane %v7698_v48, %v13221_v3  ;;  %v7703_v36 = vmax.f32 %v7671_v31, 0.0  ;;  %v9616_v52 = vpop.f32.mrf.mxu1  ;;  %v7669_v13 = vadd.f32 %v13211_v9, %v7630_v47  ;;  %v7633_v38 = vmul.f32 %v13200_v21, %v7594_v45  ;;  %v7492_v56 = vpop.f32.mrf.mxu0 }
 0x3d3   : > { %v8081_v2 = vmax.f32 %v8049_v32, %v8051_v51  ;;  %v8052_v44 = vmax.f32 %v7756_v59, %v7988_v30  ;;  %v7631_v61 = vmul.f32 %v13200_v21, %v7592_v41  ;;  %v7501_v8 = vadd.f32 %v9951_v39, %v9597_v50 }
 0x3d4   : > { %v7986_v42 = vrot.slane %v7742_v25, 4  ;;  %v7777_v29 = vrot.slane %v7703_v36, %v13221_v3  ;;  %v7701_v20 = vmax.f32 %v7669_v13, 0.0  ;;  %v9617_v58 = vpop.f32.mrf.mxu1  ;;  %v7672_v60 = vadd.f32 %v13211_v9, %v7633_v38  ;;  %v9952_v54 = vpop.f32.mrf.mxu0 }
 0x3d5   : > { %v13271_v34 = vadd.f32 %v9617_v58, %v9616_v52  ;;  %v7670_v23 = vadd.f32 %v13211_v9, %v7631_v61  ;;  %v7597_v37 = vadd.f32 %v7501_v8, %v13065_v27  ;;  %v7493_v17 = vadd.f32 %v13232_v53, %v7492_v56 }
 0x3d6   : > { %v8050_v50 = vmax.f32 %v7742_v25, %v7986_v42  ;;  %v7991_v22 = vrot.slane %v7777_v29, 4  ;;  %v7763_v11 = vrot.slane %v7701_v20, %v13221_v3  ;;  %v7704_v6 = vmax.f32 %v7672_v60, 0.0  ;;  %v9619_v33 = vpop.f32.mrf.mxu1  ;;  %v7495_v14 = vpop.f32.mrf.mxu0 }
 0x3d7   : > { %v7702_v51 = vmax.f32 %v7670_v23, 0.0  ;;  %v7636_v18 = vmul.f32 %v13200_v21, %v7597_v37  ;;  %v7595_v59 = vadd.f32 %v7493_v17, %v13059_v1  ;;  %v7504_v4 = vadd.f32 %v9952_v54, %v13238_v40 }
 0x3d8   : > { %v8082_v27 = vmax.f32 %v8050_v50, %v8052_v44  ;;  %v8055_v48 = vmax.f32 %v7777_v29, %v7991_v22  ;;  %v7989_v53 = vrot.slane %v7763_v11, 4  ;;  %v7784_v5 = vrot.slane %v7704_v6, %v13221_v3  ;;  %v9620_v31 = vpop.f32.mrf.mxu1  ;;  %v9955_v47 = vpop.f32.mrf.mxu0 }
 0x3d9   : > { %v7770_v45 = vrot.slane %v7702_v51, %v13221_v3  ;;  %v9621_v39 = vadd.f32 %v9620_v31, %v9619_v33  ;;  %v7675_v32 = vadd.f32 %v13211_v9, %v7636_v18  ;;  %v7634_v30 = vmul.f32 %v13200_v21, %v7595_v59 }
 0x3da   : > { %v8113_v41 = vcombine.low %v8081_v2, %v8082_v27  ;;  %v8053_v25 = vmax.f32 %v7763_v11, %v7989_v53  ;;  %v7992_v1 = vrot.slane %v7784_v5, 4  ;;  %v9622_v36 = vpop.f32.mrf.mxu1  ;;  %v7598_v40 = vadd.f32 %v7504_v4, %v13068_v46  ;;  %v7508_v52 = vpop.f32.mrf.mxu0 }
 0x3db   : > { %v7990_v13 = vrot.slane %v7770_v45, 4  ;;  %v7707_v38 = vmax.f32 %v7675_v32, 0.0  ;;  %v7673_v56 = vadd.f32 %v13211_v9, %v7634_v30  ;;  %v7496_v44 = vadd.f32 %v13234_v43, %v7495_v14 }
 0x3dc   : > { %8129 = vst [vmem:[%s13292_s19] sm:$0xff] %v8113_v41  ;;  %v8083_v61 = vmax.f32 %v8053_v25, %v8055_v48  ;;  %v8056_v8 = vmax.f32 %v7784_v5, %v7992_v1  ;;  %v9623_v42 = vpop.f32.mrf.mxu1  ;;  %v7637_v2 = vmul.f32 %v13200_v21, %v7598_v40  ;;  %v7517_v29 = vadd.f32 %v9955_v47, %v13247_v12  ;;  %v9956_v20 = vpop.f32.mrf.mxu0 }
 0x3dd   : > { %v8054_v46 = vmax.f32 %v7770_v45, %v7990_v13  ;;  %v7805_v58 = vrot.slane %v7707_v38, %v13221_v3  ;;  %v7705_v60 = vmax.f32 %v7673_v56, 0.0  ;;  %v9624_v54 = vadd.f32 %v9623_v42, %v9622_v36 }
 0x3de   : > { %v7676_v23 = vadd.f32 %v13211_v9, %v7637_v2  ;;  %v9625_v43 = vpop.f32.mrf.mxu1  ;;  %v7596_v37 = vadd.f32 %v7496_v44, %v13062_v16  ;;  %v7601_v17 = vadd.f32 %v7517_v29, %v13083_v10  ;;  %v7509_v50 = vadd.f32 %v13240_v7, %v7508_v52  ;;  %v7511_v22 = vpop.f32.mrf.mxu0 }
 0x3df   : > { %v8084_v11 = vmax.f32 %v8054_v46, %v8056_v8  ;;  %v7995_v6 = vrot.slane %v7805_v58, 4  ;;  %v7791_v12 = vrot.slane %v7705_v60, %v13221_v3  ;;  %v7520_v33 = vadd.f32 %v9956_v20, %v13252_v28 }
 0x3e0   : > { %v7708_v14 = vmax.f32 %v7676_v23, 0.0  ;;  %v7635_v51 = vmul.f32 %v13200_v21, %v7596_v37  ;;  %v9626_v18 = vpop.f32.mrf.mxu1  ;;  %v7640_v59 = vmul.f32 %v13200_v21, %v7601_v17  ;;  %v7599_v16 = vadd.f32 %v7509_v50, %v13073_v63  ;;  %v9959_v4 = vpop.f32.mrf.mxu0 }
 0x3e1   : > { %v8114_v10 = vcombine.low %v8083_v61, %v8084_v11  ;;  %v13307_v27 = vmax.f32 %v7805_v58, %v7995_v6  ;;  %v7993_v7 = vrot.slane %v7791_v12, 4  ;;  %v13309_v48 = vadd.f32 %v9626_v18, %v9625_v43 }
 0x3e2   : > { %v7812_v53 = vrot.slane %v7708_v14, %v13221_v3  ;;  %v7674_v28 = vadd.f32 %v13211_v9, %v7635_v51  ;;  %v7679_v5 = vadd.f32 %v13211_v9, %v7640_v59  ;;  %v9628_v31 = vpop.f32.mrf.mxu1  ;;  %v7638_v47 = vmul.f32 %v13200_v21, %v7599_v16  ;;  %v7524_v45 = vpop.f32.mrf.mxu0 }
 0x3e3   : > { %8130 = vst [vmem:[%s13292_s19 + $0x8] sm:$0xff] %v8114_v10  ;;  %v8057_v32 = vmax.f32 %v7791_v12, %v7993_v7  ;;  %v7602_v63 = vadd.f32 %v7520_v33, %v13090_v19  ;;  %v7512_v30 = vadd.f32 %v13245_v24, %v7511_v22  ;;  %v7533_v41 = vadd.f32 %v9959_v4, %v9621_v39 }
 0x3e4   : > { %v7996_v25 = vrot.slane %v7812_v53, 4  ;;  %v7706_v1 = vmax.f32 %v7674_v28, 0.0  ;;  %v7711_v36 = vmax.f32 %v7679_v5, 0.0  ;;  %v7677_v40 = vadd.f32 %v13211_v9, %v7638_v47  ;;  %v9629_v52 = vpop.f32.mrf.mxu1  ;;  %v9960_v13 = vpop.f32.mrf.mxu0 }
 0x3e5   : > { %v8085_v38 = vmax.f32 %v8057_v32, %v13307_v27  ;;  %v13320_v56 = vadd.f32 %v9629_v52, %v9628_v31  ;;  %v7641_v44 = vmul.f32 %v13200_v21, %v7602_v63  ;;  %v7600_v61 = vadd.f32 %v7512_v30, %v13078_v49 }
 0x3e6   : > { %v8060_v8 = vmax.f32 %v7812_v53, %v7996_v25  ;;  %v7798_v19 = vrot.slane %v7706_v1, %v13221_v3  ;;  %v7833_v24 = vrot.slane %v7711_v36, %v13221_v3  ;;  %v7709_v39 = vmax.f32 %v7677_v40, 0.0  ;;  %v9631_v42 = vpop.f32.mrf.mxu1  ;;  %v7527_v2 = vpop.f32.mrf.mxu0 }
 0x3e7   : > { %v7680_v29 = vadd.f32 %v13211_v9, %v7641_v44  ;;  %v7639_v20 = vmul.f32 %v13200_v21, %v7600_v61  ;;  %v7605_v46 = vadd.f32 %v7533_v41, %v13111_v62  ;;  %v7525_v58 = vadd.f32 %v13261_v55, %v7524_v45 }
 0x3e8   : > { %v7994_v60 = vrot.slane %v7798_v19, 4  ;;  %v7999_v23 = vrot.slane %v7833_v24, 4  ;;  %v7819_v49 = vrot.slane %v7709_v39, %v13221_v3  ;;  %v9632_v43 = vpop.f32.mrf.mxu1  ;;  %v7536_v37 = vadd.f32 %v9960_v13, %v9624_v54  ;;  %v9963_v17 = vpop.f32.mrf.mxu0 }
 0x3e9   : > { %v7712_v50 = vmax.f32 %v7680_v29, 0.0  ;;  %v7678_v22 = vadd.f32 %v13211_v9, %v7639_v20  ;;  %v9633_v11 = vadd.f32 %v9632_v43, %v9631_v42  ;;  %v7644_v6 = vmul.f32 %v13200_v21, %v7605_v46  ;;  %v13499_v20 = vld [vmem:[#allocation12_spill] sm:$0xff] }
 0x3ea   : > { %v8058_v12 = vmax.f32 %v7798_v19, %v7994_v60  ;;  %v8063_v33 = vmax.f32 %v7833_v24, %v7999_v23  ;;  %v7997_v14 = vrot.slane %v7819_v49, 4  ;;  %v9634_v51 = vpop.f32.mrf.mxu1  ;;  %v7603_v62 = vadd.f32 %v7525_v58, %v13097_v0  ;;  %v7540_v55 = vpop.f32.mrf.mxu0  ;;  %v13500_v60 = vld [vmem:[#allocation10_spill] sm:$0xff] }
 0x3eb   : > { %v7840_v18 = vrot.slane %v7712_v50, %v13221_v3  ;;  %v7710_v59 = vmax.f32 %v7678_v22, 0.0  ;;  %v7683_v16 = vadd.f32 %v13211_v9, %v7644_v6  ;;  %v7606_v54 = vadd.f32 %v7536_v37, %v13118_v57 }
 0x3ec   : > { %v8086_v4 = vmax.f32 %v8058_v12, %v8060_v8  ;;  %v8061_v10 = vmax.f32 %v7819_v49, %v7997_v14  ;;  %v7642_v27 = vmul.f32 %v13200_v21, %v7603_v62  ;;  %v9635_v7 = vpop.f32.mrf.mxu1  ;;  %v7528_v53 = vadd.f32 %v13271_v34, %v7527_v2  ;;  %v9964_v28 = vpop.f32.mrf.mxu0  ;;  %v13498_v34 = vld [vmem:[#allocation9_spill] sm:$0xff] }
 0x3ed   : > { %v8000_v5 = vrot.slane %v7840_v18, 4  ;;  %v7826_v0 = vrot.slane %v7710_v59, %v13221_v3  ;;  %v7715_v31 = vmax.f32 %v7683_v16, 0.0  ;;  %v9636_v47 = vadd.f32 %v9635_v7, %v9634_v51 }
 0x3ee   : > { %v8115_v45 = vcombine.low %v8085_v38, %v8086_v4  ;;  %v8087_v32 = vmax.f32 %v8061_v10, %v8063_v33  ;;  %v7681_v63 = vadd.f32 %v13211_v9, %v7642_v27  ;;  %v7645_v57 = vmul.f32 %v13200_v21, %v7606_v54  ;;  %v9637_v30 = vpop.f32.mrf.mxu1  ;;  %v7543_v41 = vpop.f32.mrf.mxu0 }
 0x3ef   : > { %v8064_v25 = vmax.f32 %v7840_v18, %v8000_v5  ;;  %v7998_v1 = vrot.slane %v7826_v0, 4  ;;  %v7861_v36 = vrot.slane %v7715_v31, %v13221_v3  ;;  %v7604_v40 = vadd.f32 %v7528_v53, %v13498_v34 }
 0x3f0   : > { %8131 = vst [vmem:[%s13292_s19 + $0x10] sm:$0xff] %v8115_v45  ;;  %v7713_v52 = vmax.f32 %v7681_v63, 0.0  ;;  %v7684_v13 = vadd.f32 %v13211_v9, %v7645_v57  ;;  %v9638_v44 = vpop.f32.mrf.mxu1  ;;  %v7549_v61 = vadd.f32 %v9963_v17, %v9633_v11  ;;  %v7541_v38 = vadd.f32 %v13309_v48, %v7540_v55  ;;  %v9967_v8 = vpop.f32.mrf.mxu0  ;;  %v13501_v55 = vld [vmem:[#allocation13_spill] sm:$0xff] }
 0x3f1   : > { %v8062_v19 = vmax.f32 %v7826_v0, %v7998_v1  ;;  %v8003_v24 = vrot.slane %v7861_v36, 4  ;;  %v7643_v39 = vmul.f32 %v13200_v21, %v7604_v40  ;;  %v9639_v42 = vadd.f32 %v9638_v44, %v9637_v30 }
 0x3f2   : > { %v7847_v2 = vrot.slane %v7713_v52, %v13221_v3  ;;  %v7716_v29 = vmax.f32 %v7684_v13, 0.0  ;;  %v7609_v46 = vadd.f32 %v7549_v61, %v13499_v20  ;;  %v9640_v58 = vpop.f32.mrf.mxu1  ;;  %v7607_v23 = vadd.f32 %v7541_v38, %v13500_v60  ;;  %v7556_v49 = vpop.f32.mrf.mxu0 }
 0x3f3   : > { %v8088_v43 = vmax.f32 %v8062_v19, %v8064_v25  ;;  %v8067_v37 = vmax.f32 %v7861_v36, %v8003_v24  ;;  %v7682_v17 = vadd.f32 %v13211_v9, %v7643_v39  ;;  %v7552_v48 = vadd.f32 %v9964_v28, %v9636_v47  ;;  %v13502_v25 = vld [vmem:[#allocation11_spill] sm:$0xff] }
 0x3f4   : > { %v8001_v50 = vrot.slane %v7847_v2, 4  ;;  %v7868_v22 = vrot.slane %v7716_v29, %v13221_v3  ;;  %v7648_v11 = vmul.f32 %v13200_v21, %v7609_v46  ;;  %v7646_v6 = vmul.f32 %v13200_v21, %v7607_v23  ;;  %v9641_v12 = vpop.f32.mrf.mxu1  ;;  %v9968_v33 = vpop.f32.mrf.mxu0  ;;  %v13504_v29 = vld [vmem:[#allocation15_spill] sm:$0xff] }
 0x3f5   : > { %v8116_v14 = vcombine.low %v8087_v32, %v8088_v43  ;;  %v7714_v51 = vmax.f32 %v7682_v17, 0.0  ;;  %v9642_v62 = vadd.f32 %v9641_v12, %v9640_v58  ;;  %v7610_v18 = vadd.f32 %v7552_v48, %v13501_v55 }
 0x3f6   : > { %v8065_v59 = vmax.f32 %v7847_v2, %v8001_v50  ;;  %v8004_v16 = vrot.slane %v7868_v22, 4  ;;  %v7687_v54 = vadd.f32 %v13211_v9, %v7648_v11  ;;  %v7685_v4 = vadd.f32 %v13211_v9, %v7646_v6  ;;  %v9643_v10 = vpop.f32.mrf.mxu1  ;;  %v7559_v27 = vpop.f32.mrf.mxu0 }
 0x3f7   : > { %8132 = vst [vmem:[%s13292_s19 + $0x18] sm:$0xff] %v8116_v14  ;;  %v7854_v7 = vrot.slane %v7714_v51, %v13221_v3  ;;  %v7649_v53 = vmul.f32 %v13200_v21, %v7610_v18  ;;  %v7544_v28 = vadd.f32 %v13320_v56, %v7543_v41  ;;  %v7557_v5 = vadd.f32 %v9639_v42, %v7556_v49  ;;  %v13503_v56 = vld [vmem:[#allocation14_spill] sm:$0xff]  ;;  %v13505_v49 = vld [vmem:[#allocation16_spill] sm:$0xff] }
 0x3f8   : > { %v8089_v0 = vmax.f32 %v8065_v59, %v8067_v37  ;;  %v8068_v31 = vmax.f32 %v7868_v22, %v8004_v16  ;;  %v7719_v47 = vmax.f32 %v7687_v54, 0.0  ;;  %v7717_v45 = vmax.f32 %v7685_v4, 0.0  ;;  %v9644_v32 = vpop.f32.mrf.mxu1  ;;  %v13362_v63 = vpop.f32.mrf.mxu0 }
 0x3f9   : > { %v8002_v57 = vrot.slane %v7854_v7, 4  ;;  %v7688_v30 = vadd.f32 %v13211_v9, %v7649_v53  ;;  %v7608_v1 = vadd.f32 %v7544_v28, %v13502_v25  ;;  %v9645_v36 = vadd.f32 %v9644_v32, %v9643_v10 }
 0x3fa   : > { %v7889_v34 = vrot.slane %v7719_v47, %v13221_v3  ;;  %v7875_v40 = vrot.slane %v7717_v45, %v13221_v3  ;;  %v9646_v52 = vpop.f32.mrf.mxu1  ;;  %v7611_v41 = vadd.f32 %v7557_v5, %v13503_v56  ;;  %v7560_v13 = vadd.f32 %v9642_v62, %v7559_v27  ;;  %v7572_v46 = vpop.f32.mrf.mxu0  ;;  %v13506_v27 = vld [vmem:[#allocation17_spill] sm:$0xff] }
 0x3fb   : > { %v8066_v44 = vmax.f32 %v7854_v7, %v8002_v57  ;;  %v7720_v61 = vmax.f32 %v7688_v30, 0.0  ;;  %v7647_v38 = vmul.f32 %v13200_v21, %v7608_v1  ;;  %v7565_v19 = vadd.f32 %v9967_v8, %v9645_v36 }
 0x3fc   : > { %v8007_v24 = vrot.slane %v7889_v34, 4  ;;  %v8005_v39 = vrot.slane %v7875_v40, 4  ;;  %v7650_v42 = vmul.f32 %v13200_v21, %v7611_v41  ;;  %v9647_v2 = vpop.f32.mrf.mxu1  ;;  %v7612_v20 = vadd.f32 %v7560_v13, %v13504_v29  ;;  %v9972_v59 = vpop.f32.mrf.mxu0  ;;  %v13507_v29 = vld [vmem:[#allocation18_spill] sm:$0xff] }
 0x3fd   : > { %v8090_v58 = vmax.f32 %v8066_v44, %v8068_v31  ;;  %v7896_v60 = vrot.slane %v7720_v61, %v13221_v3  ;;  %v7686_v23 = vadd.f32 %v13211_v9, %v7647_v38  ;;  %v7613_v43 = vadd.f32 %v7565_v19, %v13505_v49 }
 0x3fe   : > { %v8071_v37 = vmax.f32 %v7889_v34, %v8007_v24  ;;  %v8069_v17 = vmax.f32 %v7875_v40, %v8005_v39  ;;  %v7689_v8 = vadd.f32 %v13211_v9, %v7650_v42  ;;  %v9648_v48 = vadd.f32 %v9647_v2, %v9646_v52  ;;  %v9649_v50 = vpop.f32.mrf.mxu1  ;;  %v7575_v30 = vpop.f32.mrf.mxu0 }
 0x3ff   : > { %v8117_v22 = vcombine.low %v8089_v0, %v8090_v58  ;;  %v8008_v11 = vrot.slane %v7896_v60, 4  ;;  %v7718_v6 = vmax.f32 %v7686_v23, 0.0  ;;  %v7652_v12 = vmul.f32 %v13200_v21, %v7613_v43 }
 0x400   : > { %v8091_v14 = vmax.f32 %v8069_v17, %v8071_v37  ;;  %v7721_v51 = vmax.f32 %v7689_v8, 0.0  ;;  %v7568_v62 = vadd.f32 %v9968_v33, %v9648_v48  ;;  %v7651_v55 = vmul.f32 %v13200_v21, %v7612_v20  ;;  %v9650_v18 = vpop.f32.mrf.mxu1 }
 0x401   : > { %8133 = vst [vmem:[%s13292_s19 + $0x20] sm:$0xff] %v8117_v22  ;;  %v7882_v16 = vrot.slane %v7718_v6, %v13221_v3  ;;  %v7691_v54 = vadd.f32 %v13211_v9, %v7652_v12  ;;  %v9651_v4 = vadd.f32 %v9650_v18, %v9649_v50  ;;  %v8072_v31 = vmax.f32 %v7896_v60, %v8008_v11 }
 0x402   : > { %v7903_v10 = vrot.slane %v7721_v51, %v13221_v3  ;;  %v7614_v7 = vadd.f32 %v7568_v62, %v13506_v27  ;;  %v7690_v53 = vadd.f32 %v13211_v9, %v7651_v55  ;;  %v9652_v28 = vpop.f32.mrf.mxu1 }
 0x403   : > { %v8006_v5 = vrot.slane %v7882_v16, 4  ;;  %v7723_v0 = vmax.f32 %v7691_v54, 0.0  ;;  %v7573_v33 = vadd.f32 %v9651_v4, %v7572_v46 }
 0x404   : > { %v8009_v47 = vrot.slane %v7903_v10, 4  ;;  %v7653_v45 = vmul.f32 %v13200_v21, %v7614_v7  ;;  %v7722_v32 = vmax.f32 %v7690_v53, 0.0  ;;  %v9653_v57 = vpop.f32.mrf.mxu1 }
 0x405   : > { %v8070_v25 = vmax.f32 %v7882_v16, %v8006_v5  ;;  %v7917_v1 = vrot.slane %v7723_v0, %v13221_v3  ;;  %v7615_v36 = vadd.f32 %v7573_v33, %v13182_v35  ;;  %v9654_v34 = vadd.f32 %v9653_v57, %v9652_v28 }
 0x406   : > { %v8073_v40 = vmax.f32 %v7903_v10, %v8009_v47  ;;  %v7692_v52 = vadd.f32 %v13211_v9, %v7653_v45  ;;  %v7910_v56 = vrot.slane %v7722_v32, %v13221_v3  ;;  %v9655_v41 = vpop.f32.mrf.mxu1 }
 0x407   : > { %v8092_v13 = vmax.f32 %v8070_v25, %v8072_v31  ;;  %v8011_v44 = vrot.slane %v7917_v1, 4  ;;  %v7654_v61 = vmul.f32 %v13200_v21, %v7615_v36  ;;  %v7576_v38 = vadd.f32 %v9654_v34, %v7575_v30 }
 0x408   : > { %v7724_v19 = vmax.f32 %v7692_v52, 0.0  ;;  %v8010_v24 = vrot.slane %v7910_v56, 4  ;;  %v9656_v39 = vpop.f32.mrf.mxu1 }
 0x409   : > { %v8118_v42 = vcombine.low %v8091_v14, %v8092_v13  ;;  %v8075_v2 = vmax.f32 %v7917_v1, %v8011_v44  ;;  %v7616_v35 = vadd.f32 %v7576_v38, %v13507_v29  ;;  %v7693_v46 = vadd.f32 %v13211_v9, %v7654_v61 }
 0x40a   : > { %v7924_v20 = vrot.slane %v7724_v19, %v13221_v3  ;;  %v9657_v58 = vadd.f32 %v9656_v39, %v9655_v41  ;;  %v9658_v60 = vpop.f32.mrf.mxu1  ;;  %v8074_v37 = vmax.f32 %v7910_v56, %v8010_v24 }
 0x40b   : > { %8134 = vst [vmem:[%s13292_s19 + $0x28] sm:$0xff] %v8118_v42  ;;  %v8093_v23 = vmax.f32 %v8073_v40, %v8075_v2  ;;  %v7655_v49 = vmul.f32 %v13200_v21, %v7616_v35  ;;  %v7725_v11 = vmax.f32 %v7693_v46, 0.0 }
 0x40c   : > { %v8012_v43 = vrot.slane %v7924_v20, 4  ;;  %v7581_v17 = vadd.f32 %v13362_v63, %v9657_v58  ;;  %v9659_v8 = vpop.f32.mrf.mxu1 }
 0x40d   : > { %v7694_v48 = vadd.f32 %v13211_v9, %v7655_v49  ;;  %v9660_v50 = vadd.f32 %v9659_v8, %v9658_v60  ;;  %v7931_v16 = vrot.slane %v7725_v11, %v13221_v3 }
 0x40e   : > { %v8076_v22 = vmax.f32 %v7924_v20, %v8012_v43  ;;  %v7617_v6 = vadd.f32 %v7581_v17, %v13192_v15 }
 0x40f   : > { %v7584_v12 = vadd.f32 %v9972_v59, %v9660_v50  ;;  %v7726_v62 = vmax.f32 %v7694_v48, 0.0  ;;  %v8013_v10 = vrot.slane %v7931_v16, 4 }
 0x410   : > { %v8094_v14 = vmax.f32 %v8074_v37, %v8076_v22  ;;  %v7656_v51 = vmul.f32 %v13200_v21, %v7617_v6 }
 0x411   : > { %v7618_v55 = vadd.f32 %v7584_v12, %v13205_v26  ;;  %v7938_v15 = vrot.slane %v7726_v62, %v13221_v3  ;;  %v8077_v5 = vmax.f32 %v7931_v16, %v8013_v10 }
 0x412   : > { %v8119_v18 = vcombine.low %v8093_v23, %v8094_v14  ;;  %v7695_v63 = vadd.f32 %v13211_v9, %v7656_v51 }
 0x413   : > { %v7657_v54 = vmul.f32 %v13200_v21, %v7618_v55  ;;  %v8014_v53 = vrot.slane %v7938_v15, 4 }
 0x414   : > { %8135 = vst [vmem:[%s13292_s19 + $0x30] sm:$0xff] %v8119_v18  ;;  %v7727_v4 = vmax.f32 %v7695_v63, 0.0 }
 0x415   : > { %v7696_v59 = vadd.f32 %v13211_v9, %v7657_v54  ;;  %v8078_v31 = vmax.f32 %v7938_v15, %v8014_v53 }
 0x416   : > { %v7945_v27 = vrot.slane %v7727_v4, %v13221_v3 }
 0x417   : > { %v7728_v7 = vmax.f32 %v7696_v59, 0.0 }
 0x418   : > { %v8015_v26 = vrot.slane %v7945_v27, 4 }
 0x419   : > { %v7952_v28 = vrot.slane %v7728_v7, %v13221_v3 }
 0x41a   : > { %v8079_v21 = vmax.f32 %v7945_v27, %v8015_v26 }
 0x41b   : > { %v8016_v0 = vrot.slane %v7952_v28, 4 }
 0x41c   : > { %v8095_v33 = vmax.f32 %v8077_v5, %v8079_v21 }
 0x41d   : > { %v8080_v47 = vmax.f32 %v7952_v28, %v8016_v0 }
 0x41f   : > { %v8096_v9 = vmax.f32 %v8078_v31, %v8080_v47 }
 0x421   : > { %v8120_v3 = vcombine.low %v8095_v33, %v8096_v9 }
 0x423   : > { %8136 = vst [vmem:[%s13292_s19 + $0x38] sm:$0xff] %v8120_v3 }
 0x424   : > { %10502 = shalt.err (!%p10499_p0)
}
 0x425   : > { %s10503_s16 = scalar_lea.hbm %s13413_s8, 1024  ;;  %s10507_s18 = scalar_lea.hbm %s13467_s7, 2048 }
 0x426   : > { %p10504_p1 = scmp.ne.s32.totalorder %s13413_s8, %s10503_s16  ;;  %p10508_p4 = scmp.lt.s32.totalorder %s13413_s8, %s13467_s7 }
 0x427   : > { %p10509_p7 = scmp.lt.s32.totalorder %s10507_s18, %s10503_s16 }
 0x428   : > { %p10505_p2 = pnand %p10504_p1, %p10641_p5 }
 0x429   : > { %p10510_p6 = por %p10509_p7, %p10508_p4 }
 0x42a   : > { %p10506_p3 = pneg %p10505_p2 }
 0x42c   : > { %p10511_p8 = pnand %p10510_p6, %p10506_p3 }
 0x42e   : > { %10514 = shalt.err (!%p10511_p8)
}
 0x42f   : > { %s10561_s23 = smov 128   ;;  %s10562_s29 = smov 8  }
 0x430   : > { %9977 = dma.vmem_to_hbm [thread:$0]  (%p10641_p5), %s13415_s22, 1024, %s13413_s8, %s13420_s21, %s10561_s23, %s10561_s23, %s10562_s29  }
 0x431 PF: > { %p9989_p9 = scmp.ge.s32.totalorder %s10553_s27, 2  ;;  %s8166_s9 = sand.u32 1, %s10541_s24  }
 0x432   : > { %p13508_p10 = scmp.ne.s32.totalorder %s13469_s12, 0  ;;  %s8167_s28 = scalar_lea.sflag [#allocation5], %s8166_s9 }
 0x434   : > { %p9984_p11 = pnand %p9989_p9, %p13508_p10 }
 0x436   : > { %p9985_p12 = pneg %p9984_p11 }
 0x438   : > { %10536 = dma.done.wait (%p9985_p12), %s8167_s28, 1024  }
 0x439   : > { %10538 = vsyncadd (%p9985_p12), %s8167_s28, 4294966272  ;;  %p18_p13 = scmp.ge.s32.totalorder %s10628_s30, 4   ;;  %s13509_s24 = smov %s10545_s25 }
 0x43a   : > { %s13510_s25 = smov %s10549_s26  ;;  %s13511_s26 = smov %s10639_s10 }
 0x43b   : > { %s13512_s27 = smov %s10628_s30  ;;  %20 = sbr.rel (!%p18_p13) target bundleno = 4 (0x4), region = 95 }
 0x440   :  { %8172 = vsyncpa [#allocation4], 1 }
 0x441   :  { %8174 = vsyncpa [#allocation4 + $0x1], 1 }
 0x442   :  { %8175 = vsyncpa [#allocation5], 1 }
 0x443   :  { %8177 = vsyncpa [#allocation5 + $0x1], 1 }

</bundles_post_ra>
